<compile_context>
chip_gen: v6e
topology: v6e:2x2x1
jax: 0.10.0
libtpu: 0.0.40
codegen_flags: <defaults>
</compile_context>

<pallas_src>
import jax
import jax.numpy as jnp
import numpy as np
from jax.experimental import pallas as pl
from jax.experimental.pallas import tpu as pltpu


C1 = 64          # conv1 out channels (module definition)
C1P = 128        # conv1 channels zero-padded to a full 128-lane width in-kernel
C2 = 128         # conv2 out channels
C3 = 256         # conv3 out channels
FC_HIDDEN = 128


# ---------------------------------------------------------------------------
# Fused kernel factory.
# ---------------------------------------------------------------------------
def _make_fused_kernel(H, W, bblk, cin, num_classes):
    HW = H * W
    H2, W2 = H // 2, W // 2           # after pool1
    H3, W3 = H // 4, W // 4           # after pool2
    K1 = 9 * cin
    B = bblk

    def kernel(xc_ref,                                   # (B, H*W, 9*cin) bf16
               w1_ref, b1_ref,                           # (9*cin, 128) bf16, (1,128) f32
               w2_ref, b2_ref,                           # (1152, 128) bf16, (1,128) f32
               w3_ref, b3_ref,                           # (1152, 256) bf16, (1,256) f32
               fw1_ref, fb1_ref, fw2_ref, fb2_ref,       # fc weights bf16 / biases f32
               o_ref,                                    # (B, 1, num_classes) f32
               pad2_ref, patch2_ref, pad3_ref, patch3_ref):
        # ---------------- Layer 1: im2col conv (one matmul) + shift + ReLU --
        x = xc_ref[...].reshape(B * HW, K1)
        y = jnp.dot(x, w1_ref[...], preferred_element_type=jnp.float32)
        y = jnp.maximum(y + b1_ref[...], 0.0)                     # (B*H*W, 128)
        # 2x2 max-pool, reshape-based (lane/channel dim untouched).
        y = jnp.max(y.reshape(B * H2, 2, W, C1P), axis=1)         # pool rows
        y = jnp.max(y.reshape(B * H2, W2, 2, C1P), axis=2)        # pool cols
        y = y.reshape(B, H2, W2, C1P).astype(jnp.bfloat16)

        # ---------------- Layer 2: pad border, im2col, ONE K=1152 matmul ----
        zr = jnp.zeros((B, 1, W2 + 2, C1P), jnp.bfloat16)
        zc = jnp.zeros((B, H2, 1, C1P), jnp.bfloat16)
        pad2_ref[:, 0:1, :, :] = zr                    # zero only the border;
        pad2_ref[:, H2 + 1:H2 + 2, :, :] = zr          # interior is fully
        pad2_ref[:, 1:H2 + 1, 0:1, :] = zc             # rewritten below.
        pad2_ref[:, 1:H2 + 1, W2 + 1:W2 + 2, :] = zc
        pad2_ref[:, 1:H2 + 1, 1:W2 + 1, :] = y
        for kh in range(3):
            for kw in range(3):
                j = kh * 3 + kw
                win = pad2_ref[:, kh:kh + H2, kw:kw + W2, :]       # (B,H2,W2,128)
                patch2_ref[:, j * C1P:(j + 1) * C1P] = win.reshape(B * H2 * W2, C1P)
        y = jnp.dot(patch2_ref[...], w2_ref[...],
                    preferred_element_type=jnp.float32)            # (B*H2*W2, 128)
        y = jnp.maximum(y + b2_ref[...], 0.0)
        y = jnp.max(y.reshape(B * H3, 2, W2, C2), axis=1)
        y = jnp.max(y.reshape(B * H3, W3, 2, C2), axis=2)
        y = y.reshape(B, H3, W3, C2).astype(jnp.bfloat16)

        # ---------------- Layer 3: same im2col pattern + global max pool ----
        zr = jnp.zeros((B, 1, W3 + 2, C2), jnp.bfloat16)
        zc = jnp.zeros((B, H3, 1, C2), jnp.bfloat16)
        pad3_ref[:, 0:1, :, :] = zr
        pad3_ref[:, H3 + 1:H3 + 2, :, :] = zr
        pad3_ref[:, 1:H3 + 1, 0:1, :] = zc
        pad3_ref[:, 1:H3 + 1, W3 + 1:W3 + 2, :] = zc
        pad3_ref[:, 1:H3 + 1, 1:W3 + 1, :] = y
        for kh in range(3):
            for kw in range(3):
                j = kh * 3 + kw
                win = pad3_ref[:, kh:kh + H3, kw:kw + W3, :]       # (B,H3,W3,128)
                patch3_ref[:, j * C2:(j + 1) * C2] = win.reshape(B * H3 * W3, C2)
        y = jnp.dot(patch3_ref[...], w3_ref[...],
                    preferred_element_type=jnp.float32)            # (B*H3*W3, 256)
        y = jnp.maximum(y + b3_ref[...], 0.0)
        feat = jnp.max(y.reshape(B, H3 * W3, C3), axis=1)          # AdaptiveMaxPool2d((1,1))

        # ---------------- FC head (Dropout is identity at inference) --------
        h = jnp.dot(feat.astype(jnp.bfloat16), fw1_ref[...],
                    preferred_element_type=jnp.float32) + fb1_ref[...]
        h = jnp.maximum(h, 0.0)
        out = jnp.dot(h.astype(jnp.bfloat16), fw2_ref[...],
                      preferred_element_type=jnp.float32) + fb2_ref[...]
        o_ref[...] = out.reshape(B, 1, num_classes)

    return kernel


# ---------------------------------------------------------------------------
# Wrapper: one pallas_call for the whole network.
# ---------------------------------------------------------------------------
def _const_spec(arr):
    """Full-array block with a constant index_map (stays VMEM-resident)."""
    return pl.BlockSpec(arr.shape, lambda n: (0,) * arr.ndim)


def _pick_batch_block(n):
    # Fold batch into the matmul M dimension (bigger M for layers 2/3 and the
    # FC head) while keeping >=2 "parallel" grid steps so both v7x TensorCores
    # get work.  v5e/v6e have a single TC; the extra grid step is cheap.
    if n >= 4 and n % 2 == 0:
        return n // 2
    return 1


def fused_cnn(x_col, p, H, W):
    """x_col: (N, H*W, 9*cin) bf16 layer-1 im2col patches."""
    N, HW, K1 = x_col.shape
    cin = K1 // 9
    num_classes = p["fc2_w"].shape[-1]
    H2, W2, H3, W3 = H // 2, W // 2, H // 4, W // 4
    bblk = _pick_batch_block(N)

    kernel = _make_fused_kernel(H, W, bblk, cin, num_classes)
    weight_args = (p["w1"], p["b1"], p["w2"], p["b2"], p["w3"], p["b3"],
                   p["fc1_w"], p["fc1_b"], p["fc2_w"], p["fc2_b"])

    out = pl.pallas_call(
        kernel,
        out_shape=jax.ShapeDtypeStruct((N, 1, num_classes), jnp.float32),
        grid_spec=pltpu.PrefetchScalarGridSpec(
            num_scalar_prefetch=0,
            grid=(N // bblk,),
            in_specs=[pl.BlockSpec((bblk, HW, K1), lambda n: (n, 0, 0))]
                     + [_const_spec(w) for w in weight_args],
            out_specs=pl.BlockSpec((bblk, 1, num_classes), lambda n: (n, 0, 0)),
            scratch_shapes=[
                pltpu.VMEM((bblk, H2 + 2, W2 + 2, C1P), jnp.bfloat16),  # padded L2 input
                pltpu.VMEM((bblk * H2 * W2, 9 * C1P), jnp.bfloat16),    # L2 im2col patches
                pltpu.VMEM((bblk, H3 + 2, W3 + 2, C2), jnp.bfloat16),   # padded L3 input
                pltpu.VMEM((bblk * H3 * W3, 9 * C2), jnp.bfloat16),     # L3 im2col patches
            ],
        ),
        compiler_params=pltpu.CompilerParams(
            dimension_semantics=("parallel",)),
    )(x_col, *weight_args)
    return out.reshape(N, num_classes)


def _im2col_3x3(x):
    """(N, H, W, C) -> (N, H*W, 9*C) pad=1 3x3 patches, tap order (kh, kw, c)."""
    N, H, W, C = x.shape
    xp = jnp.pad(x, ((0, 0), (1, 1), (1, 1), (0, 0)))
    cols = [xp[:, kh:kh + H, kw:kw + W, :] for kh in range(3) for kw in range(3)]
    return jnp.concatenate(cols, axis=-1).reshape(N, H * W, 9 * C)


# ---------------------------------------------------------------------------
# Parameters: raw f32 params (for the reference) + kernel params with BN scale
# folded into the (bf16) conv weights and channels padded to 128.
# ---------------------------------------------------------------------------
def init_params(key, channels=3, num_classes=3):
    keys = iter(jax.random.split(key, 22))
    nxt = lambda: next(keys)

    def conv_bn(cin, cout):
        w = jax.random.normal(nxt(), (3, 3, cin, cout), jnp.float32) * 0.05
        b = jax.random.normal(nxt(), (cout,), jnp.float32) * 0.05
        gamma = 1.0 + 0.1 * jax.random.normal(nxt(), (cout,), jnp.float32)
        beta = 0.1 * jax.random.normal(nxt(), (cout,), jnp.float32)
        mean = 0.1 * jax.random.normal(nxt(), (cout,), jnp.float32)
        var = jnp.abs(jax.random.normal(nxt(), (cout,), jnp.float32)) + 0.5
        return (w, b, gamma, beta, mean, var)

    l1, l2, l3 = conv_bn(channels, C1), conv_bn(C1, C2), conv_bn(C2, C3)
    fc1_w = jax.random.normal(nxt(), (C3, FC_HIDDEN), jnp.float32) * 0.05
    fc1_b = jax.random.normal(nxt(), (FC_HIDDEN,), jnp.float32) * 0.05
    fc2_w = jax.random.normal(nxt(), (FC_HIDDEN, num_classes), jnp.float32) * 0.05
    fc2_b = jax.random.normal(nxt(), (num_classes,), jnp.float32) * 0.05

    raw = {"l1": l1, "l2": l2, "l3": l3,
           "fc1_w": fc1_w, "fc1_b": fc1_b, "fc2_w": fc2_w, "fc2_b": fc2_b}

    def fold(w, b, gamma, beta, mean, var, eps=1e-5):
        scale = gamma / jnp.sqrt(var + eps)          # per-output-channel
        return w * scale, (b - mean) * scale + beta  # scale folded into weights

    w1f, sh1 = fold(*l1)
    w2f, sh2 = fold(*l2)
    w3f, sh3 = fold(*l3)

    # Pad conv1 output channels 64 -> 128 (zeros) and conv2 input channels to
    # match, so every in-kernel lane dimension is 128-aligned.
    w1k = jnp.zeros((9 * channels, C1P), jnp.float32).at[:, :C1].set(
        w1f.reshape(9 * channels, C1))
    b1k = jnp.zeros((1, C1P), jnp.float32).at[:, :C1].set(sh1.reshape(1, C1))
    w2p = jnp.zeros((3, 3, C1P, C2), jnp.float32).at[:, :, :C1, :].set(w2f)

    kparams = {
        "w1": w1k.astype(jnp.bfloat16), "b1": b1k,
        "w2": w2p.reshape(9 * C1P, C2).astype(jnp.bfloat16), "b2": sh2.reshape(1, C2),
        "w3": w3f.reshape(9 * C2, C3).astype(jnp.bfloat16), "b3": sh3.reshape(1, C3),
        "fc1_w": fc1_w.astype(jnp.bfloat16), "fc1_b": fc1_b.reshape(1, FC_HIDDEN),
        "fc2_w": fc2_w.astype(jnp.bfloat16), "fc2_b": fc2_b.reshape(1, num_classes),
    }
    return raw, kparams


# ---------------------------------------------------------------------------
# Forward pass.
# ---------------------------------------------------------------------------
@jax.jit
def forward(kparams, x_nchw):
    x = jnp.transpose(x_nchw, (0, 2, 3, 1)).astype(jnp.float32)   # NCHW -> NHWC
    N, H, W, _ = x.shape
    assert H % 4 == 0 and W % 4 == 0, "two 2x2 maxpools require H, W % 4 == 0"
    # TODO(synk): for large H, W move this layer-1 im2col into the kernel (DMA
    # the raw NHWC block); at 16x16 the 9x patch expansion is negligible.
    x_col = _im2col_3x3(x).astype(jnp.bfloat16)
    return fused_cnn(x_col, kparams, H, W)


# ---------------------------------------------------------------------------
# Pure-JAX f32 reference (eval-mode PyTorch semantics) for validation.
# ---------------------------------------------------------------------------
@jax.jit
def reference_forward(raw, x_nchw):
    x = jnp.transpose(x_nchw, (0, 2, 3, 1)).astype(jnp.float32)

    def conv_bn_relu(x, params):
        w, b, gamma, beta, mean, var = params
        y = jax.lax.conv_general_dilated(
            x, w, window_strides=(1, 1), padding="SAME",
            dimension_numbers=("NHWC", "HWIO", "NHWC"),
            precision=jax.lax.Precision.HIGHEST) + b
        y = (y - mean) * (gamma / jnp.sqrt(var + 1e-5)) + beta
        return jnp.maximum(y, 0.0)

    def pool2(x):
        N, H, W, C = x.shape
        return jnp.max(x.reshape(N, H // 2, 2, W // 2, 2, C), axis=(2, 4))

    y = pool2(conv_bn_relu(x, raw["l1"]))
    y = pool2(conv_bn_relu(y, raw["l2"]))
    y = conv_bn_relu(y, raw["l3"])
    feat = jnp.max(y, axis=(1, 2))                                 # global max pool
    h = jnp.maximum(feat @ raw["fc1_w"] + raw["fc1_b"], 0.0)
    return h @ raw["fc2_w"] + raw["fc2_b"]                         # dropout = identity


if __name__ == "__main__":
    key = jax.random.PRNGKey(0)
    k_in, k_params = jax.random.split(key)

    N, CH, HIMG, WIMG, NCLS = 4, 3, 16, 16, 3                      # NCHW input
    x = jax.random.normal(k_in, (N, CH, HIMG, WIMG), jnp.float32)
    raw, kparams = init_params(k_params, channels=CH, num_classes=NCLS)

    out = jax.block_until_ready(forward(kparams, x))
    assert out.shape == (N, NCLS), out.shape

    ref = jax.block_until_ready(reference_forward(raw, x))
    np.testing.assert_allclose(np.asarray(out), np.asarray(ref),
                               rtol=5e-2, atol=5e-2)
    print("KERNEL_OK")
</pallas_src>

<mosaic_0001>
module attributes {stable_mosaic.version = 11 : i64} {
  func.func @kernel(%arg0: i32, %arg1: memref<2x256x27xbf16, #tpu.memory_space<vmem>>, %arg2: memref<27x128xbf16, #tpu.memory_space<vmem>>, %arg3: memref<1x128xf32, #tpu.memory_space<vmem>>, %arg4: memref<1152x128xbf16, #tpu.memory_space<vmem>>, %arg5: memref<1x128xf32, #tpu.memory_space<vmem>>, %arg6: memref<1152x256xbf16, #tpu.memory_space<vmem>>, %arg7: memref<1x256xf32, #tpu.memory_space<vmem>>, %arg8: memref<256x128xbf16, #tpu.memory_space<vmem>>, %arg9: memref<1x128xf32, #tpu.memory_space<vmem>>, %arg10: memref<128x3xbf16, #tpu.memory_space<vmem>>, %arg11: memref<1x3xf32, #tpu.memory_space<vmem>>, %arg12: memref<2x1x3xf32, #tpu.memory_space<vmem>>, %arg13: memref<2x10x10x128xbf16, #tpu.memory_space<vmem>>, %arg14: memref<128x1152xbf16, #tpu.memory_space<vmem>>, %arg15: memref<2x6x6x128xbf16, #tpu.memory_space<vmem>>, %arg16: memref<32x1152xbf16, #tpu.memory_space<vmem>>) attributes {dimension_semantics = [#tpu.dimension_semantics<parallel>], iteration_bounds = array<i64: 2>, scalar_prefetch = 0 : i64, scratch_operands = 4 : i64, tpu.core_type = #tpu.core_type<tc>, window_params = [{transform_indices = @transform_0, window_bounds = array<i64: 2, 256, 27>}, {pipeline_mode = #tpu.pipeline_mode<synchronous>, transform_indices = @transform_1, window_bounds = array<i64: 27, 128>}, {pipeline_mode = #tpu.pipeline_mode<synchronous>, transform_indices = @transform_2, window_bounds = array<i64: 1, 128>}, {pipeline_mode = #tpu.pipeline_mode<synchronous>, transform_indices = @transform_3, window_bounds = array<i64: 1152, 128>}, {pipeline_mode = #tpu.pipeline_mode<synchronous>, transform_indices = @transform_4, window_bounds = array<i64: 1, 128>}, {pipeline_mode = #tpu.pipeline_mode<synchronous>, transform_indices = @transform_5, window_bounds = array<i64: 1152, 256>}, {pipeline_mode = #tpu.pipeline_mode<synchronous>, transform_indices = @transform_6, window_bounds = array<i64: 1, 256>}, {pipeline_mode = #tpu.pipeline_mode<synchronous>, transform_indices = @transform_7, window_bounds = array<i64: 256, 128>}, {pipeline_mode = #tpu.pipeline_mode<synchronous>, transform_indices = @transform_8, window_bounds = array<i64: 1, 128>}, {pipeline_mode = #tpu.pipeline_mode<synchronous>, transform_indices = @transform_9, window_bounds = array<i64: 128, 3>}, {pipeline_mode = #tpu.pipeline_mode<synchronous>, transform_indices = @transform_10, window_bounds = array<i64: 1, 3>}, {transform_indices = @transform_11, window_bounds = array<i64: 2, 1, 3>}]} {
    %c0 = arith.constant 0 : index
    %c0_0 = arith.constant 0 : index
    %c0_1 = arith.constant 0 : index
    %0 = vector.load %arg1[%c0, %c0_0, %c0_1] : memref<2x256x27xbf16, #tpu.memory_space<vmem>>, vector<2x256x27xbf16>
    %1 = vector.shape_cast %0 : vector<2x256x27xbf16> to vector<512x27xbf16>
    %c0_2 = arith.constant 0 : index
    %c0_3 = arith.constant 0 : index
    %2 = vector.load %arg2[%c0_2, %c0_3] : memref<27x128xbf16, #tpu.memory_space<vmem>>, vector<27x128xbf16>
    %cst = arith.constant dense<0.000000e+00> : vector<512x128xf32>
    %3 = tpu.matmul %1, %2, %cst {dimension_numbers = #tpu.dot_dimension_numbers<[1], [0], [0], [1], [0, 0, 1, 1], [], []>} : vector<512x27xbf16>, vector<27x128xbf16>, vector<512x128xf32> -> vector<512x128xf32>
    %c0_4 = arith.constant 0 : index
    %c0_5 = arith.constant 0 : index
    %4 = vector.load %arg3[%c0_4, %c0_5] : memref<1x128xf32, #tpu.memory_space<vmem>>, vector<1x128xf32>
    %5 = vector.broadcast %4 : vector<1x128xf32> to vector<512x128xf32>
    %6 = arith.addf %3, %5 : vector<512x128xf32>
    %cst_6 = arith.constant 0.000000e+00 : f32
    %7 = vector.broadcast %cst_6 : f32 to vector<512x128xf32>
    %8 = arith.maximumf %6, %7 : vector<512x128xf32>
    %9 = vector.shape_cast %8 : vector<512x128xf32> to vector<16x2x16x128xf32>
    %cst_7 = arith.constant dense<0xFF800000> : vector<16x16x128xf32>
    %10 = vector.multi_reduction <maximumf>, %9, %cst_7 [1] : vector<16x2x16x128xf32> to vector<16x16x128xf32>
    %11 = vector.shape_cast %10 : vector<16x16x128xf32> to vector<16x8x2x128xf32>
    %cst_8 = arith.constant dense<0xFF800000> : vector<16x8x128xf32>
    %12 = vector.multi_reduction <maximumf>, %11, %cst_8 [2] : vector<16x8x2x128xf32> to vector<16x8x128xf32>
    %13 = vector.shape_cast %12 : vector<16x8x128xf32> to vector<2x8x8x128xf32>
    %14 = arith.truncf %13 : vector<2x8x8x128xf32> to vector<2x8x8x128xbf16>
    %cst_9 = arith.constant 0.000000e+00 : bf16
    %15 = vector.broadcast %cst_9 : bf16 to vector<2x1x10x128xbf16>
    %cst_10 = arith.constant 0.000000e+00 : bf16
    %16 = vector.broadcast %cst_10 : bf16 to vector<2x8x1x128xbf16>
    %c0_11 = arith.constant 0 : index
    %c0_12 = arith.constant 0 : index
    %c0_13 = arith.constant 0 : index
    %c0_14 = arith.constant 0 : index
    %17 = vector.load %arg13[%c0_11, %c0_12, %c0_13, %c0_14] : memref<2x10x10x128xbf16, #tpu.memory_space<vmem>>, vector<2x1x10x128xbf16>
    tpu.vector_store %arg13[%c0_11, %c0_12, %c0_13, %c0_14], %15 {strides = array<i32>} : memref<2x10x10x128xbf16, #tpu.memory_space<vmem>>, vector<2x1x10x128xbf16>,
    %c0_15 = arith.constant 0 : index
    %c9 = arith.constant 9 : index
    %c0_16 = arith.constant 0 : index
    %c0_17 = arith.constant 0 : index
    %18 = vector.load %arg13[%c0_15, %c9, %c0_16, %c0_17] : memref<2x10x10x128xbf16, #tpu.memory_space<vmem>>, vector<2x1x10x128xbf16>
    tpu.vector_store %arg13[%c0_15, %c9, %c0_16, %c0_17], %15 {strides = array<i32>} : memref<2x10x10x128xbf16, #tpu.memory_space<vmem>>, vector<2x1x10x128xbf16>,
    %c0_18 = arith.constant 0 : index
    %c1 = arith.constant 1 : index
    %c0_19 = arith.constant 0 : index
    %c0_20 = arith.constant 0 : index
    %19 = vector.load %arg13[%c0_18, %c1, %c0_19, %c0_20] : memref<2x10x10x128xbf16, #tpu.memory_space<vmem>>, vector<2x8x1x128xbf16>
    tpu.vector_store %arg13[%c0_18, %c1, %c0_19, %c0_20], %16 {strides = array<i32>} : memref<2x10x10x128xbf16, #tpu.memory_space<vmem>>, vector<2x8x1x128xbf16>,
    %c0_21 = arith.constant 0 : index
    %c1_22 = arith.constant 1 : index
    %c9_23 = arith.constant 9 : index
    %c0_24 = arith.constant 0 : index
    %20 = vector.load %arg13[%c0_21, %c1_22, %c9_23, %c0_24] : memref<2x10x10x128xbf16, #tpu.memory_space<vmem>>, vector<2x8x1x128xbf16>
    tpu.vector_store %arg13[%c0_21, %c1_22, %c9_23, %c0_24], %16 {strides = array<i32>} : memref<2x10x10x128xbf16, #tpu.memory_space<vmem>>, vector<2x8x1x128xbf16>,
    %c0_25 = arith.constant 0 : index
    %c1_26 = arith.constant 1 : index
    %c1_27 = arith.constant 1 : index
    %c0_28 = arith.constant 0 : index
    %21 = vector.load %arg13[%c0_25, %c1_26, %c1_27, %c0_28] : memref<2x10x10x128xbf16, #tpu.memory_space<vmem>>, vector<2x8x8x128xbf16>
    tpu.vector_store %arg13[%c0_25, %c1_26, %c1_27, %c0_28], %14 {strides = array<i32>} : memref<2x10x10x128xbf16, #tpu.memory_space<vmem>>, vector<2x8x8x128xbf16>,
    %c0_29 = arith.constant 0 : index
    %c0_30 = arith.constant 0 : index
    %c0_31 = arith.constant 0 : index
    %c0_32 = arith.constant 0 : index
    %22 = vector.load %arg13[%c0_29, %c0_30, %c0_31, %c0_32] : memref<2x10x10x128xbf16, #tpu.memory_space<vmem>>, vector<2x8x8x128xbf16>
    %23 = vector.shape_cast %22 : vector<2x8x8x128xbf16> to vector<128x128xbf16>
    %c0_33 = arith.constant 0 : index
    %c0_34 = arith.constant 0 : index
    %24 = vector.load %arg14[%c0_33, %c0_34] : memref<128x1152xbf16, #tpu.memory_space<vmem>>, vector<128x128xbf16>
    tpu.vector_store %arg14[%c0_33, %c0_34], %23 {strides = array<i32>} : memref<128x1152xbf16, #tpu.memory_space<vmem>>, vector<128x128xbf16>,
    %c0_35 = arith.constant 0 : index
    %c0_36 = arith.constant 0 : index
    %c1_37 = arith.constant 1 : index
    %c0_38 = arith.constant 0 : index
    %25 = vector.load %arg13[%c0_35, %c0_36, %c1_37, %c0_38] : memref<2x10x10x128xbf16, #tpu.memory_space<vmem>>, vector<2x8x8x128xbf16>
    %26 = vector.shape_cast %25 : vector<2x8x8x128xbf16> to vector<128x128xbf16>
    %c0_39 = arith.constant 0 : index
    %c128 = arith.constant 128 : index
    %27 = vector.load %arg14[%c0_39, %c128] : memref<128x1152xbf16, #tpu.memory_space<vmem>>, vector<128x128xbf16>
    tpu.vector_store %arg14[%c0_39, %c128], %26 {strides = array<i32>} : memref<128x1152xbf16, #tpu.memory_space<vmem>>, vector<128x128xbf16>,
    %c0_40 = arith.constant 0 : index
    %c0_41 = arith.constant 0 : index
    %c2 = arith.constant 2 : index
    %c0_42 = arith.constant 0 : index
    %28 = vector.load %arg13[%c0_40, %c0_41, %c2, %c0_42] : memref<2x10x10x128xbf16, #tpu.memory_space<vmem>>, vector<2x8x8x128xbf16>
    %29 = vector.shape_cast %28 : vector<2x8x8x128xbf16> to vector<128x128xbf16>
    %c0_43 = arith.constant 0 : index
    %c256 = arith.constant 256 : index
    %30 = vector.load %arg14[%c0_43, %c256] : memref<128x1152xbf16, #tpu.memory_space<vmem>>, vector<128x128xbf16>
    tpu.vector_store %arg14[%c0_43, %c256], %29 {strides = array<i32>} : memref<128x1152xbf16, #tpu.memory_space<vmem>>, vector<128x128xbf16>,
    %c0_44 = arith.constant 0 : index
    %c1_45 = arith.constant 1 : index
    %c0_46 = arith.constant 0 : index
    %c0_47 = arith.constant 0 : index
    %31 = vector.load %arg13[%c0_44, %c1_45, %c0_46, %c0_47] : memref<2x10x10x128xbf16, #tpu.memory_space<vmem>>, vector<2x8x8x128xbf16>
    %32 = vector.shape_cast %31 : vector<2x8x8x128xbf16> to vector<128x128xbf16>
    %c0_48 = arith.constant 0 : index
    %c384 = arith.constant 384 : index
    %33 = vector.load %arg14[%c0_48, %c384] : memref<128x1152xbf16, #tpu.memory_space<vmem>>, vector<128x128xbf16>
    tpu.vector_store %arg14[%c0_48, %c384], %32 {strides = array<i32>} : memref<128x1152xbf16, #tpu.memory_space<vmem>>, vector<128x128xbf16>,
    %c0_49 = arith.constant 0 : index
    %c1_50 = arith.constant 1 : index
    %c1_51 = arith.constant 1 : index
    %c0_52 = arith.constant 0 : index
    %34 = vector.load %arg13[%c0_49, %c1_50, %c1_51, %c0_52] : memref<2x10x10x128xbf16, #tpu.memory_space<vmem>>, vector<2x8x8x128xbf16>
    %35 = vector.shape_cast %34 : vector<2x8x8x128xbf16> to vector<128x128xbf16>
    %c0_53 = arith.constant 0 : index
    %c512 = arith.constant 512 : index
    %36 = vector.load %arg14[%c0_53, %c512] : memref<128x1152xbf16, #tpu.memory_space<vmem>>, vector<128x128xbf16>
    tpu.vector_store %arg14[%c0_53, %c512], %35 {strides = array<i32>} : memref<128x1152xbf16, #tpu.memory_space<vmem>>, vector<128x128xbf16>,
    %c0_54 = arith.constant 0 : index
    %c1_55 = arith.constant 1 : index
    %c2_56 = arith.constant 2 : index
    %c0_57 = arith.constant 0 : index
    %37 = vector.load %arg13[%c0_54, %c1_55, %c2_56, %c0_57] : memref<2x10x10x128xbf16, #tpu.memory_space<vmem>>, vector<2x8x8x128xbf16>
    %38 = vector.shape_cast %37 : vector<2x8x8x128xbf16> to vector<128x128xbf16>
    %c0_58 = arith.constant 0 : index
    %c640 = arith.constant 640 : index
    %39 = vector.load %arg14[%c0_58, %c640] : memref<128x1152xbf16, #tpu.memory_space<vmem>>, vector<128x128xbf16>
    tpu.vector_store %arg14[%c0_58, %c640], %38 {strides = array<i32>} : memref<128x1152xbf16, #tpu.memory_space<vmem>>, vector<128x128xbf16>,
    %c0_59 = arith.constant 0 : index
    %c2_60 = arith.constant 2 : index
    %c0_61 = arith.constant 0 : index
    %c0_62 = arith.constant 0 : index
    %40 = vector.load %arg13[%c0_59, %c2_60, %c0_61, %c0_62] : memref<2x10x10x128xbf16, #tpu.memory_space<vmem>>, vector<2x8x8x128xbf16>
    %41 = vector.shape_cast %40 : vector<2x8x8x128xbf16> to vector<128x128xbf16>
    %c0_63 = arith.constant 0 : index
    %c768 = arith.constant 768 : index
    %42 = vector.load %arg14[%c0_63, %c768] : memref<128x1152xbf16, #tpu.memory_space<vmem>>, vector<128x128xbf16>
    tpu.vector_store %arg14[%c0_63, %c768], %41 {strides = array<i32>} : memref<128x1152xbf16, #tpu.memory_space<vmem>>, vector<128x128xbf16>,
    %c0_64 = arith.constant 0 : index
    %c2_65 = arith.constant 2 : index
    %c1_66 = arith.constant 1 : index
    %c0_67 = arith.constant 0 : index
    %43 = vector.load %arg13[%c0_64, %c2_65, %c1_66, %c0_67] : memref<2x10x10x128xbf16, #tpu.memory_space<vmem>>, vector<2x8x8x128xbf16>
    %44 = vector.shape_cast %43 : vector<2x8x8x128xbf16> to vector<128x128xbf16>
    %c0_68 = arith.constant 0 : index
    %c896 = arith.constant 896 : index
    %45 = vector.load %arg14[%c0_68, %c896] : memref<128x1152xbf16, #tpu.memory_space<vmem>>, vector<128x128xbf16>
    tpu.vector_store %arg14[%c0_68, %c896], %44 {strides = array<i32>} : memref<128x1152xbf16, #tpu.memory_space<vmem>>, vector<128x128xbf16>,
    %c0_69 = arith.constant 0 : index
    %c2_70 = arith.constant 2 : index
    %c2_71 = arith.constant 2 : index
    %c0_72 = arith.constant 0 : index
    %46 = vector.load %arg13[%c0_69, %c2_70, %c2_71, %c0_72] : memref<2x10x10x128xbf16, #tpu.memory_space<vmem>>, vector<2x8x8x128xbf16>
    %47 = vector.shape_cast %46 : vector<2x8x8x128xbf16> to vector<128x128xbf16>
    %c0_73 = arith.constant 0 : index
    %c1024 = arith.constant 1024 : index
    %48 = vector.load %arg14[%c0_73, %c1024] : memref<128x1152xbf16, #tpu.memory_space<vmem>>, vector<128x128xbf16>
    tpu.vector_store %arg14[%c0_73, %c1024], %47 {strides = array<i32>} : memref<128x1152xbf16, #tpu.memory_space<vmem>>, vector<128x128xbf16>,
    %c0_74 = arith.constant 0 : index
    %c0_75 = arith.constant 0 : index
    %49 = vector.load %arg14[%c0_74, %c0_75] : memref<128x1152xbf16, #tpu.memory_space<vmem>>, vector<128x1152xbf16>
    %c0_76 = arith.constant 0 : index
    %c0_77 = arith.constant 0 : index
    %50 = vector.load %arg4[%c0_76, %c0_77] : memref<1152x128xbf16, #tpu.memory_space<vmem>>, vector<1152x128xbf16>
    %cst_78 = arith.constant dense<0.000000e+00> : vector<128x128xf32>
    %51 = tpu.matmul %49, %50, %cst_78 {dimension_numbers = #tpu.dot_dimension_numbers<[1], [0], [0], [1], [0, 0, 1, 1], [], []>} : vector<128x1152xbf16>, vector<1152x128xbf16>, vector<128x128xf32> -> vector<128x128xf32>
    %c0_79 = arith.constant 0 : index
    %c0_80 = arith.constant 0 : index
    %52 = vector.load %arg5[%c0_79, %c0_80] : memref<1x128xf32, #tpu.memory_space<vmem>>, vector<1x128xf32>
    %53 = vector.broadcast %52 : vector<1x128xf32> to vector<128x128xf32>
    %54 = arith.addf %51, %53 : vector<128x128xf32>
    %cst_81 = arith.constant 0.000000e+00 : f32
    %55 = vector.broadcast %cst_81 : f32 to vector<128x128xf32>
    %56 = arith.maximumf %54, %55 : vector<128x128xf32>
    %57 = vector.shape_cast %56 : vector<128x128xf32> to vector<8x2x8x128xf32>
    %cst_82 = arith.constant dense<0xFF800000> : vector<8x8x128xf32>
    %58 = vector.multi_reduction <maximumf>, %57, %cst_82 [1] : vector<8x2x8x128xf32> to vector<8x8x128xf32>
    %59 = vector.shape_cast %58 : vector<8x8x128xf32> to vector<8x4x2x128xf32>
    %cst_83 = arith.constant dense<0xFF800000> : vector<8x4x128xf32>
    %60 = vector.multi_reduction <maximumf>, %59, %cst_83 [2] : vector<8x4x2x128xf32> to vector<8x4x128xf32>
    %61 = vector.shape_cast %60 : vector<8x4x128xf32> to vector<2x4x4x128xf32>
    %62 = arith.truncf %61 : vector<2x4x4x128xf32> to vector<2x4x4x128xbf16>
    %cst_84 = arith.constant 0.000000e+00 : bf16
    %63 = vector.broadcast %cst_84 : bf16 to vector<2x1x6x128xbf16>
    %cst_85 = arith.constant 0.000000e+00 : bf16
    %64 = vector.broadcast %cst_85 : bf16 to vector<2x4x1x128xbf16>
    %c0_86 = arith.constant 0 : index
    %c0_87 = arith.constant 0 : index
    %c0_88 = arith.constant 0 : index
    %c0_89 = arith.constant 0 : index
    %65 = vector.load %arg15[%c0_86, %c0_87, %c0_88, %c0_89] : memref<2x6x6x128xbf16, #tpu.memory_space<vmem>>, vector<2x1x6x128xbf16>
    tpu.vector_store %arg15[%c0_86, %c0_87, %c0_88, %c0_89], %63 {strides = array<i32>} : memref<2x6x6x128xbf16, #tpu.memory_space<vmem>>, vector<2x1x6x128xbf16>,
    %c0_90 = arith.constant 0 : index
    %c5 = arith.constant 5 : index
    %c0_91 = arith.constant 0 : index
    %c0_92 = arith.constant 0 : index
    %66 = vector.load %arg15[%c0_90, %c5, %c0_91, %c0_92] : memref<2x6x6x128xbf16, #tpu.memory_space<vmem>>, vector<2x1x6x128xbf16>
    tpu.vector_store %arg15[%c0_90, %c5, %c0_91, %c0_92], %63 {strides = array<i32>} : memref<2x6x6x128xbf16, #tpu.memory_space<vmem>>, vector<2x1x6x128xbf16>,
    %c0_93 = arith.constant 0 : index
    %c1_94 = arith.constant 1 : index
    %c0_95 = arith.constant 0 : index
    %c0_96 = arith.constant 0 : index
    %67 = vector.load %arg15[%c0_93, %c1_94, %c0_95, %c0_96] : memref<2x6x6x128xbf16, #tpu.memory_space<vmem>>, vector<2x4x1x128xbf16>
    tpu.vector_store %arg15[%c0_93, %c1_94, %c0_95, %c0_96], %64 {strides = array<i32>} : memref<2x6x6x128xbf16, #tpu.memory_space<vmem>>, vector<2x4x1x128xbf16>,
    %c0_97 = arith.constant 0 : index
    %c1_98 = arith.constant 1 : index
    %c5_99 = arith.constant 5 : index
    %c0_100 = arith.constant 0 : index
    %68 = vector.load %arg15[%c0_97, %c1_98, %c5_99, %c0_100] : memref<2x6x6x128xbf16, #tpu.memory_space<vmem>>, vector<2x4x1x128xbf16>
    tpu.vector_store %arg15[%c0_97, %c1_98, %c5_99, %c0_100], %64 {strides = array<i32>} : memref<2x6x6x128xbf16, #tpu.memory_space<vmem>>, vector<2x4x1x128xbf16>,
    %c0_101 = arith.constant 0 : index
    %c1_102 = arith.constant 1 : index
    %c1_103 = arith.constant 1 : index
    %c0_104 = arith.constant 0 : index
    %69 = vector.load %arg15[%c0_101, %c1_102, %c1_103, %c0_104] : memref<2x6x6x128xbf16, #tpu.memory_space<vmem>>, vector<2x4x4x128xbf16>
    tpu.vector_store %arg15[%c0_101, %c1_102, %c1_103, %c0_104], %62 {strides = array<i32>} : memref<2x6x6x128xbf16, #tpu.memory_space<vmem>>, vector<2x4x4x128xbf16>,
    %c0_105 = arith.constant 0 : index
    %c0_106 = arith.constant 0 : index
    %c0_107 = arith.constant 0 : index
    %c0_108 = arith.constant 0 : index
    %70 = vector.load %arg15[%c0_105, %c0_106, %c0_107, %c0_108] : memref<2x6x6x128xbf16, #tpu.memory_space<vmem>>, vector<2x4x4x128xbf16>
    %71 = vector.shape_cast %70 : vector<2x4x4x128xbf16> to vector<32x128xbf16>
    %c0_109 = arith.constant 0 : index
    %c0_110 = arith.constant 0 : index
    %72 = vector.load %arg16[%c0_109, %c0_110] : memref<32x1152xbf16, #tpu.memory_space<vmem>>, vector<32x128xbf16>
    tpu.vector_store %arg16[%c0_109, %c0_110], %71 {strides = array<i32>} : memref<32x1152xbf16, #tpu.memory_space<vmem>>, vector<32x128xbf16>,
    %c0_111 = arith.constant 0 : index
    %c0_112 = arith.constant 0 : index
    %c1_113 = arith.constant 1 : index
    %c0_114 = arith.constant 0 : index
    %73 = vector.load %arg15[%c0_111, %c0_112, %c1_113, %c0_114] : memref<2x6x6x128xbf16, #tpu.memory_space<vmem>>, vector<2x4x4x128xbf16>
    %74 = vector.shape_cast %73 : vector<2x4x4x128xbf16> to vector<32x128xbf16>
    %c0_115 = arith.constant 0 : index
    %c128_116 = arith.constant 128 : index
    %75 = vector.load %arg16[%c0_115, %c128_116] : memref<32x1152xbf16, #tpu.memory_space<vmem>>, vector<32x128xbf16>
    tpu.vector_store %arg16[%c0_115, %c128_116], %74 {strides = array<i32>} : memref<32x1152xbf16, #tpu.memory_space<vmem>>, vector<32x128xbf16>,
    %c0_117 = arith.constant 0 : index
    %c0_118 = arith.constant 0 : index
    %c2_119 = arith.constant 2 : index
    %c0_120 = arith.constant 0 : index
    %76 = vector.load %arg15[%c0_117, %c0_118, %c2_119, %c0_120] : memref<2x6x6x128xbf16, #tpu.memory_space<vmem>>, vector<2x4x4x128xbf16>
    %77 = vector.shape_cast %76 : vector<2x4x4x128xbf16> to vector<32x128xbf16>
    %c0_121 = arith.constant 0 : index
    %c256_122 = arith.constant 256 : index
    %78 = vector.load %arg16[%c0_121, %c256_122] : memref<32x1152xbf16, #tpu.memory_space<vmem>>, vector<32x128xbf16>
    tpu.vector_store %arg16[%c0_121, %c256_122], %77 {strides = array<i32>} : memref<32x1152xbf16, #tpu.memory_space<vmem>>, vector<32x128xbf16>,
    %c0_123 = arith.constant 0 : index
    %c1_124 = arith.constant 1 : index
    %c0_125 = arith.constant 0 : index
    %c0_126 = arith.constant 0 : index
    %79 = vector.load %arg15[%c0_123, %c1_124, %c0_125, %c0_126] : memref<2x6x6x128xbf16, #tpu.memory_space<vmem>>, vector<2x4x4x128xbf16>
    %80 = vector.shape_cast %79 : vector<2x4x4x128xbf16> to vector<32x128xbf16>
    %c0_127 = arith.constant 0 : index
    %c384_128 = arith.constant 384 : index
    %81 = vector.load %arg16[%c0_127, %c384_128] : memref<32x1152xbf16, #tpu.memory_space<vmem>>, vector<32x128xbf16>
    tpu.vector_store %arg16[%c0_127, %c384_128], %80 {strides = array<i32>} : memref<32x1152xbf16, #tpu.memory_space<vmem>>, vector<32x128xbf16>,
    %c0_129 = arith.constant 0 : index
    %c1_130 = arith.constant 1 : index
    %c1_131 = arith.constant 1 : index
    %c0_132 = arith.constant 0 : index
    %82 = vector.load %arg15[%c0_129, %c1_130, %c1_131, %c0_132] : memref<2x6x6x128xbf16, #tpu.memory_space<vmem>>, vector<2x4x4x128xbf16>
    %83 = vector.shape_cast %82 : vector<2x4x4x128xbf16> to vector<32x128xbf16>
    %c0_133 = arith.constant 0 : index
    %c512_134 = arith.constant 512 : index
    %84 = vector.load %arg16[%c0_133, %c512_134] : memref<32x1152xbf16, #tpu.memory_space<vmem>>, vector<32x128xbf16>
    tpu.vector_store %arg16[%c0_133, %c512_134], %83 {strides = array<i32>} : memref<32x1152xbf16, #tpu.memory_space<vmem>>, vector<32x128xbf16>,
    %c0_135 = arith.constant 0 : index
    %c1_136 = arith.constant 1 : index
    %c2_137 = arith.constant 2 : index
    %c0_138 = arith.constant 0 : index
    %85 = vector.load %arg15[%c0_135, %c1_136, %c2_137, %c0_138] : memref<2x6x6x128xbf16, #tpu.memory_space<vmem>>, vector<2x4x4x128xbf16>
    %86 = vector.shape_cast %85 : vector<2x4x4x128xbf16> to vector<32x128xbf16>
    %c0_139 = arith.constant 0 : index
    %c640_140 = arith.constant 640 : index
    %87 = vector.load %arg16[%c0_139, %c640_140] : memref<32x1152xbf16, #tpu.memory_space<vmem>>, vector<32x128xbf16>
    tpu.vector_store %arg16[%c0_139, %c640_140], %86 {strides = array<i32>} : memref<32x1152xbf16, #tpu.memory_space<vmem>>, vector<32x128xbf16>,
    %c0_141 = arith.constant 0 : index
    %c2_142 = arith.constant 2 : index
    %c0_143 = arith.constant 0 : index
    %c0_144 = arith.constant 0 : index
    %88 = vector.load %arg15[%c0_141, %c2_142, %c0_143, %c0_144] : memref<2x6x6x128xbf16, #tpu.memory_space<vmem>>, vector<2x4x4x128xbf16>
    %89 = vector.shape_cast %88 : vector<2x4x4x128xbf16> to vector<32x128xbf16>
    %c0_145 = arith.constant 0 : index
    %c768_146 = arith.constant 768 : index
    %90 = vector.load %arg16[%c0_145, %c768_146] : memref<32x1152xbf16, #tpu.memory_space<vmem>>, vector<32x128xbf16>
    tpu.vector_store %arg16[%c0_145, %c768_146], %89 {strides = array<i32>} : memref<32x1152xbf16, #tpu.memory_space<vmem>>, vector<32x128xbf16>,
    %c0_147 = arith.constant 0 : index
    %c2_148 = arith.constant 2 : index
    %c1_149 = arith.constant 1 : index
    %c0_150 = arith.constant 0 : index
    %91 = vector.load %arg15[%c0_147, %c2_148, %c1_149, %c0_150] : memref<2x6x6x128xbf16, #tpu.memory_space<vmem>>, vector<2x4x4x128xbf16>
    %92 = vector.shape_cast %91 : vector<2x4x4x128xbf16> to vector<32x128xbf16>
    %c0_151 = arith.constant 0 : index
    %c896_152 = arith.constant 896 : index
    %93 = vector.load %arg16[%c0_151, %c896_152] : memref<32x1152xbf16, #tpu.memory_space<vmem>>, vector<32x128xbf16>
    tpu.vector_store %arg16[%c0_151, %c896_152], %92 {strides = array<i32>} : memref<32x1152xbf16, #tpu.memory_space<vmem>>, vector<32x128xbf16>,
    %c0_153 = arith.constant 0 : index
    %c2_154 = arith.constant 2 : index
    %c2_155 = arith.constant 2 : index
    %c0_156 = arith.constant 0 : index
    %94 = vector.load %arg15[%c0_153, %c2_154, %c2_155, %c0_156] : memref<2x6x6x128xbf16, #tpu.memory_space<vmem>>, vector<2x4x4x128xbf16>
    %95 = vector.shape_cast %94 : vector<2x4x4x128xbf16> to vector<32x128xbf16>
    %c0_157 = arith.constant 0 : index
    %c1024_158 = arith.constant 1024 : index
    %96 = vector.load %arg16[%c0_157, %c1024_158] : memref<32x1152xbf16, #tpu.memory_space<vmem>>, vector<32x128xbf16>
    tpu.vector_store %arg16[%c0_157, %c1024_158], %95 {strides = array<i32>} : memref<32x1152xbf16, #tpu.memory_space<vmem>>, vector<32x128xbf16>,
    %c0_159 = arith.constant 0 : index
    %c0_160 = arith.constant 0 : index
    %97 = vector.load %arg16[%c0_159, %c0_160] : memref<32x1152xbf16, #tpu.memory_space<vmem>>, vector<32x1152xbf16>
    %c0_161 = arith.constant 0 : index
    %c0_162 = arith.constant 0 : index
    %98 = vector.load %arg6[%c0_161, %c0_162] : memref<1152x256xbf16, #tpu.memory_space<vmem>>, vector<1152x256xbf16>
    %cst_163 = arith.constant dense<0.000000e+00> : vector<32x256xf32>
    %99 = tpu.matmul %97, %98, %cst_163 {dimension_numbers = #tpu.dot_dimension_numbers<[1], [0], [0], [1], [0, 0, 1, 1], [], []>} : vector<32x1152xbf16>, vector<1152x256xbf16>, vector<32x256xf32> -> vector<32x256xf32>
    %c0_164 = arith.constant 0 : index
    %c0_165 = arith.constant 0 : index
    %100 = vector.load %arg7[%c0_164, %c0_165] : memref<1x256xf32, #tpu.memory_space<vmem>>, vector<1x256xf32>
    %101 = vector.broadcast %100 : vector<1x256xf32> to vector<32x256xf32>
    %102 = arith.addf %99, %101 : vector<32x256xf32>
    %cst_166 = arith.constant 0.000000e+00 : f32
    %103 = vector.broadcast %cst_166 : f32 to vector<32x256xf32>
    %104 = arith.maximumf %102, %103 : vector<32x256xf32>
    %105 = vector.shape_cast %104 : vector<32x256xf32> to vector<2x16x256xf32>
    %cst_167 = arith.constant dense<0xFF800000> : vector<2x256xf32>
    %106 = vector.multi_reduction <maximumf>, %105, %cst_167 [1] : vector<2x16x256xf32> to vector<2x256xf32>
    %107 = arith.truncf %106 : vector<2x256xf32> to vector<2x256xbf16>
    %c0_168 = arith.constant 0 : index
    %c0_169 = arith.constant 0 : index
    %108 = vector.load %arg8[%c0_168, %c0_169] : memref<256x128xbf16, #tpu.memory_space<vmem>>, vector<256x128xbf16>
    %cst_170 = arith.constant dense<0.000000e+00> : vector<2x128xf32>
    %109 = tpu.matmul %107, %108, %cst_170 {dimension_numbers = #tpu.dot_dimension_numbers<[1], [0], [0], [1], [0, 0, 1, 1], [], []>} : vector<2x256xbf16>, vector<256x128xbf16>, vector<2x128xf32> -> vector<2x128xf32>
    %c0_171 = arith.constant 0 : index
    %c0_172 = arith.constant 0 : index
    %110 = vector.load %arg9[%c0_171, %c0_172] : memref<1x128xf32, #tpu.memory_space<vmem>>, vector<1x128xf32>
    %111 = vector.broadcast %110 : vector<1x128xf32> to vector<2x128xf32>
    %112 = arith.addf %109, %111 : vector<2x128xf32>
    %cst_173 = arith.constant 0.000000e+00 : f32
    %113 = vector.broadcast %cst_173 : f32 to vector<2x128xf32>
    %114 = arith.maximumf %112, %113 : vector<2x128xf32>
    %115 = arith.truncf %114 : vector<2x128xf32> to vector<2x128xbf16>
    %c0_174 = arith.constant 0 : index
    %c0_175 = arith.constant 0 : index
    %116 = vector.load %arg10[%c0_174, %c0_175] : memref<128x3xbf16, #tpu.memory_space<vmem>>, vector<128x3xbf16>
    %cst_176 = arith.constant dense<0.000000e+00> : vector<2x3xf32>
    %117 = tpu.matmul %115, %116, %cst_176 {dimension_numbers = #tpu.dot_dimension_numbers<[1], [0], [0], [1], [0, 0, 1, 1], [], []>} : vector<2x128xbf16>, vector<128x3xbf16>, vector<2x3xf32> -> vector<2x3xf32>
    %c0_177 = arith.constant 0 : index
    %c0_178 = arith.constant 0 : index
    %118 = vector.load %arg11[%c0_177, %c0_178] : memref<1x3xf32, #tpu.memory_space<vmem>>, vector<1x3xf32>
    %119 = vector.broadcast %118 : vector<1x3xf32> to vector<2x3xf32>
    %120 = arith.addf %117, %119 : vector<2x3xf32>
    %121 = vector.shape_cast %120 : vector<2x3xf32> to vector<2x1x3xf32>
    %c0_179 = arith.constant 0 : index
    %c0_180 = arith.constant 0 : index
    %c0_181 = arith.constant 0 : index
    %122 = vector.load %arg12[%c0_179, %c0_180, %c0_181] : memref<2x1x3xf32, #tpu.memory_space<vmem>>, vector<2x1x3xf32>
    tpu.vector_store %arg12[%c0_179, %c0_180, %c0_181], %121 {strides = array<i32>} : memref<2x1x3xf32, #tpu.memory_space<vmem>>, vector<2x1x3xf32>,
    return
  }
  func.func @transform_0(%arg0: i32) -> (i32, i32, i32) {
    %c0_i32 = arith.constant 0 : i32
    %c0_i32_0 = arith.constant 0 : i32
    %c0_i32_1 = arith.constant 0 : i32
    return %arg0, %c0_i32, %c0_i32_0 : i32, i32, i32
  }
  func.func @transform_1(%arg0: i32) -> (i32, i32) {
    %c0_i32 = arith.constant 0 : i32
    %c0_i32_0 = arith.constant 0 : i32
    %c0_i32_1 = arith.constant 0 : i32
    return %c0_i32, %c0_i32_0 : i32, i32
  }
  func.func @transform_2(%arg0: i32) -> (i32, i32) {
    %c0_i32 = arith.constant 0 : i32
    %c0_i32_0 = arith.constant 0 : i32
    %c0_i32_1 = arith.constant 0 : i32
    return %c0_i32, %c0_i32_0 : i32, i32
  }
  func.func @transform_3(%arg0: i32) -> (i32, i32) {
    %c0_i32 = arith.constant 0 : i32
    %c0_i32_0 = arith.constant 0 : i32
    %c0_i32_1 = arith.constant 0 : i32
    return %c0_i32, %c0_i32_0 : i32, i32
  }
  func.func @transform_4(%arg0: i32) -> (i32, i32) {
    %c0_i32 = arith.constant 0 : i32
    %c0_i32_0 = arith.constant 0 : i32
    %c0_i32_1 = arith.constant 0 : i32
    return %c0_i32, %c0_i32_0 : i32, i32
  }
  func.func @transform_5(%arg0: i32) -> (i32, i32) {
    %c0_i32 = arith.constant 0 : i32
    %c0_i32_0 = arith.constant 0 : i32
    %c0_i32_1 = arith.constant 0 : i32
    return %c0_i32, %c0_i32_0 : i32, i32
  }
  func.func @transform_6(%arg0: i32) -> (i32, i32) {
    %c0_i32 = arith.constant 0 : i32
    %c0_i32_0 = arith.constant 0 : i32
    %c0_i32_1 = arith.constant 0 : i32
    return %c0_i32, %c0_i32_0 : i32, i32
  }
  func.func @transform_7(%arg0: i32) -> (i32, i32) {
    %c0_i32 = arith.constant 0 : i32
    %c0_i32_0 = arith.constant 0 : i32
    %c0_i32_1 = arith.constant 0 : i32
    return %c0_i32, %c0_i32_0 : i32, i32
  }
  func.func @transform_8(%arg0: i32) -> (i32, i32) {
    %c0_i32 = arith.constant 0 : i32
    %c0_i32_0 = arith.constant 0 : i32
    %c0_i32_1 = arith.constant 0 : i32
    return %c0_i32, %c0_i32_0 : i32, i32
  }
  func.func @transform_9(%arg0: i32) -> (i32, i32) {
    %c0_i32 = arith.constant 0 : i32
    %c0_i32_0 = arith.constant 0 : i32
    %c0_i32_1 = arith.constant 0 : i32
    return %c0_i32, %c0_i32_0 : i32, i32
  }
  func.func @transform_10(%arg0: i32) -> (i32, i32) {
    %c0_i32 = arith.constant 0 : i32
    %c0_i32_0 = arith.constant 0 : i32
    %c0_i32_1 = arith.constant 0 : i32
    return %c0_i32, %c0_i32_0 : i32, i32
  }
  func.func @transform_11(%arg0: i32) -> (i32, i32, i32) {
    %c0_i32 = arith.constant 0 : i32
    %c0_i32_0 = arith.constant 0 : i32
    %c0_i32_1 = arith.constant 0 : i32
    return %arg0, %c0_i32, %c0_i32_0 : i32, i32, i32
  }
}

</mosaic_0001>

<bundles_post_ra>
// kernel: forward.1
= control target key start
LH: loop header
LB: loop body
LE: loop exit
PB: predicated region body
PF: predicated region fallthrough
CT: control target
= control target key end

     0   :  { %s15016_s0 = inlined_call_operand.vmem [shape: bf16[4,256,27], index: 0, kind: input, shape index: {}]   ;;  %s15017_s1 = inlined_call_operand.vmem [shape: bf16[27,128], index: 1, kind: input, shape index: {}]   ;;  %s15018_s2 = inlined_call_operand.vmem [shape: f32[1,128], index: 2, kind: input, shape index: {}]   ;;  %s15019_s3 = inlined_call_operand.vmem [shape: bf16[1152,128], index: 3, kind: input, shape index: {}]   ;;  %s15020_s4 = inlined_call_operand.vmem [shape: f32[1,128], index: 4, kind: input, shape index: {}]   ;;  %s15021_s5 = inlined_call_operand.vmem [shape: bf16[1152,256], index: 5, kind: input, shape index: {}]   ;;  %s15022_s6 = inlined_call_operand.vmem [shape: f32[1,256], index: 6, kind: input, shape index: {}]   ;;  %s15023_s7 = inlined_call_operand.vmem [shape: bf16[256,128], index: 7, kind: input, shape index: {}]   ;;  %s15024_s8 = inlined_call_operand.vmem [shape: f32[1,128], index: 8, kind: input, shape index: {}]   ;;  %s15025_s9 = inlined_call_operand.vmem [shape: bf16[128,3], index: 9, kind: input, shape index: {}]   ;;  %s15026_s10 = inlined_call_operand.vmem [shape: f32[1,3], index: 10, kind: input, shape index: {}]   ;;  %s15027_s11 = inlined_call_operand.hbm [shape: f32[4,1,3], index: 11, kind: output, shape index: {}]  }
   0x1   :  { %15028 = sst [smem:[#allocation9_spill]] %s15016_s0 }
   0x2   :  { %16 = vsyncpa [#allocation7], 0 }
   0x3   :  { %18 = vsyncpa [#allocation7 + $0x1], 0  ;;  %s12496_s17 = smov 0   ;;  %s12498_s18 = smov 0  }
   0x4   :  { %s12500_s19 = smov 0   ;;  %s12502_s20 = smov 0  }
   0x5 LB: > { %s12517_s21 = sadd.s32 4294967295, %s12425_s20   ;;  %s10446_s22 = sadd.s32 4294967294, %s12425_s20   ;;  %s12425_s20 = sphi %s12502_s20, %s15055_s20   ;;  %s12421_s19 = sphi %s12500_s19, %s15054_s19   ;;  %s12417_s18 = sphi %s12498_s18, %s15053_s18   ;;  %s12413_s17 = sphi %s12496_s17, %s15052_s17  }
   0x6   : > { %s12521_s23 = sadd.s32 1, %s12425_s20   ;;  %s267_s24 = sadd.s32 1, %s12421_s19 }
   0x7   : > { %s264_s25 = ssub.s32 %s12425_s20, %s12521_s23  ;;  %p277_p0 = scmp.ne.s32.totalorder %s12421_s19, %s12417_s18 }
   0x8   : > { %p265_p1 = scmp.eq.s32.totalorder %s264_s25, 0  ;;  %p278_p2 = scmp.eq.s32.totalorder %s12517_s21, 1 }
   0x9   : > { %p283_p3 = scmp.ne.s32.totalorder %s12417_s18, %s12413_s17  ;;  %p284_p4 = scmp.eq.s32.totalorder %s10446_s22, 1 }
   0xa   : > { %s12532_s26 = scalar_select %p265_p1, %s12421_s19, %s267_s24  }
   0xb   : > { %p12534_p5 = por %p278_p2, %p277_p0  ;;  %p12538_p6 = por %p284_p4, %p283_p3 }
   0xc   : > { %p10449_p7 = scmp.ge.s32.totalorder %s12425_s20, 1  ;;  %p342_p8 = scmp.lt.s32.totalorder %s12425_s20, 3 }
   0xe   : > { %p343_p9 = pnand %p10449_p7, %p342_p8 }
   0xf   : > { %s10451_s14 = sshll.u32 (!%p343_p9), %s12517_s21, 1  ;;  %s15031_s0 = sld [smem:[#allocation9_spill]] (!%p343_p9) }
  0x10   : > { %346 = sbr.rel (%p343_p9) target bundleno = 1942 (0x796), region = 64  ;;  %p384_p10 = scmp.lt.s32.totalorder (!%p343_p9), %s10451_s14, 3 }
  0x11   : > { %s11368_s25 = sshll.u32 (!%p343_p9), %s12517_s21, 5  ;;  %s12433_s22 = smov (!%p343_p9), [#allocation6]  }
  0x15   : > { %v11873_v0 = vld [vmem:[%s15017_s1 + $0x8] sm:$0x3f]   ;;  %vm735_vm0 = vcmask 1044480   ;;  %vm736_vm1 = vcmask 1045504   ;;  %v12427_v1 = vmov 65535   ;;  %v11874_v3 = vld [vmem:[%s15017_s1] sm:$0xff]  }
  0x16   : > { %v737_v2 = vsel %vm735_vm0, 4294967295, %v12427_v1  ;;  %vm638_vm2 = vcmask 220160   ;;  %s15057_s14 = smov (!%p384_p10, %s10451_s14), 3  ;;  %vm2866_vm3 = vcmask 1040384   ;;  %vm2917_vm4 = vsmask.f32 7938 }
  0x17   : > { %v738_v4 = vsel %vm736_vm1, %v737_v2, 0  ;;  %s11191_s15 = sshll.u32 %s15057_s14, 7  ;;  %vm12610_vm5 = vmand %vm2866_vm3, %vm2917_vm4  ;;  %v2919_v34 = vld [vmem:[#allocation2 + $0xc] sm:$0x1]  ;;  %vm2867_vm6 = vsmask.f32 256  ;;  %v1163_v2 = vlaneseq  ;;  %s14972_s14 = scalar_lea.hbm %s15027_s11, %s11368_s25 }
  0x18   : > { %v740_v5 = vand.u32 %v11873_v0, %v738_v4  ;;  %s12554_s24 = scalar_lea.vmem %s15031_s0, %s11191_s15  ;;  %v2920_v35 = vsel %vm12610_vm5, 0, %v2919_v34  ;;  %vm12617_vm7 = vmand %vm2866_vm3, %vm2867_vm6  ;;  %v2869_v37 = vld [vmem:[#allocation2 + $0x8] sm:$0x1]  ;;  %v2922_v44 = vld [vmem:[#allocation2 + $0x14] sm:$0x1]  ;;  %vm1831_vm8 = vcmask 1041408  }
  0x19   : > { %v11875_v6 = vld [vmem:[%s12554_s24] sm:$0xff]   ;;  %v11876_v7 = vld [vmem:[%s12554_s24 + $0x8] sm:$0xff]   ;;  %v11877_v8 = vld [vmem:[%s12554_s24 + $0x10] sm:$0xff]   ;;  %2921 = vst [vmem:[#allocation2 + $0xc] sm:$0x1] %v2920_v35  ;;  %v2870_v38 = vsel %vm12617_vm7, 0, %v2869_v37 }
  0x1a   : > { %11706 = vmatprep.subr.bf16.mxu0 %v740_v5  ;;  %11710 = vmatprep.mubr.msk.bf16.mxu0 %vm638_vm2, %v11875_v6  ;;  %v11878_v9 = vld [vmem:[%s12554_s24 + $0x18] sm:$0xff]   ;;  %v11879_v10 = vld [vmem:[%s12554_s24 + $0x20] sm:$0xff]   ;;  %v11880_v11 = vld [vmem:[%s12554_s24 + $0x28] sm:$0xff]   ;;  %2871 = vst [vmem:[#allocation2 + $0x8] sm:$0x1] %v2870_v38  ;;  %v2923_v45 = vsel %vm12610_vm5, 0, %v2922_v44 }
  0x1b   : > { %11707 = vmatpush3.bf16.msra.mxu0 %v740_v5  ;;  %v11881_v12 = vld [vmem:[%s12554_s24 + $0x30] sm:$0xff]   ;;  %v11882_v13 = vld [vmem:[%s12554_s24 + $0x38] sm:$0xff]   ;;  %v11883_v14 = vld [vmem:[%s12554_s24 + $0x40] sm:$0xff]   ;;  %2924 = vst [vmem:[#allocation2 + $0x14] sm:$0x1] %v2923_v45  ;;  %vm3479_vm9 = vcmask 1042434  }
  0x1c   : > { %11708 = vmatprep.subr.bf16.mxu0 %v11874_v3  ;;  %v11884_v15 = vld [vmem:[%s12554_s24 + $0x48] sm:$0xff]   ;;  %v11885_v16 = vld [vmem:[%s12554_s24 + $0x50] sm:$0xff]   ;;  %v11886_v17 = vld [vmem:[%s12554_s24 + $0x58] sm:$0xff]   ;;  %v12428_v0 = vmov 1983009808   ;;  %vm3481_vm10 = vcmask 1043459  }
  0x1d   : > { %v11887_v18 = vld [vmem:[%s12554_s24 + $0x60] sm:$0xff]   ;;  %v11888_v19 = vld [vmem:[%s12554_s24 + $0x68] sm:$0xff]   ;;  %v11889_v20 = vld [vmem:[%s12554_s24 + $0x70] sm:$0xff]   ;;  %v1161_v1 = vunpack.c.l.s4 %v12428_v0  ;;  %vm3483_vm11 = vcmask 1044484   ;;  %vm3485_vm12 = vcmask 1045509   ;;  %vm3487_vm13 = vcmask 1046534  }
  0x1e   : > { %v11890_v21 = vld [vmem:[%s12554_s24 + $0x78] sm:$0xff]   ;;  %v11891_v22 = vld [vmem:[%s12554_s24 + $0x80] sm:$0xff]   ;;  %v11892_v23 = vld [vmem:[%s12554_s24 + $0x88] sm:$0xff]   ;;  %vm3489_vm14 = vcmask 1047559   ;;  %vm3645_vm15 = vcmask 1043456   ;;  %vm4130_vm6 = vcmask 1042432  }
  0x1f   : > { %11709 = vmatpush3.bf16.msra.mxu0 %v11874_v3  ;;  %v11893_v24 = vld [vmem:[%s12554_s24 + $0x90] sm:$0xff]   ;;  %v11894_v25 = vld [vmem:[%s12554_s24 + $0x98] sm:$0xff]   ;;  %v11895_v26 = vld [vmem:[%s12554_s24 + $0xa0] sm:$0xff]   ;;  %v1162_v6 = vunpack.c.0.s8 %v1161_v1  ;;  %vm3807_vm1 = vsmask.f32 3328  ;;  %s380_s15 = sand.u32 1, %s12417_s18  }
  0x20   : > { %v11896_v27 = vld [vmem:[%s12554_s24 + $0xa8] sm:$0xff]   ;;  %v11897_v28 = vld [vmem:[%s12554_s24 + $0xb0] sm:$0xff]   ;;  %v11898_v29 = vld [vmem:[%s12554_s24 + $0xb8] sm:$0xff]   ;;  %s10450_s16 = sshll.u32 %s380_s15, 1  ;;  %s14976_s21 = scalar_lea.sflag [#allocation7], %s380_s15 }
  0x21   : > { %v11899_v30 = vld [vmem:[%s12554_s24 + $0xc0] sm:$0xff]   ;;  %v11900_v31 = vld [vmem:[%s12554_s24 + $0xc8] sm:$0xff]   ;;  %v11901_v32 = vld [vmem:[%s12554_s24 + $0xd0] sm:$0xff]   ;;  %s382_s29 = scalar_lea.vmem [#allocation6], %s10450_s16 }
  0x22   : > { %11711 = vmatmul.mubr.msk.bf16.vlgmr.msra.gmra.mxu0 %vm638_vm2, %v11876_v7  ;;  %v11902_v39 = vld [vmem:[%s12554_s24 + $0xd8] sm:$0xff]   ;;  %v11903_v40 = vld [vmem:[%s12554_s24 + $0xe0] sm:$0xff]   ;;  %v11904_v41 = vld [vmem:[%s12554_s24 + $0xe8] sm:$0xff]   ;;  %v12677_v7 = vshrl.u32 %v1163_v2, 7  ;;  %s10384_s30 = sshll.u32 %s382_s29, 4  ;;  %s14974_s30 = int_to_ptr.vmem [resolvable:$true] %s10384_s30 }
  0x23   : > { %11714 = vmatprep.mubr.msk.bf16.mxu0 %vm638_vm2, %v11877_v8  ;;  %v11905_v42 = vld [vmem:[%s12554_s24 + $0xf0] sm:$0xff]   ;;  %v11906_v43 = vld [vmem:[%s12554_s24 + $0xf8] sm:$0xff]   ;;  %v2928_v53 = vld [vmem:[#allocation2 + $0x24] sm:$0x1]  ;;  %s12365_s16 = scalar_lea.vmem %s14974_s30, 32  ;;  %s12369_s24 = sshll.u32 %s12433_s22, 4  ;;  %s12370_s24 = int_to_ptr.vmem [resolvable:$false] %s12369_s24 }
  0x24   : > { %v2872_v46 = vld [vmem:[#allocation2 + $0x10] sm:$0x1]  ;;  %v2925_v48 = vld [vmem:[#allocation2 + $0x1c] sm:$0x1]  ;;  %v2875_v50 = vld [vmem:[#allocation2 + $0x18] sm:$0x1]  ;;  %p12366_p11 = scmp.ne.s32.totalorder %s14974_s30, %s12365_s16  ;;  %p12372_p0 = scmp.lt.s32.totalorder %s14974_s30, %s12370_s24 }
  0x25   : > { %v2873_v47 = vsel %vm12617_vm7, 0, %v2872_v46  ;;  %v2926_v49 = vsel %vm12610_vm5, 0, %v2925_v48  ;;  %v2876_v51 = vsel %vm12617_vm7, 0, %v2875_v50  ;;  %v11907_v52 = vld [vmem:[%s15019_s3 + $0x78] sm:$0xff]   ;;  %v2929_v54 = vsel %vm12610_vm5, 0, %v2928_v53  ;;  %v11909_v58 = vld [vmem:[%s15019_s3 + $0x70] sm:$0xff]   ;;  %vm12765_vm0 = vmand %vm3645_vm15, %vm2917_vm4 }
  0x26   : > { %2874 = vst [vmem:[#allocation2 + $0x10] sm:$0x1] %v2873_v47  ;;  %2927 = vst [vmem:[#allocation2 + $0x1c] sm:$0x1] %v2926_v49  ;;  %11403 = vmatprep.subr.bf16.mxu1 %v11907_v52  ;;  %v11908_v55 = vld [vmem:[%s15019_s3 + $0x38] sm:$0xff]   ;;  %v11910_v59 = vld [vmem:[%s15019_s3 + $0x30] sm:$0xff]   ;;  %p12367_p12 = pnand %p12366_p11, %p12534_p5 }
  0x27   : > { %2877 = vst [vmem:[#allocation2 + $0x18] sm:$0x1] %v2876_v51  ;;  %2930 = vst [vmem:[#allocation2 + $0x24] sm:$0x1] %v2929_v54  ;;  %v2878_v56 = vld [vmem:[#allocation2 + $0x20] sm:$0x1]  ;;  %11404 = vmatpush3.bf16.msra.mxu1 %v11908_v55 }
  0x28   : > { %v2879_v57 = vsel %vm12617_vm7, 0, %v2878_v56  ;;  %11405 = vmatprep.subr.bf16.mxu1 %v11909_v58  ;;  %v11911_v60 = vld [vmem:[%s15019_s3 + $0x68] sm:$0xff]   ;;  %v11912_v61 = vld [vmem:[%s15019_s3 + $0x178] sm:$0xff]   ;;  %v12674_v3 = vld [vmem:[%s15018_s2] ss:$0 sm:$0xff]  ;;  %vm4131_vm15 = vcmask 1046532   ;;  %p12368_p13 = pneg %p12367_p12 }
  0x29   : > { %2880 = vst [vmem:[#allocation2 + $0x20] sm:$0x1] %v2879_v57  ;;  %v11913_v62 = vld [vmem:[%s15019_s3 + $0x28] sm:$0xff]   ;;  %v11914_v63 = vld [vmem:[%s15019_s3 + $0x138] sm:$0xff]   ;;  %11531 = vmatprep.subr.bf16.mxu0 %v11912_v61  ;;  %v11917_v45 = vld [vmem:[%s15019_s3 + $0x20] sm:$0xff]   ;;  %s12371_s25 = scalar_lea.vmem %s12370_s24, 64 }
  0x2a   : > { %11715 = vmatmul.mubr.msk.bf16.gmra.mxu0 %vm638_vm2, %v11878_v9  ;;  %v11918_v46 = vld [vmem:[%s15019_s3 + $0x130] sm:$0xff]   ;;  %p12373_p1 = scmp.lt.s32.totalorder %s12371_s25, %s12365_s16 }
  0x2b   : > { %11718 = vmatprep.mubr.msk.bf16.mxu0 %vm638_vm2, %v11879_v10  ;;  %11406 = vmatpush3.bf16.msra.mxu1 %v11910_v59 }
  0x2c   : > { %11407 = vmatprep.subr.bf16.mxu1 %v11911_v60  ;;  %11532 = vmatpush3.bf16.msra.mxu0 %v11914_v63  ;;  %p12374_p2 = por %p12373_p1, %p12372_p0 }
  0x2e   : > { %p12375_p3 = pnand %p12374_p2, %p12368_p13 }
  0x2f   : > { %11408 = vmatpush3.bf16.msra.mxu1 %v11913_v62 }
  0x32   : > { %11719 = vmatmul.mubr.msk.bf16.gmra.mxu0 %vm638_vm2, %v11880_v11 }
  0x33   : > { %11722 = vmatprep.mubr.msk.bf16.mxu0 %vm638_vm2, %v11881_v12 }
  0x3a   : > { %11723 = vmatmul.mubr.msk.bf16.gmra.mxu0 %vm638_vm2, %v11882_v13  ;;  %v12681_v13 = vsub.s32 %v1162_v6, %v12677_v7 }
  0x3b   : > { %11726 = vmatprep.mubr.msk.bf16.mxu0 %vm638_vm2, %v11883_v14 }
  0x42   : > { %11727 = vmatmul.mubr.msk.bf16.gmra.mxu0 %vm638_vm2, %v11884_v15  ;;  %v2931_v15 = vld [vmem:[#allocation2 + $0x2c] sm:$0x1] }
  0x43   : > { %11730 = vmatprep.mubr.msk.bf16.mxu0 %vm638_vm2, %v11885_v16 }
  0x4a   : > { %11731 = vmatmul.mubr.msk.bf16.gmra.mxu0 %vm638_vm2, %v11886_v17  ;;  %v2932_v17 = vsel %vm12610_vm5, 0, %v2931_v15 }
  0x4b   : > { %11734 = vmatprep.mubr.msk.bf16.mxu0 %vm638_vm2, %v11887_v18  ;;  %2933 = vst [vmem:[#allocation2 + $0x2c] sm:$0x1] %v2932_v17 }
  0x52   : > { %11735 = vmatmul.mubr.msk.bf16.gmra.mxu0 %vm638_vm2, %v11888_v19 }
  0x53   : > { %11738 = vmatprep.mubr.msk.bf16.mxu0 %vm638_vm2, %v11889_v20 }
  0x5a   : > { %11739 = vmatmul.mubr.msk.bf16.gmra.mxu0 %vm638_vm2, %v11890_v21 }
  0x5b   : > { %11742 = vmatprep.mubr.msk.bf16.mxu0 %vm638_vm2, %v11891_v22 }
  0x62   : > { %11743 = vmatmul.mubr.msk.bf16.gmra.mxu0 %vm638_vm2, %v11892_v23 }
  0x63   : > { %11746 = vmatprep.mubr.msk.bf16.mxu0 %vm638_vm2, %v11893_v24 }
  0x6a   : > { %11747 = vmatmul.mubr.msk.bf16.gmra.mxu0 %vm638_vm2, %v11894_v25 }
  0x6b   : > { %11750 = vmatprep.mubr.msk.bf16.mxu0 %vm638_vm2, %v11895_v26  ;;  %v2881_v26 = vld [vmem:[#allocation2 + $0x28] sm:$0x1] }
  0x72   : > { %11751 = vmatmul.mubr.msk.bf16.gmra.mxu0 %vm638_vm2, %v11896_v27 }
  0x73   : > { %11754 = vmatprep.mubr.msk.bf16.mxu0 %vm638_vm2, %v11897_v28  ;;  %v2882_v28 = vsel %vm12617_vm7, 0, %v2881_v26 }
  0x74   : > { %2883 = vst [vmem:[#allocation2 + $0x28] sm:$0x1] %v2882_v28 }
  0x7a   : > { %11755 = vmatmul.mubr.msk.bf16.gmra.mxu0 %vm638_vm2, %v11898_v29  ;;  %v11915_v29 = vld [vmem:[%s15019_s3 + $0x60] sm:$0xff]  }
  0x7b   : > { %11758 = vmatprep.mubr.msk.bf16.mxu0 %vm638_vm2, %v11899_v30  ;;  %v11916_v30 = vld [vmem:[%s15019_s3 + $0x170] sm:$0xff]   ;;  %11409 = vmatprep.subr.bf16.mxu1 %v11915_v29 }
  0x7c   : > { %11533 = vmatprep.subr.bf16.mxu0 %v11916_v30  ;;  %11410 = vmatpush3.bf16.msra.mxu1 %v11917_v45 }
  0x7d   : > { %11534 = vmatpush3.bf16.msra.mxu0 %v11918_v46 }
  0x82   : > { %11759 = vmatmul.mubr.msk.bf16.gmra.mxu0 %vm638_vm2, %v11900_v31 }
  0x83   : > { %11762 = vmatprep.mubr.msk.bf16.mxu0 %vm638_vm2, %v11901_v32 }
  0x8a   : > { %11763 = vmatmul.mubr.msk.bf16.gmra.mxu0 %vm638_vm2, %v11902_v39 }
  0x8b   : > { %11766 = vmatprep.mubr.msk.bf16.mxu0 %vm638_vm2, %v11903_v40 }
  0x92   : > { %11767 = vmatmul.mubr.msk.bf16.gmra.mxu0 %vm638_vm2, %v11904_v41 }
  0x93   : > { %11770 = vmatprep.mubr.msk.bf16.mxu0 %vm638_vm2, %v11905_v42 }
  0x9a   : > { %11771 = vmatmul.mubr.msk.bf16.gmra.mxu0 %vm638_vm2, %v11906_v43  ;;  %vm3808_vm2 = vsmask.f32 7440 }
  0x9b   : > { %vm13072_vm4 = vmor %vm3807_vm1, %vm3808_vm2 }
  0x9c   : > { %vm13123_vm1 = vmor %vm4130_vm6, %vm4131_vm15  ;;  %vm7554_vm15 = vsmask.f32 7448 }
  0xe2   : > { %v11712_v4 = vpop.f32.mrf.mxu0 }
  0xe3   : > { %v785_v5 = vadd.f32 %v11712_v4, %v12674_v3  ;;  %v11919_v4 = vld [vmem:[%s15019_s3 + $0x58] sm:$0xff]  }
  0xe4   : > { %v776_v8 = vpop.f32.mrf.mxu0  ;;  %11411 = vmatprep.subr.bf16.mxu1 %v11919_v4 }
  0xe5   : > { %v777_v9 = vadd.f32 %v12674_v3, %v776_v8  ;;  %v1033_v11 = vmax.f32 %v785_v5, 0.0  ;;  %v11920_v5 = vld [vmem:[%s15019_s3 + $0x168] sm:$0xff]  }
  0xe6   : > { %v11713_v10 = vpop.f32.mrf.mxu0  ;;  %11535 = vmatprep.subr.bf16.mxu0 %v11920_v5 }
  0xe7   : > { %v1031_v12 = vmax.f32 %v777_v9, 0.0  ;;  %v788_v14 = vadd.f32 %v11713_v10, %v12674_v3 }
  0xe8   : > { %v779_v16 = vpop.f32.mrf.mxu0 }
  0xe9   : > { %v1095_v18 = vmax.f32 %v1031_v12, %v1033_v11  ;;  %v780_v19 = vadd.f32 %v12674_v3, %v779_v16  ;;  %v1034_v20 = vmax.f32 %v788_v14, 0.0  ;;  %v11921_v11 = vld [vmem:[%s15019_s3 + $0x18] sm:$0xff]   ;;  %v11922_v12 = vld [vmem:[%s15019_s3 + $0x128] sm:$0xff]  }
  0xea   : > { %v11716_v21 = vpop.f32.mrf.mxu0  ;;  %11412 = vmatpush3.bf16.msra.mxu1 %v11921_v11  ;;  %11536 = vmatpush3.bf16.msra.mxu0 %v11922_v12 }
  0xeb   : > { %v1159_v22 = vcombine.high %v1095_v18, %v1095_v18  ;;  %v1166_v23 = vrot.slane %v1095_v18, %v12681_v13  ;;  %v1032_v24 = vmax.f32 %v780_v19, 0.0  ;;  %v12689_v25 = vadd.f32 %v11716_v21, %v12674_v3 }
  0xec   : > { %v792_v27 = vpop.f32.mrf.mxu0 }
  0xed   : > { %v1173_v31 = vrot.slane %v1159_v22, %v12681_v13  ;;  %v1174_v32 = vcombine.high %v1166_v23, %v1166_v23  ;;  %v1832_v34 = vsel %vm1831_vm8, %v1166_v23, -inf  ;;  %v1096_v35 = vmax.f32 %v1032_v24, %v1034_v20 }
  0xee   : > { %v1833_v37 = vrot.slane %v1832_v34, 4  ;;  %v1037_v38 = vmax.f32 %v12689_v25, 0.0  ;;  %v12703_v39 = vadd.f32 %v12674_v3, %v792_v27  ;;  %v11717_v40 = vpop.f32.mrf.mxu0 }
  0xef   : > { %v1175_v41 = vcombine.high %v1173_v31, %v1173_v31  ;;  %v1839_v42 = vsel %vm1831_vm8, %v1174_v32, -inf  ;;  %v1846_v43 = vsel %vm1831_vm8, %v1173_v31, -inf  ;;  %v1176_v44 = vcombine.high %v1096_v35, %v1096_v35 }
  0xf0   : > { %v1834_v47 = vmax.f32 %v1832_v34, %v1833_v37  ;;  %v1840_v48 = vrot.slane %v1839_v42, 4  ;;  %v1847_v49 = vrot.slane %v1846_v43, 4  ;;  %v1183_v50 = vrot.slane %v1096_v35, %v12681_v13  ;;  %v12736_v37 = vpop.f32.mrf.mxu0 }
  0xf1   : > { %v1853_v51 = vsel %vm1831_vm8, %v1175_v41, -inf  ;;  %v1190_v52 = vrot.slane %v1176_v44, %v12681_v13  ;;  %v1035_v53 = vmax.f32 %v12703_v39, 0.0  ;;  %v12718_v54 = vadd.f32 %v11717_v40, %v12674_v3 }
  0xf2   : > { %v1835_v55 = vrot.slane %v1834_v47, 2  ;;  %v1841_v56 = vmax.f32 %v1839_v42, %v1840_v48  ;;  %v1848_v57 = vmax.f32 %v1846_v43, %v1847_v49  ;;  %v1854_v58 = vrot.slane %v1853_v51, 4 }
  0xf3   : > { %v1191_v59 = vcombine.high %v1183_v50, %v1183_v50  ;;  %v1192_v60 = vcombine.high %v1190_v52, %v1190_v52  ;;  %v1860_v61 = vsel %vm1831_vm8, %v1183_v50, -inf  ;;  %v1874_v62 = vsel %vm1831_vm8, %v1190_v52, -inf }
  0xf4   : > { %v1836_v63 = vmax.f32 %v1834_v47, %v1835_v55  ;;  %v1842_v0 = vrot.slane %v1841_v56, 2  ;;  %v1849_v1 = vrot.slane %v1848_v57, 2  ;;  %v1855_v2 = vmax.f32 %v1853_v51, %v1854_v58  ;;  %v11720_v58 = vpop.f32.mrf.mxu0 }
  0xf5   : > { %v1861_v6 = vrot.slane %v1860_v61, 4  ;;  %v1867_v8 = vsel %vm1831_vm8, %v1191_v59, -inf  ;;  %v1875_v9 = vrot.slane %v1874_v62, 4  ;;  %v1881_v10 = vsel %vm1831_vm8, %v1192_v60, -inf }
  0xf6   : > { %v1837_v14 = vrot.slane %v1836_v63, 1  ;;  %v1843_v15 = vmax.f32 %v1841_v56, %v1842_v0  ;;  %v1850_v16 = vmax.f32 %v1848_v57, %v1849_v1  ;;  %v1856_v17 = vrot.slane %v1855_v2, 2 }
  0xf7   : > { %v1862_v18 = vmax.f32 %v1860_v61, %v1861_v6  ;;  %v1868_v19 = vrot.slane %v1867_v8, 4  ;;  %v1876_v20 = vmax.f32 %v1874_v62, %v1875_v9  ;;  %v1882_v21 = vrot.slane %v1881_v10, 4 }
  0xf8   : > { %v1838_v22 = vmax.f32 %v1836_v63, %v1837_v14  ;;  %v1844_v23 = vrot.slane %v1843_v15, 1  ;;  %v1851_v24 = vrot.slane %v1850_v16, 1  ;;  %v1857_v26 = vmax.f32 %v1855_v2, %v1856_v17  ;;  %v11924_v17 = vld [vmem:[%s15019_s3 + $0x160] sm:$0xff]  }
  0xf9   : > { %v1863_v27 = vrot.slane %v1862_v18, 2  ;;  %v1869_v28 = vmax.f32 %v1867_v8, %v1868_v19  ;;  %v1877_v29 = vrot.slane %v1876_v20, 2  ;;  %v1883_v30 = vmax.f32 %v1881_v10, %v1882_v21  ;;  %v808_v10 = vpop.f32.mrf.mxu0  ;;  %11537 = vmatprep.subr.bf16.mxu0 %v11924_v17 }
  0xfa   : > { %v1845_v31 = vmax.f32 %v1843_v15, %v1844_v23  ;;  %v1852_v32 = vmax.f32 %v1850_v16, %v1851_v24  ;;  %v1858_v34 = vrot.slane %v1857_v26, 1  ;;  %v11192_v35 = vpack.c.bf16 %v1838_v22, %v1838_v22  ;;  %v11923_v16 = vld [vmem:[%s15019_s3 + $0x50] sm:$0xff]  }
  0xfb   : > { %v1864_v40 = vmax.f32 %v1862_v18, %v1863_v27  ;;  %v1870_v41 = vrot.slane %v1869_v28, 2  ;;  %v1878_v42 = vmax.f32 %v1876_v20, %v1877_v29  ;;  %v1884_v43 = vrot.slane %v1883_v30, 2  ;;  %11413 = vmatprep.subr.bf16.mxu1 %v11923_v16 }
  0xfc   : > { %v1859_v44 = vmax.f32 %v1857_v26, %v1858_v34  ;;  %v11193_v45 = vpack.c.bf16 %v1845_v31, %v1845_v31  ;;  %v11194_v46 = vpack.c.bf16 %v1852_v32, %v1852_v32  ;;  %v3351_v47 = vunpack.c.l.b16 %v11192_v35  ;;  %v11721_v31 = vpop.f32.mrf.mxu0 }
  0xfd   : > { %v1865_v48 = vrot.slane %v1864_v40, 1  ;;  %v1871_v49 = vmax.f32 %v1869_v28, %v1870_v41  ;;  %v1879_v50 = vrot.slane %v1878_v42, 1  ;;  %v1885_v51 = vmax.f32 %v1883_v30, %v1884_v43  ;;  %v3647_v43 = vld [vmem:[#allocation2 + $0x8] sm:$0xf] }
  0xfe   : > { %v11195_v52 = vpack.c.bf16 %v1859_v44, %v1859_v44  ;;  %v3352_v55 = vunpack.c.l.b16 %v11193_v45  ;;  %v3353_v56 = vunpack.c.l.b16 %v11194_v46  ;;  %v1097_v57 = vmax.f32 %v1035_v53, %v1037_v38  ;;  %v3650_v38 = vld [vmem:[#allocation2 + $0xc] sm:$0x1] }
  0xff   : > { %v1866_v59 = vmax.f32 %v1864_v40, %v1865_v48  ;;  %v1872_v60 = vrot.slane %v1871_v49, 1  ;;  %v1880_v61 = vmax.f32 %v1878_v42, %v1879_v50  ;;  %v1886_v62 = vrot.slane %v1885_v51, 1 }
 0x100   : > { %v3354_v63 = vunpack.c.l.b16 %v11195_v52  ;;  %v3480_v0 = vsel %vm3479_vm9, %v3352_v55, %v3351_v47  ;;  %v1193_v1 = vcombine.high %v1097_v57, %v1097_v57  ;;  %v1200_v2 = vrot.slane %v1097_v57, %v12681_v13 }
 0x101   : > { %v3482_v4 = vsel %vm3481_vm10, %v3353_v56, %v3480_v0  ;;  %v1873_v5 = vmax.f32 %v1871_v49, %v1872_v60  ;;  %v1887_v6 = vmax.f32 %v1885_v51, %v1886_v62  ;;  %v11196_v8 = vpack.c.bf16 %v1866_v59, %v1866_v59  ;;  %v811_v56 = vpop.f32.mrf.mxu0  ;;  %v11925_v0 = vld [vmem:[%s15019_s3 + $0x10] sm:$0xff]  }
 0x102   : > { %v11198_v25 = vpack.c.bf16 %v1880_v61, %v1880_v61  ;;  %v3484_v39 = vsel %vm3483_vm11, %v3354_v63, %v3482_v4  ;;  %v1207_v53 = vrot.slane %v1193_v1, %v12681_v13  ;;  %v1208_v9 = vcombine.high %v1200_v2, %v1200_v2  ;;  %v11926_v1 = vld [vmem:[%s15019_s3 + $0x120] sm:$0xff]   ;;  %11414 = vmatpush3.bf16.msra.mxu1 %v11925_v0 }
 0x103   : > { %v11197_v11 = vpack.c.bf16 %v1873_v5, %v1873_v5  ;;  %v3355_v12 = vunpack.c.l.b16 %v11196_v8  ;;  %v11320_v14 = vpack.c.bf16 %v1887_v6, %v1887_v6  ;;  %v1888_v15 = vsel %vm1831_vm8, %v1200_v2, -inf  ;;  %11538 = vmatpush3.bf16.msra.mxu0 %v11926_v1 }
 0x104   : > { %v3357_v18 = vunpack.c.l.b16 %v11198_v25  ;;  %v1209_v19 = vcombine.high %v1207_v53, %v1207_v53  ;;  %v1889_v20 = vrot.slane %v1888_v15, 4  ;;  %v1895_v21 = vsel %vm1831_vm8, %v1208_v9, -inf }
 0x105   : > { %v3356_v22 = vunpack.c.l.b16 %v11197_v11  ;;  %v3486_v23 = vsel %vm3485_vm12, %v3355_v12, %v3484_v39  ;;  %v3651_v24 = vsel %vm12617_vm7, %v11320_v14, %v3650_v38  ;;  %v1896_v26 = vrot.slane %v1895_v21, 4 }
 0x106   : > { %3652 = vst [vmem:[#allocation2 + $0xc] sm:$0x1] %v3651_v24  ;;  %v1890_v27 = vmax.f32 %v1888_v15, %v1889_v20  ;;  %v1902_v28 = vsel %vm1831_vm8, %v1207_v53, -inf  ;;  %v1909_v29 = vsel %vm1831_vm8, %v1209_v19, -inf  ;;  %v1038_v30 = vmax.f32 %v12718_v54, 0.0 }
 0x107   : > { %v3488_v32 = vsel %vm3487_vm13, %v3356_v22, %v3486_v23  ;;  %v1897_v34 = vmax.f32 %v1895_v21, %v1896_v26  ;;  %v1903_v35 = vrot.slane %v1902_v28, 4  ;;  %v1910_v40 = vrot.slane %v1909_v29, 4  ;;  %v11927_v26 = vld [vmem:[%s15019_s3 + $0x48] sm:$0xff]  }
 0x108   : > { %v3490_v41 = vsel %vm3489_vm14, %v3357_v18, %v3488_v32  ;;  %v1891_v44 = vrot.slane %v1890_v27, 2  ;;  %v796_v45 = vadd.f32 %v12674_v3, %v12736_v37  ;;  %v817_v54 = vadd.f32 %v11720_v58, %v12674_v3  ;;  %v11929_v32 = vld [vmem:[%s15019_s3 + $0x8] sm:$0xff]   ;;  %11415 = vmatprep.subr.bf16.mxu1 %v11927_v26 }
 0x109   : > { %v3581_v46 = vpack.c.b16 %v3490_v41, %v3490_v41  ;;  %v1898_v47 = vrot.slane %v1897_v34, 2  ;;  %v1904_v48 = vmax.f32 %v1902_v28, %v1903_v35  ;;  %v1911_v49 = vmax.f32 %v1909_v29, %v1910_v40  ;;  %11416 = vmatpush3.bf16.msra.mxu1 %v11929_v32 }
 0x10a   : > { %v1892_v50 = vmax.f32 %v1890_v27, %v1891_v44  ;;  %v1036_v51 = vmax.f32 %v796_v45, 0.0  ;;  %v1041_v52 = vmax.f32 %v817_v54, 0.0  ;;  %v809_v55 = vadd.f32 %v12674_v3, %v808_v10  ;;  %v11928_v27 = vld [vmem:[%s15019_s3 + $0x158] sm:$0xff]  }
 0x10b   : > { %v3648_v57 = vsel %vm12765_vm0, %v3581_v46, %v3647_v43  ;;  %v1899_v59 = vmax.f32 %v1897_v34, %v1898_v47  ;;  %v1905_v60 = vrot.slane %v1904_v48, 2  ;;  %v1912_v61 = vrot.slane %v1911_v49, 2  ;;  %v11930_v34 = vld [vmem:[%s15019_s3 + $0x118] sm:$0xff]   ;;  %11539 = vmatprep.subr.bf16.mxu0 %v11928_v27 }
 0x10c   : > { %3649 = vst [vmem:[#allocation2 + $0x8] sm:$0xf] %v3648_v57  ;;  %v1893_v37 = vrot.slane %v1892_v50, 1  ;;  %v1098_v62 = vmax.f32 %v1036_v51, %v1038_v30  ;;  %v1039_v58 = vmax.f32 %v809_v55, 0.0  ;;  %v12776_v63 = vadd.f32 %v11721_v31, %v12674_v3  ;;  %11540 = vmatpush3.bf16.msra.mxu0 %v11930_v34 }
 0x10d   : > { %v1900_v2 = vrot.slane %v1899_v59, 1  ;;  %v1906_v4 = vmax.f32 %v1904_v48, %v1905_v60  ;;  %v1913_v5 = vmax.f32 %v1911_v49, %v1912_v61  ;;  %v12785_v6 = vadd.f32 %v12674_v3, %v811_v56 }
 0x10e   : > { %v1894_v8 = vmax.f32 %v1892_v50, %v1893_v37  ;;  %v1210_v25 = vcombine.high %v1098_v62, %v1098_v62  ;;  %v1217_v39 = vrot.slane %v1098_v62, %v12681_v13  ;;  %v1099_v38 = vmax.f32 %v1039_v58, %v1041_v52  ;;  %v11931_v37 = vld [vmem:[%s15019_s3 + $0x40] sm:$0xff]   ;;  %v11932_v62 = vld [vmem:[%s15019_s3 + $0x150] sm:$0xff]  }
 0x10f   : > { %v1901_v53 = vmax.f32 %v1899_v59, %v1900_v2  ;;  %v1907_v9 = vrot.slane %v1906_v4, 1  ;;  %v1914_v10 = vrot.slane %v1913_v5, 1  ;;  %v1042_v11 = vmax.f32 %v12776_v63, 0.0  ;;  %11417 = vmatprep.subr.bf16.mxu1 %v11931_v37  ;;  %11541 = vmatprep.subr.bf16.mxu0 %v11932_v62  ;;  %v3653_v37 = vld [vmem:[#allocation2 + $0x10] sm:$0xf] }
 0x110   : > { %v11200_v12 = vpack.c.bf16 %v1894_v8, %v1894_v8  ;;  %v1224_v14 = vrot.slane %v1210_v25, %v12681_v13  ;;  %v1225_v15 = vcombine.high %v1217_v39, %v1217_v39  ;;  %v1916_v16 = vsel %vm1831_vm8, %v1217_v39, -inf  ;;  %v11724_v25 = vpop.f32.mrf.mxu0 }
 0x111   : > { %v1908_v17 = vmax.f32 %v1906_v4, %v1907_v9  ;;  %v1915_v18 = vmax.f32 %v1913_v5, %v1914_v10  ;;  %v11201_v19 = vpack.c.bf16 %v1901_v53, %v1901_v53  ;;  %v1917_v20 = vrot.slane %v1916_v16, 4 }
 0x112   : > { %v3359_v21 = vunpack.c.l.b16 %v11200_v12  ;;  %v1226_v22 = vcombine.high %v1224_v14, %v1224_v14  ;;  %v1923_v23 = vsel %vm1831_vm8, %v1225_v15, -inf  ;;  %v1930_v24 = vsel %vm1831_vm8, %v1224_v14, -inf }
 0x113   : > { %v11202_v28 = vpack.c.bf16 %v1908_v17, %v1908_v17  ;;  %v11203_v29 = vpack.c.bf16 %v1915_v18, %v1915_v18  ;;  %v3360_v30 = vunpack.c.l.b16 %v11201_v19  ;;  %v1918_v31 = vmax.f32 %v1916_v16, %v1917_v20 }
 0x114   : > { %v1924_v35 = vrot.slane %v1923_v23, 4  ;;  %v1931_v40 = vrot.slane %v1930_v24, 4  ;;  %v1937_v41 = vsel %vm1831_vm8, %v1226_v22, -inf  ;;  %v1227_v43 = vcombine.high %v1099_v38, %v1099_v38 }
 0x115   : > { %v3361_v44 = vunpack.c.l.b16 %v11202_v28  ;;  %v3362_v45 = vunpack.c.l.b16 %v11203_v29  ;;  %v3491_v54 = vsel %vm3479_vm9, %v3360_v30, %v3359_v21  ;;  %v1919_v46 = vrot.slane %v1918_v31, 2 }
 0x116   : > { %v1925_v47 = vmax.f32 %v1923_v23, %v1924_v35  ;;  %v1932_v48 = vmax.f32 %v1930_v24, %v1931_v40  ;;  %v1938_v49 = vrot.slane %v1937_v41, 4  ;;  %v1234_v50 = vrot.slane %v1099_v38, %v12681_v13  ;;  %v12822_v24 = vpop.f32.mrf.mxu0  ;;  %v3656_v40 = vld [vmem:[#allocation2 + $0x14] sm:$0x1] }
 0x117   : > { %v3492_v51 = vsel %vm3481_vm10, %v3361_v44, %v3491_v54  ;;  %v1920_v52 = vmax.f32 %v1918_v31, %v1919_v46  ;;  %v1241_v55 = vrot.slane %v1227_v43, %v12681_v13  ;;  %v1040_v56 = vmax.f32 %v12785_v6, 0.0 }
 0x118   : > { %v1926_v57 = vrot.slane %v1925_v47, 2  ;;  %v1933_v59 = vrot.slane %v1932_v48, 2  ;;  %v1939_v60 = vmax.f32 %v1937_v41, %v1938_v49  ;;  %v3493_v61 = vsel %vm3483_vm11, %v3362_v45, %v3492_v51 }
 0x119   : > { %v1921_v58 = vrot.slane %v1920_v52, 1  ;;  %v1242_v0 = vcombine.high %v1234_v50, %v1234_v50  ;;  %v1243_v1 = vcombine.high %v1241_v55, %v1241_v55  ;;  %v1944_v2 = vsel %vm1831_vm8, %v1234_v50, -inf }
 0x11a   : > { %v1927_v4 = vmax.f32 %v1925_v47, %v1926_v57  ;;  %v1934_v5 = vmax.f32 %v1932_v48, %v1933_v59  ;;  %v1940_v6 = vrot.slane %v1939_v60, 2  ;;  %v1945_v8 = vrot.slane %v1944_v2, 4  ;;  %v11725_v48 = vpop.f32.mrf.mxu0 }
 0x11b   : > { %v1922_v39 = vmax.f32 %v1920_v52, %v1921_v58  ;;  %v1951_v38 = vsel %vm1831_vm8, %v1242_v0, -inf  ;;  %v1958_v53 = vsel %vm1831_vm8, %v1241_v55, -inf  ;;  %v1965_v9 = vsel %vm1831_vm8, %v1243_v1, -inf }
 0x11c   : > { %v1928_v10 = vrot.slane %v1927_v4, 1  ;;  %v1935_v12 = vrot.slane %v1934_v5, 1  ;;  %v1941_v14 = vmax.f32 %v1939_v60, %v1940_v6  ;;  %v1946_v15 = vmax.f32 %v1944_v2, %v1945_v8 }
 0x11d   : > { %v11204_v16 = vpack.c.bf16 %v1922_v39, %v1922_v39  ;;  %v1952_v17 = vrot.slane %v1951_v38, 4  ;;  %v1959_v18 = vrot.slane %v1958_v53, 4  ;;  %v1966_v19 = vrot.slane %v1965_v9, 4  ;;  %v11934_v39 = vld [vmem:[%s15019_s3 + $0x110] sm:$0xff]  }
 0x11e   : > { %v1929_v20 = vmax.f32 %v1927_v4, %v1928_v10  ;;  %v1936_v21 = vmax.f32 %v1934_v5, %v1935_v12  ;;  %v1942_v22 = vrot.slane %v1941_v14, 1  ;;  %v1947_v23 = vrot.slane %v1946_v15, 2  ;;  %11542 = vmatpush3.bf16.msra.mxu0 %v11934_v39 }
 0x11f   : > { %v3363_v26 = vunpack.c.l.b16 %v11204_v16  ;;  %v1953_v27 = vmax.f32 %v1951_v38, %v1952_v17  ;;  %v1960_v28 = vmax.f32 %v1958_v53, %v1959_v18  ;;  %v1967_v29 = vmax.f32 %v1965_v9, %v1966_v19 }
 0x120   : > { %v1943_v30 = vmax.f32 %v1941_v14, %v1942_v22  ;;  %v11205_v31 = vpack.c.bf16 %v1929_v20, %v1929_v20  ;;  %v11206_v32 = vpack.c.bf16 %v1936_v21, %v1936_v21  ;;  %v1948_v34 = vmax.f32 %v1946_v15, %v1947_v23 }
 0x121   : > { %v3494_v35 = vsel %vm3485_vm12, %v3363_v26, %v3493_v61  ;;  %v1954_v41 = vrot.slane %v1953_v27, 2  ;;  %v1961_v43 = vrot.slane %v1960_v28, 2  ;;  %v1968_v44 = vrot.slane %v1967_v29, 2 }
 0x122   : > { %v3364_v45 = vunpack.c.l.b16 %v11205_v31  ;;  %v3365_v54 = vunpack.c.l.b16 %v11206_v32  ;;  %v11321_v46 = vpack.c.bf16 %v1943_v30, %v1943_v30  ;;  %v1949_v47 = vrot.slane %v1948_v34, 1 }
 0x123   : > { %v1955_v49 = vmax.f32 %v1953_v27, %v1954_v41  ;;  %v1962_v50 = vmax.f32 %v1960_v28, %v1961_v43  ;;  %v1969_v51 = vmax.f32 %v1967_v29, %v1968_v44  ;;  %v1100_v52 = vmax.f32 %v1040_v56, %v1042_v11  ;;  %v827_v11 = vpop.f32.mrf.mxu0 }
 0x124   : > { %v3495_v55 = vsel %vm3487_vm13, %v3364_v45, %v3494_v35  ;;  %v3657_v57 = vsel %vm12617_vm7, %v11321_v46, %v3656_v40  ;;  %v1950_v59 = vmax.f32 %v1948_v34, %v1949_v47  ;;  %v833_v60 = vadd.f32 %v11724_v25, %v12674_v3  ;;  %v11933_v25 = vld [vmem:[%s15019_s3] sm:$0xff]  }
 0x125   : > { %v3496_v61 = vsel %vm3489_vm14, %v3365_v54, %v3495_v55  ;;  %3658 = vst [vmem:[#allocation2 + $0x14] sm:$0x1] %v3657_v57  ;;  %v1956_v62 = vrot.slane %v1955_v49, 1  ;;  %v1963_v58 = vrot.slane %v1962_v50, 1  ;;  %v1970_v0 = vrot.slane %v1969_v51, 1  ;;  %11418 = vmatpush3.bf16.msra.mxu1 %v11933_v25  ;;  %v11728_v21 = vpop.f32.mrf.mxu0 }
 0x126   : > { %v3583_v1 = vpack.c.b16 %v3496_v61, %v3496_v61  ;;  %v11208_v2 = vpack.c.bf16 %v1950_v59, %v1950_v59  ;;  %v1244_v4 = vcombine.high %v1100_v52, %v1100_v52  ;;  %v1251_v63 = vrot.slane %v1100_v52, %v12681_v13 }
 0x127   : > { %v1957_v56 = vmax.f32 %v1955_v49, %v1956_v62  ;;  %v1964_v5 = vmax.f32 %v1962_v50, %v1963_v58  ;;  %v1971_v6 = vmax.f32 %v1969_v51, %v1970_v0  ;;  %v1045_v8 = vmax.f32 %v833_v60, 0.0  ;;  %v840_v54 = vpop.f32.mrf.mxu0 }
 0x128   : > { %v3654_v38 = vsel %vm12765_vm0, %v3583_v1, %v3653_v37  ;;  %v3367_v53 = vunpack.c.l.b16 %v11208_v2  ;;  %v1258_v9 = vrot.slane %v1244_v4, %v12681_v13  ;;  %v1259_v10 = vcombine.high %v1251_v63, %v1251_v63 }
 0x129   : > { %3655 = vst [vmem:[#allocation2 + $0x10] sm:$0xf] %v3654_v38  ;;  %v11209_v12 = vpack.c.bf16 %v1957_v56, %v1957_v56  ;;  %v11210_v14 = vpack.c.bf16 %v1964_v5, %v1964_v5  ;;  %v11211_v15 = vpack.c.bf16 %v1971_v6, %v1971_v6  ;;  %v1972_v16 = vsel %vm1831_vm8, %v1251_v63, -inf }
 0x12a   : > { %v1260_v17 = vcombine.high %v1258_v9, %v1258_v9  ;;  %v1973_v18 = vrot.slane %v1972_v16, 4  ;;  %v1979_v19 = vsel %vm1831_vm8, %v1259_v10, -inf  ;;  %v1986_v20 = vsel %vm1831_vm8, %v1258_v9, -inf }
 0x12b   : > { %v3368_v22 = vunpack.c.l.b16 %v11209_v12  ;;  %v3369_v23 = vunpack.c.l.b16 %v11210_v14  ;;  %v3370_v26 = vunpack.c.l.b16 %v11211_v15  ;;  %v1980_v27 = vrot.slane %v1979_v19, 4 }
 0x12c   : > { %v1974_v28 = vmax.f32 %v1972_v16, %v1973_v18  ;;  %v1987_v29 = vrot.slane %v1986_v20, 4  ;;  %v1993_v30 = vsel %vm1831_vm8, %v1260_v17, -inf  ;;  %v825_v31 = vadd.f32 %v12674_v3, %v12822_v24 }
 0x12d   : > { %v3497_v32 = vsel %vm3479_vm9, %v3368_v22, %v3367_v53  ;;  %v1981_v34 = vmax.f32 %v1979_v19, %v1980_v27  ;;  %v1994_v35 = vrot.slane %v1993_v30, 4  ;;  %v836_v40 = vadd.f32 %v11725_v48, %v12674_v3  ;;  %v3662_v19 = vld [vmem:[#allocation2 + $0x1c] sm:$0x1] }
 0x12e   : > { %v3498_v41 = vsel %vm3481_vm10, %v3369_v23, %v3497_v32  ;;  %v1975_v43 = vrot.slane %v1974_v28, 2  ;;  %v1988_v44 = vmax.f32 %v1986_v20, %v1987_v29  ;;  %v1043_v45 = vmax.f32 %v825_v31, 0.0 }
 0x12f   : > { %v1982_v46 = vrot.slane %v1981_v34, 2  ;;  %v1995_v47 = vmax.f32 %v1993_v30, %v1994_v35  ;;  %v3499_v49 = vsel %vm3483_vm11, %v3370_v26, %v3498_v41  ;;  %v1046_v50 = vmax.f32 %v836_v40, 0.0 }
 0x130   : > { %v1976_v51 = vmax.f32 %v1974_v28, %v1975_v43  ;;  %v1989_v52 = vrot.slane %v1988_v44, 2  ;;  %v1101_v24 = vmax.f32 %v1043_v45, %v1045_v8  ;;  %v828_v55 = vadd.f32 %v12674_v3, %v827_v11  ;;  %v3659_v43 = vld [vmem:[#allocation2 + $0x18] sm:$0xf] }
 0x131   : > { %v1983_v57 = vmax.f32 %v1981_v34, %v1982_v46  ;;  %v1996_v59 = vrot.slane %v1995_v47, 2  ;;  %v12854_v48 = vadd.f32 %v11728_v21, %v12674_v3  ;;  %v12857_v60 = vadd.f32 %v12674_v3, %v840_v54  ;;  %v3744_v46 = vld [vmem:[#allocation2 + $0x8] sm:$0xf] }
 0x132   : > { %v1977_v61 = vrot.slane %v1976_v51, 1  ;;  %v1990_v37 = vmax.f32 %v1988_v44, %v1989_v52  ;;  %v1261_v62 = vcombine.high %v1101_v24, %v1101_v24  ;;  %v1268_v58 = vrot.slane %v1101_v24, %v12681_v13  ;;  %3760 = vst [vmem:[#allocation3 + $0x24] sm:$0xf] %v3744_v46 }
 0x133   : > { %v1984_v0 = vrot.slane %v1983_v57, 1  ;;  %v1997_v1 = vmax.f32 %v1995_v47, %v1996_v59  ;;  %v1044_v2 = vmax.f32 %v828_v55, 0.0  ;;  %v1049_v4 = vmax.f32 %v12854_v48, 0.0 }
 0x134   : > { %v1978_v63 = vmax.f32 %v1976_v51, %v1977_v61  ;;  %v1991_v11 = vrot.slane %v1990_v37, 1  ;;  %v1275_v56 = vrot.slane %v1261_v62, %v12681_v13  ;;  %v1276_v5 = vcombine.high %v1268_v58, %v1268_v58 }
 0x135   : > { %v1985_v6 = vmax.f32 %v1983_v57, %v1984_v0  ;;  %v1998_v8 = vrot.slane %v1997_v1, 1  ;;  %v2000_v25 = vsel %vm1831_vm8, %v1268_v58, -inf  ;;  %v1102_v39 = vmax.f32 %v1044_v2, %v1046_v50 }
 0x136   : > { %v1992_v38 = vmax.f32 %v1990_v37, %v1991_v11  ;;  %v11212_v53 = vpack.c.bf16 %v1978_v63, %v1978_v63  ;;  %v1277_v9 = vcombine.high %v1275_v56, %v1275_v56  ;;  %v2001_v10 = vrot.slane %v2000_v25, 4 }
 0x137   : > { %v1999_v12 = vmax.f32 %v1997_v1, %v1998_v8  ;;  %v11213_v14 = vpack.c.bf16 %v1985_v6, %v1985_v6  ;;  %v2007_v15 = vsel %vm1831_vm8, %v1276_v5, -inf  ;;  %v2014_v16 = vsel %vm1831_vm8, %v1275_v56, -inf }
 0x138   : > { %v11214_v17 = vpack.c.bf16 %v1992_v38, %v1992_v38  ;;  %v3371_v18 = vunpack.c.l.b16 %v11212_v53  ;;  %v2002_v20 = vmax.f32 %v2000_v25, %v2001_v10  ;;  %v2008_v21 = vrot.slane %v2007_v15, 4 }
 0x139   : > { %v3372_v22 = vunpack.c.l.b16 %v11213_v14  ;;  %v11322_v23 = vpack.c.bf16 %v1999_v12, %v1999_v12  ;;  %v2015_v26 = vrot.slane %v2014_v16, 4  ;;  %v2021_v27 = vsel %vm1831_vm8, %v1277_v9, -inf }
 0x13a   : > { %v3373_v28 = vunpack.c.l.b16 %v11214_v17  ;;  %v3500_v29 = vsel %vm3485_vm12, %v3371_v18, %v3499_v49  ;;  %v2003_v30 = vrot.slane %v2002_v20, 2  ;;  %v2009_v31 = vmax.f32 %v2007_v15, %v2008_v21 }
 0x13b   : > { %v3501_v32 = vsel %vm3487_vm13, %v3372_v22, %v3500_v29  ;;  %v3663_v34 = vsel %vm12617_vm7, %v11322_v23, %v3662_v19  ;;  %v2016_v35 = vmax.f32 %v2014_v16, %v2015_v26  ;;  %v2022_v40 = vrot.slane %v2021_v27, 4 }
 0x13c   : > { %v3502_v41 = vsel %vm3489_vm14, %v3373_v28, %v3501_v32  ;;  %3664 = vst [vmem:[#allocation2 + $0x1c] sm:$0x1] %v3663_v34  ;;  %v2004_v44 = vmax.f32 %v2002_v20, %v2003_v30  ;;  %v2010_v45 = vrot.slane %v2009_v31, 2  ;;  %v1278_v54 = vcombine.high %v1102_v39, %v1102_v39 }
 0x13d   : > { %v3585_v47 = vpack.c.b16 %v3502_v41, %v3502_v41  ;;  %v2017_v50 = vrot.slane %v2016_v35, 2  ;;  %v2023_v49 = vmax.f32 %v2021_v27, %v2022_v40  ;;  %v1285_v51 = vrot.slane %v1102_v39, %v12681_v13  ;;  %v11729_v39 = vpop.f32.mrf.mxu0 }
 0x13e   : > { %v2005_v52 = vrot.slane %v2004_v44, 1  ;;  %v2011_v24 = vmax.f32 %v2009_v31, %v2010_v45  ;;  %v1292_v55 = vrot.slane %v1278_v54, %v12681_v13  ;;  %v1047_v57 = vmax.f32 %v12857_v60, 0.0 }
 0x13f   : > { %v3660_v59 = vsel %vm12765_vm0, %v3585_v47, %v3659_v43  ;;  %v2018_v61 = vmax.f32 %v2016_v35, %v2017_v50  ;;  %v2024_v37 = vrot.slane %v2023_v49, 2  ;;  %v1293_v62 = vcombine.high %v1285_v51, %v1285_v51  ;;  %v12882_v27 = vpop.f32.mrf.mxu0 }
 0x140   : > { %3661 = vst [vmem:[#allocation2 + $0x18] sm:$0xf] %v3660_v59  ;;  %v2006_v58 = vmax.f32 %v2004_v44, %v2005_v52  ;;  %v2012_v0 = vrot.slane %v2011_v24, 1  ;;  %v1294_v1 = vcombine.high %v1292_v55, %v1292_v55  ;;  %v2028_v2 = vsel %vm1831_vm8, %v1285_v51, -inf }
 0x141   : > { %v2019_v63 = vrot.slane %v2018_v61, 1  ;;  %v2025_v11 = vmax.f32 %v2023_v49, %v2024_v37  ;;  %v2029_v56 = vrot.slane %v2028_v2, 4  ;;  %v2035_v5 = vsel %vm1831_vm8, %v1293_v62, -inf  ;;  %v11732_v47 = vpop.f32.mrf.mxu0 }
 0x142   : > { %v2013_v6 = vmax.f32 %v2011_v24, %v2012_v0  ;;  %v11216_v8 = vpack.c.bf16 %v2006_v58, %v2006_v58  ;;  %v2036_v60 = vrot.slane %v2035_v5, 4  ;;  %v2042_v25 = vsel %vm1831_vm8, %v1292_v55, -inf }
 0x143   : > { %v2020_v38 = vmax.f32 %v2018_v61, %v2019_v63  ;;  %v2026_v53 = vrot.slane %v2025_v11, 1  ;;  %v2030_v9 = vmax.f32 %v2028_v2, %v2029_v56  ;;  %v2043_v10 = vrot.slane %v2042_v25, 4  ;;  %v11939_v56 = vld [vmem:[%s15019_s3 + $0x108] sm:$0xff]  }
 0x144   : > { %v11217_v12 = vpack.c.bf16 %v2013_v6, %v2013_v6  ;;  %v3375_v14 = vunpack.c.l.b16 %v11216_v8  ;;  %v2037_v15 = vmax.f32 %v2035_v5, %v2036_v60  ;;  %v2049_v16 = vsel %vm1831_vm8, %v1294_v1, -inf }
 0x145   : > { %v2027_v17 = vmax.f32 %v2025_v11, %v2026_v53  ;;  %v11218_v18 = vpack.c.bf16 %v2020_v38, %v2020_v38  ;;  %v2031_v19 = vrot.slane %v2030_v9, 2  ;;  %v2044_v20 = vmax.f32 %v2042_v25, %v2043_v10  ;;  %v856_v11 = vpop.f32.mrf.mxu0 }
 0x146   : > { %v3376_v21 = vunpack.c.l.b16 %v11217_v12  ;;  %v2038_v22 = vrot.slane %v2037_v15, 2  ;;  %v2050_v23 = vrot.slane %v2049_v16, 4  ;;  %v1103_v26 = vmax.f32 %v1047_v57, %v1049_v4  ;;  %v3668_v12 = vld [vmem:[#allocation2 + $0x24] sm:$0x1] }
 0x147   : > { %v11219_v28 = vpack.c.bf16 %v2027_v17, %v2027_v17  ;;  %v3377_v29 = vunpack.c.l.b16 %v11218_v18  ;;  %v2032_v30 = vmax.f32 %v2030_v9, %v2031_v19  ;;  %v2045_v31 = vrot.slane %v2044_v20, 2 }
 0x148   : > { %v3503_v32 = vsel %vm3479_vm9, %v3376_v21, %v3375_v14  ;;  %v2039_v34 = vmax.f32 %v2037_v15, %v2038_v22  ;;  %v2051_v35 = vmax.f32 %v2049_v16, %v2050_v23  ;;  %v1295_v40 = vcombine.high %v1103_v26, %v1103_v26  ;;  %v11940_v21 = vld [vmem:[%s15019_s3 + $0x140] sm:$0xff]  }
 0x149   : > { %v3378_v41 = vunpack.c.l.b16 %v11219_v28  ;;  %v3504_v43 = vsel %vm3481_vm10, %v3377_v29, %v3503_v32  ;;  %v2033_v44 = vrot.slane %v2032_v30, 1  ;;  %v2046_v45 = vmax.f32 %v2044_v20, %v2045_v31  ;;  %v11733_v20 = vpop.f32.mrf.mxu0  ;;  %v3665_v23 = vld [vmem:[#allocation2 + $0x20] sm:$0xf] }
 0x14a   : > { %v2040_v54 = vrot.slane %v2039_v34, 1  ;;  %v2052_v46 = vrot.slane %v2051_v35, 2  ;;  %v1302_v48 = vrot.slane %v1103_v26, %v12681_v13  ;;  %v1309_v4 = vrot.slane %v1295_v40, %v12681_v13 }
 0x14b   : > { %v2034_v50 = vmax.f32 %v2032_v30, %v2033_v44  ;;  %v2047_v49 = vrot.slane %v2046_v45, 1  ;;  %v3505_v51 = vsel %vm3483_vm11, %v3378_v41, %v3504_v43  ;;  %v12890_v52 = vadd.f32 %v11729_v39, %v12674_v3  ;;  %v11938_v3 = vld [vmem:[%s15019_s3 + $0x148] sm:$0xff]   ;;  %v11941_v30 = vld [vmem:[%s15019_s3 + $0x100] sm:$0xff]  }
 0x14c   : > { %v2041_v24 = vmax.f32 %v2039_v34, %v2040_v54  ;;  %v2053_v55 = vmax.f32 %v2051_v35, %v2052_v46  ;;  %v1310_v57 = vcombine.high %v1302_v48, %v1302_v48  ;;  %v1311_v59 = vcombine.high %v1309_v4, %v1309_v4  ;;  %11543 = vmatprep.subr.bf16.mxu0 %v11938_v3  ;;  %v12917_v43 = vld [vmem:[%s15018_s2] ss:$0 sm:$0xff] }
 0x14d   : > { %v2048_v61 = vmax.f32 %v2046_v45, %v2047_v49  ;;  %v11220_v37 = vpack.c.bf16 %v2034_v50, %v2034_v50  ;;  %v2056_v62 = vsel %vm1831_vm8, %v1302_v48, -inf  ;;  %v2070_v58 = vsel %vm1831_vm8, %v1309_v4, -inf  ;;  %11544 = vmatpush3.bf16.msra.mxu0 %v11939_v56  ;;  %v859_v50 = vpop.f32.mrf.mxu0 }
 0x14e   : > { %v2054_v0 = vrot.slane %v2053_v55, 1  ;;  %v11221_v1 = vpack.c.bf16 %v2041_v24, %v2041_v24  ;;  %v2057_v2 = vrot.slane %v2056_v62, 4  ;;  %v2063_v63 = vsel %vm1831_vm8, %v1310_v57, -inf  ;;  %11545 = vmatprep.subr.bf16.mxu0 %v11940_v21 }
 0x14f   : > { %v11222_v5 = vpack.c.bf16 %v2048_v61, %v2048_v61  ;;  %v3379_v6 = vunpack.c.l.b16 %v11220_v37  ;;  %v2064_v8 = vrot.slane %v2063_v63, 4  ;;  %v2071_v60 = vrot.slane %v2070_v58, 4 }
 0x150   : > { %v2055_v25 = vmax.f32 %v2053_v55, %v2054_v0  ;;  %v3380_v39 = vunpack.c.l.b16 %v11221_v1  ;;  %v2058_v38 = vmax.f32 %v2056_v62, %v2057_v2  ;;  %v2077_v53 = vsel %vm1831_vm8, %v1311_v59, -inf }
 0x151   : > { %v3381_v9 = vunpack.c.l.b16 %v11222_v5  ;;  %v3506_v10 = vsel %vm3485_vm12, %v3379_v6, %v3505_v51  ;;  %v2065_v14 = vmax.f32 %v2063_v63, %v2064_v8  ;;  %v2072_v15 = vmax.f32 %v2070_v58, %v2071_v60  ;;  %11546 = vmatpush3.bf16.msra.mxu0 %v11941_v30 }
 0x152   : > { %v3507_v16 = vsel %vm3487_vm13, %v3380_v39, %v3506_v10  ;;  %v11323_v17 = vpack.c.bf16 %v2055_v25, %v2055_v25  ;;  %v2059_v18 = vrot.slane %v2058_v38, 2  ;;  %v2078_v19 = vrot.slane %v2077_v53, 4 }
 0x153   : > { %v3508_v22 = vsel %vm3489_vm14, %v3381_v9, %v3507_v16  ;;  %v2066_v26 = vrot.slane %v2065_v14, 2  ;;  %v2073_v28 = vrot.slane %v2072_v15, 2  ;;  %v1050_v29 = vmax.f32 %v12890_v52, 0.0 }
 0x154   : > { %v3587_v31 = vpack.c.b16 %v3508_v22, %v3508_v22  ;;  %v3669_v32 = vsel %vm12617_vm7, %v11323_v17, %v3668_v12  ;;  %v2060_v34 = vmax.f32 %v2058_v38, %v2059_v18  ;;  %v2079_v35 = vmax.f32 %v2077_v53, %v2078_v19 }
 0x155   : > { %3670 = vst [vmem:[#allocation2 + $0x24] sm:$0x1] %v3669_v32  ;;  %v2067_v40 = vmax.f32 %v2065_v14, %v2066_v26  ;;  %v2074_v41 = vmax.f32 %v2072_v15, %v2073_v28  ;;  %v844_v44 = vadd.f32 %v12917_v43, %v12882_v27  ;;  %v865_v45 = vadd.f32 %v12917_v43, %v11732_v47 }
 0x156   : > { %v3666_v54 = vsel %vm12765_vm0, %v3587_v31, %v3665_v23  ;;  %v2061_v46 = vrot.slane %v2060_v34, 1  ;;  %v2080_v48 = vrot.slane %v2079_v35, 2  ;;  %v857_v4 = vadd.f32 %v12917_v43, %v856_v11 }
 0x157   : > { %3667 = vst [vmem:[#allocation2 + $0x20] sm:$0xf] %v3666_v54  ;;  %v2068_v49 = vrot.slane %v2067_v40, 1  ;;  %v2075_v51 = vrot.slane %v2074_v41, 1  ;;  %v1048_v52 = vmax.f32 %v844_v44, 0.0  ;;  %v1053_v24 = vmax.f32 %v865_v45, 0.0 }
 0x158   : > { %v2062_v55 = vmax.f32 %v2060_v34, %v2061_v46  ;;  %v2081_v57 = vmax.f32 %v2079_v35, %v2080_v48  ;;  %v1051_v59 = vmax.f32 %v857_v4, 0.0  ;;  %v12926_v27 = vadd.f32 %v12917_v43, %v11733_v20 }
 0x159   : > { %v2069_v47 = vmax.f32 %v2067_v40, %v2068_v49  ;;  %v2076_v61 = vmax.f32 %v2074_v41, %v2075_v51  ;;  %v1104_v37 = vmax.f32 %v1048_v52, %v1050_v29  ;;  %v12929_v62 = vadd.f32 %v12917_v43, %v859_v50 }
 0x15a   : > { %v2082_v58 = vrot.slane %v2081_v57, 1  ;;  %v11224_v0 = vpack.c.bf16 %v2062_v55, %v2062_v55  ;;  %v1105_v1 = vmax.f32 %v1051_v59, %v1053_v24  ;;  %v1054_v2 = vmax.f32 %v12926_v27, 0.0 }
 0x15b   : > { %v11225_v63 = vpack.c.bf16 %v2069_v47, %v2069_v47  ;;  %v11226_v11 = vpack.c.bf16 %v2076_v61, %v2076_v61  ;;  %v1312_v3 = vcombine.high %v1104_v37, %v1104_v37  ;;  %v1319_v56 = vrot.slane %v1104_v37, %v12681_v13 }
 0x15c   : > { %v2083_v5 = vmax.f32 %v2081_v57, %v2082_v58  ;;  %v3383_v6 = vunpack.c.l.b16 %v11224_v0  ;;  %v1329_v8 = vcombine.high %v1105_v1, %v1105_v1  ;;  %v1336_v60 = vrot.slane %v1105_v1, %v12681_v13  ;;  %v11736_v58 = vpop.f32.mrf.mxu0 }
 0x15d   : > { %v3384_v25 = vunpack.c.l.b16 %v11225_v63  ;;  %v3385_v39 = vunpack.c.l.b16 %v11226_v11  ;;  %v1326_v38 = vrot.slane %v1312_v3, %v12681_v13  ;;  %v1327_v53 = vcombine.high %v1319_v56, %v1319_v56 }
 0x15e   : > { %v11227_v9 = vpack.c.bf16 %v2083_v5, %v2083_v5  ;;  %v2084_v10 = vsel %vm1831_vm8, %v1319_v56, -inf  ;;  %v1343_v12 = vrot.slane %v1329_v8, %v12681_v13  ;;  %v1344_v14 = vcombine.high %v1336_v60, %v1336_v60 }
 0x15f   : > { %v3509_v15 = vsel %vm3479_vm9, %v3384_v25, %v3383_v6  ;;  %v1328_v16 = vcombine.high %v1326_v38, %v1326_v38  ;;  %v2085_v17 = vrot.slane %v2084_v10, 4  ;;  %v2091_v18 = vsel %vm1831_vm8, %v1327_v53, -inf }
 0x160   : > { %v3386_v19 = vunpack.c.l.b16 %v11227_v9  ;;  %v3510_v20 = vsel %vm3481_vm10, %v3385_v39, %v3509_v15  ;;  %v2092_v21 = vrot.slane %v2091_v18, 4  ;;  %v2098_v22 = vsel %vm1831_vm8, %v1326_v38, -inf  ;;  %v3745_v38 = vld [vmem:[#allocation2 + $0x10] sm:$0xf] }
 0x161   : > { %v2086_v23 = vmax.f32 %v2084_v10, %v2085_v17  ;;  %v2099_v26 = vrot.slane %v2098_v22, 4  ;;  %v2105_v28 = vsel %vm1831_vm8, %v1328_v16, -inf  ;;  %v1345_v29 = vcombine.high %v1343_v12, %v1343_v12  ;;  %3761 = vst [vmem:[#allocation3 + $0x48] sm:$0xf] %v3745_v38 }
 0x162   : > { %v2093_v30 = vmax.f32 %v2091_v18, %v2092_v21  ;;  %v2106_v31 = vrot.slane %v2105_v28, 4  ;;  %v3511_v32 = vsel %vm3483_vm11, %v3386_v19, %v3510_v20  ;;  %v2112_v34 = vsel %vm1831_vm8, %v1336_v60, -inf  ;;  %v3674_v21 = vld [vmem:[#allocation2 + $0x2c] sm:$0x1] }
 0x163   : > { %v2087_v35 = vrot.slane %v2086_v23, 2  ;;  %v2100_v40 = vmax.f32 %v2098_v22, %v2099_v26  ;;  %v2113_v41 = vrot.slane %v2112_v34, 4  ;;  %v2119_v44 = vsel %vm1831_vm8, %v1344_v14, -inf  ;;  %v872_v14 = vpop.f32.mrf.mxu0 }
 0x164   : > { %v2094_v45 = vrot.slane %v2093_v30, 2  ;;  %v2107_v54 = vmax.f32 %v2105_v28, %v2106_v31  ;;  %v2120_v46 = vrot.slane %v2119_v44, 4  ;;  %v2126_v48 = vsel %vm1831_vm8, %v1343_v12, -inf }
 0x165   : > { %v2088_v4 = vmax.f32 %v2086_v23, %v2087_v35  ;;  %v2101_v50 = vrot.slane %v2100_v40, 2  ;;  %v2114_v49 = vmax.f32 %v2112_v34, %v2113_v41  ;;  %v2127_v51 = vrot.slane %v2126_v48, 4  ;;  %v2884_v41 = vld [vmem:[#allocation2 + $0x30] sm:$0x1] }
 0x166   : > { %v2095_v52 = vmax.f32 %v2093_v30, %v2094_v45  ;;  %v2108_v24 = vrot.slane %v2107_v54, 2  ;;  %v2121_v55 = vmax.f32 %v2119_v44, %v2120_v46  ;;  %v2133_v57 = vsel %vm1831_vm8, %v1345_v29, -inf  ;;  %v11737_v44 = vpop.f32.mrf.mxu0 }
 0x167   : > { %v2089_v59 = vrot.slane %v2088_v4, 1  ;;  %v2102_v47 = vmax.f32 %v2100_v40, %v2101_v50  ;;  %v2115_v61 = vrot.slane %v2114_v49, 2  ;;  %v2128_v37 = vmax.f32 %v2126_v48, %v2127_v51 }
 0x168   : > { %v2096_v0 = vrot.slane %v2095_v52, 1  ;;  %v2109_v1 = vmax.f32 %v2107_v54, %v2108_v24  ;;  %v2122_v63 = vrot.slane %v2121_v55, 2  ;;  %v2134_v11 = vrot.slane %v2133_v57, 4 }
 0x169   : > { %v2090_v3 = vmax.f32 %v2088_v4, %v2089_v59  ;;  %v2103_v56 = vrot.slane %v2102_v47, 1  ;;  %v2116_v5 = vmax.f32 %v2114_v49, %v2115_v61  ;;  %v2129_v6 = vrot.slane %v2128_v37, 2  ;;  %v2934_v4 = vld [vmem:[#allocation2 + $0x34] sm:$0x1]  ;;  %v3671_v49 = vld [vmem:[#allocation2 + $0x28] sm:$0xf] }
 0x16a   : > { %v2097_v8 = vmax.f32 %v2095_v52, %v2096_v0  ;;  %v2110_v60 = vrot.slane %v2109_v1, 1  ;;  %v2123_v25 = vmax.f32 %v2121_v55, %v2122_v63  ;;  %v2135_v39 = vmax.f32 %v2133_v57, %v2134_v11  ;;  %v875_v63 = vpop.f32.mrf.mxu0 }
 0x16b   : > { %v2104_v53 = vmax.f32 %v2102_v47, %v2103_v56  ;;  %v11228_v9 = vpack.c.bf16 %v2090_v3, %v2090_v3  ;;  %v2117_v10 = vrot.slane %v2116_v5, 1  ;;  %v2130_v12 = vmax.f32 %v2128_v37, %v2129_v6  ;;  %v3746_v47 = vld [vmem:[#allocation2 + $0x18] sm:$0xf] }
 0x16c   : > { %v2111_v15 = vmax.f32 %v2109_v1, %v2110_v60  ;;  %v11229_v16 = vpack.c.bf16 %v2097_v8, %v2097_v8  ;;  %v2124_v17 = vrot.slane %v2123_v25, 1  ;;  %v2136_v18 = vrot.slane %v2135_v39, 2  ;;  %3762 = vst [vmem:[#allocation3 + $0x6c] sm:$0xf] %v3746_v47 }
 0x16d   : > { %v11230_v19 = vpack.c.bf16 %v2104_v53, %v2104_v53  ;;  %v3387_v20 = vunpack.c.l.b16 %v11228_v9  ;;  %v2118_v22 = vmax.f32 %v2116_v5, %v2117_v10  ;;  %v2131_v23 = vrot.slane %v2130_v12, 1  ;;  %v2887_v5 = vld [vmem:[#allocation2 + $0x38] sm:$0x1] }
 0x16e   : > { %v3388_v26 = vunpack.c.l.b16 %v11229_v16  ;;  %v11324_v28 = vpack.c.bf16 %v2111_v15, %v2111_v15  ;;  %v2125_v29 = vmax.f32 %v2123_v25, %v2124_v17  ;;  %v2137_v30 = vmax.f32 %v2135_v39, %v2136_v18  ;;  %v2937_v17 = vld [vmem:[#allocation2 + $0x3c] sm:$0x1] }
 0x16f   : > { %v3389_v31 = vunpack.c.l.b16 %v11230_v19  ;;  %v3512_v34 = vsel %vm3485_vm12, %v3387_v20, %v3511_v32  ;;  %v2132_v35 = vmax.f32 %v2130_v12, %v2131_v23  ;;  %v11232_v40 = vpack.c.bf16 %v2118_v22, %v2118_v22 }
 0x170   : > { %v3513_v45 = vsel %vm3487_vm13, %v3388_v26, %v3512_v34  ;;  %v3675_v54 = vsel %vm12617_vm7, %v11324_v28, %v3674_v21  ;;  %v2138_v46 = vrot.slane %v2137_v30, 1  ;;  %v11233_v48 = vpack.c.bf16 %v2125_v29, %v2125_v29 }
 0x171   : > { %v3514_v50 = vsel %vm3489_vm14, %v3389_v31, %v3513_v45  ;;  %3676 = vst [vmem:[#allocation2 + $0x2c] sm:$0x1] %v3675_v54  ;;  %v11234_v51 = vpack.c.bf16 %v2132_v35, %v2132_v35  ;;  %v3391_v52 = vunpack.c.l.b16 %v11232_v40  ;;  %v1052_v32 = vmax.f32 %v12929_v62, 0.0 }
 0x172   : > { %v3589_v24 = vpack.c.b16 %v3514_v50, %v3514_v50  ;;  %v2139_v55 = vmax.f32 %v2137_v30, %v2138_v46  ;;  %v3392_v57 = vunpack.c.l.b16 %v11233_v48  ;;  %v2885_v59 = vsel %vm12617_vm7, 0, %v2884_v41 }
 0x173   : > { %v3393_v61 = vunpack.c.l.b16 %v11234_v51  ;;  %v1106_v37 = vmax.f32 %v1052_v32, %v1054_v2  ;;  %2886 = vst [vmem:[#allocation2 + $0x30] sm:$0x1] %v2885_v59  ;;  %v2935_v0 = vsel %vm12610_vm5, 0, %v2934_v4  ;;  %v881_v1 = vadd.f32 %v12917_v43, %v11736_v58 }
 0x174   : > { %v3672_v62 = vsel %vm12765_vm0, %v3589_v24, %v3671_v49  ;;  %v11235_v11 = vpack.c.bf16 %v2139_v55, %v2139_v55  ;;  %v3515_v3 = vsel %vm3479_vm9, %v3392_v57, %v3391_v52  ;;  %2936 = vst [vmem:[#allocation2 + $0x34] sm:$0x1] %v2935_v0  ;;  %v873_v56 = vadd.f32 %v12917_v43, %v872_v14 }
 0x175   : > { %3673 = vst [vmem:[#allocation2 + $0x28] sm:$0xf] %v3672_v62  ;;  %v3516_v27 = vsel %vm3481_vm10, %v3393_v61, %v3515_v3  ;;  %v1346_v2 = vcombine.high %v1106_v37, %v1106_v37  ;;  %v1353_v6 = vrot.slane %v1106_v37, %v12681_v13  ;;  %v1057_v8 = vmax.f32 %v881_v1, 0.0 }
 0x176   : > { %v3394_v58 = vunpack.c.l.b16 %v11235_v11  ;;  %v1055_v60 = vmax.f32 %v873_v56, 0.0  ;;  %v884_v25 = vadd.f32 %v12917_v43, %v11737_v44  ;;  %v876_v39 = vadd.f32 %v12917_v43, %v875_v63 }
 0x177   : > { %v1360_v38 = vrot.slane %v1346_v2, %v12681_v13  ;;  %v1361_v53 = vcombine.high %v1353_v6, %v1353_v6  ;;  %v2140_v9 = vsel %vm1831_vm8, %v1353_v6, -inf  ;;  %v2888_v10 = vsel %vm12617_vm7, 0, %v2887_v5 }
 0x178   : > { %v2141_v12 = vrot.slane %v2140_v9, 4  ;;  %v12973_v14 = vsel %vm3483_vm11, %v3394_v58, %v3516_v27  ;;  %v1107_v15 = vmax.f32 %v1055_v60, %v1057_v8  ;;  %v1058_v16 = vmax.f32 %v884_v25, 0.0  ;;  %2889 = vst [vmem:[#allocation2 + $0x38] sm:$0x1] %v2888_v10  ;;  %v11740_v10 = vpop.f32.mrf.mxu0 }
 0x179   : > { %v1362_v18 = vcombine.high %v1360_v38, %v1360_v38  ;;  %v2147_v19 = vsel %vm1831_vm8, %v1361_v53, -inf  ;;  %v2154_v20 = vsel %vm1831_vm8, %v1360_v38, -inf  ;;  %v1056_v21 = vmax.f32 %v876_v39, 0.0 }
 0x17a   : > { %v2142_v22 = vmax.f32 %v2140_v9, %v2141_v12  ;;  %v2148_v23 = vrot.slane %v2147_v19, 4  ;;  %v2155_v26 = vrot.slane %v2154_v20, 4  ;;  %v1363_v28 = vcombine.high %v1107_v15, %v1107_v15 }
 0x17b   : > { %v2161_v29 = vsel %vm1831_vm8, %v1362_v18, -inf  ;;  %v1370_v30 = vrot.slane %v1107_v15, %v12681_v13  ;;  %v12979_v31 = vmax.f32 %v1056_v21, %v1058_v16  ;;  %v2938_v34 = vsel %vm12610_vm5, 0, %v2937_v17  ;;  %v3680_v18 = vld [vmem:[#allocation2 + $0x34] sm:$0x1] }
 0x17c   : > { %v2143_v35 = vrot.slane %v2142_v22, 2  ;;  %v2149_v40 = vmax.f32 %v2147_v19, %v2148_v23  ;;  %v2156_v41 = vmax.f32 %v2154_v20, %v2155_v26  ;;  %v2162_v44 = vrot.slane %v2161_v29, 4  ;;  %2939 = vst [vmem:[#allocation2 + $0x3c] sm:$0x1] %v2938_v34 }
 0x17d   : > { %v1377_v45 = vrot.slane %v1363_v28, %v12681_v13  ;;  %v1378_v54 = vcombine.high %v1370_v30, %v1370_v30  ;;  %v2168_v46 = vsel %vm1831_vm8, %v1370_v30, -inf  ;;  %v1380_v48 = vcombine.high %v12979_v31, %v12979_v31 }
 0x17e   : > { %v2144_v4 = vmax.f32 %v2142_v22, %v2143_v35  ;;  %v2150_v50 = vrot.slane %v2149_v40, 2  ;;  %v2157_v49 = vrot.slane %v2156_v41, 2  ;;  %v2163_v51 = vmax.f32 %v2161_v29, %v2162_v44 }
 0x17f   : > { %v1379_v52 = vcombine.high %v1377_v45, %v1377_v45  ;;  %v2169_v32 = vrot.slane %v2168_v46, 4  ;;  %v2175_v24 = vsel %vm1831_vm8, %v1378_v54, -inf  ;;  %v2182_v55 = vsel %vm1831_vm8, %v1377_v45, -inf }
 0x180   : > { %v2145_v57 = vrot.slane %v2144_v4, 1  ;;  %v2151_v59 = vmax.f32 %v2149_v40, %v2150_v50  ;;  %v2158_v47 = vmax.f32 %v2156_v41, %v2157_v49  ;;  %v2164_v61 = vrot.slane %v2163_v51, 2  ;;  %v888_v41 = vpop.f32.mrf.mxu0  ;;  %v3677_v50 = vld [vmem:[#allocation2 + $0x30] sm:$0xf] }
 0x181   : > { %v2170_v37 = vmax.f32 %v2168_v46, %v2169_v32  ;;  %v2176_v0 = vrot.slane %v2175_v24, 4  ;;  %v2183_v1 = vrot.slane %v2182_v55, 4  ;;  %v2189_v63 = vsel %vm1831_vm8, %v1379_v52, -inf }
 0x182   : > { %v2146_v62 = vmax.f32 %v2144_v4, %v2145_v57  ;;  %v2152_v11 = vrot.slane %v2151_v59, 1  ;;  %v2159_v3 = vrot.slane %v2158_v47, 1  ;;  %v2165_v56 = vmax.f32 %v2163_v51, %v2164_v61 }
 0x183   : > { %v2171_v5 = vrot.slane %v2170_v37, 2  ;;  %v2177_v27 = vmax.f32 %v2175_v24, %v2176_v0  ;;  %v2184_v2 = vmax.f32 %v2182_v55, %v2183_v1  ;;  %v2190_v6 = vrot.slane %v2189_v63, 4 }
 0x184   : > { %v2153_v8 = vmax.f32 %v2151_v59, %v2152_v11  ;;  %v2160_v58 = vmax.f32 %v2158_v47, %v2159_v3  ;;  %v2166_v60 = vrot.slane %v2165_v56, 1  ;;  %v11236_v25 = vpack.c.bf16 %v2146_v62, %v2146_v62 }
 0x185   : > { %v2172_v39 = vmax.f32 %v2170_v37, %v2171_v5  ;;  %v2178_v38 = vrot.slane %v2177_v27, 2  ;;  %v2185_v53 = vrot.slane %v2184_v2, 2  ;;  %v2191_v9 = vmax.f32 %v2189_v63, %v2190_v6  ;;  %v11741_v37 = vpop.f32.mrf.mxu0 }
 0x186   : > { %v2167_v12 = vmax.f32 %v2165_v56, %v2166_v60  ;;  %v11237_v15 = vpack.c.bf16 %v2153_v8, %v2153_v8  ;;  %v11238_v16 = vpack.c.bf16 %v2160_v58, %v2160_v58  ;;  %v3395_v17 = vunpack.c.l.b16 %v11236_v25 }
 0x187   : > { %v2173_v19 = vrot.slane %v2172_v39, 1  ;;  %v2179_v20 = vmax.f32 %v2177_v27, %v2178_v38  ;;  %v2186_v21 = vmax.f32 %v2184_v2, %v2185_v53  ;;  %v2192_v22 = vrot.slane %v2191_v9, 2  ;;  %v891_v25 = vpop.f32.mrf.mxu0 }
 0x188   : > { %v3396_v23 = vunpack.c.l.b16 %v11237_v15  ;;  %v3397_v26 = vunpack.c.l.b16 %v11238_v16  ;;  %v3518_v28 = vsel %vm3485_vm12, %v3395_v17, %v12973_v14  ;;  %v11325_v29 = vpack.c.bf16 %v2167_v12, %v2167_v12  ;;  %v2890_v12 = vld [vmem:[#allocation2 + $0x40] sm:$0x1] }
 0x189   : > { %v2174_v30 = vmax.f32 %v2172_v39, %v2173_v19  ;;  %v2180_v34 = vrot.slane %v2179_v20, 1  ;;  %v2187_v35 = vrot.slane %v2186_v21, 1  ;;  %v2193_v40 = vmax.f32 %v2191_v9, %v2192_v22  ;;  %v2940_v22 = vld [vmem:[#allocation2 + $0x44] sm:$0x1] }
 0x18a   : > { %v3519_v44 = vsel %vm3487_vm13, %v3396_v23, %v3518_v28  ;;  %v3681_v45 = vsel %vm12617_vm7, %v11325_v29, %v3680_v18  ;;  %v1387_v54 = vrot.slane %v12979_v31, %v12681_v13  ;;  %v1394_v46 = vrot.slane %v1380_v48, %v12681_v13 }
 0x18b   : > { %v3520_v4 = vsel %vm3489_vm14, %v3397_v26, %v3519_v44  ;;  %3682 = vst [vmem:[#allocation2 + $0x34] sm:$0x1] %v3681_v45  ;;  %v2181_v14 = vmax.f32 %v2179_v20, %v2180_v34  ;;  %v2188_v49 = vmax.f32 %v2186_v21, %v2187_v35  ;;  %v2194_v51 = vrot.slane %v2193_v40, 1 }
 0x18c   : > { %v3591_v52 = vpack.c.b16 %v3520_v4, %v3520_v4  ;;  %v11240_v32 = vpack.c.bf16 %v2174_v30, %v2174_v30  ;;  %v1395_v24 = vcombine.high %v1387_v54, %v1387_v54  ;;  %v1396_v55 = vcombine.high %v1394_v46, %v1394_v46  ;;  %v11744_v30 = vpop.f32.mrf.mxu0 }
 0x18d   : > { %v2195_v57 = vmax.f32 %v2193_v40, %v2194_v51  ;;  %v11241_v59 = vpack.c.bf16 %v2181_v14, %v2181_v14  ;;  %v11242_v47 = vpack.c.bf16 %v2188_v49, %v2188_v49  ;;  %v2196_v61 = vsel %vm1831_vm8, %v1387_v54, -inf }
 0x18e   : > { %v3678_v31 = vsel %vm12765_vm0, %v3591_v52, %v3677_v50  ;;  %v3399_v48 = vunpack.c.l.b16 %v11240_v32  ;;  %v2197_v0 = vrot.slane %v2196_v61, 4  ;;  %v2203_v1 = vsel %vm1831_vm8, %v1395_v24, -inf }
 0x18f   : > { %3679 = vst [vmem:[#allocation2 + $0x30] sm:$0xf] %v3678_v31  ;;  %v11243_v63 = vpack.c.bf16 %v2195_v57, %v2195_v57  ;;  %v3400_v62 = vunpack.c.l.b16 %v11241_v59  ;;  %v3401_v11 = vunpack.c.l.b16 %v11242_v47  ;;  %v2204_v3 = vrot.slane %v2203_v1, 4 }
 0x190   : > { %v2198_v56 = vmax.f32 %v2196_v61, %v2197_v0  ;;  %v2210_v5 = vsel %vm1831_vm8, %v1394_v46, -inf  ;;  %v2217_v27 = vsel %vm1831_vm8, %v1396_v55, -inf  ;;  %v897_v2 = vadd.f32 %v12917_v43, %v11740_v10 }
 0x191   : > { %v3402_v6 = vunpack.c.l.b16 %v11243_v63  ;;  %v3521_v8 = vsel %vm3479_vm9, %v3400_v62, %v3399_v48  ;;  %v2205_v58 = vmax.f32 %v2203_v1, %v2204_v3  ;;  %v2211_v60 = vrot.slane %v2210_v5, 4 }
 0x192   : > { %v3522_v39 = vsel %vm3481_vm10, %v3401_v11, %v3521_v8  ;;  %v2199_v38 = vrot.slane %v2198_v56, 2  ;;  %v2218_v53 = vrot.slane %v2217_v27, 4  ;;  %v1061_v9 = vmax.f32 %v897_v2, 0.0 }
 0x193   : > { %v2206_v15 = vrot.slane %v2205_v58, 2  ;;  %v2212_v16 = vmax.f32 %v2210_v5, %v2211_v60  ;;  %v3523_v17 = vsel %vm3483_vm11, %v3402_v6, %v3522_v39  ;;  %v889_v18 = vadd.f32 %v12917_v43, %v888_v41 }
 0x194   : > { %v2200_v19 = vmax.f32 %v2198_v56, %v2199_v38  ;;  %v2219_v10 = vmax.f32 %v2217_v27, %v2218_v53  ;;  %v900_v20 = vadd.f32 %v12917_v43, %v11741_v37  ;;  %v892_v21 = vadd.f32 %v12917_v43, %v891_v25  ;;  %v3686_v56 = vld [vmem:[#allocation2 + $0x3c] sm:$0x1] }
 0x195   : > { %v2207_v23 = vmax.f32 %v2205_v58, %v2206_v15  ;;  %v2213_v26 = vrot.slane %v2212_v16, 2  ;;  %v1059_v28 = vmax.f32 %v889_v18, 0.0  ;;  %v2891_v29 = vsel %vm12617_vm7, 0, %v2890_v12 }
 0x196   : > { %v2201_v34 = vrot.slane %v2200_v19, 1  ;;  %v2220_v35 = vrot.slane %v2219_v10, 2  ;;  %v1062_v40 = vmax.f32 %v900_v20, 0.0  ;;  %v1060_v44 = vmax.f32 %v892_v21, 0.0  ;;  %2892 = vst [vmem:[#allocation2 + $0x40] sm:$0x1] %v2891_v29 }
 0x197   : > { %v2208_v41 = vrot.slane %v2207_v23, 1  ;;  %v2214_v45 = vmax.f32 %v2212_v16, %v2213_v26  ;;  %v1109_v54 = vmax.f32 %v1059_v28, %v1061_v9  ;;  %v2941_v46 = vsel %vm12610_vm5, 0, %v2940_v22 }
 0x198   : > { %v2202_v4 = vmax.f32 %v2200_v19, %v2201_v34  ;;  %v2221_v50 = vmax.f32 %v2219_v10, %v2220_v35  ;;  %v1110_v14 = vmax.f32 %v1060_v44, %v1062_v40  ;;  %2942 = vst [vmem:[#allocation2 + $0x44] sm:$0x1] %v2941_v46  ;;  %v13017_v49 = vadd.f32 %v12917_v43, %v11744_v30 }
 0x199   : > { %v2209_v51 = vmax.f32 %v2207_v23, %v2208_v41  ;;  %v2215_v52 = vrot.slane %v2214_v45, 1  ;;  %v1397_v32 = vcombine.high %v1109_v54, %v1109_v54  ;;  %v1404_v24 = vrot.slane %v1109_v54, %v12681_v13 }
 0x19a   : > { %v2222_v55 = vrot.slane %v2221_v50, 1  ;;  %v11244_v57 = vpack.c.bf16 %v2202_v4, %v2202_v4  ;;  %v1414_v59 = vcombine.high %v1110_v14, %v1110_v14  ;;  %v1421_v47 = vrot.slane %v1110_v14, %v12681_v13 }
 0x19b   : > { %v2216_v61 = vmax.f32 %v2214_v45, %v2215_v52  ;;  %v11245_v37 = vpack.c.bf16 %v2209_v51, %v2209_v51  ;;  %v1411_v31 = vrot.slane %v1397_v32, %v12681_v13  ;;  %v1412_v48 = vcombine.high %v1404_v24, %v1404_v24 }
 0x19c   : > { %v2223_v0 = vmax.f32 %v2221_v50, %v2222_v55  ;;  %v3403_v1 = vunpack.c.l.b16 %v11244_v57  ;;  %v2224_v63 = vsel %vm1831_vm8, %v1404_v24, -inf  ;;  %v1428_v62 = vrot.slane %v1414_v59, %v12681_v13 }
 0x19d   : > { %v11246_v11 = vpack.c.bf16 %v2216_v61, %v2216_v61  ;;  %v3404_v3 = vunpack.c.l.b16 %v11245_v37  ;;  %v1413_v5 = vcombine.high %v1411_v31, %v1411_v31  ;;  %v2225_v27 = vrot.slane %v2224_v63, 4 }
 0x19e   : > { %v3524_v2 = vsel %vm3485_vm12, %v3403_v1, %v3523_v17  ;;  %v11326_v6 = vpack.c.bf16 %v2223_v0, %v2223_v0  ;;  %v2231_v8 = vsel %vm1831_vm8, %v1412_v48, -inf  ;;  %v2238_v58 = vsel %vm1831_vm8, %v1411_v31, -inf  ;;  %v3683_v17 = vld [vmem:[#allocation2 + $0x38] sm:$0xf] }
 0x19f   : > { %v3405_v60 = vunpack.c.l.b16 %v11246_v11  ;;  %v3525_v25 = vsel %vm3487_vm13, %v3404_v3, %v3524_v2  ;;  %v2226_v39 = vmax.f32 %v2224_v63, %v2225_v27  ;;  %v2232_v38 = vrot.slane %v2231_v8, 4  ;;  %v3747_v2 = vld [vmem:[#allocation2 + $0x20] sm:$0xf] }
 0x1a0   : > { %v3687_v53 = vsel %vm12617_vm7, %v11326_v6, %v3686_v56  ;;  %v2239_v9 = vrot.slane %v2238_v58, 4  ;;  %v2245_v12 = vsel %vm1831_vm8, %v1413_v5, -inf  ;;  %v1429_v15 = vcombine.high %v1421_v47, %v1421_v47  ;;  %3763 = vst [vmem:[#allocation3 + $0x90] sm:$0xf] %v3747_v2 }
 0x1a1   : > { %v3526_v16 = vsel %vm3489_vm14, %v3405_v60, %v3525_v25  ;;  %3688 = vst [vmem:[#allocation2 + $0x3c] sm:$0x1] %v3687_v53  ;;  %v2227_v18 = vrot.slane %v2226_v39, 2  ;;  %v2233_v19 = vmax.f32 %v2231_v8, %v2232_v38  ;;  %v2246_v10 = vrot.slane %v2245_v12, 4  ;;  %v904_v25 = vpop.f32.mrf.mxu0 }
 0x1a2   : > { %v3593_v20 = vpack.c.b16 %v3526_v16, %v3526_v16  ;;  %v2240_v21 = vmax.f32 %v2238_v58, %v2239_v9  ;;  %v1430_v22 = vcombine.high %v1428_v62, %v1428_v62  ;;  %v2252_v23 = vsel %vm1831_vm8, %v1421_v47, -inf }
 0x1a3   : > { %v2228_v26 = vmax.f32 %v2226_v39, %v2227_v18  ;;  %v2234_v28 = vrot.slane %v2233_v19, 2  ;;  %v2247_v29 = vmax.f32 %v2245_v12, %v2246_v10  ;;  %v2253_v30 = vrot.slane %v2252_v23, 4 }
 0x1a4   : > { %v3684_v34 = vsel %vm12765_vm0, %v3593_v20, %v3683_v17  ;;  %v2241_v35 = vrot.slane %v2240_v21, 2  ;;  %v2259_v40 = vsel %vm1831_vm8, %v1429_v15, -inf  ;;  %v2266_v44 = vsel %vm1831_vm8, %v1428_v62, -inf }
 0x1a5   : > { %3685 = vst [vmem:[#allocation2 + $0x38] sm:$0xf] %v3684_v34  ;;  %v2229_v41 = vrot.slane %v2228_v26, 1  ;;  %v2235_v45 = vmax.f32 %v2233_v19, %v2234_v28  ;;  %v2248_v54 = vrot.slane %v2247_v29, 2  ;;  %v2254_v46 = vmax.f32 %v2252_v23, %v2253_v30  ;;  %v3777_v28 = vld [vmem:[#allocation2 + $0x8] sm:$0xf] }
 0x1a6   : > { %v2242_v4 = vmax.f32 %v2240_v21, %v2241_v35  ;;  %v2260_v50 = vrot.slane %v2259_v40, 4  ;;  %v2267_v14 = vrot.slane %v2266_v44, 4  ;;  %v2273_v51 = vsel %vm1831_vm8, %v1430_v22, -inf }
 0x1a7   : > { %v2230_v52 = vmax.f32 %v2228_v26, %v2229_v41  ;;  %v2236_v32 = vrot.slane %v2235_v45, 1  ;;  %v2249_v24 = vmax.f32 %v2247_v29, %v2248_v54  ;;  %v2255_v55 = vrot.slane %v2254_v46, 2  ;;  %v11745_v54 = vpop.f32.mrf.mxu0 }
 0x1a8   : > { %v2243_v57 = vrot.slane %v2242_v4, 1  ;;  %v2261_v59 = vmax.f32 %v2259_v40, %v2260_v50  ;;  %v2268_v47 = vmax.f32 %v2266_v44, %v2267_v14  ;;  %v2274_v61 = vrot.slane %v2273_v51, 4  ;;  %v3692_v44 = vld [vmem:[#allocation2 + $0x44] sm:$0x1]  ;;  %v3748_v14 = vld [vmem:[#allocation2 + $0x28] sm:$0xf] }
 0x1a9   : > { %v2237_v37 = vmax.f32 %v2235_v45, %v2236_v32  ;;  %v2250_v31 = vrot.slane %v2249_v24, 1  ;;  %v11248_v48 = vpack.c.bf16 %v2230_v52, %v2230_v52  ;;  %v2256_v0 = vmax.f32 %v2254_v46, %v2255_v55  ;;  %v3778_v45 = vld [vmem:[#allocation2 + $0xc] sm:$0x1]  ;;  %3764 = vst [vmem:[#allocation3 + $0xb4] sm:$0xf] %v3748_v14 }
 0x1aa   : > { %v2244_v1 = vmax.f32 %v2242_v4, %v2243_v57  ;;  %v2262_v63 = vrot.slane %v2261_v59, 2  ;;  %v2269_v62 = vrot.slane %v2268_v47, 2  ;;  %v2275_v11 = vmax.f32 %v2273_v51, %v2274_v61 }
 0x1ab   : > { %v2251_v3 = vmax.f32 %v2249_v24, %v2250_v31  ;;  %v11249_v56 = vpack.c.bf16 %v2237_v37, %v2237_v37  ;;  %v3407_v5 = vunpack.c.l.b16 %v11248_v48  ;;  %v2257_v27 = vrot.slane %v2256_v0, 1 }
 0x1ac   : > { %v11250_v6 = vpack.c.bf16 %v2244_v1, %v2244_v1  ;;  %v2263_v8 = vmax.f32 %v2261_v59, %v2262_v63  ;;  %v2270_v58 = vmax.f32 %v2268_v47, %v2269_v62  ;;  %v2276_v60 = vrot.slane %v2275_v11, 2  ;;  %v3689_v63 = vld [vmem:[#allocation2 + $0x40] sm:$0xf] }
 0x1ad   : > { %v11251_v39 = vpack.c.bf16 %v2251_v3, %v2251_v3  ;;  %v3408_v38 = vunpack.c.l.b16 %v11249_v56  ;;  %v2258_v53 = vmax.f32 %v2256_v0, %v2257_v27  ;;  %v1065_v9 = vmax.f32 %v13017_v49, 0.0  ;;  %v907_v0 = vpop.f32.mrf.mxu0 }
 0x1ae   : > { %v3409_v12 = vunpack.c.l.b16 %v11250_v6  ;;  %v2264_v15 = vrot.slane %v2263_v8, 1  ;;  %v2271_v16 = vrot.slane %v2270_v58, 1  ;;  %v2277_v17 = vmax.f32 %v2275_v11, %v2276_v60 }
 0x1af   : > { %v3410_v18 = vunpack.c.l.b16 %v11251_v39  ;;  %v3527_v19 = vsel %vm3479_vm9, %v3408_v38, %v3407_v5  ;;  %v11252_v10 = vpack.c.bf16 %v2258_v53, %v2258_v53  ;;  %v905_v20 = vadd.f32 %v12917_v43, %v904_v25 }
 0x1b0   : > { %v3528_v21 = vsel %vm3481_vm10, %v3409_v12, %v3527_v19  ;;  %v2265_v22 = vmax.f32 %v2263_v8, %v2264_v15  ;;  %v2272_v23 = vmax.f32 %v2270_v58, %v2271_v16  ;;  %v2278_v26 = vrot.slane %v2277_v17, 1 }
 0x1b1   : > { %v3411_v29 = vunpack.c.l.b16 %v11252_v10  ;;  %v3529_v30 = vsel %vm3483_vm11, %v3410_v18, %v3528_v21  ;;  %v1063_v49 = vmax.f32 %v905_v20, 0.0  ;;  %v12429_v41 = vmov 0  }
 0x1b2   : > { %v2279_v34 = vmax.f32 %v2277_v17, %v2278_v26  ;;  %v11253_v35 = vpack.c.bf16 %v2265_v22, %v2265_v22  ;;  %v11254_v40 = vpack.c.bf16 %v2272_v23, %v2272_v23  ;;  %2856 = vst [vmem:[#allocation2] sm:$0xf] %v12429_v41  ;;  %2857 = vst [vmem:[#allocation2 + $0x4] sm:$0x1] %v12429_v41  ;;  %v3825_v50 = vshrl.u32 %v3777_v28, 16 }
 0x1b3   : > { %2858 = vst [vmem:[#allocation2 + $0x50] sm:$0xf] %v12429_v41  ;;  %2859 = vst [vmem:[#allocation2 + $0x54] sm:$0x1] %v12429_v41  ;;  %v3530_v46 = vsel %vm3485_vm12, %v3411_v29, %v3529_v30  ;;  %v1111_v4 = vmax.f32 %v1063_v49, %v1065_v9  ;;  %v3828_v24 = vshll.u32 %v3777_v28, 16  ;;  %v3834_v47 = vshll.u32 %v3778_v45, 16 }
 0x1b4   : > { %2861 = vst [vmem:[#allocation2 + $0x48] sm:$0xf] %v12429_v41  ;;  %2862 = vst [vmem:[#allocation2 + $0x4c] sm:$0x1] %v12429_v41  ;;  %v3412_v51 = vunpack.c.l.b16 %v11253_v35  ;;  %v3413_v52 = vunpack.c.l.b16 %v11254_v40  ;;  %v11327_v32 = vpack.c.bf16 %v2279_v34, %v2279_v34  ;;  %v3827_v59 = vrot.slane %v3825_v50, 4 }
 0x1b5   : > { %2863 = vst [vmem:[#allocation2 + $0x98] sm:$0xf] %v12429_v41  ;;  %2864 = vst [vmem:[#allocation2 + $0x9c] sm:$0x1] %v12429_v41  ;;  %v1431_v55 = vcombine.high %v1111_v4, %v1111_v4  ;;  %v1438_v57 = vrot.slane %v1111_v4, %v12681_v13  ;;  %v3830_v31 = vrot.slane %v3828_v24, 5  ;;  %v916_v48 = vadd.f32 %v12917_v43, %v11745_v54 }
 0x1b6   : > { %7162 = vst [vmem:[#allocation4] sm:$0x7] %v12429_v41  ;;  %7163 = vst [vmem:[#allocation4 + $0x18] sm:$0x7] %v12429_v41  ;;  %v3531_v61 = vsel %vm3487_vm13, %v3412_v51, %v3530_v46  ;;  %v3693_v37 = vsel %vm12617_vm7, %v11327_v32, %v3692_v44  ;;  %v3836_v2 = vrot.slane %v3834_v47, 5  ;;  %v908_v39 = vadd.f32 %v12917_v43, %v907_v0 }
 0x1b7   : > { %7165 = vst [vmem:[#allocation4 + $0x14] sm:$0x7] %v12429_v41  ;;  %7166 = vst [vmem:[#allocation4 + $0x2c] sm:$0x7] %v12429_v41  ;;  %v3532_v1 = vsel %vm3489_vm14, %v3413_v52, %v3531_v61  ;;  %v1445_v62 = vrot.slane %v1431_v55, %v12681_v13  ;;  %v1446_v11 = vcombine.high %v1438_v57, %v1438_v57  ;;  %v2280_v3 = vsel %vm1831_vm8, %v1438_v57, -inf }
 0x1b8   : > { %3694 = vst [vmem:[#allocation2 + $0x44] sm:$0x1] %v3693_v37  ;;  %v3595_v56 = vpack.c.b16 %v3532_v1, %v3532_v1  ;;  %v2281_v5 = vrot.slane %v2280_v3, 4  ;;  %v3831_v27 = vor.u32 %v3830_v31, %v3827_v59  ;;  %v2893_v40 = vld [vmem:[#allocation2 + $0x58] sm:$0x1]  ;;  %v1066_v46 = vmax.f32 %v916_v48, 0.0  ;;  %v11748_v31 = vpop.f32.mrf.mxu0 }
 0x1b9   : > { %v1447_v6 = vcombine.high %v1445_v62, %v1445_v62  ;;  %v2287_v8 = vsel %vm1831_vm8, %v1446_v11, -inf  ;;  %v2294_v58 = vsel %vm1831_vm8, %v1445_v62, -inf  ;;  %v3743_v60 = vld [vmem:[#allocation2] sm:$0xf]  ;;  %v3776_v15 = vld [vmem:[#allocation2 + $0x4] sm:$0x1] }
 0x1ba   : > { %v3775_v25 = vld [vmem:[#allocation2] sm:$0xf]  ;;  %v3690_v38 = vsel %vm12765_vm0, %v3595_v56, %v3689_v63  ;;  %v2282_v53 = vmax.f32 %v2280_v3, %v2281_v5  ;;  %v2288_v9 = vrot.slane %v2287_v8, 4  ;;  %v2295_v12 = vrot.slane %v2294_v58, 4  ;;  %3759 = vst [vmem:[#allocation3] sm:$0xf] %v3743_v60 }
 0x1bb   : > { %3691 = vst [vmem:[#allocation2 + $0x40] sm:$0xf] %v3690_v38  ;;  %v2301_v16 = vsel %vm1831_vm8, %v1447_v6, -inf  ;;  %v3811_v17 = vshrl.u32 %v3775_v25, 16  ;;  %v3814_v18 = vshll.u32 %v3775_v25, 16  ;;  %v3820_v19 = vshll.u32 %v3776_v15, 16 }
 0x1bc   : > { %v2283_v10 = vrot.slane %v2282_v53, 2  ;;  %v2289_v20 = vmax.f32 %v2287_v8, %v2288_v9  ;;  %v2296_v21 = vmax.f32 %v2294_v58, %v2295_v12  ;;  %v2302_v22 = vrot.slane %v2301_v16, 4  ;;  %v2943_v44 = vld [vmem:[#allocation2 + $0x5c] sm:$0x1] }
 0x1bd   : > { %v3813_v23 = vrot.slane %v3811_v17, 4  ;;  %v3816_v26 = vrot.slane %v3814_v18, 5  ;;  %v3822_v28 = vrot.slane %v3820_v19, 5  ;;  %v3832_v29 = vrot.slane %v3831_v27, 4 }
 0x1be   : > { %v2284_v30 = vmax.f32 %v2282_v53, %v2283_v10  ;;  %v2290_v49 = vrot.slane %v2289_v20, 2  ;;  %v2297_v34 = vrot.slane %v2296_v21, 2  ;;  %v2303_v35 = vmax.f32 %v2301_v16, %v2302_v22 }
 0x1bf   : > { %v3817_v45 = vor.u32 %v3816_v26, %v3813_v23  ;;  %v3837_v54 = vsel %vm13072_vm4, %v3832_v29, %v3836_v2  ;;  %v1064_v4 = vmax.f32 %v908_v39, 0.0  ;;  %v2894_v55 = vsel %vm12617_vm7, 0, %v2893_v40  ;;  %v13090_v2 = vld [vmem:[%s15018_s2] ss:$0 sm:$0xff]  ;;  %v920_v39 = vpop.f32.mrf.mxu0  ;;  %v4261_v29 = vld [vmem:[#allocation2 + $0x8] sm:$0xf] }
 0x1c0   : > { %v2285_v50 = vrot.slane %v2284_v30, 1  ;;  %v2291_v14 = vmax.f32 %v2289_v20, %v2290_v49  ;;  %v2298_v51 = vmax.f32 %v2296_v21, %v2297_v34  ;;  %v2304_v52 = vrot.slane %v2303_v35, 2  ;;  %4051 = vst [vmem:[#allocation3 + $0x28] sm:$0xf] %v3837_v54  ;;  %2895 = vst [vmem:[#allocation2 + $0x58] sm:$0x1] %v2894_v55 }
 0x1c1   : > { %v3818_v32 = vrot.slane %v3817_v45, 4  ;;  %v1112_v24 = vmax.f32 %v1064_v4, %v1066_v46  ;;  %v2944_v57 = vsel %vm12610_vm5, 0, %v2943_v44  ;;  %v929_v6 = vadd.f32 %v13090_v2, %v11748_v31  ;;  %v11935_v34 = vld [vmem:[#allocation3] ss:$36 sps:$4 sm:$0xff]  }
 0x1c2   : > { %v2286_v59 = vmax.f32 %v2284_v30, %v2285_v50  ;;  %v2292_v47 = vrot.slane %v2291_v14, 1  ;;  %v2299_v61 = vrot.slane %v2298_v51, 1  ;;  %v2305_v37 = vmax.f32 %v2303_v35, %v2304_v52  ;;  %2945 = vst [vmem:[#allocation2 + $0x5c] sm:$0x1] %v2944_v57  ;;  %v11749_v30 = vpop.f32.mrf.mxu0  ;;  %v13099_v50 = vld [vmem:[#allocation2 + $0xc] sm:$0x1] }
 0x1c3   : > { %v3823_v48 = vsel %vm13072_vm4, %v3818_v32, %v3822_v28  ;;  %v1448_v0 = vcombine.high %v1112_v24, %v1112_v24  ;;  %v1455_v1 = vrot.slane %v1112_v24, %v12681_v13  ;;  %v921_v21 = vadd.f32 %v13090_v2, %v920_v39 }
 0x1c4   : > { %v2293_v63 = vmax.f32 %v2291_v14, %v2292_v47  ;;  %v2300_v62 = vmax.f32 %v2298_v51, %v2299_v61  ;;  %v2306_v11 = vrot.slane %v2305_v37, 1  ;;  %v11256_v3 = vpack.c.bf16 %v2286_v59, %v2286_v59  ;;  %4050 = vst [vmem:[#allocation3 + $0x4] sm:$0xf] %v3823_v48 }
 0x1c5   : > { %v1462_v56 = vrot.slane %v1448_v0, %v12681_v13  ;;  %v1463_v5 = vcombine.high %v1455_v1, %v1455_v1  ;;  %v2308_v27 = vsel %vm1831_vm8, %v1455_v1, -inf  ;;  %v1069_v46 = vmax.f32 %v929_v6, 0.0 }
 0x1c6   : > { %v2307_v8 = vmax.f32 %v2305_v37, %v2306_v11  ;;  %v11257_v58 = vpack.c.bf16 %v2293_v63, %v2293_v63  ;;  %v11258_v60 = vpack.c.bf16 %v2300_v62, %v2300_v62  ;;  %v3415_v25 = vunpack.c.l.b16 %v11256_v3 }
 0x1c7   : > { %v1464_v38 = vcombine.high %v1462_v56, %v1462_v56  ;;  %v2309_v53 = vrot.slane %v2308_v27, 4  ;;  %v2315_v9 = vsel %vm1831_vm8, %v1463_v5, -inf  ;;  %v2322_v12 = vsel %vm1831_vm8, %v1462_v56, -inf }
 0x1c8   : > { %v11259_v15 = vpack.c.bf16 %v2307_v8, %v2307_v8  ;;  %v3416_v16 = vunpack.c.l.b16 %v11257_v58  ;;  %v3417_v17 = vunpack.c.l.b16 %v11258_v60  ;;  %v2316_v18 = vrot.slane %v2315_v9, 4 }
 0x1c9   : > { %v2310_v19 = vmax.f32 %v2308_v27, %v2309_v53  ;;  %v2323_v10 = vrot.slane %v2322_v12, 4  ;;  %v2329_v20 = vsel %vm1831_vm8, %v1464_v38, -inf  ;;  %v1067_v4 = vmax.f32 %v921_v21, 0.0 }
 0x1ca   : > { %v3418_v22 = vunpack.c.l.b16 %v11259_v15  ;;  %v3533_v23 = vsel %vm3479_vm9, %v3416_v16, %v3415_v25  ;;  %v2317_v26 = vmax.f32 %v2315_v9, %v2316_v18  ;;  %v2330_v28 = vrot.slane %v2329_v20, 4 }
 0x1cb   : > { %v3534_v49 = vsel %vm3481_vm10, %v3417_v17, %v3533_v23  ;;  %v11937_v35 = vld [vmem:[#allocation3 + $0x4] ss:$36 sps:$4 sm:$0xff]   ;;  %v2311_v40 = vrot.slane %v2310_v19, 2  ;;  %v2324_v44 = vmax.f32 %v2322_v12, %v2323_v10  ;;  %v13103_v32 = vadd.f32 %v13090_v2, %v11749_v30  ;;  %v3698_v17 = vld [vmem:[#allocation2 + $0x5c] sm:$0x1] }
 0x1cc   : > { %v2318_v45 = vrot.slane %v2317_v26, 2  ;;  %v2331_v54 = vmax.f32 %v2329_v20, %v2330_v28  ;;  %6253 = vmatprep.mubr.bf16.mxu1 %v11937_v35  ;;  %v3535_v52 = vsel %vm3483_vm11, %v3418_v22, %v3534_v49  ;;  %v1113_v57 = vmax.f32 %v1067_v4, %v1069_v46 }
 0x1cd   : > { %v2312_v14 = vmax.f32 %v2310_v19, %v2311_v40  ;;  %v2325_v51 = vrot.slane %v2324_v44, 2  ;;  %6254 = vmatmul.mubr.bf16.vlgmr.msra.gmra.mxu1 %v11935_v34  ;;  %v4294_v59 = vshrl.u32 %v4261_v29, 16  ;;  %v4297_v37 = vshll.u32 %v4261_v29, 16  ;;  %v4263_v40 = vld [vmem:[#allocation2 + $0x10] sm:$0xf] }
 0x1ce   : > { %v2319_v24 = vmax.f32 %v2317_v26, %v2318_v45  ;;  %v2332_v55 = vrot.slane %v2331_v54, 2  ;;  %v4303_v31 = vshll.u32 %v13099_v50, 16  ;;  %v1465_v1 = vcombine.high %v1113_v57, %v1113_v57  ;;  %v3695_v45 = vld [vmem:[#allocation2 + $0x58] sm:$0xf] }
 0x1cf   : > { %v2313_v47 = vrot.slane %v2312_v14, 1  ;;  %v2326_v61 = vmax.f32 %v2324_v44, %v2325_v51  ;;  %v1472_v63 = vrot.slane %v1113_v57, %v12681_v13  ;;  %v4296_v3 = vrot.slane %v4294_v59, 4 }
 0x1d0   : > { %v2320_v48 = vrot.slane %v2319_v24, 1  ;;  %v2333_v0 = vmax.f32 %v2331_v54, %v2332_v55  ;;  %v4299_v56 = vrot.slane %v4297_v37, 5  ;;  %v1479_v6 = vrot.slane %v1465_v1, %v12681_v13  ;;  %v923_v55 = vpop.f32.mrf.mxu0  ;;  %v4549_v37 = vld [vmem:[#allocation2 + $0x8] sm:$0xe] }
 0x1d1   : > { %v2314_v62 = vmax.f32 %v2312_v14, %v2313_v47  ;;  %v2327_v11 = vrot.slane %v2326_v61, 1  ;;  %v1480_v8 = vcombine.high %v1472_v63, %v1472_v63  ;;  %v2336_v25 = vsel %vm1831_vm8, %v1472_v63, -inf }
 0x1d2   : > { %v2321_v5 = vmax.f32 %v2319_v24, %v2320_v48  ;;  %v2334_v27 = vrot.slane %v2333_v0, 1  ;;  %v4300_v39 = vor.u32 %v4299_v56, %v4296_v3  ;;  %v1481_v9 = vcombine.high %v1479_v6, %v1479_v6 }
 0x1d3   : > { %v2328_v58 = vmax.f32 %v2326_v61, %v2327_v11  ;;  %v11260_v60 = vpack.c.bf16 %v2314_v62, %v2314_v62  ;;  %v2337_v12 = vrot.slane %v2336_v25, 4  ;;  %v2343_v18 = vsel %vm1831_vm8, %v1480_v8, -inf  ;;  %v4550_v62 = vld [vmem:[#allocation2 + $0xc] sm:$0x1] }
 0x1d4   : > { %v2335_v38 = vmax.f32 %v2333_v0, %v2334_v27  ;;  %v11261_v53 = vpack.c.bf16 %v2321_v5, %v2321_v5  ;;  %v2350_v19 = vsel %vm1831_vm8, %v1479_v6, -inf  ;;  %v2344_v22 = vrot.slane %v2343_v18, 4  ;;  %v4551_v5 = vld [vmem:[#allocation2 + $0x10] sm:$0xe] }
 0x1d5   : > { %v11262_v15 = vpack.c.bf16 %v2328_v58, %v2328_v58  ;;  %v3419_v16 = vunpack.c.l.b16 %v11260_v60  ;;  %v2338_v21 = vmax.f32 %v2336_v25, %v2337_v12  ;;  %v2351_v28 = vrot.slane %v2350_v19, 4  ;;  %v11752_v60 = vpop.f32.mrf.mxu0 }
 0x1d6   : > { %v3420_v10 = vunpack.c.l.b16 %v11261_v53  ;;  %v11328_v20 = vpack.c.bf16 %v2335_v38, %v2335_v38  ;;  %v2357_v29 = vsel %vm1831_vm8, %v1481_v9, -inf  ;;  %v2345_v35 = vmax.f32 %v2343_v18, %v2344_v22  ;;  %v4552_v53 = vld [vmem:[#allocation2 + $0x14] sm:$0x1]  ;;  %v2896_v22 = vld [vmem:[#allocation2 + $0x60] sm:$0x1] }
 0x1d7   : > { %v3421_v23 = vunpack.c.l.b16 %v11262_v15  ;;  %v3536_v26 = vsel %vm3485_vm12, %v3419_v16, %v3535_v52  ;;  %v2339_v34 = vrot.slane %v2338_v21, 2  ;;  %v2352_v54 = vmax.f32 %v2350_v19, %v2351_v28  ;;  %v4264_v52 = vld [vmem:[#allocation2 + $0x14] sm:$0x1] }
 0x1d8   : > { %v3537_v30 = vsel %vm3487_vm13, %v3420_v10, %v3536_v26  ;;  %v3699_v49 = vsel %vm12617_vm7, %v11328_v20, %v3698_v17  ;;  %v2358_v46 = vrot.slane %v2357_v29, 4  ;;  %v4301_v4 = vrot.slane %v4300_v39, 4 }
 0x1d9   : > { %v3538_v44 = vsel %vm3489_vm14, %v3421_v23, %v3537_v30  ;;  %3700 = vst [vmem:[#allocation2 + $0x5c] sm:$0x1] %v3699_v49  ;;  %v2340_v14 = vmax.f32 %v2338_v21, %v2339_v34  ;;  %v2346_v51 = vrot.slane %v2345_v35, 2  ;;  %v4305_v24 = vrot.slane %v4303_v31, 5  ;;  %v2946_v23 = vld [vmem:[#allocation2 + $0x64] sm:$0x1]  ;;  %v936_v49 = vpop.f32.mrf.mxu0 }
 0x1da   : > { %v3597_v50 = vpack.c.b16 %v3538_v44, %v3538_v44  ;;  %v2353_v57 = vrot.slane %v2352_v54, 2  ;;  %v2359_v59 = vmax.f32 %v2357_v29, %v2358_v46  ;;  %v4308_v47 = vshrl.u32 %v4263_v40, 16 }
 0x1db   : > { %v4311_v61 = vshll.u32 %v4263_v40, 16  ;;  %v2341_v0 = vrot.slane %v2340_v14, 1  ;;  %v2347_v1 = vmax.f32 %v2345_v35, %v2346_v51  ;;  %v4306_v63 = vsel %vm13072_vm4, %v4301_v4, %v4305_v24  ;;  %v3780_v24 = vld [vmem:[#allocation2 + $0x14] sm:$0x1] }
 0x1dc   : > { %v3696_v48 = vsel %vm12765_vm0, %v3597_v50, %v3695_v45  ;;  %v2354_v11 = vmax.f32 %v2352_v54, %v2353_v57  ;;  %v2360_v3 = vrot.slane %v2359_v59, 2  ;;  %v4310_v56 = vrot.slane %v4308_v47, 4  ;;  %4533 = vst [vmem:[#allocation3 + $0x10] sm:$0xf] %v4306_v63  ;;  %v3779_v45 = vld [vmem:[#allocation2 + $0x10] sm:$0xf] }
 0x1dd   : > { %3697 = vst [vmem:[#allocation2 + $0x58] sm:$0xf] %v3696_v48  ;;  %v4313_v31 = vrot.slane %v4311_v61, 5  ;;  %v2342_v27 = vmax.f32 %v2340_v14, %v2341_v0  ;;  %v2348_v6 = vrot.slane %v2347_v1, 1  ;;  %v4317_v8 = vshll.u32 %v4264_v52, 16 }
 0x1de   : > { %v10681_v58 = vrot.slane %v4549_v37, 9  ;;  %v2355_v25 = vrot.slane %v2354_v11, 1  ;;  %v2361_v39 = vmax.f32 %v2359_v59, %v2360_v3  ;;  %v4615_v9 = vrot.slane %v4550_v62, 5  ;;  %v13142_v59 = vld [vmem:[#allocation2 + $0x18] sm:$0xf]  ;;  %v11753_v37 = vpop.f32.mrf.mxu0 }
 0x1df   : > { %v4314_v38 = vor.u32 %v4313_v31, %v4310_v56  ;;  %v2349_v12 = vmax.f32 %v2347_v1, %v2348_v6  ;;  %v11264_v15 = vpack.c.bf16 %v2342_v27, %v2342_v27  ;;  %v4319_v17 = vrot.slane %v4317_v8, 5  ;;  %v3749_v62 = vld [vmem:[#allocation2 + $0x30] sm:$0xf] }
 0x1e0   : > { %v10682_v18 = vrot.slane %v4551_v5, 9  ;;  %v2356_v19 = vmax.f32 %v2354_v11, %v2355_v25  ;;  %v2362_v10 = vrot.slane %v2361_v39, 1  ;;  %v4616_v21 = vsel %vm13123_vm1, %v10681_v58, %v4615_v9  ;;  %3765 = vst [vmem:[#allocation3 + $0xd8] sm:$0xf] %v3749_v62 }
 0x1e1   : > { %v4315_v20 = vrot.slane %v4314_v38, 4  ;;  %v11265_v26 = vpack.c.bf16 %v2349_v12, %v2349_v12  ;;  %v3423_v28 = vunpack.c.l.b16 %v11264_v15  ;;  %v4619_v29 = vrot.slane %v4552_v53, 5  ;;  %4693 = vst [vmem:[#allocation3 + $0x14] sm:$0xf] %v4616_v21  ;;  %v939_v38 = vpop.f32.mrf.mxu0 }
 0x1e2   : > { %v1070_v30 = vmax.f32 %v13103_v32, 0.0  ;;  %v2363_v34 = vmax.f32 %v2361_v39, %v2362_v10  ;;  %v11266_v35 = vpack.c.bf16 %v2356_v19, %v2356_v19  ;;  %v924_v44 = vadd.f32 %v13090_v2, %v923_v55 }
 0x1e3   : > { %v4320_v40 = vsel %vm13072_vm4, %v4315_v20, %v4319_v17  ;;  %v3424_v54 = vunpack.c.l.b16 %v11265_v26  ;;  %v4620_v46 = vsel %vm13123_vm1, %v10682_v18, %v4619_v29  ;;  %v2897_v4 = vsel %vm12617_vm7, 0, %v2896_v22 }
 0x1e4   : > { %4534 = vst [vmem:[#allocation3 + $0x34] sm:$0xf] %v4320_v40  ;;  %v2947_v32 = vsel %vm12610_vm5, 0, %v2946_v23  ;;  %v11267_v50 = vpack.c.bf16 %v2363_v34, %v2363_v34  ;;  %v3425_v14 = vunpack.c.l.b16 %v11266_v35  ;;  %4694 = vst [vmem:[#allocation3 + $0x38] sm:$0xf] %v4620_v46  ;;  %v1068_v51 = vmax.f32 %v924_v44, 0.0 }
 0x1e5   : > { %2898 = vst [vmem:[#allocation2 + $0x60] sm:$0x1] %v2897_v4  ;;  %2948 = vst [vmem:[#allocation2 + $0x64] sm:$0x1] %v2947_v32  ;;  %v945_v52 = vadd.f32 %v13090_v2, %v11752_v60  ;;  %v3539_v55 = vsel %vm3479_vm9, %v3424_v54, %v3423_v28  ;;  %v937_v57 = vadd.f32 %v13090_v2, %v936_v49  ;;  %v3839_v47 = vshrl.u32 %v3779_v45, 16 }
 0x1e6   : > { %v3842_v61 = vshll.u32 %v3779_v45, 16  ;;  %v3426_v48 = vunpack.c.l.b16 %v11267_v50  ;;  %v3540_v0 = vsel %vm3481_vm10, %v3425_v14, %v3539_v55  ;;  %v1114_v1 = vmax.f32 %v1068_v51, %v1070_v30  ;;  %v3750_v54 = vld [vmem:[#allocation2 + $0x38] sm:$0xf] }
 0x1e7   : > { %v1073_v63 = vmax.f32 %v945_v52, 0.0  ;;  %v1071_v11 = vmax.f32 %v937_v57, 0.0  ;;  %v3841_v3 = vrot.slane %v3839_v47, 4  ;;  %v3848_v31 = vshll.u32 %v3780_v24, 16  ;;  %3766 = vst [vmem:[#allocation3 + $0xfc] sm:$0xf] %v3750_v54 }
 0x1e8   : > { %v3844_v56 = vrot.slane %v3842_v61, 5  ;;  %v1482_v5 = vcombine.high %v1114_v1, %v1114_v1  ;;  %v1489_v27 = vrot.slane %v1114_v1, %v12681_v13  ;;  %v13147_v6 = vsel %vm3483_vm11, %v3426_v48, %v3540_v0 }
 0x1e9   : > { %v3853_v8 = vshrl.u32 %v13142_v59, 16  ;;  %v1115_v58 = vmax.f32 %v1071_v11, %v1073_v63  ;;  %v13150_v25 = vrot.slane %v3848_v31, 5  ;;  %v3856_v39 = vshll.u32 %v13142_v59, 16 }
 0x1ea   : > { %v3845_v60 = vor.u32 %v3844_v56, %v3841_v3  ;;  %v1496_v53 = vrot.slane %v1482_v5, %v12681_v13  ;;  %v1497_v9 = vcombine.high %v1489_v27, %v1489_v27  ;;  %v2364_v12 = vsel %vm1831_vm8, %v1489_v27, -inf }
 0x1eb   : > { %v13155_v15 = vrot.slane %v3853_v8, 4  ;;  %v11942_v17 = vld [vmem:[#allocation3 + $0x10] ss:$36 sps:$4 sm:$0xff]   ;;  %v2365_v19 = vrot.slane %v2364_v12, 4  ;;  %v1499_v10 = vcombine.high %v1115_v58, %v1115_v58  ;;  %v1506_v20 = vrot.slane %v1115_v58, %v12681_v13 }
 0x1ec   : > { %v11944_v18 = vld [vmem:[#allocation3 + $0x14] ss:$36 sps:$4 sm:$0xff]   ;;  %v13159_v21 = vadd.f32 %v13090_v2, %v11753_v37  ;;  %v1498_v22 = vcombine.high %v1496_v53, %v1496_v53  ;;  %v2371_v23 = vsel %vm1831_vm8, %v1497_v9, -inf  ;;  %v2378_v26 = vsel %vm1831_vm8, %v1496_v53, -inf }
 0x1ed   : > { %v13164_v28 = vadd.f32 %v13090_v2, %v939_v38  ;;  %6447 = vmatprep.mubr.bf16.mxu0 %v11944_v18  ;;  %v2366_v29 = vmax.f32 %v2364_v12, %v2365_v19  ;;  %v2372_v30 = vrot.slane %v2371_v23, 4  ;;  %v2379_v49 = vrot.slane %v2378_v26, 4 }
 0x1ee   : > { %v1513_v34 = vrot.slane %v1499_v10, %v12681_v13  ;;  %6448 = vmatmul.mubr.bf16.vlgmr.msra.gmra.mxu0 %v11942_v17  ;;  %v2385_v35 = vsel %vm1831_vm8, %v1498_v22, -inf  ;;  %v1514_v40 = vcombine.high %v1506_v20, %v1506_v20  ;;  %v2392_v44 = vsel %vm1831_vm8, %v1506_v20, -inf }
 0x1ef   : > { %v13169_v45 = vrot.slane %v3845_v60, 4  ;;  %v2367_v46 = vrot.slane %v2366_v29, 2  ;;  %v2373_v4 = vmax.f32 %v2371_v23, %v2372_v30  ;;  %v2380_v32 = vmax.f32 %v2378_v26, %v2379_v49 }
 0x1f0   : > { %v2386_v50 = vrot.slane %v2385_v35, 4  ;;  %v1515_v14 = vcombine.high %v1513_v34, %v1513_v34  ;;  %v2393_v51 = vrot.slane %v2392_v44, 4  ;;  %v2399_v52 = vsel %vm1831_vm8, %v1514_v40, -inf  ;;  %v3704_v40 = vld [vmem:[#allocation2 + $0x64] sm:$0x1] }
 0x1f1   : > { %v2406_v24 = vsel %vm1831_vm8, %v1513_v34, -inf  ;;  %v2368_v55 = vmax.f32 %v2366_v29, %v2367_v46  ;;  %v2374_v57 = vrot.slane %v2373_v4, 2  ;;  %v2381_v47 = vrot.slane %v2380_v32, 2 }
 0x1f2   : > { %v2387_v61 = vmax.f32 %v2385_v35, %v2386_v50  ;;  %v2394_v37 = vmax.f32 %v2392_v44, %v2393_v51  ;;  %v2400_v48 = vrot.slane %v2399_v52, 4  ;;  %v2407_v0 = vrot.slane %v2406_v24, 4 }
 0x1f3   : > { %v2413_v1 = vsel %vm1831_vm8, %v1515_v14, -inf  ;;  %v2369_v63 = vrot.slane %v2368_v55, 1  ;;  %v2375_v62 = vmax.f32 %v2373_v4, %v2374_v57  ;;  %v2382_v11 = vmax.f32 %v2380_v32, %v2381_v47  ;;  %v3782_v47 = vld [vmem:[#allocation2 + $0x1c] sm:$0x1] }
 0x1f4   : > { %v2388_v3 = vrot.slane %v2387_v61, 2  ;;  %v2395_v56 = vrot.slane %v2394_v37, 2  ;;  %v2401_v31 = vmax.f32 %v2399_v52, %v2400_v48  ;;  %v2408_v5 = vmax.f32 %v2406_v24, %v2407_v0 }
 0x1f5   : > { %v2414_v27 = vrot.slane %v2413_v1, 4  ;;  %v2370_v8 = vmax.f32 %v2368_v55, %v2369_v63  ;;  %v2376_v58 = vrot.slane %v2375_v62, 1  ;;  %v2383_v60 = vrot.slane %v2382_v11, 1  ;;  %v3701_v63 = vld [vmem:[#allocation2 + $0x60] sm:$0xf] }
 0x1f6   : > { %v2389_v38 = vmax.f32 %v2387_v61, %v2388_v3  ;;  %v2396_v53 = vmax.f32 %v2394_v37, %v2395_v56  ;;  %v2402_v9 = vrot.slane %v2401_v31, 2  ;;  %v2409_v12 = vrot.slane %v2408_v5, 2  ;;  %v11756_v61 = vpop.f32.mrf.mxu0 }
 0x1f7   : > { %v2415_v17 = vmax.f32 %v2413_v1, %v2414_v27  ;;  %v2377_v18 = vmax.f32 %v2375_v62, %v2376_v58  ;;  %v2384_v19 = vmax.f32 %v2382_v11, %v2383_v60  ;;  %v11268_v20 = vpack.c.bf16 %v2370_v8, %v2370_v8  ;;  %v2899_v8 = vld [vmem:[#allocation2 + $0x68] sm:$0x1]  ;;  %v2949_v58 = vld [vmem:[#allocation2 + $0x6c] sm:$0x1] }
 0x1f8   : > { %v2390_v10 = vrot.slane %v2389_v38, 1  ;;  %v2397_v22 = vrot.slane %v2396_v53, 1  ;;  %v2403_v23 = vmax.f32 %v2401_v31, %v2402_v9  ;;  %v2410_v26 = vmax.f32 %v2408_v5, %v2409_v12 }
 0x1f9   : > { %v2416_v29 = vrot.slane %v2415_v17, 2  ;;  %v11269_v49 = vpack.c.bf16 %v2377_v18, %v2377_v18  ;;  %v11270_v34 = vpack.c.bf16 %v2384_v19, %v2384_v19  ;;  %v3427_v35 = vunpack.c.l.b16 %v11268_v20 }
 0x1fa   : > { %v2391_v30 = vmax.f32 %v2389_v38, %v2390_v10  ;;  %v2398_v44 = vmax.f32 %v2396_v53, %v2397_v22  ;;  %v2404_v54 = vrot.slane %v2403_v23, 1  ;;  %v2411_v46 = vrot.slane %v2410_v26, 1 }
 0x1fb   : > { %v2417_v4 = vmax.f32 %v2415_v17, %v2416_v29  ;;  %v3428_v32 = vunpack.c.l.b16 %v11269_v49  ;;  %v3429_v50 = vunpack.c.l.b16 %v11270_v34  ;;  %v3542_v14 = vsel %vm3485_vm12, %v3427_v35, %v13147_v6  ;;  %v4265_v17 = vld [vmem:[#allocation2 + $0x18] sm:$0xf] }
 0x1fc   : > { %v11329_v51 = vpack.c.bf16 %v2391_v30, %v2391_v30  ;;  %v2405_v52 = vmax.f32 %v2403_v23, %v2404_v54  ;;  %v2412_v24 = vmax.f32 %v2410_v26, %v2411_v46  ;;  %v11272_v57 = vpack.c.bf16 %v2398_v44, %v2398_v44  ;;  %v13200_v26 = vld [vmem:[#allocation2 + $0x20] sm:$0xf] }
 0x1fd   : > { %v2418_v55 = vrot.slane %v2417_v4, 1  ;;  %v3543_v37 = vsel %vm3487_vm13, %v3428_v32, %v3542_v14  ;;  %v3851_v0 = vsel %vm13072_vm4, %v13169_v45, %v13150_v25  ;;  %v3858_v6 = vrot.slane %v3856_v39, 5  ;;  %v952_v39 = vpop.f32.mrf.mxu0 }
 0x1fe   : > { %v3705_v48 = vsel %vm12617_vm7, %v11329_v51, %v3704_v40  ;;  %v3544_v1 = vsel %vm3489_vm14, %v3429_v50, %v3543_v37  ;;  %v11273_v11 = vpack.c.bf16 %v2405_v52, %v2405_v52  ;;  %v11274_v3 = vpack.c.bf16 %v2412_v24, %v2412_v24  ;;  %4052 = vst [vmem:[#allocation3 + $0x4c] sm:$0xf] %v3851_v0 }
 0x1ff   : > { %3706 = vst [vmem:[#allocation2 + $0x64] sm:$0x1] %v3705_v48  ;;  %v2419_v62 = vmax.f32 %v2417_v4, %v2418_v55  ;;  %v3599_v56 = vpack.c.b16 %v3544_v1, %v3544_v1  ;;  %v3431_v31 = vunpack.c.l.b16 %v11272_v57  ;;  %v3859_v5 = vor.u32 %v3858_v6, %v13155_v15  ;;  %v11757_v35 = vpop.f32.mrf.mxu0 }
 0x200   : > { %v3862_v27 = vshll.u32 %v3782_v47, 16  ;;  %v3432_v25 = vunpack.c.l.b16 %v11273_v11  ;;  %v3433_v45 = vunpack.c.l.b16 %v11274_v3  ;;  %v1074_v59 = vmax.f32 %v13159_v21, 0.0  ;;  %v4266_v21 = vld [vmem:[#allocation2 + $0x1c] sm:$0x1] }
 0x201   : > { %v11275_v60 = vpack.c.bf16 %v2419_v62, %v2419_v62  ;;  %v3702_v38 = vsel %vm12765_vm0, %v3599_v56, %v3701_v63  ;;  %v3860_v53 = vrot.slane %v3859_v5, 4  ;;  %v1072_v12 = vmax.f32 %v13164_v28, 0.0  ;;  %v955_v48 = vpop.f32.mrf.mxu0  ;;  %v11947_v5 = vld [vmem:[#allocation3 + $0x48] ss:$36 sps:$4 sm:$0xff]  }
 0x202   : > { %v3864_v9 = vrot.slane %v3862_v27, 5  ;;  %3703 = vst [vmem:[#allocation2 + $0x60] sm:$0xf] %v3702_v38  ;;  %v3545_v15 = vsel %vm3479_vm9, %v3432_v25, %v3431_v31  ;;  %v2900_v19 = vsel %vm12617_vm7, 0, %v2899_v8  ;;  %v2950_v10 = vsel %vm12610_vm5, 0, %v2949_v58 }
 0x203   : > { %v3434_v18 = vunpack.c.l.b16 %v11275_v60  ;;  %v3546_v20 = vsel %vm3481_vm10, %v3433_v45, %v3545_v15  ;;  %v1116_v23 = vmax.f32 %v1072_v12, %v1074_v59  ;;  %2901 = vst [vmem:[#allocation2 + $0x68] sm:$0x1] %v2900_v19  ;;  %2951 = vst [vmem:[#allocation2 + $0x6c] sm:$0x1] %v2950_v10  ;;  %v961_v28 = vadd.f32 %v13090_v2, %v11756_v61 }
 0x204   : > { %v3865_v22 = vsel %vm13072_vm4, %v3860_v53, %v3864_v9  ;;  %v953_v30 = vadd.f32 %v13090_v2, %v952_v39  ;;  %v4322_v49 = vshrl.u32 %v4265_v17, 16  ;;  %v4325_v34 = vshll.u32 %v4265_v17, 16 }
 0x205   : > { %4053 = vst [vmem:[#allocation3 + $0x70] sm:$0xf] %v3865_v22  ;;  %v13203_v29 = vsel %vm3483_vm11, %v3434_v18, %v3546_v20  ;;  %v1516_v40 = vcombine.high %v1116_v23, %v1116_v23  ;;  %v1523_v44 = vrot.slane %v1116_v23, %v12681_v13  ;;  %v1077_v54 = vmax.f32 %v961_v28, 0.0 }
 0x206   : > { %v4331_v46 = vshll.u32 %v4266_v21, 16  ;;  %v1075_v4 = vmax.f32 %v953_v30, 0.0  ;;  %v4324_v32 = vrot.slane %v4322_v49, 4  ;;  %v4327_v50 = vrot.slane %v4325_v34, 5 }
 0x207   : > { %v4336_v14 = vshrl.u32 %v13200_v26, 16  ;;  %v1530_v51 = vrot.slane %v1516_v40, %v12681_v13  ;;  %v1531_v52 = vcombine.high %v1523_v44, %v1523_v44  ;;  %v2420_v24 = vsel %vm1831_vm8, %v1523_v44, -inf }
 0x208   : > { %v13210_v55 = vrot.slane %v4331_v46, 5  ;;  %v2421_v57 = vrot.slane %v2420_v24, 4  ;;  %v1117_v47 = vmax.f32 %v1075_v4, %v1077_v54  ;;  %v4328_v61 = vor.u32 %v4327_v50, %v4324_v32 }
 0x209   : > { %v13212_v37 = vrot.slane %v4336_v14, 4  ;;  %v1532_v0 = vcombine.high %v1530_v51, %v1530_v51  ;;  %v2427_v6 = vsel %vm1831_vm8, %v1531_v52, -inf  ;;  %v2434_v1 = vsel %vm1831_vm8, %v1530_v51, -inf }
 0x20a   : > { %v4339_v63 = vshll.u32 %v13200_v26, 16  ;;  %v2422_v62 = vmax.f32 %v2420_v24, %v2421_v57  ;;  %v2428_v11 = vrot.slane %v2427_v6, 4  ;;  %v2435_v3 = vrot.slane %v2434_v1, 4 }
 0x20b   : > { %v1533_v56 = vcombine.high %v1117_v47, %v1117_v47  ;;  %v2441_v27 = vsel %vm1831_vm8, %v1532_v0, -inf  ;;  %v1540_v8 = vrot.slane %v1117_v47, %v12681_v13  ;;  %v13220_v58 = vadd.f32 %v13090_v2, %v11757_v35 }
 0x20c   : > { %v11945_v31 = vld [vmem:[#allocation3 + $0x4c] ss:$36 sps:$4 sm:$0xff]   ;;  %v13223_v60 = vadd.f32 %v13090_v2, %v955_v48  ;;  %v2423_v25 = vrot.slane %v2422_v62, 2  ;;  %v2429_v45 = vmax.f32 %v2427_v6, %v2428_v11  ;;  %v2436_v59 = vmax.f32 %v2434_v1, %v2435_v3 }
 0x20d   : > { %v2442_v39 = vrot.slane %v2441_v27, 4  ;;  %6261 = vmatprep.mubr.bf16.mxu1 %v11945_v31  ;;  %v1547_v38 = vrot.slane %v1533_v56, %v12681_v13  ;;  %v1548_v53 = vcombine.high %v1540_v8, %v1540_v8  ;;  %v2448_v9 = vsel %vm1831_vm8, %v1540_v8, -inf  ;;  %v3710_v31 = vld [vmem:[#allocation2 + $0x6c] sm:$0x1] }
 0x20e   : > { %v13227_v12 = vrot.slane %v4328_v61, 4  ;;  %6262 = vmatmul.mubr.bf16.gmra.mxu1 %v11947_v5  ;;  %v2424_v17 = vmax.f32 %v2422_v62, %v2423_v25  ;;  %v2430_v18 = vrot.slane %v2429_v45, 2  ;;  %v2437_v15 = vrot.slane %v2436_v59, 2 }
 0x20f   : > { %v2443_v19 = vmax.f32 %v2441_v27, %v2442_v39  ;;  %v1549_v10 = vcombine.high %v1547_v38, %v1547_v38  ;;  %v2449_v21 = vrot.slane %v2448_v9, 4  ;;  %v2455_v20 = vsel %vm1831_vm8, %v1548_v53, -inf }
 0x210   : > { %v2462_v22 = vsel %vm1831_vm8, %v1547_v38, -inf  ;;  %v2425_v23 = vrot.slane %v2424_v17, 1  ;;  %v2431_v28 = vmax.f32 %v2429_v45, %v2430_v18  ;;  %v2438_v30 = vmax.f32 %v2436_v59, %v2437_v15  ;;  %v4268_v15 = vld [vmem:[#allocation2 + $0x24] sm:$0x1] }
 0x211   : > { %v2444_v49 = vrot.slane %v2443_v19, 2  ;;  %v2450_v34 = vmax.f32 %v2448_v9, %v2449_v21  ;;  %v2456_v35 = vrot.slane %v2455_v20, 4  ;;  %v2463_v40 = vrot.slane %v2462_v22, 4 }
 0x212   : > { %v2469_v44 = vsel %vm1831_vm8, %v1549_v10, -inf  ;;  %v2426_v54 = vmax.f32 %v2424_v17, %v2425_v23  ;;  %v2432_v46 = vrot.slane %v2431_v28, 1  ;;  %v2439_v4 = vrot.slane %v2438_v30, 1  ;;  %v3707_v23 = vld [vmem:[#allocation2 + $0x68] sm:$0xf] }
 0x213   : > { %v2445_v32 = vmax.f32 %v2443_v19, %v2444_v49  ;;  %v2451_v50 = vrot.slane %v2450_v34, 2  ;;  %v2457_v14 = vmax.f32 %v2455_v20, %v2456_v35  ;;  %v2464_v51 = vmax.f32 %v2462_v22, %v2463_v40 }
 0x214   : > { %v2470_v52 = vrot.slane %v2469_v44, 4  ;;  %v2433_v24 = vmax.f32 %v2431_v28, %v2432_v46  ;;  %v2440_v57 = vmax.f32 %v2438_v30, %v2439_v4  ;;  %v11276_v61 = vpack.c.bf16 %v2426_v54, %v2426_v54  ;;  %v4554_v54 = vld [vmem:[#allocation2 + $0x1c] sm:$0x1]  ;;  %v11760_v46 = vpop.f32.mrf.mxu0  ;;  %v4556_v4 = vld [vmem:[#allocation2 + $0x24] sm:$0x1] }
 0x215   : > { %v2446_v47 = vrot.slane %v2445_v32, 1  ;;  %v2452_v48 = vmax.f32 %v2450_v34, %v2451_v50  ;;  %v2458_v0 = vrot.slane %v2457_v14, 2  ;;  %v2465_v6 = vrot.slane %v2464_v51, 2  ;;  %v11960_v50 = vld [vmem:[%s15019_s3 + $0xf8] sm:$0xff]  }
 0x216   : > { %v2471_v1 = vmax.f32 %v2469_v44, %v2470_v52  ;;  %v11277_v11 = vpack.c.bf16 %v2433_v24, %v2433_v24  ;;  %v11278_v3 = vpack.c.bf16 %v2440_v57, %v2440_v57  ;;  %v3435_v56 = vunpack.c.l.b16 %v11276_v61  ;;  %11467 = vmatprep.subr.bf16.mxu1 %v11960_v50 }
 0x217   : > { %v2447_v62 = vmax.f32 %v2445_v32, %v2446_v47  ;;  %v2453_v5 = vrot.slane %v2452_v48, 1  ;;  %v2459_v27 = vmax.f32 %v2457_v14, %v2458_v0  ;;  %v2466_v8 = vmax.f32 %v2464_v51, %v2465_v6  ;;  %v2952_v0 = vld [vmem:[#allocation2 + $0x74] sm:$0x1] }
 0x218   : > { %v2472_v25 = vrot.slane %v2471_v1, 2  ;;  %v3436_v45 = vunpack.c.l.b16 %v11277_v11  ;;  %v3437_v59 = vunpack.c.l.b16 %v11278_v3  ;;  %v3548_v39 = vsel %vm3485_vm12, %v3435_v56, %v13203_v29  ;;  %v4553_v29 = vld [vmem:[#allocation2 + $0x18] sm:$0xe]  ;;  %v968_v3 = vpop.f32.mrf.mxu0  ;;  %v3784_v56 = vld [vmem:[#allocation2 + $0x24] sm:$0x1] }
 0x219   : > { %v11330_v38 = vpack.c.bf16 %v2447_v62, %v2447_v62  ;;  %v2454_v53 = vmax.f32 %v2452_v48, %v2453_v5  ;;  %v2460_v9 = vrot.slane %v2459_v27, 1  ;;  %v2467_v17 = vrot.slane %v2466_v8, 1  ;;  %v2902_v48 = vld [vmem:[#allocation2 + $0x70] sm:$0x1] }
 0x21a   : > { %v2473_v18 = vmax.f32 %v2471_v1, %v2472_v25  ;;  %v3549_v19 = vsel %vm3487_vm13, %v3436_v45, %v3548_v39  ;;  %v4334_v21 = vsel %vm13072_vm4, %v13227_v12, %v13210_v55  ;;  %v4341_v20 = vrot.slane %v4339_v63, 5  ;;  %v4555_v63 = vld [vmem:[#allocation2 + $0x20] sm:$0xe]  ;;  %v13257_v45 = vld [vmem:[#allocation2 + $0x28] sm:$0xf] }
 0x21b   : > { %v3711_v10 = vsel %vm12617_vm7, %v11330_v38, %v3710_v31  ;;  %v3550_v22 = vsel %vm3489_vm14, %v3437_v59, %v3549_v19  ;;  %v2461_v28 = vmax.f32 %v2459_v27, %v2460_v9  ;;  %v2468_v30 = vmax.f32 %v2466_v8, %v2467_v17  ;;  %4535 = vst [vmem:[#allocation3 + $0x58] sm:$0xf] %v4334_v21  ;;  %v3783_v25 = vld [vmem:[#allocation2 + $0x20] sm:$0xf]  ;;  %v11761_v21 = vpop.f32.mrf.mxu0 }
 0x21c   : > { %3712 = vst [vmem:[#allocation2 + $0x6c] sm:$0x1] %v3711_v10  ;;  %v2474_v49 = vrot.slane %v2473_v18, 1  ;;  %v3601_v34 = vpack.c.b16 %v3550_v22, %v3550_v22  ;;  %v11280_v35 = vpack.c.bf16 %v2454_v53, %v2454_v53  ;;  %v4342_v40 = vor.u32 %v4341_v20, %v13212_v37 }
 0x21d   : > { %v4345_v44 = vshll.u32 %v4268_v15, 16  ;;  %v11281_v12 = vpack.c.bf16 %v2461_v28, %v2461_v28  ;;  %v11282_v26 = vpack.c.bf16 %v2468_v30, %v2468_v30  ;;  %v10683_v32 = vrot.slane %v4553_v29, 9  ;;  %v13273_v28 = vld [vmem:[#allocation2 + $0x2c] sm:$0x1] }
 0x21e   : > { %v2475_v55 = vmax.f32 %v2473_v18, %v2474_v49  ;;  %v3708_v14 = vsel %vm12765_vm0, %v3601_v34, %v3707_v23  ;;  %v3439_v51 = vunpack.c.l.b16 %v11280_v35  ;;  %v4343_v52 = vrot.slane %v4342_v40, 4 }
 0x21f   : > { %v4347_v24 = vrot.slane %v4345_v44, 5  ;;  %3709 = vst [vmem:[#allocation2 + $0x68] sm:$0xf] %v3708_v14  ;;  %v3440_v57 = vunpack.c.l.b16 %v11281_v12  ;;  %v3441_v47 = vunpack.c.l.b16 %v11282_v26  ;;  %v4623_v61 = vrot.slane %v4554_v54, 5 }
 0x220   : > { %v11283_v37 = vpack.c.bf16 %v2475_v55, %v2475_v55  ;;  %v10684_v1 = vrot.slane %v4555_v63, 9  ;;  %v4627_v62 = vrot.slane %v4556_v4, 5  ;;  %v1078_v11 = vmax.f32 %v13220_v58, 0.0  ;;  %v971_v63 = vpop.f32.mrf.mxu0 }
 0x221   : > { %v4348_v6 = vsel %vm13072_vm4, %v4343_v52, %v4347_v24  ;;  %v3551_v5 = vsel %vm3479_vm9, %v3440_v57, %v3439_v51  ;;  %v4624_v27 = vsel %vm13123_vm1, %v10683_v32, %v4623_v61  ;;  %v1076_v8 = vmax.f32 %v13223_v60, 0.0  ;;  %v11963_v51 = vld [vmem:[%s15019_s3 + $0xb8] sm:$0xff]   ;;  %v13298_v61 = vld [vmem:[%s15018_s2] ss:$0 sm:$0xff] }
 0x222   : > { %v3442_v31 = vunpack.c.l.b16 %v11283_v37  ;;  %4536 = vst [vmem:[#allocation3 + $0x7c] sm:$0xf] %v4348_v6  ;;  %v3552_v59 = vsel %vm3481_vm10, %v3441_v47, %v3551_v5  ;;  %v4628_v39 = vsel %vm13123_vm1, %v10684_v1, %v4627_v62  ;;  %4695 = vst [vmem:[#allocation3 + $0x5c] sm:$0xf] %v4624_v27  ;;  %v2903_v58 = vsel %vm12617_vm7, 0, %v2902_v48  ;;  %11468 = vmatpush3.bf16.msra.mxu1 %v11963_v51 }
 0x223   : > { %v2953_v38 = vsel %vm12610_vm5, 0, %v2952_v0  ;;  %4696 = vst [vmem:[#allocation3 + $0x80] sm:$0xf] %v4628_v39  ;;  %v1118_v53 = vmax.f32 %v1076_v8, %v1078_v11  ;;  %2904 = vst [vmem:[#allocation2 + $0x70] sm:$0x1] %v2903_v58  ;;  %v977_v9 = vadd.f32 %v13090_v2, %v11760_v46  ;;  %v969_v17 = vadd.f32 %v13090_v2, %v968_v3 }
 0x224   : > { %2954 = vst [vmem:[#allocation2 + $0x74] sm:$0x1] %v2953_v38  ;;  %v13267_v60 = vsel %vm3483_vm11, %v3442_v31, %v3552_v59  ;;  %v3867_v18 = vshrl.u32 %v3783_v25, 16  ;;  %v3870_v15 = vshll.u32 %v3783_v25, 16  ;;  %v3876_v19 = vshll.u32 %v3784_v56, 16 }
 0x225   : > { %v3881_v10 = vshrl.u32 %v13257_v45, 16  ;;  %v1550_v20 = vcombine.high %v1118_v53, %v1118_v53  ;;  %v1557_v29 = vrot.slane %v1118_v53, %v12681_v13  ;;  %v1081_v22 = vmax.f32 %v977_v9, 0.0  ;;  %v3752_v59 = vld [vmem:[#allocation2 + $0x58] sm:$0xf] }
 0x226   : > { %v1079_v23 = vmax.f32 %v969_v17, 0.0  ;;  %v13275_v30 = vrot.slane %v3867_v18, 4  ;;  %v13277_v49 = vrot.slane %v3870_v15, 5  ;;  %v13279_v34 = vrot.slane %v3876_v19, 5  ;;  %3768 = vst [vmem:[#allocation3 + $0x144] sm:$0xf] %v3752_v59 }
 0x227   : > { %v13281_v2 = vrot.slane %v3881_v10, 4  ;;  %v1564_v35 = vrot.slane %v1550_v20, %v12681_v13  ;;  %v1565_v40 = vcombine.high %v1557_v29, %v1557_v29  ;;  %v2476_v44 = vsel %vm1831_vm8, %v1557_v29, -inf }
 0x228   : > { %v1119_v54 = vmax.f32 %v1079_v23, %v1081_v22  ;;  %v2477_v46 = vrot.slane %v2476_v44, 4  ;;  %v3873_v55 = vor.u32 %v13277_v49, %v13275_v30  ;;  %v3884_v12 = vshll.u32 %v13257_v45, 16  ;;  %v2905_v49 = vld [vmem:[#allocation2 + $0x78] sm:$0x1] }
 0x229   : > { %v3890_v26 = vshll.u32 %v13273_v28, 16  ;;  %v1566_v4 = vcombine.high %v1564_v35, %v1564_v35  ;;  %v2483_v32 = vsel %vm1831_vm8, %v1565_v40, -inf  ;;  %v2490_v50 = vsel %vm1831_vm8, %v1564_v35, -inf  ;;  %v11950_v24 = vld [vmem:[#allocation3 + $0x58] ss:$36 sps:$4 sm:$0xff]  }
 0x22a   : > { %v1567_v14 = vcombine.high %v1119_v54, %v1119_v54  ;;  %v11948_v52 = vld [vmem:[#allocation3 + $0x5c] ss:$36 sps:$4 sm:$0xff]   ;;  %v2478_v37 = vmax.f32 %v2476_v44, %v2477_v46  ;;  %v2484_v57 = vrot.slane %v2483_v32, 4  ;;  %v1574_v47 = vrot.slane %v1119_v54, %v12681_v13 }
 0x22b   : > { %v13301_v48 = vadd.f32 %v13298_v61, %v11761_v21  ;;  %v2491_v0 = vrot.slane %v2490_v50, 4  ;;  %v2497_v6 = vsel %vm1831_vm8, %v1566_v4, -inf  ;;  %v13306_v62 = vadd.f32 %v13298_v61, %v971_v63  ;;  %6455 = vmatprep.mubr.bf16.mxu0 %v11948_v52 }
 0x22c   : > { %v1581_v1 = vrot.slane %v1567_v14, %v12681_v13  ;;  %v2479_v11 = vrot.slane %v2478_v37, 2  ;;  %v2485_v3 = vmax.f32 %v2483_v32, %v2484_v57  ;;  %v2498_v56 = vrot.slane %v2497_v6, 4  ;;  %6456 = vmatmul.mubr.bf16.gmra.mxu0 %v11950_v24 }
 0x22d   : > { %v1582_v31 = vcombine.high %v1574_v47, %v1574_v47  ;;  %v2492_v5 = vmax.f32 %v2490_v50, %v2491_v0  ;;  %v2504_v8 = vsel %vm1831_vm8, %v1574_v47, -inf  ;;  %v3886_v30 = vrot.slane %v3884_v12, 5 }
 0x22e   : > { %v1583_v27 = vcombine.high %v1581_v1, %v1581_v1  ;;  %v2518_v25 = vsel %vm1831_vm8, %v1581_v1, -inf  ;;  %v2480_v39 = vmax.f32 %v2478_v37, %v2479_v11  ;;  %v2486_v58 = vrot.slane %v2485_v3, 2 }
 0x22f   : > { %v2499_v38 = vmax.f32 %v2497_v6, %v2498_v56  ;;  %v2505_v53 = vrot.slane %v2504_v8, 4  ;;  %v2493_v9 = vrot.slane %v2492_v5, 2  ;;  %v2511_v17 = vsel %vm1831_vm8, %v1582_v31, -inf  ;;  %v3751_v56 = vld [vmem:[#allocation2 + $0x50] sm:$0xf] }
 0x230   : > { %v2519_v18 = vrot.slane %v2518_v25, 4  ;;  %v2525_v15 = vsel %vm1831_vm8, %v1583_v27, -inf  ;;  %v2481_v19 = vrot.slane %v2480_v39, 1  ;;  %v2487_v10 = vmax.f32 %v2485_v3, %v2486_v58  ;;  %3767 = vst [vmem:[#allocation3 + $0x120] sm:$0xf] %v3751_v56 }
 0x231   : > { %v2500_v21 = vrot.slane %v2499_v38, 2  ;;  %v2506_v20 = vmax.f32 %v2504_v8, %v2505_v53  ;;  %v2494_v29 = vmax.f32 %v2492_v5, %v2493_v9  ;;  %v2512_v22 = vrot.slane %v2511_v17, 4  ;;  %v3716_v5 = vld [vmem:[#allocation2 + $0x74] sm:$0x1] }
 0x232   : > { %v2520_v23 = vmax.f32 %v2518_v25, %v2519_v18  ;;  %v2526_v35 = vrot.slane %v2525_v15, 4  ;;  %v2482_v40 = vmax.f32 %v2480_v39, %v2481_v19  ;;  %v2488_v44 = vrot.slane %v2487_v10, 1  ;;  %v11967_v19 = vld [vmem:[%s15019_s3 + $0xf0] sm:$0xff]  }
 0x233   : > { %v2501_v54 = vmax.f32 %v2499_v38, %v2500_v21  ;;  %v2507_v46 = vrot.slane %v2506_v20, 2  ;;  %v2495_v63 = vrot.slane %v2494_v29, 1  ;;  %v2513_v4 = vmax.f32 %v2511_v17, %v2512_v22  ;;  %v11970_v21 = vld [vmem:[%s15019_s3 + $0xe8] sm:$0xff]   ;;  %11469 = vmatprep.subr.bf16.mxu1 %v11967_v19 }
 0x234   : > { %v2521_v32 = vrot.slane %v2520_v23, 2  ;;  %v2527_v50 = vmax.f32 %v2525_v15, %v2526_v35  ;;  %v2489_v14 = vmax.f32 %v2487_v10, %v2488_v44  ;;  %v11284_v52 = vpack.c.bf16 %v2482_v40, %v2482_v40  ;;  %v11764_v15 = vpop.f32.mrf.mxu0  ;;  %v11969_v10 = vld [vmem:[%s15019_s3 + $0xb0] sm:$0xff]  }
 0x235   : > { %v2502_v51 = vrot.slane %v2501_v54, 1  ;;  %v2508_v24 = vmax.f32 %v2506_v20, %v2507_v46  ;;  %v2496_v37 = vmax.f32 %v2494_v29, %v2495_v63  ;;  %v2514_v57 = vrot.slane %v2513_v4, 2  ;;  %v3713_v40 = vld [vmem:[#allocation2 + $0x70] sm:$0xf]  ;;  %11470 = vmatpush3.bf16.msra.mxu1 %v11969_v10 }
 0x236   : > { %v2522_v47 = vmax.f32 %v2520_v23, %v2521_v32  ;;  %v2528_v0 = vrot.slane %v2527_v50, 2  ;;  %v11285_v1 = vpack.c.bf16 %v2489_v14, %v2489_v14  ;;  %v3443_v11 = vunpack.c.l.b16 %v11284_v52  ;;  %v3753_v23 = vld [vmem:[#allocation2 + $0x60] sm:$0xf]  ;;  %11471 = vmatprep.subr.bf16.mxu1 %v11970_v21 }
 0x237   : > { %v2503_v6 = vmax.f32 %v2501_v54, %v2502_v51  ;;  %v2509_v3 = vrot.slane %v2508_v24, 1  ;;  %v11286_v31 = vpack.c.bf16 %v2496_v37, %v2496_v37  ;;  %v2515_v27 = vmax.f32 %v2513_v4, %v2514_v57  ;;  %3769 = vst [vmem:[#allocation3 + $0x168] sm:$0xf] %v3753_v23  ;;  %v4269_v57 = vld [vmem:[#allocation2 + $0x28] sm:$0xf] }
 0x238   : > { %v2523_v8 = vrot.slane %v2522_v47, 1  ;;  %v2529_v25 = vmax.f32 %v2527_v50, %v2528_v0  ;;  %v3444_v59 = vunpack.c.l.b16 %v11285_v1  ;;  %v3554_v39 = vsel %vm3485_vm12, %v3443_v11, %v13267_v60  ;;  %v11973_v1 = vld [vmem:[%s15019_s3 + $0xa8] sm:$0xff]  }
 0x239   : > { %v11331_v58 = vpack.c.bf16 %v2503_v6, %v2503_v6  ;;  %v2510_v38 = vmax.f32 %v2508_v24, %v2509_v3  ;;  %v3445_v53 = vunpack.c.l.b16 %v11286_v31  ;;  %v2516_v9 = vrot.slane %v2515_v27, 1  ;;  %v984_v24 = vpop.f32.mrf.mxu0  ;;  %v3754_v3 = vld [vmem:[#allocation2 + $0x68] sm:$0xf]  ;;  %11472 = vmatpush3.bf16.msra.mxu1 %v11973_v1 }
 0x23a   : > { %v2524_v17 = vmax.f32 %v2522_v47, %v2523_v8  ;;  %v2530_v18 = vrot.slane %v2529_v25, 1  ;;  %v3555_v60 = vsel %vm3487_vm13, %v3444_v59, %v3554_v39  ;;  %v3874_v22 = vrot.slane %v3873_v55, 4  ;;  %v2955_v55 = vld [vmem:[#allocation2 + $0x7c] sm:$0x1]  ;;  %v4270_v47 = vld [vmem:[#allocation2 + $0x2c] sm:$0x1] }
 0x23b   : > { %v3717_v20 = vsel %vm12617_vm7, %v11331_v58, %v3716_v5  ;;  %v11288_v29 = vpack.c.bf16 %v2510_v38, %v2510_v38  ;;  %v3556_v35 = vsel %vm3489_vm14, %v3445_v53, %v3555_v60  ;;  %v2517_v44 = vmax.f32 %v2515_v27, %v2516_v9  ;;  %3770 = vst [vmem:[#allocation3 + $0x18c] sm:$0xf] %v3754_v3  ;;  %v13356_v58 = vld [vmem:[#allocation2 + $0x30] sm:$0xf] }
 0x23c   : > { %3718 = vst [vmem:[#allocation2 + $0x74] sm:$0x1] %v3717_v20  ;;  %v2531_v54 = vmax.f32 %v2529_v25, %v2530_v18  ;;  %v11290_v46 = vpack.c.bf16 %v2524_v17, %v2524_v17  ;;  %v3603_v63 = vpack.c.b16 %v3556_v35, %v3556_v35  ;;  %v3879_v32 = vsel %vm13072_vm4, %v3874_v22, %v13279_v34 }
 0x23d   : > { %v3447_v4 = vunpack.c.l.b16 %v11288_v29  ;;  %v11289_v50 = vpack.c.bf16 %v2517_v44, %v2517_v44  ;;  %v3892_v52 = vrot.slane %v3890_v26, 5  ;;  %4054 = vst [vmem:[#allocation3 + $0x94] sm:$0xf] %v3879_v32  ;;  %v3887_v34 = vor.u32 %v3886_v30, %v13281_v2 }
 0x23e   : > { %v11291_v14 = vpack.c.bf16 %v2531_v54, %v2531_v54  ;;  %v3449_v51 = vunpack.c.l.b16 %v11290_v46  ;;  %v3714_v37 = vsel %vm12765_vm0, %v3603_v63, %v3713_v40  ;;  %v1082_v45 = vmax.f32 %v13301_v48, 0.0 }
 0x23f   : > { %v1080_v12 = vmax.f32 %v13306_v62, 0.0  ;;  %3715 = vst [vmem:[#allocation2 + $0x70] sm:$0xf] %v3714_v37  ;;  %v3448_v0 = vunpack.c.l.b16 %v11289_v50  ;;  %v2906_v28 = vsel %vm12617_vm7, 0, %v2905_v49  ;;  %v2956_v26 = vsel %vm12610_vm5, 0, %v2955_v55  ;;  %v11977_v55 = vld [vmem:[%s15019_s3 + $0xe0] sm:$0xff]  }
 0x240   : > { %v3450_v6 = vunpack.c.l.b16 %v11291_v14  ;;  %v3888_v2 = vrot.slane %v3887_v34, 4  ;;  %2907 = vst [vmem:[#allocation2 + $0x78] sm:$0x1] %v2906_v28  ;;  %2957 = vst [vmem:[#allocation2 + $0x7c] sm:$0x1] %v2956_v26  ;;  %v993_v48 = vadd.f32 %v13298_v61, %v11764_v15  ;;  %v985_v62 = vadd.f32 %v13298_v61, %v984_v24  ;;  %v11979_v24 = vld [vmem:[%s15019_s3 + $0xa0] sm:$0xff]   ;;  %11473 = vmatprep.subr.bf16.mxu1 %v11977_v55 }
 0x241   : > { %v1120_v11 = vmax.f32 %v1080_v12, %v1082_v45  ;;  %v3557_v56 = vsel %vm3479_vm9, %v3448_v0, %v3447_v4  ;;  %v4350_v31 = vshrl.u32 %v4269_v57, 16  ;;  %v4353_v5 = vshll.u32 %v4269_v57, 16  ;;  %v11980_v37 = vld [vmem:[%s15019_s3 + $0xd8] sm:$0xff]   ;;  %v11953_v45 = vld [vmem:[#allocation3 + $0x90] ss:$36 sps:$4 sm:$0xff]   ;;  %11474 = vmatpush3.bf16.msra.mxu1 %v11979_v24 }
 0x242   : > { %v4359_v27 = vshll.u32 %v4270_v47, 16  ;;  %v3558_v8 = vsel %vm3481_vm10, %v3449_v51, %v3557_v56  ;;  %v3893_v25 = vsel %vm13072_vm4, %v3888_v2, %v3892_v52  ;;  %v1085_v53 = vmax.f32 %v993_v48, 0.0  ;;  %11475 = vmatprep.subr.bf16.mxu1 %v11980_v37  ;;  %v11983_v56 = vld [vmem:[%s15019_s3 + $0x98] sm:$0xff]  }
 0x243   : > { %v1584_v59 = vcombine.high %v1120_v11, %v1120_v11  ;;  %v1591_v39 = vrot.slane %v1120_v11, %v12681_v13  ;;  %4055 = vst [vmem:[#allocation3 + $0xb8] sm:$0xf] %v3893_v25  ;;  %v13359_v38 = vsel %vm3483_vm11, %v3450_v6, %v3558_v8  ;;  %v1083_v9 = vmax.f32 %v985_v62, 0.0 }
 0x244   : > { %v4352_v17 = vrot.slane %v4350_v31, 4  ;;  %v4355_v10 = vrot.slane %v4353_v5, 5  ;;  %v4361_v20 = vrot.slane %v4359_v27, 5  ;;  %v4364_v29 = vshrl.u32 %v13356_v58, 16 }
 0x245   : > { %v1598_v18 = vrot.slane %v1584_v59, %v12681_v13  ;;  %v1599_v15 = vcombine.high %v1591_v39, %v1591_v39  ;;  %v2532_v19 = vsel %vm1831_vm8, %v1591_v39, -inf  ;;  %v1121_v60 = vmax.f32 %v1083_v9, %v1085_v53  ;;  %11476 = vmatpush3.bf16.msra.mxu1 %v11983_v56 }
 0x246   : > { %v2533_v21 = vrot.slane %v2532_v19, 4  ;;  %v4356_v40 = vor.u32 %v4355_v10, %v4352_v17  ;;  %v13368_v49 = vrot.slane %v4364_v29, 4  ;;  %v3755_v2 = vld [vmem:[#allocation2 + $0x70] sm:$0xf] }
 0x247   : > { %v1600_v22 = vcombine.high %v1598_v18, %v1598_v18  ;;  %v2539_v23 = vsel %vm1831_vm8, %v1599_v15, -inf  ;;  %v2546_v35 = vsel %vm1831_vm8, %v1598_v18, -inf  ;;  %v1601_v63 = vcombine.high %v1121_v60, %v1121_v60  ;;  %3771 = vst [vmem:[#allocation3 + $0x1b0] sm:$0xf] %v3755_v2 }
 0x248   : > { %v2534_v44 = vmax.f32 %v2532_v19, %v2533_v21  ;;  %v2540_v54 = vrot.slane %v2539_v23, 4  ;;  %v2547_v46 = vrot.slane %v2546_v35, 4  ;;  %v1608_v32 = vrot.slane %v1121_v60, %v12681_v13 }
 0x249   : > { %v2553_v4 = vsel %vm1831_vm8, %v1600_v22, -inf  ;;  %v4357_v30 = vrot.slane %v4356_v40, 4  ;;  %v1615_v12 = vrot.slane %v1601_v63, %v12681_v13  ;;  %v4272_v63 = vld [vmem:[#allocation2 + $0x34] sm:$0x1] }
 0x24a   : > { %v2535_v50 = vrot.slane %v2534_v44, 2  ;;  %v2541_v14 = vmax.f32 %v2539_v23, %v2540_v54  ;;  %v2548_v51 = vmax.f32 %v2546_v35, %v2547_v46  ;;  %v2554_v52 = vrot.slane %v2553_v4, 4  ;;  %v11951_v34 = vld [vmem:[#allocation3 + $0x94] ss:$36 sps:$4 sm:$0xff]  }
 0x24b   : > { %v1616_v57 = vcombine.high %v1608_v32, %v1608_v32  ;;  %v2560_v47 = vsel %vm1831_vm8, %v1608_v32, -inf  ;;  %v4362_v0 = vsel %vm13072_vm4, %v4357_v30, %v4361_v20  ;;  %6269 = vmatprep.mubr.bf16.mxu1 %v11951_v34  ;;  %v1617_v11 = vcombine.high %v1615_v12, %v1615_v12  ;;  %v13389_v20 = vpop.f32.mrf.mxu0 }
 0x24c   : > { %v2536_v6 = vmax.f32 %v2534_v44, %v2535_v50  ;;  %v2542_v28 = vrot.slane %v2541_v14, 2  ;;  %v2549_v26 = vrot.slane %v2548_v51, 2  ;;  %v2555_v1 = vmax.f32 %v2553_v4, %v2554_v52  ;;  %4537 = vst [vmem:[#allocation3 + $0xa0] sm:$0xf] %v4362_v0  ;;  %6270 = vmatmul.mubr.bf16.gmra.mxu1 %v11953_v45  ;;  %v3722_v50 = vld [vmem:[#allocation2 + $0x7c] sm:$0x1] }
 0x24d   : > { %v2561_v48 = vrot.slane %v2560_v47, 4  ;;  %v2567_v62 = vsel %vm1831_vm8, %v1616_v57, -inf  ;;  %v2574_v3 = vsel %vm1831_vm8, %v1615_v12, -inf  ;;  %v2581_v53 = vsel %vm1831_vm8, %v1617_v11, -inf  ;;  %v13394_v45 = vpop.f32.mrf.mxu0  ;;  %v11989_v12 = vld [vmem:[%s15019_s3 + $0x90] sm:$0xff]   ;;  %v11990_v57 = vld [vmem:[%s15019_s3 + $0x238] sm:$0xff]  }
 0x24e   : > { %v2537_v31 = vrot.slane %v2536_v6, 1  ;;  %v2543_v5 = vmax.f32 %v2541_v14, %v2542_v28  ;;  %v2550_v27 = vmax.f32 %v2548_v51, %v2549_v26  ;;  %v2556_v8 = vrot.slane %v2555_v1, 2  ;;  %v11987_v14 = vld [vmem:[%s15019_s3 + $0xd0] sm:$0xff]   ;;  %v4229_v51 = vld [vmem:[#allocation2 + $0x8] sm:$0xf]  ;;  %11774 = vmatprep.subr.bf16.mxu0 %v11990_v57 }
 0x24f   : > { %v2562_v25 = vmax.f32 %v2560_v47, %v2561_v48  ;;  %v2568_v59 = vrot.slane %v2567_v62, 4  ;;  %v2575_v39 = vrot.slane %v2574_v3, 4  ;;  %v2582_v60 = vrot.slane %v2581_v53, 4  ;;  %v11991_v47 = vld [vmem:[%s15019_s3 + $0x230] sm:$0xff]   ;;  %4245 = vst [vmem:[#allocation3 + $0xc] sm:$0xf] %v4229_v51  ;;  %11477 = vmatprep.subr.bf16.mxu1 %v11987_v14  ;;  %11775 = vmatpush3.bf16.msra.mxu0 %v11990_v57 }
 0x250   : > { %v2538_v9 = vmax.f32 %v2536_v6, %v2537_v31  ;;  %v2544_v17 = vrot.slane %v2543_v5, 1  ;;  %v2551_v18 = vrot.slane %v2550_v27, 1  ;;  %v2557_v15 = vmax.f32 %v2555_v1, %v2556_v8  ;;  %v11992_v1 = vld [vmem:[%s15019_s3 + $0xc8] sm:$0xff]   ;;  %11478 = vmatpush3.bf16.msra.mxu1 %v11989_v12  ;;  %v3719_v8 = vld [vmem:[#allocation2 + $0x78] sm:$0xf]  ;;  %11776 = vmatprep.subr.bf16.mxu0 %v11991_v47  ;;  %v11998_v51 = vld [vmem:[%s15019_s3 + $0x220] sm:$0xff]  }
 0x251   : > { %v2563_v19 = vrot.slane %v2562_v25, 2  ;;  %v2569_v10 = vmax.f32 %v2567_v62, %v2568_v59  ;;  %v2576_v21 = vmax.f32 %v2574_v3, %v2575_v39  ;;  %v2583_v46 = vmax.f32 %v2581_v53, %v2582_v60  ;;  %11479 = vmatprep.subr.bf16.mxu1 %v11992_v1  ;;  %v4558_v53 = vld [vmem:[#allocation2 + $0x2c] sm:$0x1]  ;;  %v4710_v12 = vld [vmem:[#allocation2 + $0x10] sm:$0xf] }
 0x252   : > { %v2545_v29 = vmax.f32 %v2543_v5, %v2544_v17  ;;  %v2552_v22 = vmax.f32 %v2550_v27, %v2551_v18  ;;  %v2558_v23 = vrot.slane %v2557_v15, 1  ;;  %v11292_v35 = vpack.c.bf16 %v2538_v9, %v2538_v9  ;;  %v4557_v5 = vld [vmem:[#allocation2 + $0x28] sm:$0xe]  ;;  %v11768_v9 = vpop.f32.mrf.mxu0  ;;  %4726 = vst [vmem:[#allocation3 + $0x18] sm:$0xf] %v4710_v12 }
 0x253   : > { %v2564_v40 = vmax.f32 %v2562_v25, %v2563_v19  ;;  %v2570_v44 = vrot.slane %v2569_v10, 2  ;;  %v2577_v54 = vrot.slane %v2576_v21, 2  ;;  %v2584_v34 = vrot.slane %v2583_v46, 2  ;;  %v11995_v17 = vld [vmem:[%s15019_s3 + $0x88] sm:$0xff]   ;;  %11777 = vmatpush3.bf16.msra.mxu0 %v11991_v47 }
 0x254   : > { %v2559_v4 = vmax.f32 %v2557_v15, %v2558_v23  ;;  %v11293_v32 = vpack.c.bf16 %v2545_v29, %v2545_v29  ;;  %v11294_v30 = vpack.c.bf16 %v2552_v22, %v2552_v22  ;;  %v3451_v55 = vunpack.c.l.b16 %v11292_v35  ;;  %v4560_v23 = vld [vmem:[#allocation2 + $0x34] sm:$0x1]  ;;  %11480 = vmatpush3.bf16.msra.mxu1 %v11995_v17  ;;  %v1000_v14 = vpop.f32.mrf.mxu0 }
 0x255   : > { %v2565_v52 = vrot.slane %v2564_v40, 1  ;;  %v2571_v24 = vmax.f32 %v2569_v10, %v2570_v44  ;;  %v2578_v37 = vmax.f32 %v2576_v21, %v2577_v54  ;;  %v2585_v62 = vmax.f32 %v2583_v46, %v2584_v34  ;;  %v4559_v10 = vld [vmem:[#allocation2 + $0x30] sm:$0xe]  ;;  %v11997_v21 = vld [vmem:[%s15019_s3 + $0x228] sm:$0xff]   ;;  %v2958_v34 = vld [vmem:[#allocation2 + $0x84] sm:$0x1] }
 0x256   : > { %v3452_v0 = vunpack.c.l.b16 %v11293_v32  ;;  %v3453_v6 = vunpack.c.l.b16 %v11294_v30  ;;  %v3560_v28 = vsel %vm3485_vm12, %v3451_v55, %v13359_v38  ;;  %v11332_v26 = vpack.c.bf16 %v2559_v4, %v2559_v4  ;;  %v4230_v4 = vld [vmem:[#allocation2 + $0x10] sm:$0xf]  ;;  %11778 = vmatprep.subr.bf16.mxu0 %v11997_v21 }
 0x257   : > { %v2566_v2 = vmax.f32 %v2564_v40, %v2565_v52  ;;  %v2572_v11 = vrot.slane %v2571_v24, 1  ;;  %v2579_v48 = vrot.slane %v2578_v37, 1  ;;  %v4367_v31 = vshll.u32 %v13356_v58, 16  ;;  %4246 = vst [vmem:[#allocation3 + $0x30] sm:$0xf] %v4230_v4  ;;  %11779 = vmatpush3.bf16.msra.mxu0 %v11997_v21 }
 0x258   : > { %v3561_v3 = vsel %vm3487_vm13, %v3452_v0, %v3560_v28  ;;  %v3723_v56 = vsel %vm12617_vm7, %v11332_v26, %v3722_v50  ;;  %v4373_v38 = vshll.u32 %v4272_v63, 16  ;;  %v2586_v39 = vrot.slane %v2585_v62, 1  ;;  %v2908_v63 = vld [vmem:[#allocation2 + $0x80] sm:$0x1]  ;;  %v3787_v28 = vld [vmem:[#allocation2 + $0x30] sm:$0xf]  ;;  %11780 = vmatprep.subr.bf16.mxu0 %v11998_v51 }
 0x259   : > { %v3562_v27 = vsel %vm3489_vm14, %v3453_v6, %v3561_v3  ;;  %3724 = vst [vmem:[#allocation2 + $0x7c] sm:$0x1] %v3723_v56  ;;  %v2573_v25 = vmax.f32 %v2571_v24, %v2572_v11  ;;  %v2580_v59 = vmax.f32 %v2578_v37, %v2579_v48  ;;  %v11296_v58 = vpack.c.bf16 %v2566_v2, %v2566_v2  ;;  %v3788_v26 = vld [vmem:[#allocation2 + $0x34] sm:$0x1]  ;;  %v3789_v48 = vld [vmem:[#allocation2 + $0x38] sm:$0xf] }
 0x25a   : > { %v3605_v18 = vpack.c.b16 %v3562_v27, %v3562_v27  ;;  %v4369_v15 = vrot.slane %v4367_v31, 5  ;;  %v4375_v19 = vrot.slane %v4373_v38, 5  ;;  %v2587_v60 = vmax.f32 %v2585_v62, %v2586_v39  ;;  %v11769_v38 = vpop.f32.mrf.mxu0  ;;  %v12004_v27 = vld [vmem:[%s15019_s3 + $0x218] sm:$0xff]  }
 0x25b   : > { %v11297_v29 = vpack.c.bf16 %v2573_v25, %v2573_v25  ;;  %v11298_v22 = vpack.c.bf16 %v2580_v59, %v2580_v59  ;;  %v10685_v35 = vrot.slane %v4557_v5, 9  ;;  %v3455_v44 = vunpack.c.l.b16 %v11296_v58  ;;  %v12003_v5 = vld [vmem:[%s15019_s3 + $0x80] sm:$0xff]   ;;  %11781 = vmatpush3.bf16.msra.mxu0 %v11998_v51 }
 0x25c   : > { %v3720_v40 = vsel %vm12765_vm0, %v3605_v18, %v3719_v8  ;;  %v4370_v54 = vor.u32 %v4369_v15, %v13368_v49  ;;  %v4631_v46 = vrot.slane %v4558_v53, 5  ;;  %v11299_v32 = vpack.c.bf16 %v2587_v60, %v2587_v60  ;;  %11782 = vmatprep.subr.bf16.mxu0 %v12004_v27 }
 0x25d   : > { %3721 = vst [vmem:[#allocation2 + $0x78] sm:$0xf] %v3720_v40  ;;  %v3456_v30 = vunpack.c.l.b16 %v11297_v29  ;;  %v3457_v55 = vunpack.c.l.b16 %v11298_v22  ;;  %v10686_v50 = vrot.slane %v4559_v10, 9  ;;  %v4635_v24 = vrot.slane %v4560_v23, 5  ;;  %v1003_v40 = vpop.f32.mrf.mxu0 }
 0x25e   : > { %v4371_v52 = vrot.slane %v4370_v54, 4  ;;  %v4632_v49 = vsel %vm13123_vm1, %v10685_v35, %v4631_v46  ;;  %v996_v37 = vadd.f32 %v13298_v61, %v13389_v20  ;;  %v3458_v57 = vunpack.c.l.b16 %v11299_v32  ;;  %v12011_v32 = vld [vmem:[%s15019_s3 + $0x1f8] sm:$0xff]  }
 0x25f   : > { %v3563_v47 = vsel %vm3479_vm9, %v3456_v30, %v3455_v44  ;;  %4697 = vst [vmem:[#allocation3 + $0xa4] sm:$0xf] %v4632_v49  ;;  %v988_v0 = vadd.f32 %v13298_v61, %v13394_v45  ;;  %v2909_v6 = vsel %vm12617_vm7, 0, %v2908_v63  ;;  %v4636_v2 = vsel %vm13123_vm1, %v10686_v50, %v4635_v24  ;;  %v12001_v45 = vld [vmem:[%s15019_s3 + $0xc0] sm:$0xff]   ;;  %v12008_v44 = vld [vmem:[%s15019_s3 + $0x210] sm:$0xff]   ;;  %11783 = vmatpush3.bf16.msra.mxu0 %v12004_v27 }
 0x260   : > { %v3564_v1 = vsel %vm3481_vm10, %v3457_v55, %v3563_v47  ;;  %v4376_v20 = vsel %vm13072_vm4, %v4371_v52, %v4375_v19  ;;  %v1086_v11 = vmax.f32 %v996_v37, 0.0  ;;  %2910 = vst [vmem:[#allocation2 + $0x80] sm:$0x1] %v2909_v6  ;;  %4698 = vst [vmem:[#allocation3 + $0xc8] sm:$0xf] %v4636_v2  ;;  %v2959_v3 = vsel %vm12610_vm5, 0, %v2958_v34  ;;  %11481 = vmatprep.subr.bf16.mxu1 %v12001_v45 }
 0x261   : > { %4538 = vst [vmem:[#allocation3 + $0xc4] sm:$0xf] %v4376_v20  ;;  %v1084_v62 = vmax.f32 %v988_v0, 0.0  ;;  %v13447_v56 = vsel %vm3483_vm11, %v3458_v57, %v3564_v1  ;;  %v1009_v31 = vadd.f32 %v13298_v61, %v11768_v9  ;;  %2960 = vst [vmem:[#allocation2 + $0x84] sm:$0x1] %v2959_v3  ;;  %v1001_v8 = vadd.f32 %v13298_v61, %v1000_v14  ;;  %v12014_v20 = vld [vmem:[%s15019_s3 + $0x208] sm:$0xff]  }
 0x262   : > { %v3895_v25 = vshrl.u32 %v3787_v28, 16  ;;  %v3898_v59 = vshll.u32 %v3787_v28, 16  ;;  %v3904_v39 = vshll.u32 %v3788_v26, 16  ;;  %v13457_v9 = vld [vmem:[#allocation2 + $0x3c] sm:$0x1]  ;;  %v3909_v18 = vshrl.u32 %v3789_v48, 16  ;;  %11482 = vmatpush3.bf16.msra.mxu1 %v12003_v5  ;;  %11784 = vmatprep.subr.bf16.mxu0 %v12008_v44 }
 0x263   : > { %v1122_v53 = vmax.f32 %v1084_v62, %v1086_v11  ;;  %v1089_v17 = vmax.f32 %v1009_v31, 0.0  ;;  %v3912_v58 = vshll.u32 %v3789_v48, 16  ;;  %v1087_v15 = vmax.f32 %v1001_v8, 0.0  ;;  %11595 = vmatprep.subr.bf16.mxu1 %v12011_v32  ;;  %v4231_v2 = vld [vmem:[#allocation2 + $0x18] sm:$0xf]  ;;  %11785 = vmatpush3.bf16.msra.mxu0 %v12008_v44 }
 0x264   : > { %v3897_v19 = vrot.slane %v3895_v25, 4  ;;  %v3900_v10 = vrot.slane %v3898_v59, 5  ;;  %v3906_v21 = vrot.slane %v3904_v39, 5  ;;  %v3756_v60 = vld [vmem:[#allocation2 + $0x78] sm:$0xf]  ;;  %v13460_v23 = vrot.slane %v3909_v18, 4  ;;  %11786 = vmatprep.subr.bf16.mxu0 %v12014_v20 }
 0x265   : > { %v1618_v29 = vcombine.high %v1122_v53, %v1122_v53  ;;  %v1625_v22 = vrot.slane %v1122_v53, %v12681_v13  ;;  %v13462_v35 = vrot.slane %v3912_v58, 5  ;;  %3772 = vst [vmem:[#allocation3 + $0x1d4] sm:$0xf] %v3756_v60  ;;  %v1123_v54 = vmax.f32 %v1087_v15, %v1089_v17  ;;  %v4232_v3 = vld [vmem:[#allocation2 + $0x20] sm:$0xf] }
 0x266   : > { %v3901_v46 = vor.u32 %v3900_v10, %v3897_v19  ;;  %v3918_v63 = vshll.u32 %v13457_v9, 16  ;;  %v13469_v4 = vadd.f32 %v13298_v61, %v11769_v38  ;;  %v13480_v34 = vadd.f32 %v13298_v61, %v1003_v40  ;;  %4247 = vst [vmem:[#allocation3 + $0x54] sm:$0xf] %v4231_v2  ;;  %4248 = vst [vmem:[#allocation3 + $0x78] sm:$0xf] %v4232_v3  ;;  %v12018_v53 = vld [vmem:[%s15019_s3 + $0x200] sm:$0xff]  }
 0x267   : > { %v1632_v30 = vrot.slane %v1618_v29, %v12681_v13  ;;  %v1633_v55 = vcombine.high %v1625_v22, %v1625_v22  ;;  %v2588_v50 = vsel %vm1831_vm8, %v1625_v22, -inf  ;;  %v3915_v14 = vor.u32 %v13462_v35, %v13460_v23  ;;  %v11954_v51 = vld [vmem:[#allocation3 + $0xa4] ss:$36 sps:$4 sm:$0xff]   ;;  %v4711_v29 = vld [vmem:[#allocation2 + $0x18] sm:$0xf]  ;;  %11787 = vmatpush3.bf16.msra.mxu0 %v12014_v20 }
 0x268   : > { %v11956_v52 = vld [vmem:[#allocation3 + $0xa0] ss:$36 sps:$4 sm:$0xff]   ;;  %v2589_v49 = vrot.slane %v2588_v50, 4  ;;  %v1635_v24 = vcombine.high %v1123_v54, %v1123_v54  ;;  %v1642_v37 = vrot.slane %v1123_v54, %v12681_v13  ;;  %v3902_v0 = vrot.slane %v3901_v46, 4  ;;  %6463 = vmatprep.mubr.bf16.mxu0 %v11954_v51  ;;  %4727 = vst [vmem:[#allocation3 + $0x3c] sm:$0xf] %v4711_v29  ;;  %11788 = vmatprep.subr.bf16.mxu0 %v12018_v53 }
 0x269   : > { %v1634_v12 = vcombine.high %v1632_v30, %v1632_v30  ;;  %v2595_v57 = vsel %vm1831_vm8, %v1633_v55, -inf  ;;  %v2602_v47 = vsel %vm1831_vm8, %v1632_v30, -inf  ;;  %6464 = vmatmul.mubr.bf16.gmra.mxu0 %v11956_v52  ;;  %v1090_v23 = vmax.f32 %v13469_v4, 0.0  ;;  %v4235_v35 = vld [vmem:[#allocation2 + $0x38] sm:$0xf] }
 0x26a   : > { %v2590_v6 = vmax.f32 %v2588_v50, %v2589_v49  ;;  %v2596_v28 = vrot.slane %v2595_v57, 4  ;;  %v2603_v26 = vrot.slane %v2602_v47, 4  ;;  %v1649_v1 = vrot.slane %v1635_v24, %v12681_v13  ;;  %4251 = vst [vmem:[#allocation3 + $0xe4] sm:$0xf] %v4235_v35 }
 0x26b   : > { %v2609_v11 = vsel %vm1831_vm8, %v1634_v12, -inf  ;;  %v1650_v48 = vcombine.high %v1642_v37, %v1642_v37  ;;  %v2616_v45 = vsel %vm1831_vm8, %v1642_v37, -inf  ;;  %v3907_v62 = vsel %vm13072_vm4, %v3902_v0, %v3906_v21  ;;  %11789 = vmatpush3.bf16.msra.mxu0 %v12018_v53 }
 0x26c   : > { %v2591_v31 = vrot.slane %v2590_v6, 2  ;;  %v2597_v38 = vmax.f32 %v2595_v57, %v2596_v28  ;;  %v2604_v5 = vmax.f32 %v2602_v47, %v2603_v26  ;;  %v2610_v27 = vrot.slane %v2609_v11, 4  ;;  %4056 = vst [vmem:[#allocation3 + $0xdc] sm:$0xf] %v3907_v62  ;;  %v4233_v26 = vld [vmem:[#allocation2 + $0x28] sm:$0xf] }
 0x26d   : > { %v1651_v8 = vcombine.high %v1649_v1, %v1649_v1  ;;  %v2617_v25 = vrot.slane %v2616_v45, 4  ;;  %v2623_v59 = vsel %vm1831_vm8, %v1650_v48, -inf  ;;  %v2630_v39 = vsel %vm1831_vm8, %v1649_v1, -inf  ;;  %v4234_v1 = vld [vmem:[#allocation2 + $0x30] sm:$0xf] }
 0x26e   : > { %v2592_v17 = vmax.f32 %v2590_v6, %v2591_v31  ;;  %v2598_v18 = vrot.slane %v2597_v38, 2  ;;  %v2605_v58 = vrot.slane %v2604_v5, 2  ;;  %v2611_v15 = vmax.f32 %v2609_v11, %v2610_v27  ;;  %4249 = vst [vmem:[#allocation3 + $0x9c] sm:$0xf] %v4233_v26  ;;  %4250 = vst [vmem:[#allocation3 + $0xc0] sm:$0xf] %v4234_v1 }
 0x26f   : > { %v2618_v19 = vmax.f32 %v2616_v45, %v2617_v25  ;;  %v2624_v10 = vrot.slane %v2623_v59, 4  ;;  %v2631_v21 = vrot.slane %v2630_v39, 4  ;;  %v2637_v60 = vsel %vm1831_vm8, %v1651_v8, -inf  ;;  %v11772_v45 = vpop.f32.mrf.mxu0  ;;  %v4274_v1 = vld [vmem:[#allocation2 + $0x3c] sm:$0x1] }
 0x270   : > { %v2593_v22 = vrot.slane %v2592_v17, 1  ;;  %v2599_v40 = vmax.f32 %v2597_v38, %v2598_v18  ;;  %v2606_v44 = vmax.f32 %v2604_v5, %v2605_v58  ;;  %v2612_v54 = vrot.slane %v2611_v15, 2  ;;  %v3728_v5 = vld [vmem:[#allocation2 + $0x84] sm:$0x1] }
 0x271   : > { %v2619_v46 = vrot.slane %v2618_v19, 2  ;;  %v2625_v32 = vmax.f32 %v2623_v59, %v2624_v10  ;;  %v2632_v30 = vmax.f32 %v2630_v39, %v2631_v21  ;;  %v2638_v55 = vrot.slane %v2637_v60, 4  ;;  %v1016_v21 = vpop.f32.mrf.mxu0 }
 0x272   : > { %v2594_v50 = vmax.f32 %v2592_v17, %v2593_v22  ;;  %v2600_v51 = vrot.slane %v2599_v40, 1  ;;  %v2607_v52 = vrot.slane %v2606_v44, 1  ;;  %v2613_v49 = vmax.f32 %v2611_v15, %v2612_v54 }
 0x273   : > { %v2620_v24 = vmax.f32 %v2618_v19, %v2619_v46  ;;  %v2626_v37 = vrot.slane %v2625_v32, 2  ;;  %v2633_v12 = vrot.slane %v2632_v30, 2  ;;  %v2639_v57 = vmax.f32 %v2637_v60, %v2638_v55  ;;  %v2961_v55 = vld [vmem:[#allocation2 + $0x8c] sm:$0x1] }
 0x274   : > { %v2601_v47 = vmax.f32 %v2599_v40, %v2600_v51  ;;  %v2608_v0 = vmax.f32 %v2606_v44, %v2607_v52  ;;  %v2614_v6 = vrot.slane %v2613_v49, 1  ;;  %v11300_v28 = vpack.c.bf16 %v2594_v50, %v2594_v50  ;;  %v3725_v44 = vld [vmem:[#allocation2 + $0x80] sm:$0xf] }
 0x275   : > { %v2621_v20 = vrot.slane %v2620_v24, 1  ;;  %v2627_v2 = vmax.f32 %v2625_v32, %v2626_v37  ;;  %v2634_v11 = vmax.f32 %v2632_v30, %v2633_v12  ;;  %v2640_v48 = vrot.slane %v2639_v57, 2  ;;  %v2911_v30 = vld [vmem:[#allocation2 + $0x88] sm:$0x1]  ;;  %v11773_v37 = vpop.f32.mrf.mxu0  ;;  %v4236_v12 = vld [vmem:[#allocation2 + $0x40] sm:$0xf] }
 0x276   : > { %v2615_v62 = vmax.f32 %v2613_v49, %v2614_v6  ;;  %v11301_v3 = vpack.c.bf16 %v2601_v47, %v2601_v47  ;;  %v11302_v31 = vpack.c.bf16 %v2608_v0, %v2608_v0  ;;  %v3459_v38 = vunpack.c.l.b16 %v11300_v28  ;;  %4252 = vst [vmem:[#allocation3 + $0x108] sm:$0xf] %v4236_v12 }
 0x277   : > { %v2622_v27 = vmax.f32 %v2620_v24, %v2621_v20  ;;  %v2628_v8 = vrot.slane %v2627_v2, 1  ;;  %v2635_v25 = vrot.slane %v2634_v11, 1  ;;  %v2641_v59 = vmax.f32 %v2639_v57, %v2640_v48  ;;  %v4273_v24 = vld [vmem:[#allocation2 + $0x38] sm:$0xf]  ;;  %v13522_v20 = vld [vmem:[#allocation2 + $0x40] sm:$0xf] }
 0x278   : > { %v3460_v39 = vunpack.c.l.b16 %v11301_v3  ;;  %v3461_v53 = vunpack.c.l.b16 %v11302_v31  ;;  %v3566_v17 = vsel %vm3485_vm12, %v3459_v38, %v13447_v56  ;;  %v11333_v18 = vpack.c.bf16 %v2615_v62, %v2615_v62 }
 0x279   : > { %v2629_v58 = vmax.f32 %v2627_v2, %v2628_v8  ;;  %v2636_v15 = vmax.f32 %v2634_v11, %v2635_v25  ;;  %v2642_v19 = vrot.slane %v2641_v59, 1  ;;  %v11304_v10 = vpack.c.bf16 %v2622_v27, %v2622_v27 }
 0x27a   : > { %v3567_v60 = vsel %vm3487_vm13, %v3460_v39, %v3566_v17  ;;  %v3729_v29 = vsel %vm12617_vm7, %v11333_v18, %v3728_v5  ;;  %v3916_v22 = vrot.slane %v3915_v14, 4  ;;  %v3920_v40 = vrot.slane %v3918_v63, 5  ;;  %v1019_v5 = vpop.f32.mrf.mxu0 }
 0x27b   : > { %v3568_v56 = vsel %vm3489_vm14, %v3461_v53, %v3567_v60  ;;  %3730 = vst [vmem:[#allocation2 + $0x84] sm:$0x1] %v3729_v29  ;;  %v2643_v54 = vmax.f32 %v2641_v59, %v2642_v19  ;;  %v11305_v46 = vpack.c.bf16 %v2629_v58, %v2629_v58  ;;  %v11306_v32 = vpack.c.bf16 %v2636_v15, %v2636_v15  ;;  %v11959_v58 = vld [vmem:[#allocation3 + $0xd8] ss:$36 sps:$4 sm:$0xff]  }
 0x27c   : > { %v3607_v50 = vpack.c.b16 %v3568_v56, %v3568_v56  ;;  %v3463_v51 = vunpack.c.l.b16 %v11304_v10  ;;  %v3921_v52 = vsel %vm13072_vm4, %v3916_v22, %v3920_v40  ;;  %v1088_v49 = vmax.f32 %v13480_v34, 0.0  ;;  %v12364_v10 = vld [vmem:[%s15018_s2] ss:$0 sm:$0xff] }
 0x27d   : > { %v11307_v14 = vpack.c.bf16 %v2643_v54, %v2643_v54  ;;  %v3464_v9 = vunpack.c.l.b16 %v11305_v46  ;;  %v3465_v63 = vunpack.c.l.b16 %v11306_v32  ;;  %4057 = vst [vmem:[#allocation3 + $0x100] sm:$0xf] %v3921_v52  ;;  %v2912_v47 = vsel %vm12617_vm7, 0, %v2911_v30 }
 0x27e   : > { %v3726_v57 = vsel %vm12765_vm0, %v3607_v50, %v3725_v44  ;;  %v2962_v4 = vsel %vm12610_vm5, 0, %v2961_v55  ;;  %v1025_v0 = vadd.f32 %v13298_v61, %v11772_v45  ;;  %v1124_v28 = vmax.f32 %v1088_v49, %v1090_v23  ;;  %2913 = vst [vmem:[#allocation2 + $0x88] sm:$0x1] %v2912_v47 }
 0x27f   : > { %3727 = vst [vmem:[#allocation2 + $0x80] sm:$0xf] %v3726_v57  ;;  %v3466_v6 = vunpack.c.l.b16 %v11307_v14  ;;  %v3569_v34 = vsel %vm3479_vm9, %v3464_v9, %v3463_v51  ;;  %2963 = vst [vmem:[#allocation2 + $0x8c] sm:$0x1] %v2962_v4  ;;  %v1017_v26 = vadd.f32 %v13298_v61, %v1016_v21  ;;  %v4378_v48 = vshrl.u32 %v4273_v24, 16 }
 0x280   : > { %v3570_v2 = vsel %vm3481_vm10, %v3465_v63, %v3569_v34  ;;  %v1093_v11 = vmax.f32 %v1025_v0, 0.0  ;;  %v4381_v62 = vshll.u32 %v4273_v24, 16  ;;  %v1652_v3 = vcombine.high %v1124_v28, %v1124_v28 }
 0x281   : > { %v1659_v45 = vrot.slane %v1124_v28, %v12681_v13  ;;  %v13527_v31 = vsel %vm3483_vm11, %v3466_v6, %v3570_v2  ;;  %v1091_v38 = vmax.f32 %v1017_v26, 0.0  ;;  %v4380_v27 = vrot.slane %v4378_v48, 4  ;;  %v4237_v48 = vld [vmem:[#allocation2 + $0x58] sm:$0xf] }
 0x282   : > { %v4383_v8 = vrot.slane %v4381_v62, 5  ;;  %v4387_v25 = vshll.u32 %v4274_v1, 16  ;;  %v4392_v61 = vshrl.u32 %v13522_v20, 16  ;;  %v1666_v59 = vrot.slane %v1652_v3, %v12681_v13  ;;  %v4238_v62 = vld [vmem:[#allocation2 + $0x60] sm:$0xf] }
 0x283   : > { %v1667_v39 = vcombine.high %v1659_v45, %v1659_v45  ;;  %v2644_v53 = vsel %vm1831_vm8, %v1659_v45, -inf  ;;  %v1125_v17 = vmax.f32 %v1091_v38, %v1093_v11  ;;  %v13535_v21 = vadd.f32 %v12364_v10, %v11773_v37  ;;  %4253 = vst [vmem:[#allocation3 + $0x12c] sm:$0xf] %v4237_v48  ;;  %4254 = vst [vmem:[#allocation3 + $0x150] sm:$0xf] %v4238_v62 }
 0x284   : > { %v11957_v18 = vld [vmem:[#allocation3 + $0xdc] ss:$36 sps:$4 sm:$0xff]   ;;  %v2645_v15 = vrot.slane %v2644_v53, 4  ;;  %v4384_v19 = vor.u32 %v4383_v8, %v4380_v27  ;;  %v13537_v60 = vadd.f32 %v12364_v10, %v1019_v5  ;;  %v1668_v29 = vcombine.high %v1666_v59, %v1666_v59  ;;  %v4713_v48 = vld [vmem:[#allocation2 + $0x28] sm:$0xf] }
 0x285   : > { %v2651_v22 = vsel %vm1831_vm8, %v1667_v39, -inf  ;;  %v2658_v40 = vsel %vm1831_vm8, %v1666_v59, -inf  ;;  %v1669_v56 = vcombine.high %v1125_v17, %v1125_v17  ;;  %6277 = vmatprep.mubr.bf16.mxu1 %v11957_v18  ;;  %v1676_v32 = vrot.slane %v1125_v17, %v12681_v13  ;;  %4729 = vst [vmem:[#allocation3 + $0x84] sm:$0xf] %v4713_v48 }
 0x286   : > { %v2646_v44 = vmax.f32 %v2644_v53, %v2645_v15  ;;  %v2652_v54 = vrot.slane %v2651_v22, 4  ;;  %v2659_v46 = vrot.slane %v2658_v40, 4  ;;  %6278 = vmatmul.mubr.bf16.gmra.mxu1 %v11959_v58  ;;  %v2665_v30 = vsel %vm1831_vm8, %v1668_v29, -inf  ;;  %v3757_v9 = vld [vmem:[#allocation2 + $0x80] sm:$0xf] }
 0x287   : > { %v1683_v55 = vrot.slane %v1669_v56, %v12681_v13  ;;  %v13544_v50 = vrot.slane %v4384_v19, 4  ;;  %v13546_v51 = vrot.slane %v4387_v25, 5  ;;  %v2666_v14 = vrot.slane %v2665_v30, 4  ;;  %3773 = vst [vmem:[#allocation3 + $0x1f8] sm:$0xf] %v3757_v9 }
 0x288   : > { %v2647_v52 = vrot.slane %v2646_v44, 2  ;;  %v2653_v23 = vmax.f32 %v2651_v22, %v2652_v54  ;;  %v2660_v35 = vmax.f32 %v2658_v40, %v2659_v46  ;;  %v1684_v63 = vcombine.high %v1676_v32, %v1676_v32  ;;  %v4239_v29 = vld [vmem:[#allocation2 + $0x68] sm:$0xf]  ;;  %v4240_v54 = vld [vmem:[#allocation2 + $0x70] sm:$0xf] }
 0x289   : > { %v1685_v49 = vcombine.high %v1683_v55, %v1683_v55  ;;  %v2672_v24 = vsel %vm1831_vm8, %v1676_v32, -inf  ;;  %v2686_v37 = vsel %vm1831_vm8, %v1683_v55, -inf  ;;  %v2667_v4 = vmax.f32 %v2665_v30, %v2666_v14  ;;  %4255 = vst [vmem:[#allocation3 + $0x174] sm:$0xf] %v4239_v29  ;;  %4256 = vst [vmem:[#allocation3 + $0x198] sm:$0xf] %v4240_v54 }
 0x28a   : > { %v2648_v12 = vmax.f32 %v2646_v44, %v2647_v52  ;;  %v2654_v57 = vrot.slane %v2653_v23, 2  ;;  %v2661_v47 = vrot.slane %v2660_v35, 2  ;;  %v2673_v0 = vrot.slane %v2672_v24, 4  ;;  %v3734_v52 = vld [vmem:[#allocation2 + $0x8c] sm:$0x1] }
 0x28b   : > { %v2679_v6 = vsel %vm1831_vm8, %v1684_v63, -inf  ;;  %v2687_v34 = vrot.slane %v2686_v37, 4  ;;  %v2693_v28 = vsel %vm1831_vm8, %v1685_v49, -inf  ;;  %v2668_v11 = vrot.slane %v2667_v4, 2  ;;  %v2964_v29 = vld [vmem:[#allocation2 + $0x94] sm:$0x1] }
 0x28c   : > { %v2649_v26 = vrot.slane %v2648_v12, 1  ;;  %v2655_v1 = vmax.f32 %v2653_v23, %v2654_v57  ;;  %v2662_v2 = vmax.f32 %v2660_v35, %v2661_v47  ;;  %v2674_v3 = vmax.f32 %v2672_v24, %v2673_v0  ;;  %v4242_v57 = vld [vmem:[#allocation2 + $0x80] sm:$0xf]  ;;  %v3791_v54 = vld [vmem:[#allocation2 + $0x50] sm:$0xf] }
 0x28d   : > { %v2680_v45 = vrot.slane %v2679_v6, 4  ;;  %v2688_v38 = vmax.f32 %v2686_v37, %v2687_v34  ;;  %v2694_v5 = vrot.slane %v2693_v28, 4  ;;  %v2669_v59 = vmax.f32 %v2667_v4, %v2668_v11  ;;  %v4276_v34 = vld [vmem:[#allocation2 + $0x44] sm:$0x1]  ;;  %4258 = vst [vmem:[#allocation3 + $0x1e0] sm:$0xf] %v4242_v57 }
 0x28e   : > { %v2650_v27 = vmax.f32 %v2648_v12, %v2649_v26  ;;  %v2656_v8 = vrot.slane %v2655_v1, 1  ;;  %v2663_v25 = vrot.slane %v2662_v2, 1  ;;  %v2675_v39 = vrot.slane %v2674_v3, 2  ;;  %v4241_v12 = vld [vmem:[#allocation2 + $0x78] sm:$0xf] }
 0x28f   : > { %v2681_v53 = vmax.f32 %v2679_v6, %v2680_v45  ;;  %v2689_v17 = vrot.slane %v2688_v38, 2  ;;  %v2695_v18 = vmax.f32 %v2693_v28, %v2694_v5  ;;  %v2670_v19 = vrot.slane %v2669_v59, 1  ;;  %4257 = vst [vmem:[#allocation3 + $0x1bc] sm:$0xf] %v4241_v12  ;;  %v4712_v28 = vld [vmem:[#allocation2 + $0x20] sm:$0xf] }
 0x290   : > { %v2657_v58 = vmax.f32 %v2655_v1, %v2656_v8  ;;  %v2664_v15 = vmax.f32 %v2662_v2, %v2663_v25  ;;  %v11308_v10 = vpack.c.bf16 %v2650_v27, %v2650_v27  ;;  %v2676_v22 = vmax.f32 %v2674_v3, %v2675_v39  ;;  %v4561_v11 = vld [vmem:[#allocation2 + $0x38] sm:$0xe]  ;;  %4728 = vst [vmem:[#allocation3 + $0x60] sm:$0xf] %v4712_v28  ;;  %v3731_v3 = vld [vmem:[#allocation2 + $0x88] sm:$0xf] }
 0x291   : > { %v2682_v40 = vrot.slane %v2681_v53, 2  ;;  %v2690_v56 = vmax.f32 %v2688_v38, %v2689_v17  ;;  %v2696_v44 = vrot.slane %v2695_v18, 2  ;;  %v2671_v46 = vmax.f32 %v2669_v59, %v2670_v19  ;;  %v4563_v59 = vld [vmem:[#allocation2 + $0x40] sm:$0xe] }
 0x292   : > { %v11309_v32 = vpack.c.bf16 %v2657_v58, %v2657_v58  ;;  %v11310_v30 = vpack.c.bf16 %v2664_v15, %v2664_v15  ;;  %v3467_v55 = vunpack.c.l.b16 %v11308_v10  ;;  %v2677_v23 = vrot.slane %v2676_v22, 1 }
 0x293   : > { %v2683_v35 = vmax.f32 %v2681_v53, %v2682_v40  ;;  %v2691_v14 = vrot.slane %v2690_v56, 1  ;;  %v2697_v9 = vmax.f32 %v2695_v18, %v2696_v44  ;;  %v11334_v37 = vpack.c.bf16 %v2671_v46, %v2671_v46  ;;  %v4564_v53 = vld [vmem:[#allocation2 + $0x44] sm:$0x1]  ;;  %v2914_v18 = vld [vmem:[#allocation2 + $0x90] sm:$0x1] }
 0x294   : > { %v3468_v63 = vunpack.c.l.b16 %v11309_v32  ;;  %v3469_v49 = vunpack.c.l.b16 %v11310_v30  ;;  %v3572_v24 = vsel %vm3485_vm12, %v3467_v55, %v13527_v31  ;;  %v2678_v47 = vmax.f32 %v2676_v22, %v2677_v23  ;;  %v4714_v22 = vld [vmem:[#allocation2 + $0x30] sm:$0xf] }
 0x295   : > { %v2684_v4 = vrot.slane %v2683_v35, 1  ;;  %v2692_v0 = vmax.f32 %v2690_v56, %v2691_v14  ;;  %v2698_v6 = vrot.slane %v2697_v9, 1  ;;  %v3735_v1 = vsel %vm12617_vm7, %v11334_v37, %v3734_v52  ;;  %4730 = vst [vmem:[#allocation3 + $0xa8] sm:$0xf] %v4714_v22  ;;  %v3792_v52 = vld [vmem:[#allocation2 + $0x54] sm:$0x1] }
 0x296   : > { %v3573_v26 = vsel %vm3487_vm13, %v3468_v63, %v3572_v24  ;;  %v4390_v31 = vsel %vm13072_vm4, %v13544_v50, %v13546_v51  ;;  %v4394_v2 = vrot.slane %v4392_v61, 4  ;;  %3736 = vst [vmem:[#allocation2 + $0x8c] sm:$0x1] %v3735_v1  ;;  %v11312_v5 = vpack.c.bf16 %v2678_v47, %v2678_v47  ;;  %v4562_v51 = vld [vmem:[#allocation2 + $0x3c] sm:$0x1] }
 0x297   : > { %v3574_v62 = vsel %vm3489_vm14, %v3469_v49, %v3573_v26  ;;  %v2685_v45 = vmax.f32 %v2683_v35, %v2684_v4  ;;  %v2699_v38 = vmax.f32 %v2697_v9, %v2698_v6  ;;  %4539 = vst [vmem:[#allocation3 + $0xe8] sm:$0xf] %v4390_v31  ;;  %v11314_v8 = vpack.c.bf16 %v2692_v0, %v2692_v0  ;;  %v3793_v63 = vld [vmem:[#allocation2 + $0x58] sm:$0xf]  ;;  %v3794_v6 = vld [vmem:[#allocation2 + $0x5c] sm:$0x1] }
 0x298   : > { %v3609_v27 = vpack.c.b16 %v3574_v62, %v3574_v62  ;;  %v4395_v25 = vshll.u32 %v13522_v20, 16  ;;  %v4401_v50 = vshll.u32 %v4276_v34, 16  ;;  %v3471_v39 = vunpack.c.l.b16 %v11312_v5 }
 0x299   : > { %v11313_v61 = vpack.c.bf16 %v2685_v45, %v2685_v45  ;;  %v10687_v17 = vrot.slane %v4561_v11, 9  ;;  %v11315_v15 = vpack.c.bf16 %v2699_v38, %v2699_v38  ;;  %v3473_v19 = vunpack.c.l.b16 %v11314_v8 }
 0x29a   : > { %v3732_v58 = vsel %vm12765_vm0, %v3609_v27, %v3731_v3  ;;  %v4397_v10 = vrot.slane %v4395_v25, 5  ;;  %v4403_v56 = vrot.slane %v4401_v50, 5  ;;  %v4639_v20 = vrot.slane %v4562_v51, 5 }
 0x29b   : > { %3733 = vst [vmem:[#allocation2 + $0x88] sm:$0xf] %v3732_v58  ;;  %v3472_v40 = vunpack.c.l.b16 %v11313_v61  ;;  %v10688_v44 = vrot.slane %v4563_v59, 9  ;;  %v4643_v32 = vrot.slane %v4564_v53, 5  ;;  %v1094_v30 = vmax.f32 %v13535_v21, 0.0 }
 0x29c   : > { %v4398_v46 = vor.u32 %v4397_v10, %v4394_v2  ;;  %v1092_v55 = vmax.f32 %v13537_v60, 0.0  ;;  %v4640_v35 = vsel %vm13123_vm1, %v10687_v17, %v4639_v20  ;;  %v2915_v14 = vsel %vm12617_vm7, 0, %v2914_v18  ;;  %v4277_v2 = vld [vmem:[#allocation2 + $0x58] sm:$0xf]  ;;  %v4279_v20 = vld [vmem:[#allocation2 + $0x60] sm:$0xf] }
 0x29d   : > { %v3575_v23 = vsel %vm3479_vm9, %v3472_v40, %v3471_v39  ;;  %v2965_v9 = vsel %vm12610_vm5, 0, %v2964_v29  ;;  %v3474_v49 = vunpack.c.l.b16 %v11315_v15  ;;  %v4644_v21 = vsel %vm13123_vm1, %v10688_v44, %v4643_v32  ;;  %4699 = vst [vmem:[#allocation3 + $0xec] sm:$0xf] %v4640_v35  ;;  %2916 = vst [vmem:[#allocation2 + $0x90] sm:$0x1] %v2915_v14 }
 0x29e   : > { %v4399_v24 = vrot.slane %v4398_v46, 4  ;;  %v1126_v60 = vmax.f32 %v1092_v55, %v1094_v30  ;;  %2966 = vst [vmem:[#allocation2 + $0x94] sm:$0x1] %v2965_v9  ;;  %v3576_v37 = vsel %vm3481_vm10, %v3473_v19, %v3575_v23  ;;  %4700 = vst [vmem:[#allocation3 + $0x110] sm:$0xf] %v4644_v21  ;;  %v3923_v12 = vshrl.u32 %v3791_v54, 16 }
 0x29f   : > { %v3926_v57 = vshll.u32 %v3791_v54, 16  ;;  %v3932_v47 = vshll.u32 %v3792_v52, 16  ;;  %v3937_v34 = vshrl.u32 %v3793_v63, 16  ;;  %v3940_v31 = vshll.u32 %v3793_v63, 16  ;;  %v4715_v9 = vld [vmem:[#allocation2 + $0x38] sm:$0xf] }
 0x2a0   : > { %v4404_v33 = vsel %vm13072_vm4, %v4399_v24, %v4403_v56  ;;  %v1686_v4 = vcombine.high %v1126_v60, %v1126_v60  ;;  %v1693_v0 = vrot.slane %v1126_v60, %v12681_v13  ;;  %v3925_v28 = vrot.slane %v3923_v12, 4  ;;  %v4278_v56 = vld [vmem:[#allocation2 + $0x5c] sm:$0x1]  ;;  %4731 = vst [vmem:[#allocation3 + $0xcc] sm:$0xf] %v4715_v9 }
 0x2a1   : > { %4540 = vst [vmem:[#allocation3 + $0x10c] sm:$0xf] %v4404_v33  ;;  %v3928_v26 = vrot.slane %v3926_v57, 5  ;;  %v3934_v1 = vrot.slane %v3932_v47, 5  ;;  %v3939_v3 = vrot.slane %v3937_v34, 4  ;;  %v3942_v27 = vrot.slane %v3940_v31, 5 }
 0x2a2   : > { %v1700_v11 = vrot.slane %v1686_v4, %v12681_v13  ;;  %v1701_v48 = vcombine.high %v1693_v0, %v1693_v0  ;;  %v2700_v62 = vsel %vm1831_vm8, %v1693_v0, -inf  ;;  %v3758_v45 = vld [vmem:[#allocation2 + $0x88] sm:$0xf]  ;;  %v3946_v8 = vshll.u32 %v3794_v6, 16  ;;  %v4280_v33 = vld [vmem:[#allocation2 + $0x64] sm:$0x1] }
 0x2a3   : > { %v2701_v38 = vrot.slane %v2700_v62, 4  ;;  %v3929_v5 = vor.u32 %v3928_v26, %v3925_v28  ;;  %3774 = vst [vmem:[#allocation3 + $0x21c] sm:$0xf] %v3758_v45  ;;  %v4406_v59 = vshrl.u32 %v4277_v2, 16  ;;  %v3943_v58 = vor.u32 %v3942_v27, %v3939_v3  ;;  %v4243_v14 = vld [vmem:[#allocation2 + $0x88] sm:$0xf] }
 0x2a4   : > { %v1702_v25 = vcombine.high %v1700_v11, %v1700_v11  ;;  %v2707_v50 = vsel %vm1831_vm8, %v1701_v48, -inf  ;;  %v2714_v51 = vsel %vm1831_vm8, %v1700_v11, -inf  ;;  %v3948_v15 = vrot.slane %v3946_v8, 5  ;;  %4259 = vst [vmem:[#allocation3 + $0x204] sm:$0xf] %v4243_v14 }
 0x2a5   : > { %v2702_v61 = vmax.f32 %v2700_v62, %v2701_v38  ;;  %v2708_v39 = vrot.slane %v2707_v50, 4  ;;  %v2715_v53 = vrot.slane %v2714_v51, 4  ;;  %v3930_v17 = vrot.slane %v3929_v5, 4  ;;  %v11961_v44 = vld [vmem:[#allocation3 + $0xec] ss:$36 sps:$4 sm:$0xff]  }
 0x2a6   : > { %v2721_v18 = vsel %vm1831_vm8, %v1702_v25, -inf  ;;  %v4408_v19 = vrot.slane %v4406_v59, 4  ;;  %v13588_v46 = vsel %vm3483_vm11, %v3474_v49, %v3576_v37  ;;  %v3944_v30 = vrot.slane %v3943_v58, 4  ;;  %6471 = vmatprep.mubr.bf16.mxu0 %v11961_v44  ;;  %v4565_v49 = vld [vmem:[#allocation2 + $0x58] sm:$0xe] }
 0x2a7   : > { %v2703_v10 = vrot.slane %v2702_v61, 2  ;;  %v2709_v29 = vmax.f32 %v2707_v50, %v2708_v39  ;;  %v2716_v22 = vmax.f32 %v2714_v51, %v2715_v53  ;;  %v2722_v40 = vrot.slane %v2721_v18, 4  ;;  %v4716_v4 = vld [vmem:[#allocation2 + $0x40] sm:$0xf]  ;;  %v4566_v11 = vld [vmem:[#allocation2 + $0x5c] sm:$0x1] }
 0x2a8   : > { %v11964_v54 = vld [vmem:[#allocation3 + $0xe8] ss:$36 sps:$4 sm:$0xff]   ;;  %v3935_v32 = vsel %vm13072_vm4, %v3930_v17, %v3934_v1  ;;  %v3949_v63 = vsel %vm13072_vm4, %v3944_v30, %v3948_v15  ;;  %v4409_v24 = vshll.u32 %v4277_v2, 16  ;;  %v4415_v21 = vshll.u32 %v4278_v56, 16  ;;  %4732 = vst [vmem:[#allocation3 + $0xf0] sm:$0xf] %v4716_v4 }
 0x2a9   : > { %v2704_v55 = vmax.f32 %v2702_v61, %v2703_v10  ;;  %v2710_v52 = vrot.slane %v2709_v29, 2  ;;  %v2717_v23 = vrot.slane %v2716_v22, 2  ;;  %v2723_v35 = vmax.f32 %v2721_v18, %v2722_v40  ;;  %4058 = vst [vmem:[#allocation3 + $0x124] sm:$0xf] %v3935_v32  ;;  %6472 = vmatmul.mubr.bf16.gmra.mxu0 %v11964_v54  ;;  %4059 = vst [vmem:[#allocation3 + $0x148] sm:$0xf] %v3949_v63 }
 0x2aa   : > { %v4420_v60 = vshrl.u32 %v4279_v20, 16  ;;  %v4411_v0 = vrot.slane %v4409_v24, 5  ;;  %v4417_v6 = vrot.slane %v4415_v21, 5  ;;  %v4423_v28 = vshll.u32 %v4279_v20, 16  ;;  %v4568_v25 = vld [vmem:[#allocation2 + $0x64] sm:$0x1] }
 0x2ab   : > { %v2705_v37 = vrot.slane %v2704_v55, 1  ;;  %v2711_v12 = vmax.f32 %v2709_v29, %v2710_v52  ;;  %v2718_v57 = vmax.f32 %v2716_v22, %v2717_v23  ;;  %v2724_v47 = vrot.slane %v2723_v35, 2  ;;  %v4567_v61 = vld [vmem:[#allocation2 + $0x60] sm:$0xe]  ;;  %v3740_v15 = vld [vmem:[#allocation2 + $0x94] sm:$0x1] }
 0x2ac   : > { %v4422_v34 = vrot.slane %v4420_v60, 4  ;;  %v4412_v48 = vor.u32 %v4411_v0, %v4408_v19  ;;  %v4425_v62 = vrot.slane %v4423_v28, 5  ;;  %v4429_v3 = vshll.u32 %v4280_v33, 16  ;;  %v3795_v10 = vld [vmem:[#allocation2 + $0x60] sm:$0xf] }
 0x2ad   : > { %v2706_v26 = vmax.f32 %v2704_v55, %v2705_v37  ;;  %v2712_v1 = vrot.slane %v2711_v12, 1  ;;  %v2719_v31 = vrot.slane %v2718_v57, 1  ;;  %v2725_v2 = vmax.f32 %v2723_v35, %v2724_v47  ;;  %v3796_v19 = vld [vmem:[#allocation2 + $0x64] sm:$0x1]  ;;  %v3797_v55 = vld [vmem:[#allocation2 + $0x68] sm:$0xf] }
 0x2ae   : > { %v10689_v45 = vrot.slane %v4565_v49, 9  ;;  %v4413_v50 = vrot.slane %v4412_v48, 4  ;;  %v4426_v51 = vor.u32 %v4425_v62, %v4422_v34  ;;  %v4431_v59 = vrot.slane %v4429_v3, 5  ;;  %v11968_v22 = vld [vmem:[#allocation3 + $0x120] ss:$36 sps:$4 sm:$0xff]  }
 0x2af   : > { %v2713_v38 = vmax.f32 %v2711_v12, %v2712_v1  ;;  %v2720_v5 = vmax.f32 %v2718_v57, %v2719_v31  ;;  %v2726_v27 = vrot.slane %v2725_v2, 1  ;;  %v11316_v8 = vpack.c.bf16 %v2706_v26, %v2706_v26  ;;  %v4717_v52 = vld [vmem:[#allocation2 + $0x48] sm:$0xf]  ;;  %v3737_v12 = vld [vmem:[#allocation2 + $0x90] sm:$0xf]  ;;  %v11419_v1 = vpop.f32.mrf.mxu1 }
 0x2b0   : > { %v4647_v39 = vrot.slane %v4566_v11, 5  ;;  %v11965_v29 = vld [vmem:[#allocation3 + $0x124] ss:$36 sps:$4 sm:$0xff]   ;;  %v4418_v40 = vsel %vm13072_vm4, %v4413_v50, %v4417_v6  ;;  %v4427_v56 = vrot.slane %v4426_v51, 4  ;;  %v10690_v35 = vrot.slane %v4567_v61, 9 }
 0x2b1   : > { %v2727_v53 = vmax.f32 %v2725_v2, %v2726_v27  ;;  %v11317_v17 = vpack.c.bf16 %v2713_v38, %v2713_v38  ;;  %v11318_v18 = vpack.c.bf16 %v2720_v5, %v2720_v5  ;;  %v3475_v58 = vunpack.c.l.b16 %v11316_v8  ;;  %4541 = vst [vmem:[#allocation3 + $0x130] sm:$0xf] %v4418_v40  ;;  %6285 = vmatprep.mubr.bf16.mxu1 %v11965_v29  ;;  %v4281_v49 = vld [vmem:[#allocation2 + $0x68] sm:$0xf]  ;;  %v4282_v4 = vld [vmem:[#allocation2 + $0x6c] sm:$0x1] }
 0x2b2   : > { %v4648_v20 = vsel %vm13123_vm1, %v10689_v45, %v4647_v39  ;;  %v4432_v23 = vsel %vm13072_vm4, %v4427_v56, %v4431_v59  ;;  %v4651_v14 = vrot.slane %v4568_v25, 5  ;;  %v3951_v9 = vshrl.u32 %v3795_v10, 16  ;;  %4733 = vst [vmem:[#allocation3 + $0x114] sm:$0xf] %v4717_v52  ;;  %6286 = vmatmul.mubr.bf16.gmra.mxu1 %v11968_v22  ;;  %v4283_v26 = vld [vmem:[#allocation2 + $0x70] sm:$0xf] }
 0x2b3   : > { %v3476_v44 = vunpack.c.l.b16 %v11317_v17  ;;  %v3477_v54 = vunpack.c.l.b16 %v11318_v18  ;;  %v3578_v32 = vsel %vm3485_vm12, %v3475_v58, %v13588_v46  ;;  %v11335_v30 = vpack.c.bf16 %v2727_v53, %v2727_v53  ;;  %4701 = vst [vmem:[#allocation3 + $0x134] sm:$0xf] %v4648_v20  ;;  %4542 = vst [vmem:[#allocation3 + $0x154] sm:$0xf] %v4432_v23  ;;  %v3798_v46 = vld [vmem:[#allocation2 + $0x6c] sm:$0x1] }
 0x2b4   : > { %v3954_v21 = vshll.u32 %v3795_v10, 16  ;;  %v3960_v60 = vshll.u32 %v3796_v19, 16  ;;  %v4652_v57 = vsel %vm13123_vm1, %v10690_v35, %v4651_v14  ;;  %v3953_v47 = vrot.slane %v3951_v9, 4  ;;  %v4569_v62 = vld [vmem:[#allocation2 + $0x68] sm:$0xe]  ;;  %v11420_v10 = vpop.f32.mrf.mxu1 }
 0x2b5   : > { %v3579_v63 = vsel %vm3487_vm13, %v3476_v44, %v3578_v32  ;;  %v3741_v24 = vsel %vm12617_vm7, %v11335_v30, %v3740_v15  ;;  %v3965_v33 = vshrl.u32 %v3797_v55, 16  ;;  %4702 = vst [vmem:[#allocation3 + $0x158] sm:$0xf] %v4652_v57  ;;  %v3968_v28 = vshll.u32 %v3797_v55, 16  ;;  %v4570_v3 = vld [vmem:[#allocation2 + $0x6c] sm:$0x1] }
 0x2b6   : > { %v3580_v37 = vsel %vm3489_vm14, %v3477_v54, %v3579_v63  ;;  %3742 = vst [vmem:[#allocation2 + $0x94] sm:$0x1] %v3741_v24  ;;  %v3956_v6 = vrot.slane %v3954_v21, 5  ;;  %v3962_v34 = vrot.slane %v3960_v60, 5  ;;  %v3974_v2 = vshll.u32 %v3798_v46, 16 }
 0x2b7   : > { %v3611_v0 = vpack.c.b16 %v3580_v37, %v3580_v37  ;;  %v3967_v31 = vrot.slane %v3965_v33, 4  ;;  %v4434_v11 = vshrl.u32 %v4281_v49, 16  ;;  %v4437_v48 = vshll.u32 %v4281_v49, 16  ;;  %v4284_v27 = vld [vmem:[#allocation2 + $0x74] sm:$0x1] }
 0x2b8   : > { %v3957_v38 = vor.u32 %v3956_v6, %v3953_v47  ;;  %v3970_v5 = vrot.slane %v3968_v28, 5  ;;  %v4443_v8 = vshll.u32 %v4282_v4, 16  ;;  %v4718_v25 = vld [vmem:[#allocation2 + $0x60] sm:$0xf]  ;;  %v3976_v50 = vrot.slane %v3974_v2, 5 }
 0x2b9   : > { %v3738_v45 = vsel %vm12765_vm0, %v3611_v0, %v3737_v12  ;;  %v4436_v51 = vrot.slane %v4434_v11, 4  ;;  %v4439_v59 = vrot.slane %v4437_v48, 5  ;;  %v4448_v61 = vshrl.u32 %v4283_v26, 16  ;;  %4734 = vst [vmem:[#allocation3 + $0x138] sm:$0xf] %v4718_v25  ;;  %vm7788_vm0 = vmor %vm2866_vm3, %vm3479_vm9 }
 0x2ba   : > { %3739 = vst [vmem:[#allocation2 + $0x90] sm:$0xf] %v3738_v45  ;;  %v3958_v39 = vrot.slane %v3957_v38, 4  ;;  %v3971_v53 = vor.u32 %v3970_v5, %v3967_v31  ;;  %v4445_v17 = vrot.slane %v4443_v8, 5  ;;  %v4451_v18 = vshll.u32 %v4283_v26, 16  ;;  %vm7790_vm2 = vmor %vm7788_vm0, %vm3483_vm11 }
 0x2bb   : > { %v4571_v58 = vld [vmem:[#allocation2 + $0x70] sm:$0xe]  ;;  %v4572_v15 = vld [vmem:[#allocation2 + $0x74] sm:$0x1]  ;;  %v4440_v42 = vor.u32 %v4439_v59, %v4436_v51  ;;  %v4450_v19 = vrot.slane %v4448_v61, 4  ;;  %v4457_v29 = vshll.u32 %v4284_v27, 16  ;;  %v13612_v35 = vadd.f32 %v11420_v10, %v11419_v1  ;;  %vm14406_vm3 = vmor %vm7790_vm2, %vm3487_vm13 }
 0x2bc   : > { %v10691_v22 = vrot.slane %v4569_v62, 9  ;;  %v3799_v40 = vld [vmem:[#allocation2 + $0x70] sm:$0xf]  ;;  %v3800_v56 = vld [vmem:[#allocation2 + $0x74] sm:$0x1]  ;;  %v3963_v20 = vsel %vm13072_vm4, %v3958_v39, %v3962_v34  ;;  %v3972_v44 = vrot.slane %v3971_v53, 4 }
 0x2bd   : > { %v4453_v54 = vrot.slane %v4451_v18, 5  ;;  %v4655_v32 = vrot.slane %v4570_v3, 5  ;;  %v3801_v30 = vld [vmem:[#allocation2 + $0x78] sm:$0xf]  ;;  %v11974_v52 = vld [vmem:[#allocation3 + $0x130] ss:$36 sps:$4 sm:$0xff]  }
 0x2be   : > { %v11971_v55 = vld [vmem:[#allocation3 + $0x134] ss:$36 sps:$4 sm:$0xff]   ;;  %4060 = vst [vmem:[#allocation3 + $0x16c] sm:$0xf] %v3963_v20  ;;  %v4441_v23 = vrot.slane %v4440_v42, 4  ;;  %v3977_v14 = vsel %vm13072_vm4, %v3972_v44, %v3976_v50  ;;  %v4459_v63 = vrot.slane %v4457_v29, 5 }
 0x2bf   : > { %v4454_v9 = vor.u32 %v4453_v54, %v4450_v19  ;;  %v4656_v24 = vsel %vm13123_vm1, %v10691_v22, %v4655_v32  ;;  %v3802_v46 = vld [vmem:[#allocation2 + $0x7c] sm:$0x1]  ;;  %6479 = vmatprep.mubr.bf16.mxu0 %v11971_v55  ;;  %4061 = vst [vmem:[#allocation3 + $0x190] sm:$0xf] %v3977_v14  ;;  %v10692_v60 = vrot.slane %v4571_v58, 9  ;;  %v4659_v49 = vrot.slane %v4572_v15, 5 }
 0x2c0   : > { %v4446_v21 = vsel %vm13072_vm4, %v4441_v23, %v4445_v17  ;;  %4703 = vst [vmem:[#allocation3 + $0x17c] sm:$0xf] %v4656_v24  ;;  %v3979_v37 = vshrl.u32 %v3799_v40, 16  ;;  %v4286_v12 = vld [vmem:[#allocation2 + $0x7c] sm:$0x1]  ;;  %6480 = vmatmul.mubr.bf16.gmra.mxu0 %v11974_v52  ;;  %v3982_v47 = vshll.u32 %v3799_v40, 16 }
 0x2c1   : > { %v4455_v57 = vrot.slane %v4454_v9, 4  ;;  %4543 = vst [vmem:[#allocation3 + $0x178] sm:$0xf] %v4446_v21  ;;  %v3988_v33 = vshll.u32 %v3800_v56, 16  ;;  %v3993_v4 = vshrl.u32 %v3801_v30, 16  ;;  %v4660_v6 = vsel %vm13123_vm1, %v10692_v60, %v4659_v49  ;;  %v13626_v9 = vpop.f32.mrf.mxu1 }
 0x2c2   : > { %v4285_v0 = vld [vmem:[#allocation2 + $0x78] sm:$0xf]  ;;  %v3981_v34 = vrot.slane %v3979_v37, 4  ;;  %v3996_v28 = vshll.u32 %v3801_v30, 16  ;;  %v4002_v26 = vshll.u32 %v3802_v46, 16  ;;  %v3984_v2 = vrot.slane %v3982_v47, 5 }
 0x2c3   : > { %v4287_v1 = vld [vmem:[#allocation2 + $0x80] sm:$0xf]  ;;  %v4460_v31 = vsel %vm13072_vm4, %v4455_v57, %v4459_v63  ;;  %4704 = vst [vmem:[#allocation3 + $0x1a0] sm:$0xf] %v4660_v6  ;;  %v3990_v11 = vrot.slane %v3988_v33, 5  ;;  %v3995_v48 = vrot.slane %v3993_v4, 4 }
 0x2c4   : > { %v4288_v62 = vld [vmem:[#allocation2 + $0x84] sm:$0x1]  ;;  %4544 = vst [vmem:[#allocation3 + $0x19c] sm:$0xf] %v4460_v31  ;;  %v3998_v3 = vrot.slane %v3996_v28, 5  ;;  %v4004_v45 = vrot.slane %v4002_v26, 5  ;;  %v3985_v25 = vor.u32 %v3984_v2, %v3981_v34 }
 0x2c5   : > { %v4462_v38 = vshrl.u32 %v4285_v0, 16  ;;  %v4465_v5 = vshll.u32 %v4285_v0, 16  ;;  %v4573_v27 = vld [vmem:[#allocation2 + $0x78] sm:$0xe]  ;;  %v4244_v8 = vld [vmem:[#allocation2 + $0x90] sm:$0xf] }
 0x2c6   : > { %v4471_v50 = vshll.u32 %v4286_v12, 16  ;;  %v4476_v51 = vshrl.u32 %v4287_v1, 16  ;;  %v4479_v59 = vshll.u32 %v4287_v1, 16  ;;  %v4574_v61 = vld [vmem:[#allocation2 + $0x7c] sm:$0x1]  ;;  %v3999_v53 = vor.u32 %v3998_v3, %v3995_v48 }
 0x2c7   : > { %4260 = vst [vmem:[#allocation3 + $0x228] sm:$0xf] %v4244_v8  ;;  %v4719_v39 = vld [vmem:[#allocation2 + $0x68] sm:$0xf]  ;;  %v4464_v17 = vrot.slane %v4462_v38, 4  ;;  %v4467_v18 = vrot.slane %v4465_v5, 5 }
 0x2c8   : > { %v4485_v58 = vshll.u32 %v4288_v62, 16  ;;  %v4575_v15 = vld [vmem:[#allocation2 + $0x80] sm:$0xe]  ;;  %v4576_v10 = vld [vmem:[#allocation2 + $0x84] sm:$0x1]  ;;  %v3986_v29 = vrot.slane %v3985_v25, 4  ;;  %v13636_v62 = vpop.f32.mrf.mxu1 }
 0x2c9   : > { %4735 = vst [vmem:[#allocation3 + $0x15c] sm:$0xf] %v4719_v39  ;;  %v11975_v42 = vld [vmem:[#allocation3 + $0x16c] ss:$36 sps:$4 sm:$0xff]   ;;  %v3803_v22 = vld [vmem:[#allocation2 + $0x80] sm:$0xf]  ;;  %v4468_v56 = vor.u32 %v4467_v18, %v4464_v17 }
 0x2ca   : > { %v11978_v19 = vld [vmem:[#allocation3 + $0x168] ss:$36 sps:$4 sm:$0xff]   ;;  %v4000_v40 = vrot.slane %v3999_v53, 4  ;;  %v4473_v20 = vrot.slane %v4471_v50, 5  ;;  %v4478_v44 = vrot.slane %v4476_v51, 4  ;;  %6293 = vmatprep.mubr.bf16.mxu1 %v11975_v42  ;;  %v3991_v30 = vsel %vm13072_vm4, %v3986_v29, %v3990_v11 }
 0x2cb   : > { %v3804_v54 = vld [vmem:[#allocation2 + $0x84] sm:$0x1]  ;;  %v3805_v32 = vld [vmem:[#allocation2 + $0x88] sm:$0xf]  ;;  %v4481_v55 = vrot.slane %v4479_v59, 5  ;;  %v4487_v52 = vrot.slane %v4485_v58, 5  ;;  %6294 = vmatmul.mubr.bf16.gmra.mxu1 %v11978_v19 }
 0x2cc   : > { %v10693_v23 = vrot.slane %v4573_v27, 9  ;;  %v3806_v14 = vld [vmem:[#allocation2 + $0x8c] sm:$0x1]  ;;  %v4720_v63 = vld [vmem:[#allocation2 + $0x70] sm:$0xf]  ;;  %v4005_v24 = vsel %vm13072_vm4, %v4000_v40, %v4004_v45  ;;  %v4469_v46 = vrot.slane %v4468_v56, 4 }
 0x2cd   : > { %4062 = vst [vmem:[#allocation3 + $0x1b4] sm:$0xf] %v3991_v30  ;;  %v4663_v21 = vrot.slane %v4574_v61, 5  ;;  %v10694_v60 = vrot.slane %v4575_v15, 9  ;;  %v4066_v49 = vld [vmem:[#allocation2] sm:$0xe]  ;;  %v4482_v47 = vor.u32 %v4481_v55, %v4478_v44 }
 0x2ce   : > { %v4721_v37 = vld [vmem:[#allocation2 + $0x78] sm:$0xf]  ;;  %4736 = vst [vmem:[#allocation3 + $0x180] sm:$0xf] %v4720_v63  ;;  %v11981_v12 = vld [vmem:[#allocation3 + $0x17c] ss:$36 sps:$4 sm:$0xff]   ;;  %v4474_v4 = vsel %vm13072_vm4, %v4469_v46, %v4473_v20  ;;  %v11425_v61 = vpop.f32.mrf.mxu1 }
 0x2cf   : > { %v11984_v57 = vld [vmem:[#allocation3 + $0x178] ss:$36 sps:$4 sm:$0xff]   ;;  %4063 = vst [vmem:[#allocation3 + $0x1d8] sm:$0xf] %v4005_v24  ;;  %v4667_v33 = vrot.slane %v4576_v10, 5  ;;  %v4664_v0 = vsel %vm13123_vm1, %v10693_v23, %v4663_v21  ;;  %v4007_v6 = vshrl.u32 %v3803_v22, 16  ;;  %6487 = vmatprep.mubr.bf16.mxu0 %v11981_v12 }
 0x2d0   : > { %4737 = vst [vmem:[#allocation3 + $0x1a4] sm:$0xf] %v4721_v37  ;;  %v4010_v34 = vshll.u32 %v3803_v22, 16  ;;  %v4067_v28 = vld [vmem:[#allocation2 + $0x4] sm:$0x1]  ;;  %v4483_v1 = vrot.slane %v4482_v47, 4  ;;  %6488 = vmatmul.mubr.bf16.gmra.mxu0 %v11984_v57  ;;  %v11426_v56 = vpop.f32.mrf.mxu1 }
 0x2d1   : > { %v4069_v26 = vld [vmem:[#allocation2 + $0xc] sm:$0x1]  ;;  %4545 = vst [vmem:[#allocation3 + $0x1c0] sm:$0xf] %v4474_v4  ;;  %v4668_v31 = vsel %vm13123_vm1, %v10694_v60, %v4667_v33  ;;  %4705 = vst [vmem:[#allocation3 + $0x1c4] sm:$0xf] %v4664_v0  ;;  %v13642_v55 = vadd.f32 %v11426_v56, %v11425_v61 }
 0x2d2   : > { %v4016_v2 = vshll.u32 %v3804_v54, 16  ;;  %v4021_v11 = vshrl.u32 %v3805_v32, 16  ;;  %v4068_v48 = vld [vmem:[#allocation2 + $0x8] sm:$0xe]  ;;  %4706 = vst [vmem:[#allocation3 + $0x1e8] sm:$0xf] %v4668_v31  ;;  %v4488_v8 = vsel %vm13072_vm4, %v4483_v1, %v4487_v52 }
 0x2d3   : > { %v4009_v3 = vrot.slane %v4007_v6, 4  ;;  %v4012_v45 = vrot.slane %v4010_v34, 5  ;;  %v4024_v38 = vshll.u32 %v3805_v32, 16  ;;  %v4030_v5 = vshll.u32 %v3806_v14, 16  ;;  %v4289_v27 = vld [vmem:[#allocation2 + $0x88] sm:$0xf] }
 0x2d4   : > { %v4018_v25 = vrot.slane %v4016_v2, 5  ;;  %v4023_v50 = vrot.slane %v4021_v11, 4  ;;  %v10665_v51 = vrot.slane %v4066_v49, 9  ;;  %v4290_v59 = vld [vmem:[#allocation2 + $0x8c] sm:$0x1]  ;;  %v4135_v18 = vrot.slane %v4067_v28, 5 }
 0x2d5   : > { %4546 = vst [vmem:[#allocation3 + $0x1e4] sm:$0xf] %v4488_v8  ;;  %v4013_v39 = vor.u32 %v4012_v45, %v4009_v3  ;;  %v4026_v53 = vrot.slane %v4024_v38, 5  ;;  %v4032_v17 = vrot.slane %v4030_v5, 5  ;;  %v4291_v58 = vld [vmem:[#allocation2 + $0x90] sm:$0xf] }
 0x2d6   : > { %v4292_v15 = vld [vmem:[#allocation2 + $0x94] sm:$0x1]  ;;  %v4577_v10 = vld [vmem:[#allocation2 + $0x88] sm:$0xe]  ;;  %v10666_v42 = vrot.slane %v4068_v48, 9  ;;  %v4139_v19 = vrot.slane %v4069_v26, 5  ;;  %v4136_v30 = vsel %vm13123_vm1, %v10665_v51, %v4135_v18 }
 0x2d7   : > { %v4490_v29 = vshrl.u32 %v4289_v27, 16  ;;  %v4493_v22 = vshll.u32 %v4289_v27, 16  ;;  %v4578_v40 = vld [vmem:[#allocation2 + $0x8c] sm:$0x1]  ;;  %v11985_v20 = vld [vmem:[#allocation3 + $0x1b4] ss:$36 sps:$4 sm:$0xff]   ;;  %v4027_v32 = vor.u32 %v4026_v53, %v4023_v50 }
 0x2d8   : > { %v11988_v44 = vld [vmem:[#allocation3 + $0x1b0] ss:$36 sps:$4 sm:$0xff]   ;;  %v4014_v54 = vrot.slane %v4013_v39, 4  ;;  %v4140_v52 = vsel %vm13123_vm1, %v10666_v42, %v4139_v19  ;;  %4213 = vst [vmem:[#allocation3 + $0x8] sm:$0xf] %v4136_v30  ;;  %v4499_v63 = vshll.u32 %v4290_v59, 16  ;;  %6301 = vmatprep.mubr.bf16.mxu1 %v11985_v20 }
 0x2d9   : > { %v4492_v23 = vrot.slane %v4490_v29, 4  ;;  %v4495_v14 = vrot.slane %v4493_v22, 5  ;;  %v4722_v24 = vld [vmem:[#allocation2 + $0x80] sm:$0xf]  ;;  %v4028_v21 = vrot.slane %v4027_v32, 4  ;;  %v4504_v60 = vshrl.u32 %v4291_v58, 16  ;;  %6302 = vmatmul.mubr.bf16.gmra.mxu1 %v11988_v44 }
 0x2da   : > { %v4019_v46 = vsel %vm13072_vm4, %v4014_v54, %v4018_v25  ;;  %4214 = vst [vmem:[#allocation3 + $0x2c] sm:$0xf] %v4140_v52  ;;  %v4507_v49 = vshll.u32 %v4291_v58, 16  ;;  %v4070_v37 = vld [vmem:[#allocation2 + $0x10] sm:$0xe]  ;;  %v4501_v33 = vrot.slane %v4499_v63, 5 }
 0x2db   : > { %v4071_v12 = vld [vmem:[#allocation2 + $0x14] sm:$0x1]  ;;  %v4723_v57 = vld [vmem:[#allocation2 + $0x88] sm:$0xf]  ;;  %4738 = vst [vmem:[#allocation3 + $0x1c8] sm:$0xf] %v4722_v24  ;;  %v4496_v47 = vor.u32 %v4495_v14, %v4492_v23  ;;  %v4033_v1 = vsel %vm13072_vm4, %v4028_v21, %v4032_v17 }
 0x2dc   : > { %4064 = vst [vmem:[#allocation3 + $0x1fc] sm:$0xf] %v4019_v46  ;;  %v4513_v4 = vshll.u32 %v4292_v15, 16  ;;  %v4579_v0 = vld [vmem:[#allocation2 + $0x90] sm:$0xe]  ;;  %v10695_v6 = vrot.slane %v4577_v10, 9 }
 0x2dd   : > { %v4072_v34 = vld [vmem:[#allocation2 + $0x18] sm:$0xe]  ;;  %v4073_v28 = vld [vmem:[#allocation2 + $0x1c] sm:$0x1]  ;;  %v5030_v26 = vld [vmem:[#allocation2 + $0x10] sm:$0xe] }
 0x2de   : > { %4739 = vst [vmem:[#allocation3 + $0x1ec] sm:$0xf] %v4723_v57  ;;  %v4506_v31 = vrot.slane %v4504_v60, 4  ;;  %v4509_v2 = vrot.slane %v4507_v49, 5  ;;  %v4580_v11 = vld [vmem:[#allocation2 + $0x94] sm:$0x1] }
 0x2df   : > { %v4671_v48 = vrot.slane %v4578_v40, 5  ;;  %v5031_v3 = vld [vmem:[#allocation2 + $0x14] sm:$0x1]  ;;  %v11993_v45 = vld [vmem:[#allocation3 + $0x1c4] ss:$36 sps:$4 sm:$0xff]   ;;  %v4497_v5 = vrot.slane %v4496_v47, 4 }
 0x2e0   : > { %v11996_v38 = vld [vmem:[#allocation3 + $0x1c0] ss:$36 sps:$4 sm:$0xff]   ;;  %4065 = vst [vmem:[#allocation3 + $0x220] sm:$0xf] %v4033_v1  ;;  %v5032_v27 = vld [vmem:[#allocation2 + $0x18] sm:$0xe]  ;;  %v4510_v25 = vor.u32 %v4509_v2, %v4506_v31  ;;  %6495 = vmatprep.mubr.bf16.mxu0 %v11993_v45 }
 0x2e1   : > { %v5033_v8 = vld [vmem:[#allocation2 + $0x1c] sm:$0x1]  ;;  %v4515_v50 = vrot.slane %v4513_v4, 5  ;;  %v4672_v51 = vsel %vm13123_vm1, %v10695_v6, %v4671_v48  ;;  %v10696_v59 = vrot.slane %v4579_v0, 9  ;;  %v5034_v61 = vld [vmem:[#allocation2 + $0x20] sm:$0xe]  ;;  %v4502_v17 = vsel %vm13072_vm4, %v4497_v5, %v4501_v33  ;;  %6496 = vmatmul.mubr.bf16.gmra.mxu0 %v11996_v38 }
 0x2e2   : > { %v5035_v39 = vld [vmem:[#allocation2 + $0x24] sm:$0x1]  ;;  %v5036_v53 = vld [vmem:[#allocation2 + $0x28] sm:$0xe]  ;;  %v4675_v18 = vrot.slane %v4580_v11, 5  ;;  %v10667_v58 = vrot.slane %v4070_v37, 9 }
 0x2e3   : > { %4707 = vst [vmem:[#allocation3 + $0x20c] sm:$0xf] %v4672_v51  ;;  %v4143_v15 = vrot.slane %v4071_v12, 5  ;;  %v5037_v10 = vld [vmem:[#allocation2 + $0x2c] sm:$0x1]  ;;  %v4511_v19 = vrot.slane %v4510_v25, 4 }
 0x2e4   : > { %v4724_v42 = vld [vmem:[#allocation2 + $0x90] sm:$0xf]  ;;  %4547 = vst [vmem:[#allocation3 + $0x208] sm:$0xf] %v4502_v17  ;;  %v10668_v29 = vrot.slane %v4072_v34, 9  ;;  %v4147_v22 = vrot.slane %v4073_v28, 5  ;;  %v4676_v54 = vsel %vm13123_vm1, %v10696_v59, %v4675_v18  ;;  %v13672_v59 = vpop.f32.mrf.mxu0 }
 0x2e5   : > { %v10697_v40 = vrot.slane %v5030_v26, 9  ;;  %v4074_v56 = vld [vmem:[#allocation2 + $0x20] sm:$0xe]  ;;  %v4075_v20 = vld [vmem:[#allocation2 + $0x24] sm:$0x1]  ;;  %v4144_v32 = vsel %vm13123_vm1, %v10667_v58, %v4143_v15  ;;  %v5096_v30 = vrot.slane %v5031_v3, 5  ;;  %v4516_v63 = vsel %vm13072_vm4, %v4511_v19, %v4515_v50 }
 0x2e6   : > { %v4076_v44 = vld [vmem:[#allocation2 + $0x28] sm:$0xe]  ;;  %4740 = vst [vmem:[#allocation3 + $0x210] sm:$0xf] %v4724_v42  ;;  %v4077_v52 = vld [vmem:[#allocation2 + $0x2c] sm:$0x1]  ;;  %v4148_v24 = vsel %vm13123_vm1, %v10668_v29, %v4147_v22 }
 0x2e7   : > { %v5038_v23 = vld [vmem:[#allocation2 + $0x30] sm:$0xe]  ;;  %v5039_v14 = vld [vmem:[#allocation2 + $0x34] sm:$0x1]  ;;  %4708 = vst [vmem:[#allocation3 + $0x230] sm:$0xf] %v4676_v54  ;;  %v5097_v57 = vsel %vm13123_vm1, %v10697_v40, %v5096_v30 }
 0x2e8   : > { %4215 = vst [vmem:[#allocation3 + $0x50] sm:$0xf] %v4144_v32  ;;  %v10698_v46 = vrot.slane %v5032_v27, 9  ;;  %v5100_v21 = vrot.slane %v5033_v8, 5  ;;  %v5040_v60 = vld [vmem:[#allocation2 + $0x38] sm:$0xe] }
 0x2e9   : > { %v5041_v49 = vld [vmem:[#allocation2 + $0x3c] sm:$0x1]  ;;  %v13662_v37 = vld [vmem:[#allocation2 + $0x40] sm:$0xe]  ;;  %v4725_v12 = vld [vmem:[#allocation2 + $0x98] sm:$0xf] }
 0x2ea   : > { %4548 = vst [vmem:[#allocation3 + $0x22c] sm:$0xf] %v4516_v63  ;;  %4216 = vst [vmem:[#allocation3 + $0x74] sm:$0xf] %v4148_v24  ;;  %v10699_v47 = vrot.slane %v5034_v61, 9  ;;  %v5104_v33 = vrot.slane %v5035_v39, 5  ;;  %v5101_v26 = vsel %vm13123_vm1, %v10698_v46, %v5100_v21 }
 0x2eb   : > { %v10700_v4 = vrot.slane %v5036_v53, 9  ;;  %v5043_v0 = vld [vmem:[#allocation2 + $0x44] sm:$0x1]  ;;  %v5044_v6 = vld [vmem:[#allocation2 + $0x48] sm:$0xe]  ;;  %v5108_v1 = vrot.slane %v5037_v10, 5 }
 0x2ec   : > { %4741 = vst [vmem:[#allocation3 + $0x234] sm:$0xf] %v4725_v12  ;;  %v11999_v34 = vld [vmem:[#allocation3 + $0x1fc] ss:$36 sps:$4 sm:$0xff]   ;;  %5174 = vst [vmem:[#allocation3 + $0x20] sm:$0xf] %v5097_v57  ;;  %v5105_v48 = vsel %vm13123_vm1, %v10699_v47, %v5104_v33 }
 0x2ed   : > { %v12002_v28 = vld [vmem:[#allocation3 + $0x1f8] ss:$36 sps:$4 sm:$0xff]   ;;  %v5045_v31 = vld [vmem:[#allocation2 + $0x4c] sm:$0x1]  ;;  %v4078_v2 = vld [vmem:[#allocation2 + $0x30] sm:$0xe]  ;;  %6309 = vmatprep.mubr.bf16.mxu1 %v11999_v34  ;;  %v5109_v8 = vsel %vm13123_vm1, %v10700_v4, %v5108_v1 }
 0x2ee   : > { %v4079_v11 = vld [vmem:[#allocation2 + $0x34] sm:$0x1]  ;;  %5175 = vst [vmem:[#allocation3 + $0x44] sm:$0xf] %v5101_v26  ;;  %v10669_v3 = vrot.slane %v4074_v56, 9  ;;  %v4151_v45 = vrot.slane %v4075_v20, 5  ;;  %6310 = vmatmul.mubr.bf16.gmra.mxu1 %v12002_v28 }
 0x2ef   : > { %v10670_v38 = vrot.slane %v4076_v44, 9  ;;  %v4080_v5 = vld [vmem:[#allocation2 + $0x38] sm:$0xe]  ;;  %v12007_v27 = vld [vmem:[#allocation3 + $0xc] ss:$36 sps:$4 sm:$0xff]   ;;  %v4155_v25 = vrot.slane %v4077_v52, 5 }
 0x2f0   : > { %5176 = vst [vmem:[#allocation3 + $0x68] sm:$0xf] %v5105_v48  ;;  %v10701_v50 = vrot.slane %v5038_v23, 9  ;;  %v5112_v51 = vrot.slane %v5039_v14, 5  ;;  %5177 = vst [vmem:[#allocation3 + $0x8c] sm:$0xf] %v5109_v8  ;;  %v4152_v61 = vsel %vm13123_vm1, %v10669_v3, %v4151_v45  ;;  %6350 = vmatprep.mubr.bf16.mxu1 %v12007_v27 }
 0x2f1   : > { %v10702_v39 = vrot.slane %v5040_v60, 9  ;;  %v5116_v53 = vrot.slane %v5041_v49, 5  ;;  %v10703_v17 = vrot.slane %v13662_v37, 9  ;;  %v4081_v18 = vld [vmem:[#allocation2 + $0x3c] sm:$0x1]  ;;  %v4156_v58 = vsel %vm13123_vm1, %v10670_v38, %v4155_v25  ;;  %v13688_v60 = vpop.f32.mrf.mxu0  ;;  %v12019_v4 = vld [vmem:[%s15019_s3 + $0x1f0] sm:$0xff]  }
 0x2f2   : > { %4217 = vst [vmem:[#allocation3 + $0x98] sm:$0xf] %v4152_v61  ;;  %v5113_v15 = vsel %vm13123_vm1, %v10701_v50, %v5112_v51  ;;  %v5120_v10 = vrot.slane %v5043_v0, 5  ;;  %v10704_v42 = vrot.slane %v5044_v6, 9  ;;  %v5046_v19 = vld [vmem:[#allocation2 + $0x60] sm:$0xe] }
 0x2f3   : > { %v5047_v29 = vld [vmem:[#allocation2 + $0x64] sm:$0x1]  ;;  %v5048_v22 = vld [vmem:[#allocation2 + $0x68] sm:$0xe]  ;;  %4218 = vst [vmem:[#allocation3 + $0xbc] sm:$0xf] %v4156_v58  ;;  %v5117_v40 = vsel %vm13123_vm1, %v10702_v39, %v5116_v53  ;;  %v13704_v38 = vpop.f32.mrf.mxu0 }
 0x2f4   : > { %5178 = vst [vmem:[#allocation3 + $0xb0] sm:$0xf] %v5113_v15  ;;  %v5124_v56 = vrot.slane %v5045_v31, 5  ;;  %v10671_v20 = vrot.slane %v4078_v2, 9  ;;  %v4159_v44 = vrot.slane %v4079_v11, 5  ;;  %v12013_v23 = vld [vmem:[%s15019_s3 + $0x1b8] sm:$0xff]   ;;  %v5121_v14 = vsel %vm13123_vm1, %v10703_v17, %v5120_v10 }
 0x2f5   : > { %v5049_v54 = vld [vmem:[#allocation2 + $0x6c] sm:$0x1]  ;;  %v5050_v32 = vld [vmem:[#allocation2 + $0x70] sm:$0xe]  ;;  %5179 = vst [vmem:[#allocation3 + $0xd4] sm:$0xf] %v5117_v40 }
 0x2f6   : > { %v12009_v30 = vld [vmem:[#allocation3 + $0x20c] ss:$36 sps:$4 sm:$0xff]   ;;  %v10672_v63 = vrot.slane %v4080_v5, 9  ;;  %v5051_v24 = vld [vmem:[#allocation2 + $0x74] sm:$0x1]  ;;  %v5125_v49 = vsel %vm13123_vm1, %v10704_v42, %v5124_v56  ;;  %v4160_v37 = vsel %vm13123_vm1, %v10671_v20, %v4159_v44  ;;  %v4163_v12 = vrot.slane %v4081_v18, 5 }
 0x2f7   : > { %v12012_v52 = vld [vmem:[#allocation3 + $0x208] ss:$36 sps:$4 sm:$0xff]   ;;  %v5052_v46 = vld [vmem:[#allocation2 + $0x78] sm:$0xe]  ;;  %v5053_v21 = vld [vmem:[#allocation2 + $0x7c] sm:$0x1]  ;;  %6503 = vmatprep.mubr.bf16.mxu0 %v12009_v30  ;;  %v13723_v30 = vpop.f32.mrf.mxu0 }
 0x2f8   : > { %5180 = vst [vmem:[#allocation3 + $0xf8] sm:$0xf] %v5121_v14  ;;  %v13694_v57 = vld [vmem:[#allocation2 + $0x50] sm:$0xe]  ;;  %v12005_v47 = vld [vmem:[#allocation3 + $0x8] ss:$36 sps:$4 sm:$0xff]   ;;  %6504 = vmatmul.mubr.bf16.gmra.mxu0 %v12012_v52  ;;  %v4164_v0 = vsel %vm13123_vm1, %v10672_v63, %v4163_v12 }
 0x2f9   : > { %v12017_v33 = vld [vmem:[#allocation3 + $0x20] ss:$36 sps:$4 sm:$0xff]   ;;  %5181 = vst [vmem:[#allocation3 + $0x11c] sm:$0xf] %v5125_v49  ;;  %4219 = vst [vmem:[#allocation3 + $0xe0] sm:$0xf] %v4160_v37  ;;  %6351 = vmatmul.mubr.bf16.vlgmr.msra.gmra.mxu1 %v12005_v47  ;;  %v11553_v47 = vpop.f32.mrf.mxu0 }
 0x2fa   : > { %v10705_v6 = vrot.slane %v5046_v19, 9  ;;  %v5128_v34 = vrot.slane %v5047_v29, 5  ;;  %v10706_v28 = vrot.slane %v5048_v22, 9  ;;  %v4083_v26 = vld [vmem:[#allocation2 + $0x54] sm:$0x1]  ;;  %11790 = vmatprep.mubr.bf16.mxu0 %v12017_v33  ;;  %v5132_v3 = vrot.slane %v5049_v54, 5  ;;  %11596 = vmatpush3.bf16.msra.mxu1 %v12013_v23 }
 0x2fb   : > { %v4084_v1 = vld [vmem:[#allocation2 + $0x58] sm:$0xe]  ;;  %v4085_v31 = vld [vmem:[#allocation2 + $0x5c] sm:$0x1]  ;;  %v5054_v2 = vld [vmem:[#allocation2 + $0x80] sm:$0xe]  ;;  %11597 = vmatprep.subr.bf16.mxu1 %v12019_v4 }
 0x2fc   : > { %v12015_v11 = vld [vmem:[#allocation3 + $0x54] ss:$36 sps:$4 sm:$0xff]   ;;  %4220 = vst [vmem:[#allocation3 + $0x104] sm:$0xf] %v4164_v0  ;;  %v10707_v45 = vrot.slane %v5050_v32, 9  ;;  %v12026_v5 = vld [vmem:[%s15019_s3 + $0x1e8] sm:$0xff]   ;;  %v5129_v27 = vsel %vm13123_vm1, %v10705_v6, %v5128_v34  ;;  %v5133_v61 = vsel %vm13123_vm1, %v10706_v28, %v5132_v3 }
 0x2fd   : > { %v12021_v48 = vld [vmem:[%s15019_s3 + $0x1b0] sm:$0xff]   ;;  %v5136_v8 = vrot.slane %v5051_v24, 5  ;;  %v10708_v25 = vrot.slane %v5052_v46, 9  ;;  %v5140_v50 = vrot.slane %v5053_v21, 5  ;;  %v5055_v51 = vld [vmem:[#allocation2 + $0x84] sm:$0x1]  ;;  %6358 = vmatprep.mubr.bf16.mxu1 %v12015_v11 }
 0x2fe   : > { %5182 = vst [vmem:[#allocation3 + $0x140] sm:$0xf] %v5129_v27  ;;  %v10673_v39 = vrot.slane %v13694_v57, 9  ;;  %v13714_v53 = vld [vmem:[#allocation2 + $0x60] sm:$0xe]  ;;  %v12028_v29 = vld [vmem:[%s15019_s3 + $0x1a8] sm:$0xff]   ;;  %11598 = vmatpush3.bf16.msra.mxu1 %v12021_v48  ;;  %v11554_v27 = vpop.f32.mrf.mxu0 }
 0x2ff   : > { %5183 = vst [vmem:[#allocation3 + $0x164] sm:$0xf] %v5133_v61  ;;  %v5137_v17 = vsel %vm13123_vm1, %v10707_v45, %v5136_v8  ;;  %v5141_v18 = vsel %vm13123_vm1, %v10708_v25, %v5140_v50  ;;  %v5056_v58 = vld [vmem:[#allocation2 + $0x88] sm:$0xe]  ;;  %v5057_v15 = vld [vmem:[#allocation2 + $0x8c] sm:$0x1]  ;;  %11599 = vmatprep.subr.bf16.mxu1 %v12026_v5 }
 0x300   : > { %v4087_v10 = vld [vmem:[#allocation2 + $0x64] sm:$0x1]  ;;  %v4088_v42 = vld [vmem:[#allocation2 + $0x68] sm:$0xe]  ;;  %v4089_v19 = vld [vmem:[#allocation2 + $0x6c] sm:$0x1] }
 0x301   : > { %5184 = vst [vmem:[#allocation3 + $0x188] sm:$0xf] %v5137_v17  ;;  %5185 = vst [vmem:[#allocation3 + $0x1ac] sm:$0xf] %v5141_v18  ;;  %v4167_v22 = vrot.slane %v4083_v26, 5  ;;  %v10674_v40 = vrot.slane %v4084_v1, 9 }
 0x302   : > { %v4171_v56 = vrot.slane %v4085_v31, 5  ;;  %v10709_v20 = vrot.slane %v5054_v2, 9  ;;  %v5059_v44 = vld [vmem:[#allocation2 + $0x94] sm:$0x1]  ;;  %v5060_v54 = vld [vmem:[#allocation2 + $0x98] sm:$0xe]  ;;  %11600 = vmatpush3.bf16.msra.mxu1 %v12028_v29  ;;  %v13751_v29 = vadd.f32 %v11554_v27, %v11553_v47 }
 0x303   : > { %v5061_v32 = vld [vmem:[#allocation2 + $0x9c] sm:$0x1]  ;;  %v12022_v52 = vld [vmem:[#allocation3 + $0x68] ss:$36 sps:$4 sm:$0xff]   ;;  %v12033_v23 = vld [vmem:[%s15019_s3 + $0x1e0] sm:$0xff]   ;;  %v5144_v14 = vrot.slane %v5055_v51, 5  ;;  %v4168_v21 = vsel %vm13123_vm1, %v10673_v39, %v4167_v22 }
 0x304   : > { %v4090_v63 = vld [vmem:[#allocation2 + $0x70] sm:$0xe]  ;;  %v4091_v24 = vld [vmem:[#allocation2 + $0x74] sm:$0x1]  ;;  %v4172_v49 = vsel %vm13123_vm1, %v10674_v40, %v4171_v56  ;;  %v10710_v37 = vrot.slane %v5056_v58, 9  ;;  %v5148_v12 = vrot.slane %v5057_v15, 5  ;;  %11791 = vmatmul.mubr.bf16.vlgmr.msra.gmra.mxu0 %v12022_v52  ;;  %11601 = vmatprep.subr.bf16.mxu1 %v12033_v23 }
 0x305   : > { %v12025_v46 = vld [vmem:[#allocation3 + $0xb0] ss:$36 sps:$4 sm:$0xff]   ;;  %4221 = vst [vmem:[#allocation3 + $0x128] sm:$0xf] %v4168_v21  ;;  %4222 = vst [vmem:[#allocation3 + $0x14c] sm:$0xf] %v4172_v49  ;;  %v5145_v4 = vsel %vm13123_vm1, %v10709_v20, %v5144_v14 }
 0x306   : > { %v5058_v57 = vld [vmem:[#allocation2 + $0x90] sm:$0xe]  ;;  %v10675_v0 = vrot.slane %v13714_v53, 9  ;;  %v4092_v6 = vld [vmem:[#allocation2 + $0x78] sm:$0xe]  ;;  %11794 = vmatprep.mubr.bf16.mxu0 %v12025_v46  ;;  %v12035_v1 = vld [vmem:[%s15019_s3 + $0x1a0] sm:$0xff]   ;;  %v5149_v31 = vsel %vm13123_vm1, %v10710_v37, %v5148_v12 }
 0x307   : > { %v12020_v33 = vld [vmem:[#allocation3 + $0x50] ss:$36 sps:$4 sm:$0xff]   ;;  %v4093_v34 = vld [vmem:[#allocation2 + $0x7c] sm:$0x1]  ;;  %v4094_v28 = vld [vmem:[#allocation2 + $0x80] sm:$0xe]  ;;  %11602 = vmatpush3.bf16.msra.mxu1 %v12035_v1 }
 0x308   : > { %v12023_v26 = vld [vmem:[#allocation3 + $0x9c] ss:$36 sps:$4 sm:$0xff]   ;;  %5186 = vst [vmem:[#allocation3 + $0x1d0] sm:$0xf] %v5145_v4  ;;  %v4175_v2 = vrot.slane %v4087_v10, 5  ;;  %v10676_v11 = vrot.slane %v4088_v42, 9  ;;  %6359 = vmatmul.mubr.bf16.gmra.mxu1 %v12020_v33 }
 0x309   : > { %v4179_v48 = vrot.slane %v4089_v19, 5  ;;  %v4095_v3 = vld [vmem:[#allocation2 + $0x84] sm:$0x1]  ;;  %v4097_v45 = vld [vmem:[#allocation2 + $0x8c] sm:$0x1]  ;;  %v10711_v8 = vrot.slane %v5058_v57, 9  ;;  %6366 = vmatprep.mubr.bf16.mxu1 %v12023_v26 }
 0x30a   : > { %v4742_v5 = vld [vmem:[#allocation2 + $0x10] sm:$0xf]  ;;  %5187 = vst [vmem:[#allocation3 + $0x1f4] sm:$0xf] %v5149_v31  ;;  %v5152_v25 = vrot.slane %v5059_v44, 5  ;;  %v10712_v50 = vrot.slane %v5060_v54, 9  ;;  %v4176_v61 = vsel %vm13123_vm1, %v10675_v0, %v4175_v2 }
 0x30b   : > { %v5156_v51 = vrot.slane %v5061_v32, 5  ;;  %v4180_v39 = vsel %vm13123_vm1, %v10676_v11, %v4179_v48  ;;  %v10677_v53 = vrot.slane %v4090_v63, 9  ;;  %v4183_v17 = vrot.slane %v4091_v24, 5  ;;  %v4096_v18 = vld [vmem:[#allocation2 + $0x88] sm:$0xe]  ;;  %v12040_v15 = vld [vmem:[%s15019_s3 + $0x1d8] sm:$0xff]  }
 0x30c   : > { %v4744_v58 = vld [vmem:[#allocation2 + $0x18] sm:$0xf]  ;;  %4223 = vst [vmem:[#allocation3 + $0x170] sm:$0xf] %v4176_v61  ;;  %4224 = vst [vmem:[#allocation3 + $0x194] sm:$0xf] %v4180_v39  ;;  %v5153_v10 = vsel %vm13123_vm1, %v10711_v8, %v5152_v25  ;;  %11603 = vmatprep.subr.bf16.mxu1 %v12040_v15 }
 0x30d   : > { %v5157_v42 = vsel %vm13123_vm1, %v10712_v50, %v5156_v51  ;;  %v4743_v19 = vld [vmem:[#allocation2 + $0x14] sm:$0x1]  ;;  %v12042_v22 = vld [vmem:[%s15019_s3 + $0x198] sm:$0xff]   ;;  %5188 = vst [vmem:[#allocation3 + $0x218] sm:$0xf] %v5153_v10  ;;  %v4184_v40 = vsel %vm13123_vm1, %v10677_v53, %v4183_v17  ;;  %v10678_v56 = vrot.slane %v4092_v6, 9 }
 0x30e   : > { %5189 = vst [vmem:[#allocation3 + $0x23c] sm:$0xf] %v5157_v42  ;;  %v4187_v20 = vrot.slane %v4093_v34, 5  ;;  %v10679_v44 = vrot.slane %v4094_v28, 9  ;;  %v4746_v54 = vld [vmem:[#allocation2 + $0x20] sm:$0xf]  ;;  %11604 = vmatpush3.bf16.msra.mxu1 %v12042_v22 }
 0x30f   : > { %v12029_v32 = vld [vmem:[#allocation3 + $0xf8] ss:$36 sps:$4 sm:$0xff]   ;;  %v12046_v52 = vld [vmem:[%s15019_s3 + $0x1d0] sm:$0xff]   ;;  %4225 = vst [vmem:[#allocation3 + $0x1b8] sm:$0xf] %v4184_v40  ;;  %v4191_v23 = vrot.slane %v4095_v3, 5 }
 0x310   : > { %v10680_v14 = vrot.slane %v4096_v18, 9  ;;  %v4195_v63 = vrot.slane %v4097_v45, 5  ;;  %v4775_v24 = vshrl.u32 %v4742_v5, 16  ;;  %v12032_v46 = vld [vmem:[#allocation3 + $0x140] ss:$36 sps:$4 sm:$0xff]   ;;  %v4188_v21 = vsel %vm13123_vm1, %v10678_v56, %v4187_v20  ;;  %11795 = vmatmul.mubr.bf16.gmra.mxu0 %v12029_v32  ;;  %v12048_v6 = vld [vmem:[%s15019_s3 + $0x190] sm:$0xff]   ;;  %11605 = vmatprep.subr.bf16.mxu1 %v12046_v52 }
 0x311   : > { %v4745_v49 = vld [vmem:[#allocation2 + $0x1c] sm:$0x1]  ;;  %v4778_v37 = vshll.u32 %v4742_v5, 16  ;;  %4226 = vst [vmem:[#allocation3 + $0x1dc] sm:$0xf] %v4188_v21  ;;  %v4192_v57 = vsel %vm13123_vm1, %v10679_v44, %v4191_v23  ;;  %v4789_v4 = vshrl.u32 %v4744_v58, 16  ;;  %11798 = vmatprep.mubr.bf16.mxu0 %v12032_v46 }
 0x312   : > { %v12027_v12 = vld [vmem:[#allocation3 + $0x98] ss:$36 sps:$4 sm:$0xff]   ;;  %v4196_v47 = vsel %vm13123_vm1, %v10680_v14, %v4195_v63  ;;  %v4777_v33 = vrot.slane %v4775_v24, 4  ;;  %v12030_v0 = vld [vmem:[#allocation3 + $0xe4] ss:$36 sps:$4 sm:$0xff]   ;;  %v4784_v28 = vshll.u32 %v4743_v19, 16  ;;  %11606 = vmatpush3.bf16.msra.mxu1 %v12048_v6 }
 0x313   : > { %4227 = vst [vmem:[#allocation3 + $0x200] sm:$0xf] %v4192_v57  ;;  %4228 = vst [vmem:[#allocation3 + $0x224] sm:$0xf] %v4196_v47  ;;  %v4780_v34 = vrot.slane %v4778_v37, 5  ;;  %6367 = vmatmul.mubr.bf16.gmra.mxu1 %v12027_v12  ;;  %v4792_v26 = vshll.u32 %v4744_v58, 16 }
 0x314   : > { %v4747_v1 = vld [vmem:[#allocation2 + $0x24] sm:$0x1]  ;;  %v4748_v31 = vld [vmem:[#allocation2 + $0x28] sm:$0xf]  ;;  %v4803_v2 = vshrl.u32 %v4746_v54, 16  ;;  %6374 = vmatprep.mubr.bf16.mxu1 %v12030_v0  ;;  %v4791_v11 = vrot.slane %v4789_v4, 4 }
 0x315   : > { %v4781_v16 = vor.u32 %v4780_v34, %v4777_v33  ;;  %v4749_v48 = vld [vmem:[#allocation2 + $0x2c] sm:$0x1]  ;;  %v4806_v3 = vshll.u32 %v4746_v54, 16  ;;  %v4798_v5 = vshll.u32 %v4745_v49, 16  ;;  %v4750_v27 = vld [vmem:[#allocation2 + $0x30] sm:$0xf] }
 0x316   : > { %v12051_v45 = vld [vmem:[%s15019_s3 + $0x1c8] sm:$0xff]   ;;  %v4786_v50 = vrot.slane %v4784_v28, 5  ;;  %v4794_v51 = vrot.slane %v4792_v26, 5  ;;  %v13776_v61 = vld [vmem:[#allocation2 + $0x34] sm:$0x1]  ;;  %v4805_v17 = vrot.slane %v4803_v2, 4 }
 0x317   : > { %v12053_v8 = vld [vmem:[%s15019_s3 + $0x188] sm:$0xff]   ;;  %v4782_v25 = vrot.slane %v4781_v16, 4  ;;  %v4752_v39 = vld [vmem:[#allocation2 + $0x38] sm:$0xf]  ;;  %v4808_v18 = vrot.slane %v4806_v3, 5  ;;  %v4812_v58 = vshll.u32 %v4747_v1, 16  ;;  %11607 = vmatprep.subr.bf16.mxu1 %v12051_v45 }
 0x318   : > { %v12036_v53 = vld [vmem:[#allocation3 + $0x188] ss:$36 sps:$4 sm:$0xff]   ;;  %v4817_v15 = vshrl.u32 %v4748_v31, 16  ;;  %v12034_v10 = vld [vmem:[#allocation3 + $0xe0] ss:$36 sps:$4 sm:$0xff]   ;;  %v4795_v22 = vor.u32 %v4794_v51, %v4791_v11  ;;  %v4820_v40 = vshll.u32 %v4748_v31, 16  ;;  %11608 = vmatpush3.bf16.msra.mxu1 %v12053_v8 }
 0x319   : > { %v12039_v42 = vld [vmem:[#allocation3 + $0x1d0] ss:$36 sps:$4 sm:$0xff]   ;;  %v4787_v19 = vsel %vm13072_vm4, %v4782_v25, %v4786_v50  ;;  %11799 = vmatmul.mubr.bf16.gmra.mxu0 %v12036_v53  ;;  %v12056_v56 = vld [vmem:[%s15019_s3 + $0x1c0] sm:$0xff]   ;;  %v4800_v20 = vrot.slane %v4798_v5, 5  ;;  %v4809_v44 = vor.u32 %v4808_v18, %v4805_v17  ;;  %v4826_v32 = vshll.u32 %v4749_v48, 16 }
 0x31a   : > { %5014 = vst [vmem:[#allocation3 + $0x1c] sm:$0xf] %v4787_v19  ;;  %v4819_v54 = vrot.slane %v4817_v15, 4  ;;  %v12037_v52 = vld [vmem:[#allocation3 + $0x12c] ss:$36 sps:$4 sm:$0xff]   ;;  %11802 = vmatprep.mubr.bf16.mxu0 %v12039_v42  ;;  %v4796_v23 = vrot.slane %v4795_v22, 4  ;;  %11609 = vmatprep.subr.bf16.mxu1 %v12056_v56 }
 0x31b   : > { %v4822_v14 = vrot.slane %v4820_v40, 5  ;;  %v4753_v63 = vld [vmem:[#allocation2 + $0x3c] sm:$0x1]  ;;  %v4831_v24 = vshrl.u32 %v4750_v27, 16  ;;  %v4834_v46 = vshll.u32 %v4750_v27, 16  ;;  %6375 = vmatmul.mubr.bf16.gmra.mxu1 %v12034_v10  ;;  %v4810_v21 = vrot.slane %v4809_v44, 4  ;;  %v13795_v44 = vpop.f32.mrf.mxu1 }
 0x31c   : > { %v4814_v49 = vrot.slane %v4812_v58, 5  ;;  %v4840_v37 = vshll.u32 %v13776_v61, 16  ;;  %v4845_v12 = vshrl.u32 %v4752_v39, 16  ;;  %v4754_v57 = vld [vmem:[#allocation2 + $0x40] sm:$0xf]  ;;  %6382 = vmatprep.mubr.bf16.mxu1 %v12037_v52  ;;  %v4801_v33 = vsel %vm13072_vm4, %v4796_v23, %v4800_v20 }
 0x31d   : > { %v12058_v47 = vld [vmem:[%s15019_s3 + $0x180] sm:$0xff]   ;;  %v4823_v4 = vor.u32 %v4822_v14, %v4819_v54  ;;  %v4833_v0 = vrot.slane %v4831_v24, 4  ;;  %v4836_v6 = vrot.slane %v4834_v46, 5  ;;  %v4756_v34 = vld [vmem:[#allocation2 + $0x48] sm:$0xf]  ;;  %v4848_v31 = vshll.u32 %v4752_v39, 16 }
 0x31e   : > { %v12045_v28 = vld [vmem:[#allocation3 + $0x218] ss:$36 sps:$4 sm:$0xff]   ;;  %5015 = vst [vmem:[#allocation3 + $0x40] sm:$0xf] %v4801_v33  ;;  %v4815_v26 = vsel %vm13072_vm4, %v4810_v21, %v4814_v49  ;;  %v4847_v1 = vrot.slane %v4845_v12, 4  ;;  %v4828_v11 = vrot.slane %v4826_v32, 5  ;;  %11610 = vmatpush3.bf16.msra.mxu1 %v12058_v47 }
 0x31f   : > { %v4755_v2 = vld [vmem:[#allocation2 + $0x44] sm:$0x1]  ;;  %v4824_v16 = vrot.slane %v4823_v4, 4  ;;  %5016 = vst [vmem:[#allocation3 + $0x64] sm:$0xf] %v4815_v26  ;;  %v4837_v48 = vor.u32 %v4836_v6, %v4833_v0  ;;  %v4859_v45 = vshrl.u32 %v4754_v57, 16  ;;  %v13799_v6 = vpop.f32.mrf.mxu1 }
 0x320   : > { %v4757_v3 = vld [vmem:[#allocation2 + $0x4c] sm:$0x1]  ;;  %v4850_v5 = vrot.slane %v4848_v31, 5  ;;  %v4854_v27 = vshll.u32 %v4753_v63, 16  ;;  %v4862_v8 = vshll.u32 %v4754_v57, 16  ;;  %v4873_v25 = vshrl.u32 %v4756_v34, 16 }
 0x321   : > { %v4758_v50 = vld [vmem:[#allocation2 + $0x60] sm:$0xf]  ;;  %v4829_v51 = vsel %vm13072_vm4, %v4824_v16, %v4828_v11  ;;  %v4838_v61 = vrot.slane %v4837_v48, 4  ;;  %v4842_v53 = vrot.slane %v4840_v37, 5  ;;  %v4861_v17 = vrot.slane %v4859_v45, 4  ;;  %11803 = vmatmul.mubr.bf16.gmra.mxu0 %v12045_v28 }
 0x322   : > { %v4759_v39 = vld [vmem:[#allocation2 + $0x64] sm:$0x1]  ;;  %v12041_v18 = vld [vmem:[#allocation3 + $0x128] ss:$36 sps:$4 sm:$0xff]   ;;  %5017 = vst [vmem:[#allocation3 + $0x88] sm:$0xf] %v4829_v51  ;;  %v4851_v58 = vor.u32 %v4850_v5, %v4847_v1 }
 0x323   : > { %v4864_v15 = vrot.slane %v4862_v8, 5  ;;  %v4868_v10 = vshll.u32 %v4755_v2, 16  ;;  %v4875_v42 = vrot.slane %v4873_v25, 4  ;;  %v12043_v19 = vld [vmem:[#allocation3 + $0x174] ss:$36 sps:$4 sm:$0xff]   ;;  %v4843_v22 = vsel %vm13072_vm4, %v4838_v61, %v4842_v53  ;;  %6383 = vmatmul.mubr.bf16.gmra.mxu1 %v12041_v18 }
 0x324   : > { %v4876_v40 = vshll.u32 %v4756_v34, 16  ;;  %v4882_v56 = vshll.u32 %v4757_v3, 16  ;;  %v4887_v20 = vshrl.u32 %v4758_v50, 16  ;;  %v4852_v54 = vrot.slane %v4851_v58, 4  ;;  %5018 = vst [vmem:[#allocation3 + $0xac] sm:$0xf] %v4843_v22  ;;  %6390 = vmatprep.mubr.bf16.mxu1 %v12043_v19  ;;  %v11431_v3 = vpop.f32.mrf.mxu1 }
 0x325   : > { %v4856_v32 = vrot.slane %v4854_v27, 5  ;;  %v4865_v52 = vor.u32 %v4864_v15, %v4861_v17  ;;  %v4760_v23 = vld [vmem:[#allocation2 + $0x68] sm:$0xf]  ;;  %v4890_v14 = vshll.u32 %v4758_v50, 16  ;;  %v4896_v24 = vshll.u32 %v4759_v39, 16 }
 0x326   : > { %v4878_v63 = vrot.slane %v4876_v40, 5  ;;  %v4762_v46 = vld [vmem:[#allocation2 + $0x70] sm:$0xf]  ;;  %v4870_v37 = vrot.slane %v4868_v10, 5  ;;  %v4889_v12 = vrot.slane %v4887_v20, 4  ;;  %v4884_v47 = vrot.slane %v4882_v56, 5  ;;  %v11432_v18 = vpop.f32.mrf.mxu1 }
 0x327   : > { %v4857_v21 = vsel %vm13072_vm4, %v4852_v54, %v4856_v32  ;;  %v4866_v49 = vrot.slane %v4865_v52, 4  ;;  %v4761_v33 = vld [vmem:[#allocation2 + $0x6c] sm:$0x1]  ;;  %v4892_v4 = vrot.slane %v4890_v14, 5  ;;  %v4901_v0 = vshrl.u32 %v4760_v23, 16 }
 0x328   : > { %5019 = vst [vmem:[#allocation3 + $0xd0] sm:$0xf] %v4857_v21  ;;  %v4879_v57 = vor.u32 %v4878_v63, %v4875_v42  ;;  %v4904_v28 = vshll.u32 %v4760_v23, 16  ;;  %v4763_v26 = vld [vmem:[#allocation2 + $0x74] sm:$0x1]  ;;  %v4915_v31 = vshrl.u32 %v4762_v46, 16  ;;  %v13807_v52 = vadd.f32 %v11432_v18, %v11431_v3 }
 0x329   : > { %v4871_v34 = vsel %vm13072_vm4, %v4866_v49, %v4870_v37  ;;  %v4764_v1 = vld [vmem:[#allocation2 + $0x78] sm:$0xf]  ;;  %v4893_v16 = vor.u32 %v4892_v4, %v4889_v12  ;;  %v4898_v11 = vrot.slane %v4896_v24, 5  ;;  %v4765_v48 = vld [vmem:[#allocation2 + $0x7c] sm:$0x1]  ;;  %v4903_v27 = vrot.slane %v4901_v0, 4 }
 0x32a   : > { %v4880_v2 = vrot.slane %v4879_v57, 4  ;;  %5020 = vst [vmem:[#allocation3 + $0xf4] sm:$0xf] %v4871_v34  ;;  %v4766_v45 = vld [vmem:[#allocation2 + $0x80] sm:$0xf]  ;;  %v4906_v8 = vrot.slane %v4904_v28, 5 }
 0x32b   : > { %v12047_v5 = vld [vmem:[#allocation3 + $0x170] ss:$36 sps:$4 sm:$0xff]   ;;  %v4910_v25 = vshll.u32 %v4761_v33, 16  ;;  %v4917_v50 = vrot.slane %v4915_v31, 4  ;;  %v12049_v51 = vld [vmem:[#allocation3 + $0x1bc] ss:$36 sps:$4 sm:$0xff]  }
 0x32c   : > { %v4885_v61 = vsel %vm13072_vm4, %v4880_v2, %v4884_v47  ;;  %v4894_v53 = vrot.slane %v4893_v16, 4  ;;  %v4918_v17 = vshll.u32 %v4762_v46, 16  ;;  %v4924_v39 = vshll.u32 %v4763_v26, 16  ;;  %6391 = vmatmul.mubr.bf16.gmra.mxu1 %v12047_v5  ;;  %v4767_v22 = vld [vmem:[#allocation2 + $0x84] sm:$0x1] }
 0x32d   : > { %5021 = vst [vmem:[#allocation3 + $0x118] sm:$0xf] %v4885_v61  ;;  %v4907_v58 = vor.u32 %v4906_v8, %v4903_v27  ;;  %v4929_v15 = vshrl.u32 %v4764_v1, 16  ;;  %v4932_v10 = vshll.u32 %v4764_v1, 16  ;;  %6398 = vmatprep.mubr.bf16.mxu1 %v12049_v51  ;;  %v4943_v40 = vshrl.u32 %v4766_v45, 16 }
 0x32e   : > { %v4899_v42 = vsel %vm13072_vm4, %v4894_v53, %v4898_v11  ;;  %v4920_v19 = vrot.slane %v4918_v17, 5  ;;  %v4912_v20 = vrot.slane %v4910_v25, 5  ;;  %v4938_v54 = vshll.u32 %v4765_v48, 16  ;;  %v4768_v32 = vld [vmem:[#allocation2 + $0x88] sm:$0xf] }
 0x32f   : > { %v4908_v56 = vrot.slane %v4907_v58, 4  ;;  %5022 = vst [vmem:[#allocation3 + $0x13c] sm:$0xf] %v4899_v42  ;;  %v4926_v14 = vrot.slane %v4924_v39, 5  ;;  %v4931_v63 = vrot.slane %v4929_v15, 4  ;;  %v4934_v24 = vrot.slane %v4932_v10, 5 }
 0x330   : > { %v4921_v23 = vor.u32 %v4920_v19, %v4917_v50  ;;  %v4769_v46 = vld [vmem:[#allocation2 + $0x8c] sm:$0x1]  ;;  %v4945_v49 = vrot.slane %v4943_v40, 4  ;;  %v4946_v37 = vshll.u32 %v4766_v45, 16  ;;  %v4952_v12 = vshll.u32 %v4767_v22, 16 }
 0x331   : > { %v4913_v21 = vsel %vm13072_vm4, %v4908_v56, %v4912_v20  ;;  %v4770_v57 = vld [vmem:[#allocation2 + $0x90] sm:$0xf]  ;;  %v4935_v33 = vor.u32 %v4934_v24, %v4931_v63  ;;  %v4957_v4 = vshrl.u32 %v4768_v32, 16  ;;  %v4960_v0 = vshll.u32 %v4768_v32, 16  ;;  %v4771_v34 = vld [vmem:[#allocation2 + $0x94] sm:$0x1] }
 0x332   : > { %5023 = vst [vmem:[#allocation3 + $0x160] sm:$0xf] %v4913_v21  ;;  %v4922_v47 = vrot.slane %v4921_v23, 4  ;;  %v12052_v28 = vld [vmem:[#allocation3 + $0x1b8] ss:$36 sps:$4 sm:$0xff]   ;;  %v4948_v26 = vrot.slane %v4946_v37, 5 }
 0x333   : > { %v4772_v1 = vld [vmem:[#allocation2 + $0x98] sm:$0xf]  ;;  %v12054_v31 = vld [vmem:[#allocation3 + $0x204] ss:$36 sps:$4 sm:$0xff]   ;;  %v4936_v16 = vrot.slane %v4935_v33, 4  ;;  %v4940_v11 = vrot.slane %v4938_v54, 5 }
 0x334   : > { %v4927_v2 = vsel %vm13072_vm4, %v4922_v47, %v4926_v14  ;;  %6399 = vmatmul.mubr.bf16.gmra.mxu1 %v12052_v28  ;;  %v4949_v48 = vor.u32 %v4948_v26, %v4945_v49  ;;  %v4959_v3 = vrot.slane %v4957_v4, 4  ;;  %v4962_v45 = vrot.slane %v4960_v0, 5  ;;  %v4773_v27 = vld [vmem:[#allocation2 + $0x9c] sm:$0x1]  ;;  %v12057_v32 = vld [vmem:[#allocation3 + $0x200] ss:$36 sps:$4 sm:$0xff]  }
 0x335   : > { %5024 = vst [vmem:[#allocation3 + $0x184] sm:$0xf] %v4927_v2  ;;  %v4966_v5 = vshll.u32 %v4769_v46, 16  ;;  %6406 = vmatprep.mubr.bf16.mxu1 %v12054_v31  ;;  %v4941_v8 = vsel %vm13072_vm4, %v4936_v16, %v4940_v11  ;;  %v4954_v25 = vrot.slane %v4952_v12, 5  ;;  %v4971_v50 = vshrl.u32 %v4770_v57, 16  ;;  %v13823_v12 = vpop.f32.mrf.mxu0 }
 0x336   : > { %v4974_v51 = vshll.u32 %v4770_v57, 16  ;;  %5025 = vst [vmem:[#allocation3 + $0x1a8] sm:$0xf] %v4941_v8  ;;  %v4950_v61 = vrot.slane %v4949_v48, 4  ;;  %v4963_v53 = vor.u32 %v4962_v45, %v4959_v3  ;;  %v4980_v17 = vshll.u32 %v4771_v34, 16  ;;  %v13831_v3 = vpop.f32.mrf.mxu1 }
 0x337   : > { %v4985_v39 = vshrl.u32 %v4772_v1, 16  ;;  %v4973_v18 = vrot.slane %v4971_v50, 4  ;;  %v4988_v15 = vshll.u32 %v4772_v1, 16  ;;  %v4994_v10 = vshll.u32 %v4773_v27, 16  ;;  %v12061_v14 = vld [vmem:[#allocation3 + $0x1c] ss:$36 sps:$4 sm:$0xff]   ;;  %v13825_v33 = vpop.f32.mrf.mxu0 }
 0x338   : > { %v4976_v58 = vrot.slane %v4974_v51, 5  ;;  %v4955_v42 = vsel %vm13072_vm4, %v4950_v61, %v4954_v25  ;;  %v4964_v19 = vrot.slane %v4963_v53, 4  ;;  %v4968_v22 = vrot.slane %v4966_v5, 5  ;;  %v12059_v57 = vld [vmem:[#allocation3 + $0x18] ss:$36 sps:$4 sm:$0xff]   ;;  %v13833_v45 = vpop.f32.mrf.mxu1 }
 0x339   : > { %5026 = vst [vmem:[#allocation3 + $0x1cc] sm:$0xf] %v4955_v42  ;;  %v4982_v56 = vrot.slane %v4980_v17, 5  ;;  %v4987_v20 = vrot.slane %v4985_v39, 4  ;;  %v4990_v54 = vrot.slane %v4988_v15, 5  ;;  %v4996_v46 = vrot.slane %v4994_v10, 5  ;;  %v11559_v4 = vpop.f32.mrf.mxu0 }
 0x33a   : > { %v4977_v40 = vor.u32 %v4976_v58, %v4973_v18  ;;  %v4969_v23 = vsel %vm13072_vm4, %v4964_v19, %v4968_v22  ;;  %v12062_v47 = vld [vmem:[#allocation3 + $0x64] ss:$36 sps:$4 sm:$0xff]   ;;  %v12065_v1 = vld [vmem:[#allocation3 + $0xac] ss:$36 sps:$4 sm:$0xff]   ;;  %v12068_v16 = vld [vmem:[#allocation3 + $0xf4] ss:$36 sps:$4 sm:$0xff]  }
 0x33b   : > { %5027 = vst [vmem:[#allocation3 + $0x1f0] sm:$0xf] %v4969_v23  ;;  %v4991_v24 = vor.u32 %v4990_v54, %v4987_v20  ;;  %v11560_v0 = vpop.f32.mrf.mxu0  ;;  %v12064_v28 = vld [vmem:[#allocation3 + $0x60] ss:$36 sps:$4 sm:$0xff]   ;;  %v12067_v2 = vld [vmem:[#allocation3 + $0xa8] ss:$36 sps:$4 sm:$0xff]  }
 0x33c   : > { %v4978_v63 = vrot.slane %v4977_v40, 4  ;;  %6407 = vmatmul.mubr.bf16.gmra.mxu1 %v12057_v32  ;;  %v13827_v34 = vadd.f32 %v11560_v0, %v11559_v4  ;;  %v12070_v11 = vld [vmem:[#allocation3 + $0xf0] ss:$36 sps:$4 sm:$0xff]   ;;  %v12071_v48 = vld [vmem:[#allocation3 + $0x13c] ss:$36 sps:$4 sm:$0xff]  }
 0x33d   : > { %6544 = vmatprep.mubr.bf16.mxu1 %v12061_v14  ;;  %v4992_v49 = vrot.slane %v4991_v24, 4  ;;  %v11562_v26 = vpop.f32.mrf.mxu0  ;;  %v12073_v5 = vld [vmem:[#allocation3 + $0x138] ss:$36 sps:$4 sm:$0xff]   ;;  %v12074_v8 = vld [vmem:[#allocation3 + $0x184] ss:$36 sps:$4 sm:$0xff]  }
 0x33e   : > { %v4983_v21 = vsel %vm13072_vm4, %v4978_v63, %v4982_v56  ;;  %v12076_v17 = vld [vmem:[#allocation3 + $0x180] ss:$36 sps:$4 sm:$0xff]   ;;  %v12079_v18 = vld [vmem:[#allocation3 + $0x1c8] ss:$36 sps:$4 sm:$0xff]   ;;  %v12082_v15 = vld [vmem:[#allocation3 + $0x210] ss:$36 sps:$4 sm:$0xff]  }
 0x33f   : > { %5028 = vst [vmem:[#allocation3 + $0x214] sm:$0xf] %v4983_v21  ;;  %v4997_v37 = vsel %vm13072_vm4, %v4992_v49, %v4996_v46  ;;  %v11563_v31 = vpop.f32.mrf.mxu0  ;;  %v7168_v4 = vld [vmem:[#allocation4 + $0x4] sm:$0x1]  ;;  %vm7193_vm5 = vsmask.f32 7946 }
 0x340   : > { %5029 = vst [vmem:[#allocation3 + $0x238] sm:$0xf] %v4997_v37  ;;  %v13829_v43 = vadd.f32 %v11563_v31, %v11562_v26  ;;  %v7195_v0 = vld [vmem:[#allocation4 + $0x4] sm:$0x4]  ;;  %v7169_v26 = vsel %vm12617_vm7, 0, %v7168_v4  ;;  %vm13854_vm12 = vmand %vm3479_vm9, %vm7193_vm5 }
 0x341   : > { %7170 = vst [vmem:[#allocation4 + $0x4] sm:$0x1] %v7169_v26  ;;  %v7201_v26 = vld [vmem:[#allocation4 + $0xc] sm:$0x4]  ;;  %vm7550_vm13 = vsmask.f32 3336 }
 0x342   : > { %v12077_v39 = vld [vmem:[#allocation3 + $0x1cc] ss:$36 sps:$4 sm:$0xff]  }
 0x344   : > { %6545 = vmatmul.mubr.bf16.vlgmr.msra.gmra.mxu1 %v12059_v57 }
 0x345   : > { %6552 = vmatprep.mubr.bf16.mxu1 %v12062_v47 }
 0x346   : > { %v11437_v27 = vpop.f32.mrf.mxu1 }
 0x347   : > { %v12080_v58 = vld [vmem:[#allocation3 + $0x214] ss:$36 sps:$4 sm:$0xff]  }
 0x348   : > { %v11438_v25 = vpop.f32.mrf.mxu1 }
 0x349   : > { %v13835_v50 = vadd.f32 %v11438_v25, %v11437_v27 }
 0x34a   : > { %v11440_v51 = vpop.f32.mrf.mxu1 }
 0x34c   : > { %6553 = vmatmul.mubr.bf16.gmra.mxu1 %v12064_v28  ;;  %v11441_v61 = vpop.f32.mrf.mxu1 }
 0x34d   : > { %6560 = vmatprep.mubr.bf16.mxu1 %v12065_v1  ;;  %v13837_v53 = vadd.f32 %v11441_v61, %v11440_v51 }
 0x354   : > { %6561 = vmatmul.mubr.bf16.gmra.mxu1 %v12067_v2  ;;  %v7196_v2 = vsel %vm13854_vm12, 0, %v7195_v0 }
 0x355   : > { %6568 = vmatprep.mubr.bf16.mxu1 %v12068_v16  ;;  %7197 = vst [vmem:[#allocation4 + $0x4] sm:$0x4] %v7196_v2 }
 0x35c   : > { %6569 = vmatmul.mubr.bf16.gmra.mxu1 %v12070_v11 }
 0x35d   : > { %6576 = vmatprep.mubr.bf16.mxu1 %v12071_v48 }
 0x364   : > { %6577 = vmatmul.mubr.bf16.gmra.mxu1 %v12073_v5 }
 0x365   : > { %6584 = vmatprep.mubr.bf16.mxu1 %v12074_v8 }
 0x369   : > { %v11565_v10 = vpop.f32.mrf.mxu0 }
 0x36b   : > { %v11566_v42 = vpop.f32.mrf.mxu0 }
 0x36c   : > { %6585 = vmatmul.mubr.bf16.gmra.mxu1 %v12076_v17  ;;  %v13839_v19 = vadd.f32 %v11566_v42, %v11565_v10 }
 0x36d   : > { %6592 = vmatprep.mubr.bf16.mxu1 %v12077_v39  ;;  %v11568_v22 = vpop.f32.mrf.mxu0  ;;  %v7171_v39 = vld [vmem:[#allocation4 + $0x8] sm:$0x1] }
 0x36f   : > { %v11569_v40 = vpop.f32.mrf.mxu0 }
 0x370   : > { %v13841_v56 = vadd.f32 %v11569_v40, %v11568_v22 }
 0x372   : > { %v11443_v20 = vpop.f32.mrf.mxu1 }
 0x374   : > { %6593 = vmatmul.mubr.bf16.gmra.mxu1 %v12079_v18  ;;  %v11444_v54 = vpop.f32.mrf.mxu1  ;;  %v7198_v18 = vld [vmem:[#allocation4 + $0x8] sm:$0x4] }
 0x375   : > { %6600 = vmatprep.mubr.bf16.mxu1 %v12080_v58  ;;  %v13843_v32 = vadd.f32 %v11444_v54, %v11443_v20  ;;  %v7172_v58 = vsel %vm12617_vm7, 0, %v7171_v39 }
 0x376   : > { %v11446_v23 = vpop.f32.mrf.mxu1  ;;  %7173 = vst [vmem:[#allocation4 + $0x8] sm:$0x1] %v7172_v58 }
 0x378   : > { %v11447_v14 = vpop.f32.mrf.mxu1 }
 0x379   : > { %v13845_v63 = vadd.f32 %v11447_v14, %v11446_v23 }
 0x37c   : > { %6601 = vmatmul.mubr.bf16.gmra.mxu1 %v12082_v15  ;;  %v7199_v15 = vsel %vm13854_vm12, 0, %v7198_v18 }
 0x37d   : > { %7200 = vst [vmem:[#allocation4 + $0x8] sm:$0x4] %v7199_v15 }
 0x380   : > { %v11571_v24 = vpop.f32.mrf.mxu0 }
 0x382   : > { %v11572_v46 = vpop.f32.mrf.mxu0 }
 0x383   : > { %v13847_v21 = vadd.f32 %v11572_v46, %v11571_v24 }
 0x384   : > { %v11574_v49 = vpop.f32.mrf.mxu0 }
 0x386   : > { %v11575_v37 = vpop.f32.mrf.mxu0 }
 0x387   : > { %v13849_v57 = vadd.f32 %v11575_v37, %v11574_v49 }
 0x38b   : > { %v11449_v47 = vpop.f32.mrf.mxu1 }
 0x38d   : > { %v11450_v28 = vpop.f32.mrf.mxu1 }
 0x38e   : > { %v13858_v31 = vadd.f32 %v11450_v28, %v11449_v47  ;;  %v7174_v28 = vld [vmem:[#allocation4 + $0xc] sm:$0x1] }
 0x38f   : > { %v11452_v16 = vpop.f32.mrf.mxu1  ;;  %v7175_v2 = vsel %vm12617_vm7, 0, %v7174_v28 }
 0x390   : > { %v11577_v11 = vpop.f32.mrf.mxu0  ;;  %7176 = vst [vmem:[#allocation4 + $0xc] sm:$0x1] %v7175_v2  ;;  %v12089_v2 = vld [vmem:[%s15021_s5 + $0x160] ss:$8 sps:$4 sm:$0xff]  }
 0x391   : > { %v11453_v48 = vpop.f32.mrf.mxu1 }
 0x392   : > { %v11578_v5 = vpop.f32.mrf.mxu0  ;;  %v13862_v27 = vadd.f32 %v11453_v48, %v11452_v16  ;;  %v7202_v16 = vsel %vm13854_vm12, 0, %v7201_v26  ;;  %v12094_v26 = vld [vmem:[%s15021_s5 + $0x64] ss:$8 sps:$4 sm:$0xff]  }
 0x393   : > { %v13864_v8 = vadd.f32 %v11578_v5, %v11577_v11  ;;  %7203 = vst [vmem:[#allocation4 + $0xc] sm:$0x4] %v7202_v16 }
 0x394   : > { %v11580_v25 = vpop.f32.mrf.mxu0 }
 0x396   : > { %v11581_v51 = vpop.f32.mrf.mxu0 }
 0x397   : > { %v13866_v61 = vadd.f32 %v11581_v51, %v11580_v25  ;;  %v13891_v25 = vld [vmem:[%s15020_s4] ss:$0 sm:$0xff] }
 0x398   : > { %v6256_v15 = vadd.f32 %v13612_v35, %v13891_v25  ;;  %v12085_v35 = vld [vmem:[%s15021_s5 + $0x174] ss:$8 sps:$4 sm:$0xff]  }
 0x399   : > { %v11455_v17 = vpop.f32.mrf.mxu1  ;;  %9787 = vmatprep.subr.bf16.mxu0 %v12085_v35 }
 0x39b   : > { %v11456_v10 = vpop.f32.mrf.mxu1 }
 0x39c   : > { %v13872_v42 = vadd.f32 %v11456_v10, %v11455_v17 }
 0x39d   : > { %v11458_v22 = vpop.f32.mrf.mxu1 }
 0x39f   : > { %v11459_v20 = vpop.f32.mrf.mxu1 }
 0x3a0   : > { %v13874_v54 = vadd.f32 %v11459_v20, %v11458_v22  ;;  %v11549_v20 = vadd.f32 %v13688_v60, %v13672_v59  ;;  %v12088_v59 = vld [vmem:[%s15021_s5 + $0x74] ss:$8 sps:$4 sm:$0xff]   ;;  %v12091_v60 = vld [vmem:[%s15021_s5 + $0x164] ss:$8 sps:$4 sm:$0xff]  }
 0x3a1   : > { %v11583_v40 = vpop.f32.mrf.mxu0  ;;  %9734 = vmatprep.subr.bf16.mxu1 %v12088_v59  ;;  %v6272_v59 = vadd.f32 %v13807_v52, %v13891_v25 }
 0x3a3   : > { %v11584_v23 = vpop.f32.mrf.mxu0 }
 0x3a4   : > { %v13876_v14 = vadd.f32 %v11584_v23, %v11583_v40 }
 0x3a5   : > { %v11586_v24 = vpop.f32.mrf.mxu0 }
 0x3a7   : > { %v11587_v46 = vpop.f32.mrf.mxu0 }
 0x3a8   : > { %v13878_v49 = vadd.f32 %v11587_v46, %v11586_v24 }
 0x3ae   : > { %v11461_v37 = vpop.f32.mrf.mxu1 }
 0x3b0   : > { %v11462_v47 = vpop.f32.mrf.mxu1 }
 0x3b1   : > { %v13880_v4 = vadd.f32 %v11462_v47, %v11461_v37  ;;  %v12083_v37 = vld [vmem:[%s15021_s5 + $0x170] ss:$8 sps:$4 sm:$0xff]  }
 0x3b2   : > { %v11464_v0 = vpop.f32.mrf.mxu1  ;;  %v12086_v47 = vld [vmem:[%s15021_s5 + $0x70] ss:$8 sps:$4 sm:$0xff]   ;;  %9788 = vmatpush1.bf16.msra.mxu0 %v12083_v37 }
 0x3b3   : > { %9735 = vmatpush1.bf16.msra.mxu1 %v12086_v47  ;;  %9789 = vmatprep.subr.bf16.mxu0 %v12091_v60  ;;  %v11436_v60 = vadd.f32 %v13833_v45, %v13831_v3  ;;  %v12100_v45 = vld [vmem:[%s15021_s5 + $0x54] ss:$8 sps:$4 sm:$0xff]  }
 0x3b4   : > { %v11465_v11 = vpop.f32.mrf.mxu1  ;;  %9736 = vmatprep.subr.bf16.mxu1 %v12094_v26 }
 0x3b5   : > { %v13886_v5 = vadd.f32 %v11465_v11, %v11464_v0  ;;  %v12092_v11 = vld [vmem:[%s15021_s5 + $0x60] ss:$8 sps:$4 sm:$0xff]   ;;  %v6275_v52 = vadd.f32 %v11436_v60, %v13891_v25 }
 0x3b6   : > { %9790 = vmatpush1.bf16.msra.mxu0 %v12089_v2 }
 0x3b7   : > { %9737 = vmatpush1.bf16.msra.mxu1 %v12092_v11  ;;  %v12095_v11 = vld [vmem:[%s15021_s5 + $0x150] ss:$8 sps:$4 sm:$0xff]  }
 0x3b8   : > { %v11589_v48 = vpop.f32.mrf.mxu0  ;;  %9738 = vmatprep.subr.bf16.mxu1 %v12100_v45  ;;  %v12118_v45 = vld [vmem:[%s15021_s5 + $0x24] ss:$8 sps:$4 sm:$0xff]  }
 0x3b9   : > { %v11483_v51 = vpop.f32.mrf.mxu1 }
 0x3ba   : > { %v11590_v17 = vpop.f32.mrf.mxu0 }
 0x3bb   : > { %v13893_v39 = vadd.f32 %v11590_v17, %v11589_v48  ;;  %v11484_v18 = vpop.f32.mrf.mxu1  ;;  %v6264_v48 = vadd.f32 %v13642_v55, %v13891_v25 }
 0x3bc   : > { %v11592_v58 = vpop.f32.mrf.mxu0  ;;  %v11485_v10 = vadd.f32 %v11484_v18, %v11483_v51  ;;  %v11430_v51 = vadd.f32 %v13799_v6, %v13795_v44 }
 0x3bd   : > { %v13897_v22 = vpop.f32.mrf.mxu1 }
 0x3be   : > { %v11593_v40 = vpop.f32.mrf.mxu0  ;;  %v6353_v23 = vadd.f32 %v11485_v10, %v6256_v15  ;;  %v7204_v15 = vld [vmem:[#allocation4 + $0x10] sm:$0x4]  ;;  %v6267_v55 = vadd.f32 %v11430_v51, %v13891_v25 }
 0x3bf   : > { %v13901_v24 = vadd.f32 %v11593_v40, %v11592_v58  ;;  %v13903_v46 = vpop.f32.mrf.mxu1  ;;  %v7177_v58 = vld [vmem:[#allocation4 + $0x10] sm:$0x1] }
 0x3c0   : > { %v13914_v0 = vadd.f32 %v11549_v20, %v6353_v23  ;;  %v7178_v40 = vsel %vm12617_vm7, 0, %v7177_v58  ;;  %v7205_v20 = vsel %vm13854_vm12, 0, %v7204_v15  ;;  %v12106_v58 = vld [vmem:[%s15021_s5 + $0x44] ss:$8 sps:$4 sm:$0xff]   ;;  %v7180_v15 = vld [vmem:[#allocation4 + $0x1c] sm:$0x1] }
 0x3c1   : > { %7179 = vst [vmem:[#allocation4 + $0x10] sm:$0x1] %v7178_v40  ;;  %7206 = vst [vmem:[#allocation4 + $0x10] sm:$0x4] %v7205_v20  ;;  %v7181_v40 = vsel %vm12617_vm7, 0, %v7180_v15 }
 0x3c2   : > { %v7207_v20 = vld [vmem:[#allocation4 + $0x1c] sm:$0x4]  ;;  %7182 = vst [vmem:[#allocation4 + $0x1c] sm:$0x1] %v7181_v40 }
 0x3c8   : > { %v11489_v28 = vpop.f32.mrf.mxu1 }
 0x3ca   : > { %v11490_v16 = vpop.f32.mrf.mxu1 }
 0x3cb   : > { %v11491_v17 = vadd.f32 %v11490_v16, %v11489_v28 }
 0x3cc   : > { %v11492_v18 = vpop.f32.mrf.mxu1 }
 0x3cd   : > { %v6361_v10 = vadd.f32 %v11491_v17, %v6264_v48  ;;  %v12098_v48 = vld [vmem:[%s15021_s5 + $0x50] ss:$8 sps:$4 sm:$0xff]   ;;  %v12103_v17 = vld [vmem:[%s15021_s5 + $0x144] ss:$8 sps:$4 sm:$0xff]  }
 0x3ce   : > { %v11493_v23 = vpop.f32.mrf.mxu1  ;;  %9739 = vmatpush1.bf16.msra.mxu1 %v12098_v48  ;;  %v12112_v48 = vld [vmem:[%s15021_s5 + $0x34] ss:$8 sps:$4 sm:$0xff]  }
 0x3cf   : > { %v11494_v44 = vadd.f32 %v11493_v23, %v11492_v18  ;;  %v13941_v6 = vadd.f32 %v13751_v29, %v6361_v10  ;;  %v12097_v29 = vld [vmem:[%s15021_s5 + $0x154] ss:$8 sps:$4 sm:$0xff]   ;;  %9740 = vmatprep.subr.bf16.mxu1 %v12106_v58  ;;  %v6288_v58 = vadd.f32 %v13843_v32, %v13891_v25  ;;  %v6296_v32 = vadd.f32 %v13858_v31, %v13891_v25 }
 0x3d0   : > { %9791 = vmatprep.subr.bf16.mxu0 %v12097_v29  ;;  %v6299_v31 = vadd.f32 %v13862_v27, %v13891_v25  ;;  %v12121_v27 = vld [vmem:[%s15021_s5 + $0x114] ss:$8 sps:$4 sm:$0xff]  }
 0x3d1   : > { %v13943_v35 = vadd.f32 %v11494_v44, %v6267_v55  ;;  %9792 = vmatpush1.bf16.msra.mxu0 %v12095_v11  ;;  %v12104_v55 = vld [vmem:[%s15021_s5 + $0x40] ss:$8 sps:$4 sm:$0xff]   ;;  %v7208_v44 = vsel %vm13854_vm12, 0, %v7207_v20 }
 0x3d2   : > { %9793 = vmatprep.subr.bf16.mxu0 %v12103_v17  ;;  %7209 = vst [vmem:[#allocation4 + $0x1c] sm:$0x4] %v7208_v44  ;;  %9741 = vmatpush1.bf16.msra.mxu1 %v12104_v55 }
 0x3d3   : > { %v11495_v37 = vpop.f32.mrf.mxu1  ;;  %9742 = vmatprep.subr.bf16.mxu1 %v12112_v48 }
 0x3d5   : > { %v11496_v47 = vpop.f32.mrf.mxu1 }
 0x3d6   : > { %v11497_v28 = vadd.f32 %v11496_v47, %v11495_v37  ;;  %v6280_v37 = vadd.f32 %v13835_v50, %v13891_v25  ;;  %v6283_v50 = vadd.f32 %v13837_v53, %v13891_v25  ;;  %v12113_v53 = vld [vmem:[%s15021_s5 + $0x120] ss:$8 sps:$4 sm:$0xff]  }
 0x3d7   : > { %v11498_v26 = vpop.f32.mrf.mxu1 }
 0x3d8   : > { %v6369_v2 = vadd.f32 %v11497_v28, %v6272_v59 }
 0x3d9   : > { %v11499_v16 = vpop.f32.mrf.mxu1 }
 0x3da   : > { %v11500_v51 = vadd.f32 %v11499_v16, %v11498_v26  ;;  %v13960_v3 = vadd.f32 %v13827_v34, %v6369_v2  ;;  %v12101_v34 = vld [vmem:[%s15021_s5 + $0x140] ss:$8 sps:$4 sm:$0xff]   ;;  %v12107_v2 = vld [vmem:[%s15021_s5 + $0x130] ss:$8 sps:$4 sm:$0xff]   ;;  %v12109_v16 = vld [vmem:[%s15021_s5 + $0x134] ss:$8 sps:$4 sm:$0xff]  }
 0x3db   : > { %v11501_v18 = vpop.f32.mrf.mxu1  ;;  %9794 = vmatpush1.bf16.msra.mxu0 %v12101_v34 }
 0x3dc   : > { %v6372_v10 = vadd.f32 %v11500_v51, %v6275_v52  ;;  %v12115_v52 = vld [vmem:[%s15021_s5 + $0x124] ss:$8 sps:$4 sm:$0xff]   ;;  %9795 = vmatprep.subr.bf16.mxu0 %v12109_v16 }
 0x3dd   : > { %v11502_v23 = vpop.f32.mrf.mxu1 }
 0x3de   : > { %v11503_v47 = vadd.f32 %v11502_v23, %v11501_v18  ;;  %v13984_v59 = vadd.f32 %v13829_v43, %v6372_v10  ;;  %v12110_v43 = vld [vmem:[%s15021_s5 + $0x30] ss:$8 sps:$4 sm:$0xff]   ;;  %v12116_v18 = vld [vmem:[%s15021_s5 + $0x20] ss:$8 sps:$4 sm:$0xff]   ;;  %v6291_v23 = vadd.f32 %v13845_v63, %v13891_v25 }
 0x3df   : > { %v11504_v60 = vpop.f32.mrf.mxu1  ;;  %9796 = vmatpush1.bf16.msra.mxu0 %v12107_v2  ;;  %9743 = vmatpush1.bf16.msra.mxu1 %v12110_v43 }
 0x3e0   : > { %v6377_v28 = vadd.f32 %v11503_v47, %v6280_v37  ;;  %9797 = vmatprep.subr.bf16.mxu0 %v12115_v52  ;;  %9744 = vmatprep.subr.bf16.mxu1 %v12118_v45  ;;  %v6304_v45 = vadd.f32 %v13872_v42, %v13891_v25  ;;  %v12124_v42 = vld [vmem:[%s15021_s5 + $0x14] ss:$8 sps:$4 sm:$0xff]  }
 0x3e1   : > { %v11505_v26 = vpop.f32.mrf.mxu1 }
 0x3e2   : > { %v11506_v11 = vadd.f32 %v11505_v26, %v11504_v60  ;;  %v13998_v29 = vadd.f32 %v13839_v19, %v6377_v28  ;;  %v7183_v60 = vld [vmem:[#allocation4 + $0x20] sm:$0x1]  ;;  %v7210_v28 = vld [vmem:[#allocation4 + $0x20] sm:$0x4] }
 0x3e3   : > { %v11507_v51 = vpop.f32.mrf.mxu1  ;;  %9798 = vmatpush1.bf16.msra.mxu0 %v12113_v53  ;;  %9745 = vmatpush1.bf16.msra.mxu1 %v12116_v18  ;;  %v7184_v16 = vsel %vm12617_vm7, 0, %v7183_v60  ;;  %v7211_v63 = vsel %vm13854_vm12, 0, %v7210_v28  ;;  %v12119_v18 = vld [vmem:[%s15021_s5 + $0x110] ss:$8 sps:$4 sm:$0xff]   ;;  %v12133_v28 = vld [vmem:[%s15021_s5 + $0x1f4] ss:$8 sps:$4 sm:$0xff]  }
 0x3e4   : > { %v6380_v17 = vadd.f32 %v11506_v11, %v6283_v50  ;;  %7185 = vst [vmem:[#allocation4 + $0x20] sm:$0x1] %v7184_v16  ;;  %7212 = vst [vmem:[#allocation4 + $0x20] sm:$0x4] %v7211_v63  ;;  %9799 = vmatprep.subr.bf16.mxu0 %v12121_v27  ;;  %9746 = vmatprep.subr.bf16.mxu1 %v12124_v42  ;;  %v12136_v16 = vld [vmem:[%s15021_s5 + $0xf4] ss:$8 sps:$4 sm:$0xff]   ;;  %v6312_v63 = vadd.f32 %v13880_v4, %v13891_v25 }
 0x3e5   : > { %v11508_v19 = vpop.f32.mrf.mxu1  ;;  %v12139_v4 = vld [vmem:[%s15021_s5 + $0x1e4] ss:$8 sps:$4 sm:$0xff]  }
 0x3e6   : > { %v11509_v15 = vadd.f32 %v11508_v19, %v11507_v51  ;;  %v14018_v10 = vadd.f32 %v13841_v56, %v6380_v17 }
 0x3e7   : > { %v11510_v34 = vpop.f32.mrf.mxu1  ;;  %9800 = vmatpush1.bf16.msra.mxu0 %v12119_v18 }
 0x3e8   : > { %v6385_v40 = vadd.f32 %v11509_v15, %v6288_v58 }
 0x3e9   : > { %v11511_v20 = vpop.f32.mrf.mxu1 }
 0x3ea   : > { %v11512_v55 = vadd.f32 %v11511_v20, %v11510_v34  ;;  %v14023_v44 = vadd.f32 %v13847_v21, %v6385_v40  ;;  %v12130_v34 = vld [vmem:[%s15021_s5 + $0x4] ss:$8 sps:$4 sm:$0xff]   ;;  %v6307_v20 = vadd.f32 %v13874_v54, %v13891_v25  ;;  %v12128_v54 = vld [vmem:[%s15021_s5] ss:$8 sps:$4 sm:$0xff]  }
 0x3eb   : > { %v7186_v40 = vld [vmem:[#allocation4 + $0x24] sm:$0x1] }
 0x3ec   : > { %v11513_v37 = vpop.f32.mrf.mxu1  ;;  %v6388_v47 = vadd.f32 %v11512_v55, %v6291_v23 }
 0x3ee   : > { %v11514_v56 = vpop.f32.mrf.mxu1  ;;  %v14028_v2 = vadd.f32 %v13849_v57, %v6388_v47  ;;  %v7187_v47 = vsel %vm12617_vm7, 0, %v7186_v40 }
 0x3ef   : > { %v11515_v26 = vadd.f32 %v11514_v56, %v11513_v37  ;;  %v12125_v37 = vld [vmem:[%s15021_s5 + $0x100] ss:$8 sps:$4 sm:$0xff]   ;;  %7188 = vst [vmem:[#allocation4 + $0x24] sm:$0x1] %v7187_v47 }
 0x3f0   : > { %v11516_v21 = vpop.f32.mrf.mxu1 }
 0x3f1   : > { %v6393_v43 = vadd.f32 %v11515_v26, %v6296_v32  ;;  %v7213_v32 = vld [vmem:[#allocation4 + $0x24] sm:$0x4] }
 0x3f2   : > { %v11517_v50 = vpop.f32.mrf.mxu1 }
 0x3f3   : > { %v11518_v11 = vadd.f32 %v11517_v50, %v11516_v21  ;;  %v14037_v48 = vadd.f32 %v13864_v8, %v6393_v43  ;;  %v12122_v8 = vld [vmem:[%s15021_s5 + $0x10] ss:$8 sps:$4 sm:$0xff]  }
 0x3f4   : > { %v11519_v57 = vpop.f32.mrf.mxu1  ;;  %9747 = vmatpush1.bf16.msra.mxu1 %v12122_v8  ;;  %v12131_v50 = vld [vmem:[%s15021_s5 + $0x1f0] ss:$8 sps:$4 sm:$0xff]   ;;  %v12140_v8 = vld [vmem:[%s15021_s5 + $0xe0] ss:$8 sps:$4 sm:$0xff]  }
 0x3f5   : > { %v6396_v52 = vadd.f32 %v11518_v11, %v6299_v31  ;;  %9748 = vmatprep.subr.bf16.mxu1 %v12130_v34  ;;  %v12134_v11 = vld [vmem:[%s15021_s5 + $0xf0] ss:$8 sps:$4 sm:$0xff]  }
 0x3f6   : > { %v11520_v51 = vpop.f32.mrf.mxu1 }
 0x3f7   : > { %v11521_v17 = vadd.f32 %v11520_v51, %v11519_v57  ;;  %v14042_v53 = vadd.f32 %v13866_v61, %v6396_v52  ;;  %v12127_v61 = vld [vmem:[%s15021_s5 + $0x104] ss:$8 sps:$4 sm:$0xff]   ;;  %v11424_v57 = vadd.f32 %v13636_v62, %v13626_v9  ;;  %v14102_v51 = vpop.f32.mrf.mxu0  ;;  %v12137_v9 = vld [vmem:[%s15021_s5 + $0x1e0] ss:$8 sps:$4 sm:$0xff]  }
 0x3f8   : > { %v11522_v19 = vpop.f32.mrf.mxu1  ;;  %9801 = vmatprep.subr.bf16.mxu0 %v12127_v61  ;;  %9749 = vmatpush1.bf16.msra.mxu1 %v12128_v54  ;;  %v12142_v52 = vld [vmem:[%s15021_s5 + $0xe4] ss:$8 sps:$4 sm:$0xff]  }
 0x3f9   : > { %v6401_v58 = vadd.f32 %v11521_v17, %v6304_v45  ;;  %9802 = vmatpush1.bf16.msra.mxu0 %v12125_v37  ;;  %9750 = vmatprep.subr.bf16.mxu1 %v12136_v16  ;;  %v6315_v17 = vadd.f32 %v13886_v5, %v13891_v25  ;;  %v6259_v5 = vadd.f32 %v11424_v57, %v13891_v25  ;;  %v6643_v42 = vpop.f32.mrf.mxu0  ;;  %v12143_v16 = vld [vmem:[%s15021_s5 + $0x1d0] ss:$8 sps:$4 sm:$0xff]   ;;  %v12154_v57 = vld [vmem:[%s15021_s5 + $0xc4] ss:$8 sps:$4 sm:$0xff]  }
 0x3fa   : > { %v11523_v15 = vpop.f32.mrf.mxu1  ;;  %9803 = vmatprep.subr.bf16.mxu0 %v12133_v28 }
 0x3fb   : > { %v11524_v23 = vadd.f32 %v11523_v15, %v11522_v19  ;;  %v14065_v55 = vadd.f32 %v13876_v14, %v6401_v58  ;;  %v7214_v14 = vsel %vm13854_vm12, 0, %v7213_v32  ;;  %v11488_v19 = vadd.f32 %v13903_v46, %v13897_v22  ;;  %v7189_v22 = vld [vmem:[#allocation4 + $0x28] sm:$0x1]  ;;  %v7216_v46 = vld [vmem:[#allocation4 + $0x28] sm:$0x4]  ;;  %v11793_v36 = vpop.f32.mrf.mxu0 }
 0x3fc   : > { %v11525_v56 = vpop.f32.mrf.mxu1  ;;  %7215 = vst [vmem:[#allocation4 + $0x24] sm:$0x4] %v7214_v14  ;;  %9751 = vmatpush2.bf16.msra.mxu1 %v12134_v11  ;;  %v7190_v61 = vsel %vm12617_vm7, 0, %v7189_v22  ;;  %v7217_v15 = vsel %vm13854_vm12, 0, %v7216_v46  ;;  %vm7387_vm7 = vsmask.f32 2306 }
 0x3fd   : > { %v6404_v60 = vadd.f32 %v11524_v23, %v6307_v20  ;;  %9804 = vmatpush2.bf16.msra.mxu0 %v12131_v50  ;;  %9752 = vmatprep.subr.bf16.mxu1 %v12142_v52  ;;  %v6356_v34 = vadd.f32 %v11488_v19, %v6259_v5  ;;  %7191 = vst [vmem:[#allocation4 + $0x28] sm:$0x1] %v7190_v61  ;;  %7218 = vst [vmem:[#allocation4 + $0x28] sm:$0x4] %v7217_v15  ;;  %v12149_v52 = vld [vmem:[%s15021_s5 + $0x1c0] ss:$8 sps:$4 sm:$0xff]  }
 0x3fe   : > { %v11526_v26 = vpop.f32.mrf.mxu1  ;;  %9805 = vmatprep.subr.bf16.mxu0 %v12139_v4  ;;  %v11552_v23 = vadd.f32 %v13723_v30, %v13704_v38  ;;  %v12145_v38 = vld [vmem:[%s15021_s5 + $0x1d4] ss:$8 sps:$4 sm:$0xff]   ;;  %v12146_v30 = vld [vmem:[%s15021_s5 + $0xd0] ss:$8 sps:$4 sm:$0xff]   ;;  %v11558_v50 = vadd.f32 %v13825_v33, %v13823_v12  ;;  %v12152_v33 = vld [vmem:[%s15021_s5 + $0xc0] ss:$8 sps:$4 sm:$0xff]  }
 0x3ff   : > { %v11527_v21 = vadd.f32 %v11526_v26, %v11525_v56  ;;  %v14086_v43 = vadd.f32 %v13878_v49, %v6404_v60  ;;  %v6646_v60 = vpop.f32.mrf.mxu0  ;;  %v12163_v61 = vld [vmem:[%s15021_s5 + $0x1a4] ss:$8 sps:$4 sm:$0xff]   ;;  %vm14260_vm14 = vmand %vm4130_vm6, %vm7387_vm7  ;;  %vm7552_vm6 = vsmask.f32 5392 }
 0x400   : > { %v11528_v31 = vpop.f32.mrf.mxu1  ;;  %9753 = vmatpush2.bf16.msra.mxu1 %v12140_v8  ;;  %v6453_v32 = vadd.f32 %v11552_v23, %v6356_v34  ;;  %v12166_v15 = vld [vmem:[%s15021_s5 + $0xa4] ss:$8 sps:$4 sm:$0xff]  }
 0x401   : > { %v6409_v49 = vadd.f32 %v11527_v21, %v6312_v63  ;;  %9806 = vmatpush2.bf16.msra.mxu0 %v12137_v9  ;;  %v12148_v63 = vld [vmem:[%s15021_s5 + $0xd4] ss:$8 sps:$4 sm:$0xff]   ;;  %v12151_v21 = vld [vmem:[%s15021_s5 + $0x1c4] ss:$8 sps:$4 sm:$0xff]   ;;  %v14178_v34 = vpop.f32.mrf.mxu0 }
 0x402   : > { %v11529_v45 = vpop.f32.mrf.mxu1  ;;  %9807 = vmatprep.subr.bf16.mxu0 %v12145_v38  ;;  %9754 = vmatprep.subr.bf16.mxu1 %v12148_v63  ;;  %v12160_v9 = vld [vmem:[%s15021_s5 + $0xb4] ss:$8 sps:$4 sm:$0xff]  }
 0x403   : > { %v11530_v18 = vadd.f32 %v11529_v45, %v11528_v31  ;;  %v14109_v27 = vadd.f32 %v13893_v39, %v6409_v49 }
 0x404   : > { %v11611_v62 = vpop.f32.mrf.mxu1  ;;  %9755 = vmatpush2.bf16.msra.mxu1 %v12146_v30 }
 0x405   : > { %v6412_v58 = vadd.f32 %v11530_v18, %v6315_v17  ;;  %9808 = vmatpush2.bf16.msra.mxu0 %v12143_v16  ;;  %v6461_v17 = vadd.f32 %v11558_v50, %v13943_v35  ;;  %9756 = vmatprep.subr.bf16.mxu1 %v12154_v57 }
 0x406   : > { %v11612_v39 = vpop.f32.mrf.mxu1  ;;  %9809 = vmatprep.subr.bf16.mxu0 %v12151_v21  ;;  %v6659_v21 = vpop.f32.mrf.mxu0 }
 0x407   : > { %v11613_v40 = vadd.f32 %v11612_v39, %v11611_v62  ;;  %v14123_v20 = vadd.f32 %v13901_v24, %v6412_v58  ;;  %v12155_v58 = vld [vmem:[%s15021_s5 + $0x1b0] ss:$8 sps:$4 sm:$0xff]  }
 0x408   : > { %v11614_v25 = vpop.f32.mrf.mxu1  ;;  %9757 = vmatpush2.bf16.msra.mxu1 %v12152_v33 }
 0x409   : > { %v6547_v37 = vadd.f32 %v11613_v40, %v13914_v0  ;;  %9810 = vmatpush2.bf16.msra.mxu0 %v12149_v52  ;;  %9758 = vmatprep.subr.bf16.mxu1 %v12160_v9 }
 0x40a   : > { %v11615_v47 = vpop.f32.mrf.mxu1 }
 0x40b   : > { %v11616_v1 = vadd.f32 %v11615_v47, %v11614_v25  ;;  %v6644_v54 = vadd.f32 %v6643_v42, %v6547_v37  ;;  %v14180_v47 = vld.sshfl [vmem:[#allocation4] sm:$0x12 pattern:$0x76325410] }
 0x40c   : > { %v11617_v56 = vpop.f32.mrf.mxu1  ;;  %v7731_v63 = vcombine.high %v14180_v47, %v14180_v47 }
 0x40d   : > { %v6550_v14 = vadd.f32 %v11616_v1, %v6453_v32  ;;  %v6706_v31 = vmax.f32 %v6644_v54, 0.0 }
 0x40e   : > { %v11618_v28 = vpop.f32.mrf.mxu1 }
 0x40f   : > { %v6647_v24 = vadd.f32 %v6646_v60, %v6550_v14  ;;  %v11619_v26 = vadd.f32 %v11618_v28, %v11617_v56 }
 0x410   : > { %v11620_v0 = vpop.f32.mrf.mxu1 }
 0x411   : > { %v6707_v11 = vmax.f32 %v6647_v24, 0.0  ;;  %v6555_v4 = vadd.f32 %v11619_v26, %v13941_v6  ;;  %v12157_v6 = vld [vmem:[%s15021_s5 + $0x1b4] ss:$8 sps:$4 sm:$0xff]   ;;  %v12161_v26 = vld [vmem:[%s15021_s5 + $0x1a0] ss:$8 sps:$4 sm:$0xff]  }
 0x412   : > { %v11621_v49 = vpop.f32.mrf.mxu1  ;;  %9811 = vmatprep.subr.bf16.mxu0 %v12157_v6 }
 0x413   : > { %v6722_v45 = vmax.f32 %v6706_v31, %v6707_v11  ;;  %v11622_v12 = vadd.f32 %v11621_v49, %v11620_v0  ;;  %v6652_v19 = vadd.f32 %v14102_v51, %v6555_v4  ;;  %v12158_v51 = vld [vmem:[%s15021_s5 + $0xb0] ss:$8 sps:$4 sm:$0xff]   ;;  %9812 = vmatpush2.bf16.msra.mxu0 %v12155_v58  ;;  %v12164_v0 = vld [vmem:[%s15021_s5 + $0xa0] ss:$8 sps:$4 sm:$0xff]   ;;  %v12172_v49 = vld [vmem:[%s15021_s5 + $0x94] ss:$8 sps:$4 sm:$0xff]  }
 0x414   : > { %v11623_v18 = vpop.f32.mrf.mxu1  ;;  %9759 = vmatpush2.bf16.msra.mxu1 %v12158_v51  ;;  %9813 = vmatprep.subr.bf16.mxu0 %v12163_v61  ;;  %v12175_v51 = vld [vmem:[%s15021_s5 + $0x184] ss:$8 sps:$4 sm:$0xff]  }
 0x415   : > { %v6738_v35 = vcombine.high %v6722_v45, %v6722_v45  ;;  %v6745_v62 = vrot.slane %v6722_v45, %v12681_v13  ;;  %v6558_v8 = vadd.f32 %v11622_v12, %v6461_v17  ;;  %v6708_v25 = vmax.f32 %v6652_v19, 0.0  ;;  %9760 = vmatprep.subr.bf16.mxu1 %v12166_v15  ;;  %v12178_v15 = vld [vmem:[%s15021_s5 + $0x84] ss:$8 sps:$4 sm:$0xff]  }
 0x416   : > { %v11624_v5 = vpop.f32.mrf.mxu1 }
 0x417   : > { %v6752_v22 = vrot.slane %v6738_v35, %v12681_v13  ;;  %v6753_v46 = vcombine.high %v6745_v62, %v6745_v62  ;;  %v6906_v42 = vsel %vm1831_vm8, %v6745_v62, -inf  ;;  %v6655_v39 = vadd.f32 %v11793_v36, %v6558_v8  ;;  %9814 = vmatpush2.bf16.msra.mxu0 %v12161_v26  ;;  %v12167_v35 = vld [vmem:[%s15021_s5 + $0x190] ss:$8 sps:$4 sm:$0xff]  }
 0x418   : > { %v6907_v40 = vrot.slane %v6906_v42, 4  ;;  %v11625_v23 = vadd.f32 %v11624_v5, %v11623_v18  ;;  %v11626_v37 = vpop.f32.mrf.mxu1  ;;  %9761 = vmatpush2.bf16.msra.mxu1 %v12164_v0 }
 0x419   : > { %v6754_v36 = vcombine.high %v6752_v22, %v6752_v22  ;;  %v6913_v32 = vsel %vm1831_vm8, %v6753_v46, -inf  ;;  %v6920_v1 = vsel %vm1831_vm8, %v6752_v22, -inf  ;;  %v6709_v56 = vmax.f32 %v6655_v39, 0.0  ;;  %9762 = vmatprep.subr.bf16.mxu1 %v12172_v49 }
 0x41a   : > { %v6908_v54 = vmax.f32 %v6906_v42, %v6907_v40  ;;  %v6914_v14 = vrot.slane %v6913_v32, 4  ;;  %v6921_v60 = vrot.slane %v6920_v1, 4  ;;  %v6563_v28 = vadd.f32 %v11625_v23, %v13960_v3  ;;  %v11627_v24 = vpop.f32.mrf.mxu1  ;;  %v12169_v3 = vld [vmem:[%s15021_s5 + $0x194] ss:$8 sps:$4 sm:$0xff]  }
 0x41b   : > { %v6927_v16 = vsel %vm1831_vm8, %v6754_v36, -inf  ;;  %v6723_v38 = vmax.f32 %v6708_v25, %v6709_v56  ;;  %v11628_v30 = vadd.f32 %v11627_v24, %v11626_v37  ;;  %9815 = vmatprep.subr.bf16.mxu0 %v12169_v3 }
 0x41c   : > { %v6909_v50 = vrot.slane %v6908_v54, 2  ;;  %v6915_v31 = vmax.f32 %v6913_v32, %v6914_v14  ;;  %v6922_v11 = vmax.f32 %v6920_v1, %v6921_v60  ;;  %v6928_v4 = vrot.slane %v6927_v16, 4  ;;  %v14197_v57 = vpop.f32.mrf.mxu1  ;;  %9816 = vmatpush2.bf16.msra.mxu0 %v12167_v35  ;;  %v12173_v14 = vld [vmem:[%s15021_s5 + $0x180] ss:$8 sps:$4 sm:$0xff]  }
 0x41d   : > { %v6755_v52 = vcombine.high %v6723_v38, %v6723_v38  ;;  %v6762_v45 = vrot.slane %v6723_v38, %v12681_v13  ;;  %v14203_v17 = vadd.f32 %v6659_v21, %v6563_v28  ;;  %v14206_v12 = vadd.f32 %v11628_v30, %v13984_v59  ;;  %v12170_v59 = vld [vmem:[%s15021_s5 + $0x90] ss:$8 sps:$4 sm:$0xff]   ;;  %v12176_v60 = vld [vmem:[%s15021_s5 + $0x80] ss:$8 sps:$4 sm:$0xff]   ;;  %v14237_v28 = vpop.f32.mrf.mxu0  ;;  %9817 = vmatprep.subr.bf16.mxu0 %v12175_v51  ;;  %v12186_v30 = vld [vmem:[%s15021_s5 + $0x374] ss:$8 sps:$4 sm:$0xff]  }
 0x41e   : > { %v6910_v33 = vmax.f32 %v6908_v54, %v6909_v50  ;;  %v6916_v6 = vrot.slane %v6915_v31, 2  ;;  %v6923_v19 = vrot.slane %v6922_v11, 2  ;;  %v6929_v18 = vmax.f32 %v6927_v16, %v6928_v4  ;;  %v14208_v9 = vpop.f32.mrf.mxu1  ;;  %9763 = vmatpush2.bf16.msra.mxu1 %v12170_v59 }
 0x41f   : > { %v6769_v62 = vrot.slane %v6755_v52, %v12681_v13  ;;  %v6770_v8 = vcombine.high %v6762_v45, %v6762_v45  ;;  %v6934_v5 = vsel %vm1831_vm8, %v6762_v45, -inf  ;;  %v6710_v58 = vmax.f32 %v14203_v17, 0.0  ;;  %9764 = vmatprep.subr.bf16.mxu1 %v12178_v15 }
 0x420   : > { %v6911_v22 = vrot.slane %v6910_v33, 1  ;;  %v6917_v46 = vmax.f32 %v6915_v31, %v6916_v6  ;;  %v6924_v42 = vmax.f32 %v6922_v11, %v6923_v19  ;;  %v6930_v39 = vrot.slane %v6929_v18, 2  ;;  %v14222_v61 = vpop.f32.mrf.mxu1  ;;  %v12194_v11 = vld [vmem:[%s15021_s5 + $0x274] ss:$8 sps:$4 sm:$0xff]   ;;  %9818 = vmatpush2.bf16.msra.mxu0 %v12173_v14 }
 0x421   : > { %v6771_v40 = vcombine.high %v6769_v62, %v6769_v62  ;;  %v6935_v25 = vrot.slane %v6934_v5, 4  ;;  %v6941_v23 = vsel %vm1831_vm8, %v6770_v8, -inf  ;;  %v6948_v37 = vsel %vm1831_vm8, %v6769_v62, -inf  ;;  %v6662_v62 = vpop.f32.mrf.mxu0  ;;  %9893 = vmatprep.subr.bf16.mxu0 %v12186_v30  ;;  %v7389_v30 = vld [vmem:[#allocation4 + $0x4] sm:$0x7] }
 0x422   : > { %v6912_v36 = vmax.f32 %v6910_v33, %v6911_v22  ;;  %v6918_v32 = vrot.slane %v6917_v46, 1  ;;  %v6925_v1 = vrot.slane %v6924_v42, 1  ;;  %v6931_v56 = vmax.f32 %v6929_v18, %v6930_v39  ;;  %v14229_v54 = vpop.f32.mrf.mxu1  ;;  %9765 = vmatpush2.bf16.msra.mxu1 %v12176_v60 }
 0x423   : > { %v6936_v24 = vmax.f32 %v6934_v5, %v6935_v25  ;;  %v6942_v26 = vrot.slane %v6941_v23, 4  ;;  %v6949_v16 = vrot.slane %v6948_v37, 4  ;;  %v6955_v38 = vsel %vm1831_vm8, %v6771_v40, -inf  ;;  %9840 = vmatprep.subr.bf16.mxu1 %v12194_v11 }
 0x424   : > { %v6919_v0 = vmax.f32 %v6917_v46, %v6918_v32  ;;  %v6926_v3 = vmax.f32 %v6924_v42, %v6925_v1  ;;  %v6932_v21 = vrot.slane %v6931_v56, 1  ;;  %v11336_v50 = vpack.c.bf16 %v6912_v36, %v6912_v36  ;;  %v14243_v31 = vpop.f32.mrf.mxu1 }
 0x425   : > { %v6937_v4 = vrot.slane %v6936_v24, 2  ;;  %v6943_v49 = vmax.f32 %v6941_v23, %v6942_v26  ;;  %v6950_v52 = vmax.f32 %v6948_v37, %v6949_v16  ;;  %v6956_v45 = vrot.slane %v6955_v38, 4 }
 0x426   : > { %v6933_v33 = vmax.f32 %v6931_v56, %v6932_v21  ;;  %v11337_v6 = vpack.c.bf16 %v6919_v0, %v6919_v0  ;;  %v11338_v19 = vpack.c.bf16 %v6926_v3, %v6926_v3  ;;  %v7315_v18 = vunpack.c.l.b16 %v11336_v50  ;;  %v14248_v35 = vpop.f32.mrf.mxu1  ;;  %v14269_v21 = vpop.f32.mrf.mxu0 }
 0x427   : > { %v6938_v8 = vmax.f32 %v6936_v24, %v6937_v4  ;;  %v6944_v5 = vrot.slane %v6943_v49, 2  ;;  %v6951_v59 = vrot.slane %v6950_v52, 2  ;;  %v6957_v51 = vmax.f32 %v6955_v38, %v6956_v45  ;;  %v12203_v38 = vld [vmem:[%s15021_s5 + $0x354] ss:$8 sps:$4 sm:$0xff]  }
 0x428   : > { %v11339_v22 = vpack.c.bf16 %v6933_v33, %v6933_v33  ;;  %v7316_v46 = vunpack.c.l.b16 %v11337_v6  ;;  %v7317_v42 = vunpack.c.l.b16 %v11338_v19  ;;  %v6663_v39 = vadd.f32 %v6662_v62, %v14206_v12  ;;  %v14251_v15 = vpop.f32.mrf.mxu1 }
 0x429   : > { %v6939_v40 = vrot.slane %v6938_v8, 1  ;;  %v6945_v25 = vmax.f32 %v6943_v49, %v6944_v5  ;;  %v6952_v23 = vmax.f32 %v6950_v52, %v6951_v59  ;;  %v6958_v37 = vrot.slane %v6957_v51, 2 }
 0x42a   : > { %v7318_v36 = vunpack.c.l.b16 %v11339_v22  ;;  %v7347_v32 = vsel %vm3479_vm9, %v7316_v46, %v7315_v18  ;;  %v6711_v1 = vmax.f32 %v6663_v39, 0.0  ;;  %v11631_v56 = vadd.f32 %v14208_v9, %v14197_v57  ;;  %v11639_v14 = vpop.f32.mrf.mxu1 }
 0x42b   : > { %v7348_v60 = vsel %vm3481_vm10, %v7317_v42, %v7347_v32  ;;  %v6940_v24 = vmax.f32 %v6938_v8, %v6939_v40  ;;  %v6946_v26 = vrot.slane %v6945_v25, 1  ;;  %v6953_v12 = vrot.slane %v6952_v23, 1 }
 0x42c   : > { %v7349_v16 = vsel %vm3483_vm11, %v7318_v36, %v7348_v60  ;;  %v6959_v0 = vmax.f32 %v6957_v51, %v6958_v37  ;;  %v6724_v3 = vmax.f32 %v6710_v58, %v6711_v1  ;;  %v6571_v57 = vadd.f32 %v11631_v56, %v13998_v29  ;;  %v14267_v9 = vpop.f32.mrf.mxu1  ;;  %v6675_v51 = vpop.f32.mrf.mxu0 }
 0x42d   : > { %v7371_v50 = vpack.c.b16 %v7349_v16, %v7349_v16  ;;  %v6947_v11 = vmax.f32 %v6945_v25, %v6946_v26  ;;  %v6954_v4 = vmax.f32 %v6952_v23, %v6953_v12  ;;  %v11340_v49 = vpack.c.bf16 %v6940_v24, %v6940_v24 }
 0x42e   : > { %v6960_v52 = vrot.slane %v6959_v0, 1  ;;  %v6772_v45 = vcombine.high %v6724_v3, %v6724_v3  ;;  %v6779_v33 = vrot.slane %v6724_v3, %v12681_v13  ;;  %v14273_v6 = vadd.f32 %v14178_v34, %v6571_v57  ;;  %v11642_v59 = vpop.f32.mrf.mxu1  ;;  %v14289_v16 = vpop.f32.mrf.mxu0 }
 0x42f   : > { %v7390_v17 = vsel %vm14260_vm14, %v7371_v50, %v7389_v30  ;;  %v11341_v58 = vpack.c.bf16 %v6947_v11, %v6947_v11  ;;  %v11342_v29 = vpack.c.bf16 %v6954_v4, %v6954_v4  ;;  %v7319_v19 = vunpack.c.l.b16 %v11340_v49  ;;  %v7392_v11 = vld [vmem:[#allocation4 + $0x8] sm:$0x7] }
 0x430   : > { %7391 = vst [vmem:[#allocation4 + $0x4] sm:$0x7] %v7390_v17  ;;  %v6961_v18 = vmax.f32 %v6959_v0, %v6960_v52  ;;  %v6786_v62 = vrot.slane %v6772_v45, %v12681_v13  ;;  %v6787_v8 = vcombine.high %v6779_v33, %v6779_v33  ;;  %v6962_v5 = vsel %vm1831_vm8, %v6779_v33, -inf  ;;  %v14287_v12 = vpop.f32.mrf.mxu1 }
 0x431   : > { %v7320_v22 = vunpack.c.l.b16 %v11341_v58  ;;  %v7321_v46 = vunpack.c.l.b16 %v11342_v29  ;;  %v6963_v42 = vrot.slane %v6962_v5, 4  ;;  %v6712_v34 = vmax.f32 %v14273_v6, 0.0 }
 0x432   : > { %v11343_v39 = vpack.c.bf16 %v6961_v18, %v6961_v18  ;;  %v6788_v40 = vcombine.high %v6786_v62, %v6786_v62  ;;  %v6969_v25 = vsel %vm1831_vm8, %v6787_v8, -inf  ;;  %v6976_v23 = vsel %vm1831_vm8, %v6786_v62, -inf }
 0x433   : > { %v7350_v37 = vsel %vm3479_vm9, %v7320_v22, %v7319_v19  ;;  %v6964_v36 = vmax.f32 %v6962_v5, %v6963_v42  ;;  %v6970_v32 = vrot.slane %v6969_v25, 4  ;;  %v6977_v1 = vrot.slane %v6976_v23, 4  ;;  %v14299_v19 = vpop.f32.mrf.mxu1 }
 0x434   : > { %v7322_v56 = vunpack.c.l.b16 %v11343_v39  ;;  %v7351_v60 = vsel %vm3481_vm10, %v7321_v46, %v7350_v37  ;;  %v6983_v24 = vsel %vm1831_vm8, %v6788_v40, -inf  ;;  %v11634_v26 = vadd.f32 %v14229_v54, %v14222_v61 }
 0x435   : > { %v6965_v30 = vrot.slane %v6964_v36, 2  ;;  %v6971_v0 = vmax.f32 %v6969_v25, %v6970_v32  ;;  %v6978_v3 = vmax.f32 %v6976_v23, %v6977_v1  ;;  %v6984_v57 = vrot.slane %v6983_v24, 4  ;;  %v14304_v23 = vpop.f32.mrf.mxu1 }
 0x436   : > { %v7352_v50 = vsel %vm3483_vm11, %v7322_v56, %v7351_v60  ;;  %v6574_v4 = vadd.f32 %v11634_v26, %v14018_v10  ;;  %v11637_v49 = vadd.f32 %v14248_v35, %v14243_v31  ;;  %v11640_v52 = vadd.f32 %v11639_v14, %v14251_v15  ;;  %v6678_v10 = vpop.f32.mrf.mxu0 }
 0x437   : > { %v7372_v45 = vpack.c.b16 %v7352_v50, %v7352_v50  ;;  %v6966_v61 = vmax.f32 %v6964_v36, %v6965_v30  ;;  %v6972_v54 = vrot.slane %v6971_v0, 2  ;;  %v6979_v33 = vrot.slane %v6978_v3, 2  ;;  %v12187_v18 = vld [vmem:[#allocation4] sm:$0x33]   ;;  %v14313_v50 = vpop.f32.mrf.mxu1 }
 0x438   : > { %v6985_v6 = vmax.f32 %v6983_v24, %v6984_v57  ;;  %v6671_v17 = vadd.f32 %v14237_v28, %v6574_v4  ;;  %v6579_v58 = vadd.f32 %v11637_v49, %v14023_v44  ;;  %v6582_v29 = vadd.f32 %v11640_v52, %v14028_v2  ;;  %10890 = vst.sshfl [vmem:[#allocation5] sm:$0x33 pattern:$0x76325410] %v12187_v18 }
 0x439   : > { %v7393_v31 = vsel %vm14260_vm14, %v7372_v45, %v7392_v11  ;;  %v6967_v35 = vrot.slane %v6966_v61, 1  ;;  %v6973_v15 = vmax.f32 %v6971_v0, %v6972_v54  ;;  %v6980_v14 = vmax.f32 %v6978_v3, %v6979_v33 }
 0x43a   : > { %7394 = vst [vmem:[#allocation4 + $0x8] sm:$0x7] %v7393_v31  ;;  %v6986_v62 = vrot.slane %v6985_v6, 2  ;;  %v6713_v8 = vmax.f32 %v6671_v17, 0.0  ;;  %v6676_v5 = vadd.f32 %v6675_v51, %v6579_v58  ;;  %v6679_v22 = vadd.f32 %v6678_v10, %v6582_v29 }
 0x43b   : > { %v6968_v28 = vmax.f32 %v6966_v61, %v6967_v35  ;;  %v6974_v44 = vrot.slane %v6973_v15, 1  ;;  %v6981_v46 = vrot.slane %v6980_v14, 1  ;;  %v11643_v2 = vadd.f32 %v11642_v59, %v14267_v9  ;;  %v14321_v35 = vpop.f32.mrf.mxu1 }
 0x43c   : > { %v6987_v42 = vmax.f32 %v6985_v6, %v6986_v62  ;;  %v6725_v39 = vmax.f32 %v6712_v34, %v6713_v8  ;;  %v6714_v40 = vmax.f32 %v6676_v5, 0.0  ;;  %v6715_v25 = vmax.f32 %v6679_v22, 0.0  ;;  %v7395_v22 = vld [vmem:[#allocation4 + $0xc] sm:$0x7] }
 0x43d   : > { %v6975_v37 = vmax.f32 %v6973_v15, %v6974_v44  ;;  %v6982_v36 = vmax.f32 %v6980_v14, %v6981_v46  ;;  %v11344_v32 = vpack.c.bf16 %v6968_v28, %v6968_v28  ;;  %v6587_v1 = vadd.f32 %v11643_v2, %v14037_v48 }
 0x43e   : > { %v6988_v56 = vrot.slane %v6987_v42, 1  ;;  %v6789_v51 = vcombine.high %v6725_v39, %v6725_v39  ;;  %v6796_v60 = vrot.slane %v6725_v39, %v12681_v13  ;;  %v6726_v24 = vmax.f32 %v6714_v40, %v6715_v25 }
 0x43f   : > { %v11345_v26 = vpack.c.bf16 %v6975_v37, %v6975_v37  ;;  %v11346_v30 = vpack.c.bf16 %v6982_v36, %v6982_v36  ;;  %v7323_v0 = vunpack.c.l.b16 %v11344_v32  ;;  %v14309_v9 = vadd.f32 %v14269_v21, %v6587_v1  ;;  %v14327_v1 = vpop.f32.mrf.mxu1 }
 0x440   : > { %v6989_v59 = vmax.f32 %v6987_v42, %v6988_v56  ;;  %v6803_v34 = vrot.slane %v6789_v51, %v12681_v13  ;;  %v6804_v3 = vcombine.high %v6796_v60, %v6796_v60  ;;  %v6990_v57 = vsel %vm1831_vm8, %v6796_v60, -inf }
 0x441   : > { %v7324_v48 = vunpack.c.l.b16 %v11345_v26  ;;  %v7325_v11 = vunpack.c.l.b16 %v11346_v30  ;;  %v6991_v4 = vrot.slane %v6990_v57, 4  ;;  %v6806_v49 = vcombine.high %v6726_v24, %v6726_v24  ;;  %v12179_v21 = vld [vmem:[#allocation4 + $0x4] sm:$0x33]  }
 0x442   : > { %v11347_v52 = vpack.c.bf16 %v6989_v59, %v6989_v59  ;;  %v6805_v45 = vcombine.high %v6803_v34, %v6803_v34  ;;  %v6997_v61 = vsel %vm1831_vm8, %v6804_v3, -inf  ;;  %v7004_v54 = vsel %vm1831_vm8, %v6803_v34, -inf  ;;  %10926 = vst.sshfl [vmem:[#allocation5 + $0xc] sm:$0x33 pattern:$0x76325410] %v12179_v21 }
 0x443   : > { %v7353_v33 = vsel %vm3479_vm9, %v7324_v48, %v7323_v0  ;;  %v6992_v6 = vmax.f32 %v6990_v57, %v6991_v4  ;;  %v6998_v17 = vrot.slane %v6997_v61, 4  ;;  %v7005_v58 = vrot.slane %v7004_v54, 4 }
 0x444   : > { %v7326_v29 = vunpack.c.l.b16 %v11347_v52  ;;  %v7354_v18 = vsel %vm3481_vm10, %v7325_v11, %v7353_v33  ;;  %v7011_v10 = vsel %vm1831_vm8, %v6805_v45, -inf  ;;  %v6813_v31 = vrot.slane %v6726_v24, %v12681_v13  ;;  %v14333_v45 = vpop.f32.mrf.mxu1 }
 0x445   : > { %v6993_v15 = vrot.slane %v6992_v6, 2  ;;  %v6999_v14 = vmax.f32 %v6997_v61, %v6998_v17  ;;  %v7006_v62 = vmax.f32 %v7004_v54, %v7005_v58  ;;  %v7012_v8 = vrot.slane %v7011_v10, 4  ;;  %v14335_v61 = vpop.f32.mrf.mxu0 }
 0x446   : > { %v7355_v5 = vsel %vm3483_vm11, %v7326_v29, %v7354_v18  ;;  %v6820_v28 = vrot.slane %v6806_v49, %v12681_v13  ;;  %v6821_v44 = vcombine.high %v6813_v31, %v6813_v31  ;;  %v7018_v46 = vsel %vm1831_vm8, %v6813_v31, -inf }
 0x447   : > { %v7373_v2 = vpack.c.b16 %v7355_v5, %v7355_v5  ;;  %v6994_v42 = vmax.f32 %v6992_v6, %v6993_v15  ;;  %v7000_v39 = vrot.slane %v6999_v14, 2  ;;  %v7007_v40 = vrot.slane %v7006_v62, 2 }
 0x448   : > { %v7013_v25 = vmax.f32 %v7011_v10, %v7012_v8  ;;  %v6822_v37 = vcombine.high %v6820_v28, %v6820_v28  ;;  %v7019_v36 = vrot.slane %v7018_v46, 4  ;;  %v7025_v32 = vsel %vm1831_vm8, %v6821_v44, -inf  ;;  %v6691_v44 = vpop.f32.mrf.mxu0 }
 0x449   : > { %v7396_v56 = vsel %vm14260_vm14, %v7373_v2, %v7395_v22  ;;  %v6995_v51 = vrot.slane %v6994_v42, 1  ;;  %v7001_v60 = vmax.f32 %v6999_v14, %v7000_v39  ;;  %v7008_v24 = vmax.f32 %v7006_v62, %v7007_v40 }
 0x44a   : > { %7397 = vst [vmem:[#allocation4 + $0xc] sm:$0x7] %v7396_v56  ;;  %v7014_v26 = vrot.slane %v7013_v25, 2  ;;  %v7020_v30 = vmax.f32 %v7018_v46, %v7019_v36  ;;  %v7026_v0 = vrot.slane %v7025_v32, 4  ;;  %v7032_v59 = vsel %vm1831_vm8, %v6820_v28, -inf  ;;  %v11654_v28 = vpop.f32.mrf.mxu1 }
 0x44b   : > { %v6996_v34 = vmax.f32 %v6994_v42, %v6995_v51  ;;  %v7002_v3 = vrot.slane %v7001_v60, 1  ;;  %v7009_v57 = vrot.slane %v7008_v24, 1  ;;  %v7033_v48 = vrot.slane %v7032_v59, 4 }
 0x44c   : > { %v7015_v11 = vmax.f32 %v7013_v25, %v7014_v26  ;;  %v7021_v4 = vrot.slane %v7020_v30, 2  ;;  %v7027_v49 = vmax.f32 %v7025_v32, %v7026_v0  ;;  %v7039_v52 = vsel %vm1831_vm8, %v6822_v37, -inf }
 0x44d   : > { %v7003_v54 = vmax.f32 %v7001_v60, %v7002_v3  ;;  %v7010_v21 = vmax.f32 %v7008_v24, %v7009_v57  ;;  %v11348_v33 = vpack.c.bf16 %v6996_v34, %v6996_v34  ;;  %v7034_v6 = vmax.f32 %v7032_v59, %v7033_v48  ;;  %v14344_v3 = vpop.f32.mrf.mxu0 }
 0x44e   : > { %v7016_v17 = vrot.slane %v7015_v11, 1  ;;  %v7022_v58 = vmax.f32 %v7020_v30, %v7021_v4  ;;  %v7028_v29 = vrot.slane %v7027_v49, 2  ;;  %v7040_v18 = vrot.slane %v7039_v52, 4 }
 0x44f   : > { %v11349_v10 = vpack.c.bf16 %v7003_v54, %v7003_v54  ;;  %v11350_v31 = vpack.c.bf16 %v7010_v21, %v7010_v21  ;;  %v7327_v15 = vunpack.c.l.b16 %v11348_v33  ;;  %v7035_v14 = vrot.slane %v7034_v6, 2 }
 0x450   : > { %v7017_v62 = vmax.f32 %v7015_v11, %v7016_v17  ;;  %v7023_v8 = vrot.slane %v7022_v58, 1  ;;  %v7029_v5 = vmax.f32 %v7027_v49, %v7028_v29  ;;  %v7041_v22 = vmax.f32 %v7039_v52, %v7040_v18  ;;  %v14353_v29 = vld.sshfl [vmem:[#allocation4 + $0x4] sm:$0x12 pattern:$0x76325410]  ;;  %v6694_v18 = vpop.f32.mrf.mxu0 }
 0x451   : > { %v7328_v46 = vunpack.c.l.b16 %v11349_v10  ;;  %v7329_v2 = vunpack.c.l.b16 %v11350_v31  ;;  %v7036_v42 = vmax.f32 %v7034_v6, %v7035_v14  ;;  %v6716_v39 = vmax.f32 %v14309_v9, 0.0  ;;  %v12188_v24 = vld [vmem:[#allocation4 + $0x8] sm:$0x33]   ;;  %v11656_v9 = vpop.f32.mrf.mxu1 }
 0x452   : > { %v11351_v40 = vpack.c.bf16 %v7017_v62, %v7017_v62  ;;  %v7024_v25 = vmax.f32 %v7022_v58, %v7023_v8  ;;  %v7030_v37 = vrot.slane %v7029_v5, 1  ;;  %v7042_v36 = vrot.slane %v7041_v22, 2  ;;  %v12253_v34 = vld [vmem:[#allocation4 + $0x8] sm:$0x33]  }
 0x453   : > { %v7356_v32 = vsel %vm3479_vm9, %v7328_v46, %v7327_v15  ;;  %v7037_v56 = vrot.slane %v7036_v42, 1  ;;  %v11646_v51 = vadd.f32 %v14299_v19, %v14287_v12  ;;  %v11649_v60 = vadd.f32 %v14313_v50, %v14304_v23  ;;  %10891 = vst.sshfl [vmem:[#allocation5 + $0x24] sm:$0x33 pattern:$0x76325410] %v12188_v24  ;;  %v11657_v58 = vpop.f32.mrf.mxu1 }
 0x454   : > { %v7330_v26 = vunpack.c.l.b16 %v11351_v40  ;;  %v7357_v30 = vsel %vm3481_vm10, %v7329_v2, %v7356_v32  ;;  %v7031_v0 = vmax.f32 %v7029_v5, %v7030_v37  ;;  %v7043_v59 = vmax.f32 %v7041_v22, %v7042_v36  ;;  %v7398_v19 = vld [vmem:[#allocation4 + $0x10] sm:$0x7]  ;;  %10962 = vst.sshfl [vmem:[#allocation5 + $0x18] sm:$0x33 pattern:$0x76325410] %v12253_v34 }
 0x455   : > { %v7038_v57 = vmax.f32 %v7036_v42, %v7037_v56  ;;  %v11352_v48 = vpack.c.bf16 %v7024_v25, %v7024_v25  ;;  %v6590_v11 = vadd.f32 %v11646_v51, %v14042_v53  ;;  %v6595_v4 = vadd.f32 %v11649_v60, %v14065_v55  ;;  %v14358_v15 = vld.sshfl [vmem:[#allocation4 + $0x8] sm:$0x12 pattern:$0x76325410]  ;;  %v7401_v36 = vld [vmem:[#allocation4 + $0x1c] sm:$0x7] }
 0x456   : > { %v7358_v12 = vsel %vm3483_vm11, %v7330_v26, %v7357_v30  ;;  %v7044_v23 = vrot.slane %v7043_v59, 1  ;;  %v11353_v50 = vpack.c.bf16 %v7031_v0, %v7031_v0  ;;  %v11652_v49 = vadd.f32 %v14327_v1, %v14321_v35  ;;  %v14363_v46 = vld.sshfl [vmem:[#allocation4 + $0xc] sm:$0x12 pattern:$0x76325410] }
 0x457   : > { %v7374_v52 = vpack.c.b16 %v7358_v12, %v7358_v12  ;;  %v11354_v54 = vpack.c.bf16 %v7038_v57, %v7038_v57  ;;  %v7331_v21 = vunpack.c.l.b16 %v11352_v48  ;;  %v6687_v33 = vadd.f32 %v14289_v16, %v6590_v11 }
 0x458   : > { %v7045_v6 = vmax.f32 %v7043_v59, %v7044_v23  ;;  %v7332_v17 = vunpack.c.l.b16 %v11353_v50  ;;  %v6692_v53 = vadd.f32 %v6691_v44, %v6595_v4  ;;  %v6598_v55 = vadd.f32 %v11652_v49, %v14086_v43 }
 0x459   : > { %v7399_v10 = vsel %vm14260_vm14, %v7374_v52, %v7398_v19  ;;  %v7333_v31 = vunpack.c.l.b16 %v11354_v54  ;;  %v6717_v35 = vmax.f32 %v6687_v33, 0.0  ;;  %v11655_v1 = vadd.f32 %v11654_v28, %v14333_v45 }
 0x45a   : > { %7400 = vst [vmem:[#allocation4 + $0x10] sm:$0x7] %v7399_v10  ;;  %v11355_v16 = vpack.c.bf16 %v7045_v6, %v7045_v6  ;;  %v7359_v14 = vsel %vm3479_vm9, %v7332_v17, %v7331_v21  ;;  %v6718_v62 = vmax.f32 %v6692_v53, 0.0  ;;  %v6695_v8 = vadd.f32 %v6694_v18, %v6598_v55 }
 0x45b   : > { %v7360_v43 = vsel %vm3481_vm10, %v7333_v31, %v7359_v14  ;;  %v6727_v5 = vmax.f32 %v6716_v39, %v6717_v35  ;;  %v6603_v22 = vadd.f32 %v11655_v1, %v14109_v27  ;;  %v11658_v44 = vadd.f32 %v11657_v58, %v11656_v9 }
 0x45c   : > { %v7334_v2 = vunpack.c.l.b16 %v11355_v16  ;;  %v6719_v42 = vmax.f32 %v6695_v8, 0.0  ;;  %v7739_v45 = vcombine.high %v14353_v29, %v14353_v29  ;;  %v7747_v28 = vcombine.high %v14358_v15, %v14358_v15 }
 0x45d   : > { %v6823_v40 = vcombine.high %v6727_v5, %v6727_v5  ;;  %v6830_v25 = vrot.slane %v6727_v5, %v12681_v13  ;;  %v14371_v37 = vadd.f32 %v14335_v61, %v6603_v22  ;;  %v6606_v39 = vadd.f32 %v11658_v44, %v14123_v20 }
 0x45e   : > { %v7361_v27 = vsel %vm3483_vm11, %v7334_v2, %v7360_v43  ;;  %v6728_v32 = vmax.f32 %v6718_v62, %v6719_v42  ;;  %v7755_v56 = vcombine.high %v14363_v46, %v14363_v46  ;;  %v10914_v51 = vrot.slane %v14180_v47, 9 }
 0x45f   : > { %v7375_v60 = vpack.c.b16 %v7361_v27, %v7361_v27  ;;  %v6837_v24 = vrot.slane %v6823_v40, %v12681_v13  ;;  %v6838_v26 = vcombine.high %v6830_v25, %v6830_v25  ;;  %v7046_v30 = vsel %vm1831_vm8, %v6830_v25, -inf }
 0x460   : > { %v7047_v0 = vrot.slane %v7046_v30, 4  ;;  %v6840_v61 = vcombine.high %v6728_v32, %v6728_v32  ;;  %v6847_v59 = vrot.slane %v6728_v32, %v12681_v13  ;;  %v6720_v20 = vmax.f32 %v14371_v37, 0.0 }
 0x461   : > { %v7402_v9 = vsel %vm14260_vm14, %v7375_v60, %v7401_v36  ;;  %v6839_v34 = vcombine.high %v6837_v24, %v6837_v24  ;;  %v7053_v57 = vsel %vm1831_vm8, %v6838_v26, -inf  ;;  %v7060_v48 = vsel %vm1831_vm8, %v6837_v24, -inf  ;;  %v12180_v11 = vld [vmem:[#allocation4 + $0xc] sm:$0x33]  }
 0x462   : > { %7403 = vst [vmem:[#allocation4 + $0x1c] sm:$0x7] %v7402_v9  ;;  %v7048_v4 = vmax.f32 %v7046_v30, %v7047_v0  ;;  %v7054_v12 = vrot.slane %v7053_v57, 4  ;;  %v7061_v19 = vrot.slane %v7060_v48, 4  ;;  %v6854_v23 = vrot.slane %v6840_v61, %v12681_v13  ;;  %v12254_v50 = vld [vmem:[#allocation4 + $0x10] sm:$0x33]  }
 0x463   : > { %v7067_v49 = vsel %vm1831_vm8, %v6839_v34, -inf  ;;  %v6855_v52 = vcombine.high %v6847_v59, %v6847_v59  ;;  %v7074_v54 = vsel %vm1831_vm8, %v6847_v59, -inf  ;;  %v14390_v21 = vadd.f32 %v14344_v3, %v6606_v39  ;;  %10927 = vst.sshfl [vmem:[#allocation5 + $0x30] sm:$0x33 pattern:$0x76325410] %v12180_v11 }
 0x464   : > { %v7049_v33 = vrot.slane %v7048_v4, 2  ;;  %v7055_v6 = vmax.f32 %v7053_v57, %v7054_v12  ;;  %v7062_v17 = vmax.f32 %v7060_v48, %v7061_v19  ;;  %v7068_v53 = vrot.slane %v7067_v49, 4  ;;  %10963 = vst.sshfl [vmem:[#allocation5 + $0x3c] sm:$0x33 pattern:$0x76325410] %v12254_v50 }
 0x465   : > { %v6856_v55 = vcombine.high %v6854_v23, %v6854_v23  ;;  %v7075_v58 = vrot.slane %v7074_v54, 4  ;;  %v7081_v18 = vsel %vm1831_vm8, %v6855_v52, -inf  ;;  %v7088_v10 = vsel %vm1831_vm8, %v6854_v23, -inf }
 0x466   : > { %v7050_v31 = vmax.f32 %v7048_v4, %v7049_v33  ;;  %v7056_v35 = vrot.slane %v7055_v6, 2  ;;  %v7063_v1 = vrot.slane %v7062_v17, 2  ;;  %v7069_v16 = vmax.f32 %v7067_v49, %v7068_v53 }
 0x467   : > { %v7076_v14 = vmax.f32 %v7074_v54, %v7075_v58  ;;  %v7082_v62 = vrot.slane %v7081_v18, 4  ;;  %v7089_v3 = vrot.slane %v7088_v10, 4  ;;  %v7095_v8 = vsel %vm1831_vm8, %v6856_v55, -inf }
 0x468   : > { %v7051_v43 = vrot.slane %v7050_v31, 1  ;;  %v7057_v5 = vmax.f32 %v7055_v6, %v7056_v35  ;;  %v7064_v22 = vmax.f32 %v7062_v17, %v7063_v1  ;;  %v7070_v44 = vrot.slane %v7069_v16, 2 }
 0x469   : > { %v7077_v2 = vrot.slane %v7076_v14, 2  ;;  %v7083_v42 = vmax.f32 %v7081_v18, %v7082_v62  ;;  %v7090_v40 = vmax.f32 %v7088_v10, %v7089_v3  ;;  %v7096_v25 = vrot.slane %v7095_v8, 4  ;;  %v12245_v0 = vld [vmem:[#allocation4 + $0x18] sm:$0x33]   ;;  %v12234_v62 = vld [vmem:[%s15021_s5 + $0x200] ss:$8 sps:$4 sm:$0xff]  }
 0x46a   : > { %v7052_v39 = vmax.f32 %v7050_v31, %v7051_v43  ;;  %v7058_v27 = vrot.slane %v7057_v5, 1  ;;  %v7065_v36 = vrot.slane %v7064_v22, 1  ;;  %v7071_v32 = vmax.f32 %v7069_v16, %v7070_v44  ;;  %10892 = vst.sshfl [vmem:[#allocation5 + $0x48] sm:$0x33 pattern:$0x76325410] %v12245_v0 }
 0x46b   : > { %v7078_v60 = vmax.f32 %v7076_v14, %v7077_v2  ;;  %v7084_v24 = vrot.slane %v7083_v42, 2  ;;  %v7091_v26 = vrot.slane %v7090_v40, 2  ;;  %v7097_v30 = vmax.f32 %v7095_v8, %v7096_v25 }
 0x46c   : > { %v7059_v61 = vmax.f32 %v7057_v5, %v7058_v27  ;;  %v7066_v59 = vmax.f32 %v7064_v22, %v7065_v36  ;;  %v7072_v9 = vrot.slane %v7071_v32, 1  ;;  %v11356_v34 = vpack.c.bf16 %v7052_v39, %v7052_v39  ;;  %v7404_v22 = vld [vmem:[#allocation4 + $0x20] sm:$0x7] }
 0x46d   : > { %v7079_v57 = vrot.slane %v7078_v60, 1  ;;  %v7085_v48 = vmax.f32 %v7083_v42, %v7084_v24  ;;  %v7092_v11 = vmax.f32 %v7090_v40, %v7091_v26  ;;  %v7098_v4 = vrot.slane %v7097_v30, 2 }
 0x46e   : > { %v7073_v12 = vmax.f32 %v7071_v32, %v7072_v9  ;;  %v11357_v19 = vpack.c.bf16 %v7059_v61, %v7059_v61  ;;  %v11358_v23 = vpack.c.bf16 %v7066_v59, %v7066_v59  ;;  %v7335_v50 = vunpack.c.l.b16 %v11356_v34  ;;  %v7407_v59 = vld [vmem:[#allocation4 + $0x24] sm:$0x7] }
 0x46f   : > { %v7080_v49 = vmax.f32 %v7078_v60, %v7079_v57  ;;  %v7086_v52 = vrot.slane %v7085_v48, 1  ;;  %v7093_v54 = vrot.slane %v7092_v11, 1  ;;  %v7099_v33 = vmax.f32 %v7097_v30, %v7098_v4 }
 0x470   : > { %v11359_v6 = vpack.c.bf16 %v7073_v12, %v7073_v12  ;;  %v7336_v17 = vunpack.c.l.b16 %v11357_v19  ;;  %v7337_v53 = vunpack.c.l.b16 %v11358_v23  ;;  %v6721_v55 = vmax.f32 %v14390_v21, 0.0 }
 0x471   : > { %v7087_v58 = vmax.f32 %v7085_v48, %v7086_v52  ;;  %v7094_v18 = vmax.f32 %v7092_v11, %v7093_v54  ;;  %v7100_v10 = vrot.slane %v7099_v33, 1  ;;  %v11360_v31 = vpack.c.bf16 %v7080_v49, %v7080_v49 }
 0x472   : > { %v7338_v35 = vunpack.c.l.b16 %v11359_v6  ;;  %v7362_v1 = vsel %vm3479_vm9, %v7336_v17, %v7335_v50  ;;  %v6729_v16 = vmax.f32 %v6720_v20, %v6721_v55  ;;  %v7795_v14 = vrot.slane %v7731_v63, 7  ;;  %v14441_v6 = vld.sshfl [vmem:[#allocation4 + $0x4] sm:$0x13 pattern:$0x76325410] }
 0x473   : > { %v7363_v21 = vsel %vm3481_vm10, %v7337_v53, %v7362_v1  ;;  %v7101_v3 = vmax.f32 %v7099_v33, %v7100_v10  ;;  %v11361_v8 = vpack.c.bf16 %v7087_v58, %v7087_v58  ;;  %v11362_v43 = vpack.c.bf16 %v7094_v18, %v7094_v18  ;;  %v14443_v55 = vld.sshfl [vmem:[#allocation4 + $0x8] sm:$0x13 pattern:$0x76325410] }
 0x474   : > { %v7364_v5 = vsel %vm3483_vm11, %v7338_v35, %v7363_v21  ;;  %v7339_v44 = vunpack.c.l.b16 %v11360_v31  ;;  %v6857_v37 = vcombine.high %v6729_v16, %v6729_v16  ;;  %v6864_v20 = vrot.slane %v6729_v16, %v12681_v13  ;;  %v10894_v10 = vld.sshfl [vmem:[#allocation4] sm:$0x13 pattern:$0x76325410] }
 0x475   : > { %v7376_v2 = vpack.c.b16 %v7364_v5, %v7364_v5  ;;  %v11363_v42 = vpack.c.bf16 %v7101_v3, %v7101_v3  ;;  %v7340_v63 = vunpack.c.l.b16 %v11361_v8  ;;  %v7341_v40 = vunpack.c.l.b16 %v11362_v43 }
 0x476   : > { %v6871_v25 = vrot.slane %v6857_v37, %v12681_v13  ;;  %v6872_v39 = vcombine.high %v6864_v20, %v6864_v20  ;;  %v7102_v27 = vsel %vm1831_vm8, %v6864_v20, -inf  ;;  %v7796_v36 = vsel %vm14406_vm3, %v10914_v51, %v7795_v14  ;;  %v14454_v14 = vld.sshfl [vmem:[#allocation4 + $0xc] sm:$0x13 pattern:$0x76325410] }
 0x477   : > { %v7405_v32 = vsel %vm14260_vm14, %v7376_v2, %v7404_v22  ;;  %v7342_v60 = vunpack.c.l.b16 %v11363_v42  ;;  %v7365_v24 = vsel %vm3479_vm9, %v7340_v63, %v7339_v44  ;;  %v7103_v26 = vrot.slane %v7102_v27, 4 }
 0x478   : > { %7406 = vst [vmem:[#allocation4 + $0x20] sm:$0x7] %v7405_v32  ;;  %v7366_v30 = vsel %vm3481_vm10, %v7341_v40, %v7365_v24  ;;  %v6873_v0 = vcombine.high %v6871_v25, %v6871_v25  ;;  %v7109_v13 = vsel %vm1831_vm8, %v6872_v39, -inf  ;;  %v7116_v61 = vsel %vm1831_vm8, %v6871_v25, -inf }
 0x479   : > { %v7367_v47 = vsel %vm3483_vm11, %v7342_v60, %v7366_v30  ;;  %v7104_v9 = vmax.f32 %v7102_v27, %v7103_v26  ;;  %v7110_v51 = vrot.slane %v7109_v13, 4  ;;  %v7117_v34 = vrot.slane %v7116_v61, 4 }
 0x47a   : > { %v7377_v57 = vpack.c.b16 %v7367_v47, %v7367_v47  ;;  %v7123_v48 = vsel %vm1831_vm8, %v6873_v0, -inf  ;;  %v10915_v11 = vrot.slane %v14353_v29, 9  ;;  %v7799_v4 = vrot.slane %v7739_v45, 7 }
 0x47b   : > { %v7105_v12 = vrot.slane %v7104_v9, 2  ;;  %v7111_v19 = vmax.f32 %v7109_v13, %v7110_v51  ;;  %v7118_v23 = vmax.f32 %v7116_v61, %v7117_v34  ;;  %v7124_v50 = vrot.slane %v7123_v48, 4  ;;  %v14473_v61 = vld.sshfl [vmem:[#allocation4 + $0x18] sm:$0x12 pattern:$0x76325410] }
 0x47c   : > { %v7408_v49 = vsel %vm14260_vm14, %v7377_v57, %v7407_v59  ;;  %v14435_v52 = vsel %vm14406_vm3, %v10915_v11, %v7799_v4  ;;  %v10916_v54 = vrot.slane %v14358_v15, 9  ;;  %v7803_v33 = vrot.slane %v7747_v28, 7 }
 0x47d   : > { %7409 = vst [vmem:[#allocation4 + $0x24] sm:$0x7] %v7408_v49  ;;  %v7106_v29 = vmax.f32 %v7104_v9, %v7105_v12  ;;  %v7112_v45 = vrot.slane %v7111_v19, 2  ;;  %v7119_v17 = vrot.slane %v7118_v23, 2  ;;  %v7125_v53 = vmax.f32 %v7123_v48, %v7124_v50  ;;  %v7410_v50 = vld [vmem:[#allocation4 + $0x28] sm:$0x7] }
 0x47e   : > { %v14447_v58 = vsel %vm14406_vm3, %v10916_v54, %v7803_v33  ;;  %v10917_v18 = vrot.slane %v14363_v46, 9  ;;  %v7807_v15 = vrot.slane %v7755_v56, 7  ;;  %v7825_v28 = vcombine.low %v7796_v36, %v14435_v52  ;;  %v12184_v49 = vld [vmem:[%s15021_s5 + $0x370] ss:$8 sps:$4 sm:$0xff]  }
 0x47f   : > { %v7107_v31 = vrot.slane %v7106_v29, 1  ;;  %v7113_v35 = vmax.f32 %v7111_v19, %v7112_v45  ;;  %v7120_v1 = vmax.f32 %v7118_v23, %v7119_v17  ;;  %v7126_v16 = vrot.slane %v7125_v53, 2  ;;  %v12237_v56 = vld [vmem:[#allocation4 + $0x1c] sm:$0x33]  }
 0x480   : > { %v14458_v21 = vsel %vm14406_vm3, %v10917_v18, %v7807_v15  ;;  %10922 = vst.sshfl [vmem:[#allocation5 + $0x8] sm:$0x33 pattern:$0x76325410] %v7825_v28  ;;  %v7492_v3 = vcombine.high %v10894_v10, %v10894_v10  ;;  %v7500_v8 = vcombine.high %v14441_v6, %v14441_v6  ;;  %v7508_v46 = vcombine.high %v14443_v55, %v14443_v55  ;;  %v12197_v15 = vld [vmem:[%s15021_s5 + $0x364] ss:$8 sps:$4 sm:$0xff]  }
 0x481   : > { %v7108_v43 = vmax.f32 %v7106_v29, %v7107_v31  ;;  %v7114_v5 = vrot.slane %v7113_v35, 1  ;;  %v7121_v22 = vrot.slane %v7120_v1, 1  ;;  %v7127_v44 = vmax.f32 %v7125_v53, %v7126_v16  ;;  %10928 = vst.sshfl [vmem:[#allocation5 + $0x54] sm:$0x33 pattern:$0x76325410] %v12237_v56 }
 0x482   : > { %v7833_v37 = vcombine.low %v14447_v58, %v14458_v21  ;;  %v7516_v20 = vcombine.high %v14454_v14, %v14454_v14  ;;  %vm7549_vm8 = vsmask.f32 1280  ;;  %v7557_v25 = vshrl.u32 %v10894_v10, 16  ;;  %v12183_v31 = vld [vmem:[#allocation5 + $0xc] ss:$36 sps:$4 sm:$0xff]  }
 0x483   : > { %v7115_v2 = vmax.f32 %v7113_v35, %v7114_v5  ;;  %v7122_v42 = vmax.f32 %v7120_v1, %v7121_v22  ;;  %v7128_v63 = vrot.slane %v7127_v44, 1  ;;  %v11364_v40 = vpack.c.bf16 %v7108_v43, %v7108_v43  ;;  %vm7551_vm4 = vmor %vm7549_vm8, %vm7550_vm13  ;;  %v14488_v29 = vld.sshfl [vmem:[#allocation4 + $0x1c] sm:$0x12 pattern:$0x76325410]  ;;  %9819 = vmatprep.mubr.bf16.mxu0 %v12183_v31 }
 0x484   : > { %10923 = vst.sshfl [vmem:[#allocation5 + $0x2c] sm:$0x33 pattern:$0x76325410] %v7833_v37  ;;  %v7560_v39 = vshll.u32 %v10894_v10, 16  ;;  %vm14468_vm1 = vmor %vm7551_vm4, %vm7552_vm6  ;;  %v7559_v26 = vrot.slane %v7557_v25, 6 }
 0x485   : > { %v7129_v27 = vmax.f32 %v7127_v44, %v7128_v63  ;;  %v11365_v36 = vpack.c.bf16 %v7115_v2, %v7115_v2  ;;  %v11366_v32 = vpack.c.bf16 %v7122_v42, %v7122_v42  ;;  %v7343_v60 = vunpack.c.l.b16 %v11364_v40  ;;  %v12246_v34 = vld [vmem:[#allocation4 + $0x20] sm:$0x33]   ;;  %vm14483_vm5 = vmor %vm14468_vm1, %vm7554_vm15 }
 0x486   : > { %v7562_v30 = vrot.slane %v7560_v39, 7  ;;  %v7566_v0 = vshll.u32 %v7492_v3, 16  ;;  %v7571_v13 = vshrl.u32 %v14441_v6, 16  ;;  %v7574_v51 = vshll.u32 %v14441_v6, 16  ;;  %v12303_v12 = vld [vmem:[#allocation4 + $0x20] sm:$0x33]  }
 0x487   : > { %v11367_v47 = vpack.c.bf16 %v7129_v27, %v7129_v27  ;;  %v7344_v59 = vunpack.c.l.b16 %v11365_v36  ;;  %v7345_v9 = vunpack.c.l.b16 %v11366_v32  ;;  %v7580_v4 = vshll.u32 %v7500_v8, 16  ;;  %10893 = vst.sshfl [vmem:[#allocation5 + $0x6c] sm:$0x33 pattern:$0x76325410] %v12246_v34 }
 0x488   : > { %v7563_v57 = vor.u32 %v7562_v30, %v7559_v26  ;;  %v7568_v48 = vrot.slane %v7566_v0, 7  ;;  %v7573_v11 = vrot.slane %v7571_v13, 6  ;;  %v7576_v33 = vrot.slane %v7574_v51, 7 }
 0x489   : > { %v7346_v19 = vunpack.c.l.b16 %v11367_v47  ;;  %v7368_v23 = vsel %vm3479_vm9, %v7344_v59, %v7343_v60  ;;  %v7585_v6 = vshrl.u32 %v14443_v55, 16  ;;  %v7582_v53 = vrot.slane %v7580_v4, 7  ;;  %10964 = vst.sshfl [vmem:[#allocation5 + $0x60] sm:$0x33 pattern:$0x76325410] %v12303_v12 }
 0x48a   : > { %v7369_v45 = vsel %vm3481_vm10, %v7345_v9, %v7368_v23  ;;  %v7564_v17 = vrot.slane %v7563_v57, 2  ;;  %v7588_v18 = vshll.u32 %v14443_v55, 16  ;;  %v7577_v35 = vor.u32 %v7576_v33, %v7573_v11  ;;  %v10912_v16 = vld.sshfl [vmem:[#allocation4 + $0x20] sm:$0x12 pattern:$0x76325410] }
 0x48b   : > { %v7370_v28 = vsel %vm3483_vm11, %v7346_v19, %v7369_v45  ;;  %v12181_v10 = vld [vmem:[#allocation5 + $0x8] ss:$36 sps:$4 sm:$0xff]   ;;  %v7587_v1 = vrot.slane %v7585_v6, 6  ;;  %v7763_v3 = vcombine.high %v14473_v61, %v14473_v61  ;;  %v7594_v5 = vshll.u32 %v7508_v46, 16  ;;  %v12195_v55 = vld [vmem:[%s15021_s5 + $0x360] ss:$8 sps:$4 sm:$0xff]  }
 0x48c   : > { %v7378_v8 = vpack.c.b16 %v7370_v28, %v7370_v28  ;;  %v7569_v56 = vsel %vm14483_vm5, %v7564_v17, %v7568_v48  ;;  %v7590_v43 = vrot.slane %v7588_v18, 7  ;;  %v10913_v22 = vld.sshfl [vmem:[#allocation4 + $0x24] sm:$0x12 pattern:$0x76325410]  ;;  %v7578_v44 = vrot.slane %v7577_v35, 2  ;;  %9820 = vmatmul.mubr.bf16.vlgmr.msra.gmra.mxu0 %v12181_v10 }
 0x48d   : > { %v7599_v37 = vshrl.u32 %v14454_v14, 16  ;;  %v7602_v2 = vshll.u32 %v14454_v14, 16  ;;  %v7608_v42 = vshll.u32 %v7516_v20, 16  ;;  %v7596_v25 = vrot.slane %v7594_v5, 7  ;;  %9894 = vmatpush1.bf16.msra.mxu0 %v12184_v49  ;;  %v12207_v17 = vld [vmem:[%s15021_s5 + $0x340] ss:$8 sps:$4 sm:$0xff]  }
 0x48e   : > { %v7411_v63 = vsel %vm14260_vm14, %v7378_v8, %v7410_v50  ;;  %v7591_v40 = vor.u32 %v7590_v43, %v7587_v1  ;;  %v7771_v46 = vcombine.high %v14488_v29, %v14488_v29  ;;  %v14517_v39 = vsel %vm14483_vm5, %v7578_v44, %v7582_v53  ;;  %v10899_v36 = vld.sshfl [vmem:[#allocation4 + $0x1c] sm:$0x13 pattern:$0x76325410]  ;;  %9895 = vmatprep.subr.bf16.mxu0 %v12197_v15  ;;  %v12209_v50 = vld [vmem:[%s15021_s5 + $0x344] ss:$8 sps:$4 sm:$0xff]  }
 0x48f   : > { %7412 = vst [vmem:[#allocation4 + $0x28] sm:$0x7] %v7411_v63  ;;  %v7601_v14 = vrot.slane %v7599_v37, 6  ;;  %v7604_v20 = vrot.slane %v7602_v2, 7  ;;  %v7610_v27 = vrot.slane %v7608_v42, 7  ;;  %v7668_v60 = vcombine.low %v7569_v56, %v14517_v39 }
 0x490   : > { %v7592_v32 = vrot.slane %v7591_v40, 2  ;;  %v7779_v24 = vcombine.high %v10912_v16, %v10912_v16  ;;  %v7787_v26 = vcombine.high %v10913_v22, %v10913_v22  ;;  %v10900_v30 = vld.sshfl [vmem:[#allocation4 + $0x20] sm:$0x13 pattern:$0x76325410]  ;;  %v10918_v13 = vrot.slane %v14473_v61, 9 }
 0x491   : > { %v7605_v0 = vor.u32 %v7604_v20, %v7601_v14  ;;  %v7811_v47 = vrot.slane %v7763_v3, 7  ;;  %v10919_v59 = vrot.slane %v14488_v29, 9  ;;  %v10898_v9 = vld.sshfl [vmem:[#allocation4 + $0x18] sm:$0x13 pattern:$0x76325410]  ;;  %9896 = vmatpush1.bf16.msra.mxu0 %v12195_v55  ;;  %v7532_v29 = vcombine.high %v10899_v36, %v10899_v36 }
 0x492   : > { %v14525_v51 = vld.sshfl [vmem:[#allocation4 + $0x24] sm:$0x13 pattern:$0x76325410]  ;;  %v14529_v34 = vsel %vm14483_vm5, %v7592_v32, %v7596_v25  ;;  %v7815_v57 = vrot.slane %v7771_v46, 7  ;;  %v10920_v48 = vrot.slane %v10912_v16, 9  ;;  %9897 = vmatprep.subr.bf16.mxu0 %v12203_v38  ;;  %v7524_v6 = vcombine.high %v10898_v9, %v10898_v9 }
 0x493   : > { %10902 = vst.sshfl [vmem:[#allocation5 + $0x4] sm:$0x33 pattern:$0x76325410] %v7668_v60  ;;  %v7819_v11 = vrot.slane %v7779_v24, 7  ;;  %v7606_v4 = vrot.slane %v7605_v0, 2  ;;  %v7812_v12 = vsel %vm14406_vm3, %v10918_v13, %v7811_v47  ;;  %v7540_v15 = vcombine.high %v10900_v30, %v10900_v30 }
 0x494   : > { %v12201_v61 = vld [vmem:[%s15021_s5 + $0x350] ss:$8 sps:$4 sm:$0xff]   ;;  %v10921_v19 = vrot.slane %v10913_v22, 9  ;;  %v7823_v23 = vrot.slane %v7787_v26, 7  ;;  %v14541_v49 = vsel %vm14406_vm3, %v10919_v59, %v7815_v57  ;;  %v12215_v10 = vld [vmem:[%s15021_s5 + $0x334] ss:$8 sps:$4 sm:$0xff]   ;;  %v7548_v1 = vcombine.high %v14525_v51, %v14525_v51 }
 0x495   : > { %v14545_v33 = vsel %vm14406_vm3, %v10920_v48, %v7819_v11  ;;  %v14549_v45 = vsel %vm14483_vm5, %v7606_v4, %v7610_v27  ;;  %v7841_v18 = vcombine.low %v7812_v12, %v14541_v49  ;;  %v7613_v16 = vshrl.u32 %v10898_v9, 16  ;;  %9898 = vmatpush1.bf16.msra.mxu0 %v12201_v61  ;;  %v14568_v5 = vld.sshfl [vmem:[#allocation4 + $0x10] sm:$0x13 pattern:$0x76325410] }
 0x496   : > { %v14556_v53 = vsel %vm14406_vm3, %v10921_v19, %v7823_v23  ;;  %v7676_v28 = vcombine.low %v14529_v34, %v14549_v45  ;;  %v12238_v35 = vld [vmem:[#allocation4 + $0x24] sm:$0x33]   ;;  %v7616_v3 = vshll.u32 %v10898_v9, 16  ;;  %v7622_v8 = vshll.u32 %v7524_v6, 16  ;;  %9899 = vmatprep.subr.bf16.mxu0 %v12209_v50  ;;  %v12213_v38 = vld [vmem:[%s15021_s5 + $0x330] ss:$8 sps:$4 sm:$0xff]  }
 0x497   : > { %v7849_v31 = vcombine.low %v14545_v33, %v14556_v53  ;;  %10924 = vst.sshfl [vmem:[#allocation5 + $0x50] sm:$0x33 pattern:$0x76325410] %v7841_v18  ;;  %v7627_v56 = vshrl.u32 %v10899_v36, 16  ;;  %v7630_v43 = vshll.u32 %v10899_v36, 16  ;;  %v8401_v59 = vcombine.high %v14568_v5, %v14568_v5 }
 0x498   : > { %10903 = vst.sshfl [vmem:[#allocation5 + $0x28] sm:$0x33 pattern:$0x76325410] %v7676_v28  ;;  %v7615_v22 = vrot.slane %v7613_v16, 6  ;;  %v7636_v44 = vshll.u32 %v7532_v29, 16 }
 0x499   : > { %10925 = vst.sshfl [vmem:[#allocation5 + $0x74] sm:$0x33 pattern:$0x76325410] %v7849_v31  ;;  %v7641_v37 = vshrl.u32 %v10900_v30, 16  ;;  %v7644_v2 = vshll.u32 %v10900_v30, 16  ;;  %9900 = vmatpush1.bf16.msra.mxu0 %v12207_v17 }
 0x49a   : > { %10929 = vst.sshfl [vmem:[#allocation5 + $0x78] sm:$0x33 pattern:$0x76325410] %v12238_v35  ;;  %v12304_v42 = vld [vmem:[#allocation4 + $0x28] sm:$0x33]   ;;  %9901 = vmatprep.subr.bf16.mxu0 %v12215_v10 }
 0x49b   : > { %10974 = vst.sshfl [vmem:[#allocation5 + $0x1c] sm:$0x33 pattern:$0x76325410] %v7676_v28  ;;  %v7618_v63 = vrot.slane %v7616_v3, 7  ;;  %v7624_v40 = vrot.slane %v7622_v8, 7 }
 0x49c   : > { %v7629_v25 = vrot.slane %v7627_v56, 6  ;;  %v7632_v55 = vrot.slane %v7630_v43, 7  ;;  %v7638_v46 = vrot.slane %v7636_v44, 7  ;;  %v7643_v14 = vrot.slane %v7641_v37, 6  ;;  %v12221_v36 = vld [vmem:[%s15021_s5 + $0x324] ss:$8 sps:$4 sm:$0xff]  }
 0x49d   : > { %v7646_v20 = vrot.slane %v7644_v2, 7  ;;  %v7650_v27 = vshll.u32 %v7540_v15, 16  ;;  %10965 = vst.sshfl [vmem:[#allocation5 + $0x84] sm:$0x33 pattern:$0x76325410] %v12304_v42  ;;  %v7619_v32 = vor.u32 %v7618_v63, %v7615_v22  ;;  %9902 = vmatpush1.bf16.msra.mxu0 %v12213_v38  ;;  %v8113_v56 = vcombine.low %v14517_v39, %v14529_v34 }
 0x49e   : > { %v7633_v60 = vor.u32 %v7632_v55, %v7629_v25  ;;  %v7655_v24 = vshrl.u32 %v14525_v51, 16  ;;  %v7658_v26 = vshll.u32 %v14525_v51, 16  ;;  %v7664_v13 = vshll.u32 %v7548_v1, 16  ;;  %v12192_v9 = vld [vmem:[%s15021_s5 + $0x270] ss:$8 sps:$4 sm:$0xff]   ;;  %9903 = vmatprep.subr.bf16.mxu0 %v12221_v36 }
 0x49f   : > { %v7647_v30 = vor.u32 %v7646_v20, %v7643_v14  ;;  %v7652_v0 = vrot.slane %v7650_v27, 7  ;;  %v10969_v47 = vld.sshfl [vmem:[#allocation4 + $0x14] sm:$0x13 pattern:$0x76325410]  ;;  %v7620_v48 = vrot.slane %v7619_v32, 2 }
 0x4a0   : > { %v12219_v57 = vld [vmem:[%s15021_s5 + $0x320] ss:$8 sps:$4 sm:$0xff]   ;;  %v7634_v11 = vrot.slane %v7633_v60, 2  ;;  %v7657_v4 = vrot.slane %v7655_v24, 6  ;;  %v7660_v51 = vrot.slane %v7658_v26, 7  ;;  %v7666_v50 = vrot.slane %v7664_v13, 7 }
 0x4a1   : > { %v14586_v61 = vld.sshfl [vmem:[#allocation4 + $0x10] sm:$0x12 pattern:$0x76325410]  ;;  %v12200_v12 = vld [vmem:[%s15021_s5 + $0x264] ss:$8 sps:$4 sm:$0xff]   ;;  %v8409_v6 = vcombine.high %v10969_v47, %v10969_v47  ;;  %v7625_v15 = vsel %vm14483_vm5, %v7620_v48, %v7624_v40  ;;  %9904 = vmatpush1.bf16.msra.mxu0 %v12219_v57 }
 0x4a2   : > { %v12227_v19 = vld [vmem:[%s15021_s5 + $0x314] ss:$8 sps:$4 sm:$0xff]   ;;  %v7648_v23 = vrot.slane %v7647_v30, 2  ;;  %v8471_v29 = vshrl.u32 %v14568_v5, 16  ;;  %v14599_v28 = vsel %vm14483_vm5, %v7634_v11, %v7638_v46  ;;  %v7661_v10 = vor.u32 %v7660_v51, %v7657_v4  ;;  %v12239_v35 = vld [vmem:[#allocation5 + $0x50] ss:$36 sps:$4 sm:$0xff]  }
 0x4a3   : > { %v12189_v17 = vld [vmem:[#allocation5] ss:$36 sps:$4 sm:$0xff]   ;;  %v8474_v31 = vshll.u32 %v14568_v5, 16  ;;  %v12241_v1 = vld [vmem:[#allocation5 + $0x54] ss:$36 sps:$4 sm:$0xff]   ;;  %v7684_v3 = vcombine.low %v7625_v15, %v14599_v28  ;;  %v8480_v37 = vshll.u32 %v8401_v59, 16  ;;  %v8200_v40 = vcombine.high %v14586_v61, %v14586_v61  ;;  %9905 = vmatprep.subr.bf16.mxu0 %v12227_v19 }
 0x4a4   : > { %v12191_v18 = vld [vmem:[#allocation5 + $0x4] ss:$36 sps:$4 sm:$0xff]   ;;  %v14604_v16 = vsel %vm14483_vm5, %v7648_v23, %v7652_v0  ;;  %v8473_v8 = vrot.slane %v8471_v29, 6  ;;  %v12198_v22 = vld [vmem:[%s15021_s5 + $0x260] ss:$8 sps:$4 sm:$0xff]   ;;  %v7662_v5 = vrot.slane %v7661_v10, 2  ;;  %9829 = vmatprep.mubr.bf16.mxu0 %v12241_v1  ;;  %v8265_v0 = vcombine.low %v14435_v52, %v14447_v58 }
 0x4a5   : > { %v10972_v43 = vld.sshfl [vmem:[#allocation4 + $0x28] sm:$0x13 pattern:$0x76325410]  ;;  %9766 = vmatprep.mubr.bf16.mxu1 %v12191_v18  ;;  %v8476_v44 = vrot.slane %v8474_v31, 7  ;;  %v8485_v2 = vshrl.u32 %v10969_v47, 16  ;;  %9830 = vmatmul.mubr.bf16.gmra.mxu0 %v12239_v35 }
 0x4a6   : > { %9767 = vmatmul.mubr.bf16.vlgmr.msra.gmra.mxu1 %v12189_v17  ;;  %v12206_v42 = vld [vmem:[%s15021_s5 + $0x254] ss:$8 sps:$4 sm:$0xff]   ;;  %v12225_v63 = vld [vmem:[%s15021_s5 + $0x310] ss:$8 sps:$4 sm:$0xff]   ;;  %v8488_v39 = vshll.u32 %v10969_v47, 16  ;;  %v8494_v34 = vshll.u32 %v8409_v6, 16  ;;  %v14623_v55 = vsel %vm14483_vm5, %v7662_v5, %v7666_v50  ;;  %v8433_v13 = vcombine.high %v10972_v43, %v10972_v43 }
 0x4a7   : > { %10904 = vst.sshfl [vmem:[#allocation5 + $0x4c] sm:$0x33 pattern:$0x76325410] %v7684_v3  ;;  %v10953_v25 = vrot.slane %v14586_v61, 9  ;;  %9841 = vmatpush1.bf16.msra.mxu1 %v12192_v9  ;;  %v8477_v46 = vor.u32 %v8476_v44, %v8473_v8  ;;  %v8482_v14 = vrot.slane %v8480_v37, 7  ;;  %v7692_v36 = vcombine.low %v14604_v16, %v14623_v55  ;;  %9906 = vmatpush1.bf16.msra.mxu0 %v12225_v63 }
 0x4a8   : > { %10938 = vst.sshfl [vmem:[#allocation5 + $0x10] sm:$0x33 pattern:$0x76325410] %v8113_v56  ;;  %v8487_v20 = vrot.slane %v8485_v2, 6  ;;  %9842 = vmatprep.subr.bf16.mxu1 %v12200_v12  ;;  %v8490_v32 = vrot.slane %v8488_v39, 7  ;;  %v8129_v56 = vcombine.low %v14599_v28, %v14604_v16  ;;  %v8281_v28 = vcombine.low %v14541_v49, %v14545_v33 }
 0x4a9   : > { %v10973_v27 = vld.sshfl [vmem:[#allocation4 + $0x2c] sm:$0x13 pattern:$0x76325410]  ;;  %v8496_v60 = vrot.slane %v8494_v34, 7  ;;  %v8247_v24 = vrot.slane %v8200_v40, 7 }
 0x4aa   : > { %v12233_v38 = vld [vmem:[%s15021_s5 + $0x304] ss:$8 sps:$4 sm:$0xff]   ;;  %v12204_v26 = vld [vmem:[%s15021_s5 + $0x250] ss:$8 sps:$4 sm:$0xff]   ;;  %v8478_v30 = vrot.slane %v8477_v46, 2  ;;  %v8441_v47 = vcombine.high %v10973_v27, %v10973_v27  ;;  %v8491_v57 = vor.u32 %v8490_v32, %v8487_v20  ;;  %v8527_v11 = vshrl.u32 %v10972_v43, 16 }
 0x4ab   : > { %v12212_v59 = vld [vmem:[%s15021_s5 + $0x244] ss:$8 sps:$4 sm:$0xff]   ;;  %v12231_v9 = vld [vmem:[%s15021_s5 + $0x300] ss:$8 sps:$4 sm:$0xff]   ;;  %v14643_v48 = vsel %vm14406_vm3, %v10953_v25, %v8247_v24  ;;  %v8530_v4 = vshll.u32 %v10972_v43, 16  ;;  %9843 = vmatpush1.bf16.msra.mxu1 %v12198_v22  ;;  %v8536_v51 = vshll.u32 %v8433_v13, 16  ;;  %9907 = vmatprep.subr.bf16.mxu0 %v12233_v38 }
 0x4ac   : > { %10905 = vst.sshfl [vmem:[#allocation5 + $0x70] sm:$0x33 pattern:$0x76325410] %v7692_v36  ;;  %v8483_v52 = vsel %vm14483_vm5, %v8478_v30, %v8482_v14  ;;  %v8273_v58 = vcombine.low %v14458_v21, %v14643_v48  ;;  %v8541_v61 = vshrl.u32 %v10973_v27, 16  ;;  %9844 = vmatprep.subr.bf16.mxu1 %v12206_v42  ;;  %v8492_v50 = vrot.slane %v8491_v57, 2  ;;  %9908 = vmatpush1.bf16.msra.mxu0 %v12231_v9 }
 0x4ad   : > { %10976 = vst.sshfl [vmem:[#allocation5 + $0x64] sm:$0x33 pattern:$0x76325410] %v7692_v36  ;;  %v12244_v23 = vld [vmem:[%s15021_s5 + $0x3f4] ss:$8 sps:$4 sm:$0xff]   ;;  %v8121_v6 = vcombine.low %v14549_v45, %v8483_v52 }
 0x4ae   : > { %10958 = vst.sshfl [vmem:[#allocation5 + $0x14] sm:$0x33 pattern:$0x76325410] %v8265_v0  ;;  %v8529_v29 = vrot.slane %v8527_v11, 6  ;;  %v8532_v17 = vrot.slane %v8530_v4, 7  ;;  %v8497_v3 = vsel %vm14483_vm5, %v8492_v50, %v8496_v60  ;;  %9909 = vmatprep.subr.bf16.mxu0 %v12244_v23 }
 0x4af   : > { %v10949_v12 = vld.sshfl [vmem:[#allocation4 + $0x28] sm:$0x12 pattern:$0x76325410]  ;;  %v8538_v15 = vrot.slane %v8536_v51, 7  ;;  %v8543_v10 = vrot.slane %v8541_v61, 6  ;;  %9845 = vmatpush1.bf16.msra.mxu1 %v12204_v26  ;;  %v8562_v5 = vcombine.low %v8483_v52, %v8497_v3 }
 0x4b0   : > { %v14649_v19 = vld.sshfl [vmem:[#allocation4 + $0x8] sm:$0x12 pattern:$0x76325410]  ;;  %v8544_v31 = vshll.u32 %v10973_v27, 16  ;;  %v8550_v35 = vshll.u32 %v8441_v47, 16  ;;  %v8533_v8 = vor.u32 %v8532_v17, %v8529_v29  ;;  %v8232_v43 = vcombine.high %v10949_v12, %v10949_v12  ;;  %9846 = vmatprep.subr.bf16.mxu1 %v12212_v59 }
 0x4b1   : > { %v14655_v18 = vld.sshfl [vmem:[#allocation4 + $0xc] sm:$0x12 pattern:$0x76325410]  ;;  %v12210_v21 = vld [vmem:[%s15021_s5 + $0x240] ss:$8 sps:$4 sm:$0xff]   ;;  %v8617_v16 = vcombine.high %v14649_v19, %v14649_v19 }
 0x4b2   : > { %10959 = vst.sshfl [vmem:[#allocation5 + $0x38] sm:$0x33 pattern:$0x76325410] %v8273_v58  ;;  %v12218_v1 = vld [vmem:[%s15021_s5 + $0x234] ss:$8 sps:$4 sm:$0xff]   ;;  %v8625_v20 = vcombine.high %v14655_v18, %v14655_v18 }
 0x4b3   : > { %v12242_v45 = vld [vmem:[%s15021_s5 + $0x3f0] ss:$8 sps:$4 sm:$0xff]   ;;  %10939 = vst.sshfl [vmem:[#allocation5 + $0x34] sm:$0x33 pattern:$0x76325410] %v8121_v6  ;;  %9847 = vmatpush1.bf16.msra.mxu1 %v12210_v21 }
 0x4b4   : > { %v10981_v22 = vld.sshfl [vmem:[#allocation4 + $0x14] sm:$0x12 pattern:$0x76325410]  ;;  %v12263_v44 = vld [vmem:[%s15021_s5 + $0x3e4] ss:$8 sps:$4 sm:$0xff]   ;;  %9848 = vmatprep.subr.bf16.mxu1 %v12218_v1  ;;  %9910 = vmatpush2.bf16.msra.mxu0 %v12242_v45 }
 0x4b5   : > { %v8546_v37 = vrot.slane %v8544_v31, 7  ;;  %v8552_v2 = vrot.slane %v8550_v35, 7  ;;  %v10957_v42 = vrot.slane %v10949_v12, 9  ;;  %v8534_v39 = vrot.slane %v8533_v8, 2  ;;  %v12247_v25 = vld [vmem:[#allocation5 + $0x4c] ss:$36 sps:$4 sm:$0xff]   ;;  %9911 = vmatprep.subr.bf16.mxu0 %v12263_v44 }
 0x4b6   : > { %v14673_v63 = vld.sshfl [vmem:[#allocation4 + $0x20] sm:$0x12 pattern:$0x76325410]  ;;  %v8263_v34 = vrot.slane %v8232_v43, 7  ;;  %v8641_v27 = vcombine.high %v10981_v22, %v10981_v22  ;;  %v10986_v38 = vrot.slane %v14649_v19, 9  ;;  %9776 = vmatprep.mubr.bf16.mxu1 %v12247_v25 }
 0x4b7   : > { %10940 = vst.sshfl [vmem:[#allocation5 + $0x58] sm:$0x33 pattern:$0x76325410] %v8129_v56  ;;  %v12252_v46 = vld [vmem:[#allocation5 + $0x48] ss:$36 sps:$4 sm:$0xff]   ;;  %v8547_v14 = vor.u32 %v8546_v37, %v8543_v10  ;;  %v8539_v49 = vsel %vm14483_vm5, %v8534_v39, %v8538_v15 }
 0x4b8   : > { %v14679_v40 = vld.sshfl [vmem:[#allocation4 + $0x24] sm:$0x12 pattern:$0x76325410]  ;;  %v12216_v36 = vld [vmem:[%s15021_s5 + $0x230] ss:$8 sps:$4 sm:$0xff]   ;;  %v14691_v33 = vsel %vm14406_vm3, %v10957_v42, %v8263_v34  ;;  %v8137_v26 = vcombine.low %v14623_v55, %v8539_v49  ;;  %9777 = vmatmul.mubr.bf16.gmra.mxu1 %v12252_v46 }
 0x4b9   : > { %10975 = vst.sshfl [vmem:[#allocation5 + $0x40] sm:$0x33 pattern:$0x76325410] %v8562_v5  ;;  %v8676_v32 = vrot.slane %v8617_v16, 7  ;;  %v10987_v60 = vrot.slane %v14655_v18, 9  ;;  %v8289_v30 = vcombine.low %v14556_v53, %v14691_v33  ;;  %v8649_v53 = vcombine.high %v14673_v63, %v14673_v63  ;;  %9849 = vmatpush1.bf16.msra.mxu1 %v12216_v36 }
 0x4ba   : > { %10960 = vst.sshfl [vmem:[#allocation5 + $0x5c] sm:$0x33 pattern:$0x76325410] %v8281_v28  ;;  %v8548_v24 = vrot.slane %v8547_v14, 2  ;;  %v8680_v0 = vrot.slane %v8625_v20, 7  ;;  %v8657_v51 = vcombine.high %v14679_v40, %v14679_v40 }
 0x4bb   : > { %v10985_v13 = vld.sshfl [vmem:[#allocation4 + $0x2c] sm:$0x12 pattern:$0x76325410]  ;;  %v12261_v59 = vld [vmem:[%s15021_s5 + $0x3e0] ss:$8 sps:$4 sm:$0xff]   ;;  %v8677_v9 = vsel %vm14406_vm3, %v10986_v38, %v8676_v32 }
 0x4bc   : > { %v12224_v47 = vld [vmem:[%s15021_s5 + $0x224] ss:$8 sps:$4 sm:$0xff]   ;;  %v10989_v57 = vrot.slane %v10981_v22, 9  ;;  %v8688_v55 = vrot.slane %v8641_v27, 7  ;;  %v12269_v4 = vld [vmem:[%s15021_s5 + $0x3d4] ss:$8 sps:$4 sm:$0xff]   ;;  %v8553_v52 = vsel %vm14483_vm5, %v8548_v24, %v8552_v2  ;;  %v8681_v58 = vsel %vm14406_vm3, %v10987_v60, %v8680_v0  ;;  %9912 = vmatpush2.bf16.msra.mxu0 %v12261_v59 }
 0x4bd   : > { %v12260_v11 = vld [vmem:[#allocation5 + $0x14] ss:$36 sps:$4 sm:$0xff]   ;;  %10941 = vst.sshfl [vmem:[#allocation5 + $0x7c] sm:$0x33 pattern:$0x76325410] %v8137_v26  ;;  %v8578_v19 = vcombine.low %v8539_v49, %v8553_v52  ;;  %v8706_v54 = vcombine.low %v8677_v9, %v8681_v58  ;;  %v8673_v50 = vcombine.high %v10985_v13, %v10985_v13  ;;  %9850 = vmatprep.subr.bf16.mxu1 %v12224_v47 }
 0x4be   : > { %10961 = vst.sshfl [vmem:[#allocation5 + $0x80] sm:$0x33 pattern:$0x76325410] %v8289_v30  ;;  %v10990_v61 = vrot.slane %v14673_v63, 9  ;;  %v8689_v23 = vsel %vm14406_vm3, %v10989_v57, %v8688_v55  ;;  %9872 = vmatprep.mubr.bf16.mxu1 %v12260_v11  ;;  %v8692_v17 = vrot.slane %v8649_v53, 7  ;;  %9913 = vmatprep.subr.bf16.mxu0 %v12269_v4 }
 0x4bf   : > { %v12222_v12 = vld [vmem:[%s15021_s5 + $0x220] ss:$8 sps:$4 sm:$0xff]   ;;  %v12230_v6 = vld [vmem:[%s15021_s5 + $0x214] ss:$8 sps:$4 sm:$0xff]   ;;  %v8714_v29 = vcombine.low %v14643_v48, %v8689_v23  ;;  %v10991_v18 = vrot.slane %v14679_v40, 9  ;;  %v8696_v21 = vrot.slane %v8657_v51, 7 }
 0x4c0   : > { %v12257_v15 = vld [vmem:[#allocation5 + $0x1c] ss:$36 sps:$4 sm:$0xff]   ;;  %10977 = vst.sshfl [vmem:[#allocation5 + $0x88] sm:$0x33 pattern:$0x76325410] %v8578_v19  ;;  %v8693_v48 = vsel %vm14406_vm3, %v10990_v61, %v8692_v17  ;;  %9851 = vmatpush1.bf16.msra.mxu1 %v12222_v12 }
 0x4c1   : > { %v12267_v10 = vld [vmem:[%s15021_s5 + $0x3d0] ss:$8 sps:$4 sm:$0xff]   ;;  %10994 = vst.sshfl [vmem:[#allocation5 + $0x20] sm:$0x33 pattern:$0x76325410] %v8706_v54  ;;  %v8697_v1 = vsel %vm14406_vm3, %v10991_v18, %v8696_v21  ;;  %9925 = vmatprep.mubr.bf16.mxu0 %v12257_v15  ;;  %9852 = vmatprep.subr.bf16.mxu1 %v12230_v6 }
 0x4c2   : > { %v10993_v31 = vrot.slane %v10985_v13, 9  ;;  %v12275_v35 = vld [vmem:[%s15021_s5 + $0x3c4] ss:$8 sps:$4 sm:$0xff]   ;;  %v8704_v45 = vrot.slane %v8673_v50, 7  ;;  %v8722_v3 = vcombine.low %v8693_v48, %v8697_v1  ;;  %v12228_v8 = vld [vmem:[%s15021_s5 + $0x210] ss:$8 sps:$4 sm:$0xff]   ;;  %9914 = vmatpush2.bf16.msra.mxu0 %v12267_v10 }
 0x4c3   : > { %10995 = vst.sshfl [vmem:[#allocation5 + $0x44] sm:$0x33 pattern:$0x76325410] %v8714_v29  ;;  %v12236_v43 = vld [vmem:[%s15021_s5 + $0x204] ss:$8 sps:$4 sm:$0xff]   ;;  %9915 = vmatprep.subr.bf16.mxu0 %v12275_v35 }
 0x4c4   : > { %v8705_v56 = vsel %vm14406_vm3, %v10993_v31, %v8704_v45  ;;  %v12273_v22 = vld [vmem:[%s15021_s5 + $0x3c0] ss:$8 sps:$4 sm:$0xff]   ;;  %10996 = vst.sshfl [vmem:[#allocation5 + $0x68] sm:$0x33 pattern:$0x76325410] %v8722_v3  ;;  %9853 = vmatpush1.bf16.msra.mxu1 %v12228_v8 }
 0x4c5   : > { %v8730_v5 = vcombine.low %v14691_v33, %v8705_v56  ;;  %v12281_v44 = vld [vmem:[%s15021_s5 + $0x3b4] ss:$8 sps:$4 sm:$0xff]   ;;  %9854 = vmatprep.subr.bf16.mxu1 %v12236_v43  ;;  %v12279_v2 = vld [vmem:[%s15021_s5 + $0x3b0] ss:$8 sps:$4 sm:$0xff]   ;;  %v12287_v42 = vld [vmem:[%s15021_s5 + $0x3a4] ss:$8 sps:$4 sm:$0xff]  }
 0x4c6   : > { %v12251_v37 = vld [vmem:[%s15021_s5 + $0x2f4] ss:$8 sps:$4 sm:$0xff]   ;;  %9916 = vmatpush2.bf16.msra.mxu0 %v12273_v22  ;;  %v12249_v63 = vld [vmem:[%s15021_s5 + $0x2f0] ss:$8 sps:$4 sm:$0xff]   ;;  %v12266_v39 = vld [vmem:[%s15021_s5 + $0x2e4] ss:$8 sps:$4 sm:$0xff]  }
 0x4c7   : > { %10997 = vst.sshfl [vmem:[#allocation5 + $0x8c] sm:$0x33 pattern:$0x76325410] %v8730_v5  ;;  %9917 = vmatprep.subr.bf16.mxu0 %v12281_v44  ;;  %v12285_v34 = vld [vmem:[%s15021_s5 + $0x3a0] ss:$8 sps:$4 sm:$0xff]  }
 0x4c8   : > { %9855 = vmatpush1.bf16.msra.mxu1 %v12234_v62  ;;  %v12293_v28 = vld [vmem:[%s15021_s5 + $0x394] ss:$8 sps:$4 sm:$0xff]   ;;  %v12264_v16 = vld [vmem:[%s15021_s5 + $0x2e0] ss:$8 sps:$4 sm:$0xff]   ;;  %v12291_v25 = vld [vmem:[%s15021_s5 + $0x390] ss:$8 sps:$4 sm:$0xff]  }
 0x4c9   : > { %9856 = vmatprep.subr.bf16.mxu1 %v12251_v37  ;;  %v12272_v40 = vld [vmem:[%s15021_s5 + $0x2d4] ss:$8 sps:$4 sm:$0xff]   ;;  %v12299_v46 = vld [vmem:[%s15021_s5 + $0x384] ss:$8 sps:$4 sm:$0xff]   ;;  %v12270_v14 = vld [vmem:[%s15021_s5 + $0x2d0] ss:$8 sps:$4 sm:$0xff]  }
 0x4ca   : > { %9918 = vmatpush2.bf16.msra.mxu0 %v12279_v2  ;;  %v12278_v20 = vld [vmem:[%s15021_s5 + $0x2c4] ss:$8 sps:$4 sm:$0xff]   ;;  %v12297_v27 = vld [vmem:[%s15021_s5 + $0x380] ss:$8 sps:$4 sm:$0xff]   ;;  %v12284_v36 = vld [vmem:[%s15021_s5 + $0x2b4] ss:$8 sps:$4 sm:$0xff]  }
 0x4cb   : > { %9919 = vmatprep.subr.bf16.mxu0 %v12287_v42  ;;  %v12276_v38 = vld [vmem:[%s15021_s5 + $0x2c0] ss:$8 sps:$4 sm:$0xff]   ;;  %v12307_v33 = vld [vmem:[#allocation5 + $0x64] ss:$36 sps:$4 sm:$0xff]   ;;  %v12290_v60 = vld [vmem:[%s15021_s5 + $0x2a4] ss:$8 sps:$4 sm:$0xff]  }
 0x4cc   : > { %9857 = vmatpush2.bf16.msra.mxu1 %v12249_v63  ;;  %v12255_v49 = vld [vmem:[#allocation5 + $0x18] ss:$36 sps:$4 sm:$0xff]   ;;  %v12282_v32 = vld [vmem:[%s15021_s5 + $0x2b0] ss:$8 sps:$4 sm:$0xff]   ;;  %v12296_v26 = vld [vmem:[%s15021_s5 + $0x294] ss:$8 sps:$4 sm:$0xff]  }
 0x4cd   : > { %9858 = vmatprep.subr.bf16.mxu1 %v12266_v39  ;;  %v12288_v24 = vld [vmem:[%s15021_s5 + $0x2a0] ss:$8 sps:$4 sm:$0xff]   ;;  %v12305_v30 = vld [vmem:[#allocation5 + $0x60] ss:$36 sps:$4 sm:$0xff]   ;;  %v12302_v13 = vld [vmem:[%s15021_s5 + $0x284] ss:$8 sps:$4 sm:$0xff]  }
 0x4ce   : > { %9920 = vmatpush2.bf16.msra.mxu0 %v12285_v34  ;;  %v12294_v0 = vld [vmem:[%s15021_s5 + $0x290] ss:$8 sps:$4 sm:$0xff]   ;;  %v12300_v47 = vld [vmem:[%s15021_s5 + $0x280] ss:$8 sps:$4 sm:$0xff]   ;;  %v12310_v59 = vld [vmem:[%s15021_s5 + $0x474] ss:$8 sps:$4 sm:$0xff]  }
 0x4cf   : > { %9921 = vmatprep.subr.bf16.mxu0 %v12293_v28  ;;  %v12308_v9 = vld [vmem:[%s15021_s5 + $0x470] ss:$8 sps:$4 sm:$0xff]   ;;  %v12258_v57 = vld [vmem:[#allocation5 + $0x10] ss:$36 sps:$4 sm:$0xff]   ;;  %v12319_v4 = vld [vmem:[%s15021_s5 + $0x454] ss:$8 sps:$4 sm:$0xff]  }
 0x4d0   : > { %9859 = vmatpush2.bf16.msra.mxu1 %v12264_v16  ;;  %v12315_v55 = vld [vmem:[%s15021_s5 + $0x464] ss:$8 sps:$4 sm:$0xff]   ;;  %v12313_v11 = vld [vmem:[%s15021_s5 + $0x460] ss:$8 sps:$4 sm:$0xff]   ;;  %v12317_v52 = vld [vmem:[%s15021_s5 + $0x450] ss:$8 sps:$4 sm:$0xff]  }
 0x4d1   : > { %9860 = vmatprep.subr.bf16.mxu1 %v12272_v40  ;;  %v12311_v53 = vld [vmem:[#allocation5 + $0x5c] ss:$36 sps:$4 sm:$0xff]   ;;  %v12320_v61 = vld [vmem:[%s15021_s5 + $0x440] ss:$8 sps:$4 sm:$0xff]   ;;  %v12325_v12 = vld [vmem:[%s15021_s5 + $0x434] ss:$8 sps:$4 sm:$0xff]  }
 0x4d2   : > { %9922 = vmatpush2.bf16.msra.mxu0 %v12291_v25  ;;  %v12316_v58 = vld [vmem:[#allocation5 + $0x58] ss:$36 sps:$4 sm:$0xff]   ;;  %v12323_v19 = vld [vmem:[%s15021_s5 + $0x430] ss:$8 sps:$4 sm:$0xff]   ;;  %v12331_v50 = vld [vmem:[%s15021_s5 + $0x414] ss:$8 sps:$4 sm:$0xff]  }
 0x4d3   : > { %9923 = vmatprep.subr.bf16.mxu0 %v12299_v46  ;;  %v12322_v51 = vld [vmem:[%s15021_s5 + $0x444] ss:$8 sps:$4 sm:$0xff]   ;;  %v12326_v54 = vld [vmem:[%s15021_s5 + $0x420] ss:$8 sps:$4 sm:$0xff]   ;;  %v12329_v6 = vld [vmem:[%s15021_s5 + $0x410] ss:$8 sps:$4 sm:$0xff]  }
 0x4d4   : > { %9861 = vmatpush2.bf16.msra.mxu1 %v12270_v14  ;;  %v12328_v23 = vld [vmem:[%s15021_s5 + $0x424] ss:$8 sps:$4 sm:$0xff]   ;;  %v12332_v17 = vld [vmem:[%s15021_s5 + $0x400] ss:$8 sps:$4 sm:$0xff]   ;;  %v12335_v18 = vld [vmem:[#allocation5 + $0x20] ss:$36 sps:$4 sm:$0xff]  }
 0x4d5   : > { %9862 = vmatprep.subr.bf16.mxu1 %v12278_v20  ;;  %v12334_v29 = vld [vmem:[%s15021_s5 + $0x404] ss:$8 sps:$4 sm:$0xff]   ;;  %v12336_v21 = vld [vmem:[#allocation5 + $0x68] ss:$36 sps:$4 sm:$0xff]   ;;  %v12339_v31 = vld [vmem:[%s15023_s7 + $0x70] sm:$0xff]   ;;  %v12430_v56 = vmov 0.0  }
 0x4d6   : > { %9924 = vmatpush2.bf16.msra.mxu0 %v12297_v27  ;;  %v12337_v15 = vld [vmem:[%s15023_s7 + $0x78] sm:$0xff]   ;;  %v12341_v35 = vld [vmem:[%s15023_s7 + $0x68] sm:$0xff]   ;;  %v12343_v1 = vld [vmem:[%s15023_s7 + $0x60] sm:$0xff]   ;;  %vm10086_vm9 = vcmask 1041409   ;;  %vm12431_vm10 = vmmov 0   ;;  %vm10367_vm11 = vcmask 16384  }
 0x4d7   : > { %v12338_v10 = vld [vmem:[%s15023_s7 + $0x38] sm:$0xff]   ;;  %v12342_v48 = vld [vmem:[%s15023_s7 + $0x28] sm:$0xff]   ;;  %v12344_v45 = vld [vmem:[%s15023_s7 + $0x20] sm:$0xff]   ;;  %11806 = vmatprep.subr.bf16.mxu0 %v12430_v56 }
 0x4d8   : > { %9863 = vmatpush2.bf16.msra.mxu1 %v12276_v38  ;;  %v12345_v3 = vld [vmem:[%s15023_s7 + $0x58] sm:$0xff]   ;;  %v12354_v43 = vld [vmem:[%s15025_s9 + $0x30] sm:$0xff]   ;;  %v12355_v44 = vld [vmem:[%s15025_s9 + $0x28] sm:$0xff]  }
 0x4d9   : > { %9926 = vmatmul.mubr.bf16.vlgmr.msra.gmra.mxu0 %v12255_v49  ;;  %9864 = vmatprep.subr.bf16.mxu1 %v12284_v36  ;;  %v12353_v8 = vld [vmem:[%s15025_s9 + $0x38] sm:$0xff]   ;;  %v12347_v5 = vld [vmem:[%s15023_s7 + $0x50] sm:$0xff]   ;;  %v12349_v37 = vld [vmem:[%s15023_s7 + $0x48] sm:$0xff]  }
 0x4da   : > { %9935 = vmatprep.mubr.bf16.mxu0 %v12307_v33  ;;  %11807 = vmatpush3.bf16.msra.mxu0 %v12353_v8  ;;  %v12346_v22 = vld [vmem:[%s15023_s7 + $0x18] sm:$0xff]   ;;  %v12348_v62 = vld [vmem:[%s15023_s7 + $0x10] sm:$0xff]   ;;  %v12356_v2 = vld [vmem:[%s15025_s9 + $0x20] sm:$0xff]  }
 0x4db   : > { %11808 = vmatprep.subr.bf16.mxu0 %v12430_v56  ;;  %v12350_v42 = vld [vmem:[%s15023_s7 + $0x8] sm:$0xff]   ;;  %v12351_v63 = vld [vmem:[%s15023_s7 + $0x40] sm:$0xff]   ;;  %v12357_v39 = vld [vmem:[%s15025_s9 + $0x18] sm:$0xff]  }
 0x4dc   : > { %9865 = vmatpush2.bf16.msra.mxu1 %v12282_v32  ;;  %v12352_v34 = vld [vmem:[%s15023_s7] sm:$0xff]  }
 0x4dd   : > { %9866 = vmatprep.subr.bf16.mxu1 %v12290_v60 }
 0x4de   : > { %11809 = vmatpush3.bf16.msra.mxu0 %v12354_v43 }
 0x4df   : > { %11810 = vmatprep.subr.bf16.mxu0 %v12430_v56 }
 0x4e0   : > { %9867 = vmatpush2.bf16.msra.mxu1 %v12288_v24 }
 0x4e1   : > { %9936 = vmatmul.mubr.bf16.gmra.mxu0 %v12305_v30  ;;  %9868 = vmatprep.subr.bf16.mxu1 %v12296_v26 }
 0x4e2   : > { %11811 = vmatpush3.bf16.msra.mxu0 %v12355_v44  ;;  %11822 = vmatprep.mubr.msk.bf16.mxu0 %vm12431_vm10, %v12430_v56 }
 0x4e3   : > { %11812 = vmatprep.subr.bf16.mxu0 %v12430_v56 }
 0x4e4   : > { %9869 = vmatpush2.bf16.msra.mxu1 %v12294_v0 }
 0x4e5   : > { %9870 = vmatprep.subr.bf16.mxu1 %v12302_v13 }
 0x4e6   : > { %11813 = vmatpush3.bf16.msra.mxu0 %v12356_v2 }
 0x4e7   : > { %11814 = vmatprep.subr.bf16.mxu0 %v12430_v56 }
 0x4e8   : > { %9871 = vmatpush2.bf16.msra.mxu1 %v12300_v47 }
 0x4e9   : > { %9946 = vmatprep.subr.bf16.mxu1 %v12310_v59  ;;  %v8914_v59 = vsub.s32 0, %v12677_v7 }
 0x4ea   : > { %11815 = vmatpush3.bf16.msra.mxu0 %v12357_v39 }
 0x4eb   : > { %9873 = vmatmul.mubr.bf16.vlgmr.msra.gmra.mxu1 %v12258_v57  ;;  %11816 = vmatprep.subr.bf16.mxu0 %v12430_v56  ;;  %v8910_v57 = vld [vmem:[%s15022_s6] sm:$0x3] }
 0x4ec   : > { %9882 = vmatprep.mubr.bf16.mxu1 %v12311_v53  ;;  %9947 = vmatpush1.bf16.msra.mxu1 %v12308_v9 }
 0x4ed   : > { %9948 = vmatprep.subr.bf16.mxu1 %v12315_v55  ;;  %v8918_v55 = vsub.s32 1, %v12677_v7 }
 0x4f0   : > { %9949 = vmatpush1.bf16.msra.mxu1 %v12313_v11  ;;  %v8915_v11 = vrot.slane %v8910_v57, %v8914_v59 }
 0x4f1   : > { %9950 = vmatprep.subr.bf16.mxu1 %v12319_v4 }
 0x4f3   : > { %9883 = vmatmul.mubr.bf16.gmra.mxu1 %v12316_v58 }
 0x4f4   : > { %9951 = vmatpush1.bf16.msra.mxu1 %v12317_v52  ;;  %9978 = vmatprep.mubr.bf16.mxu1 %v12429_v41  ;;  %v8919_v52 = vrot.slane %v8910_v57, %v8918_v55 }
 0x4f5   : > { %9952 = vmatprep.subr.bf16.mxu1 %v12322_v51 }
 0x4f8   : > { %9953 = vmatpush1.bf16.msra.mxu1 %v12320_v61 }
 0x4f9   : > { %9954 = vmatprep.subr.bf16.mxu1 %v12325_v12 }
 0x4fc   : > { %9955 = vmatpush1.bf16.msra.mxu1 %v12323_v19 }
 0x4fd   : > { %9956 = vmatprep.subr.bf16.mxu1 %v12328_v23 }
 0x500   : > { %9957 = vmatpush1.bf16.msra.mxu1 %v12326_v54 }
 0x501   : > { %9958 = vmatprep.subr.bf16.mxu1 %v12331_v50 }
 0x504   : > { %9959 = vmatpush1.bf16.msra.mxu1 %v12329_v6 }
 0x505   : > { %9960 = vmatprep.subr.bf16.mxu1 %v12334_v29 }
 0x508   : > { %9961 = vmatpush1.bf16.msra.mxu1 %v12332_v17 }
 0x509   : > { %11675 = vmatprep.subr.bf16.mxu1 %v12337_v15 }
 0x50b   : > { %9979 = vmatmul.mubr.bf16.vlgmr.msra.gmra.mxu1 %v12335_v18 }
 0x50c   : > { %9988 = vmatprep.mubr.bf16.mxu1 %v12429_v41  ;;  %11676 = vmatpush3.bf16.msra.mxu1 %v12338_v10  ;;  %v12340_v41 = vld [vmem:[%s15023_s7 + $0x30] sm:$0xff]  }
 0x50d   : > { %11677 = vmatprep.subr.bf16.mxu1 %v12339_v31 }
 0x510   : > { %11678 = vmatpush3.bf16.msra.mxu1 %v12340_v41 }
 0x511   : > { %11679 = vmatprep.subr.bf16.mxu1 %v12341_v35 }
 0x513   : > { %9989 = vmatmul.mubr.bf16.gmra.mxu1 %v12336_v21 }
 0x514   : > { %11680 = vmatpush3.bf16.msra.mxu1 %v12342_v48 }
 0x515   : > { %11681 = vmatprep.subr.bf16.mxu1 %v12343_v1 }
 0x518   : > { %11682 = vmatpush3.bf16.msra.mxu1 %v12344_v45 }
 0x519   : > { %11683 = vmatprep.subr.bf16.mxu1 %v12345_v3 }
 0x51c   : > { %11684 = vmatpush3.bf16.msra.mxu1 %v12346_v22 }
 0x51d   : > { %11685 = vmatprep.subr.bf16.mxu1 %v12347_v5 }
 0x520   : > { %11686 = vmatpush3.bf16.msra.mxu1 %v12348_v62 }
 0x521   : > { %11687 = vmatprep.subr.bf16.mxu1 %v12349_v37 }
 0x524   : > { %11688 = vmatpush3.bf16.msra.mxu1 %v12350_v42 }
 0x525   : > { %11689 = vmatprep.subr.bf16.mxu1 %v12351_v63 }
 0x528   : > { %11690 = vmatpush3.bf16.msra.mxu1 %v12352_v34 }
 0x54c   : > { %v9821_v46 = vpop.f32.mrf.mxu0 }
 0x54e   : > { %v9823_v20 = vpop.f32.mrf.mxu0 }
 0x550   : > { %v9825_v38 = vpop.f32.mrf.mxu0 }
 0x552   : > { %v9827_v49 = vpop.f32.mrf.mxu0 }
 0x565   : > { %v9831_v32 = vpop.f32.mrf.mxu0 }
 0x566   : > { %v9768_v28 = vpop.f32.mrf.mxu1 }
 0x567   : > { %v9833_v24 = vpop.f32.mrf.mxu0  ;;  %v9769_v51 = vadd.f32 %v9768_v28, %v8915_v11 }
 0x568   : > { %v9770_v16 = vpop.f32.mrf.mxu1 }
 0x569   : > { %v9835_v30 = vpop.f32.mrf.mxu0  ;;  %v9771_v12 = vadd.f32 %v9770_v16, %v8919_v52  ;;  %v9822_v50 = vadd.f32 %v9821_v46, %v9769_v51 }
 0x56a   : > { %v9772_v40 = vpop.f32.mrf.mxu1 }
 0x56b   : > { %v9837_v13 = vpop.f32.mrf.mxu0  ;;  %v9773_v19 = vadd.f32 %v9772_v40, %v8915_v11  ;;  %v9824_v17 = vadd.f32 %v9823_v20, %v9771_v12 }
 0x56c   : > { %v9774_v25 = vpop.f32.mrf.mxu1 }
 0x56d   : > { %v9775_v54 = vadd.f32 %v9774_v25, %v8919_v52  ;;  %v9826_v18 = vadd.f32 %v9825_v38, %v9773_v19 }
 0x56f   : > { %v9828_v41 = vadd.f32 %v9827_v49, %v9775_v54 }
 0x578   : > { %v9778_v14 = vpop.f32.mrf.mxu1 }
 0x579   : > { %v9779_v21 = vadd.f32 %v9778_v14, %v8915_v11 }
 0x57a   : > { %v9780_v27 = vpop.f32.mrf.mxu1 }
 0x57b   : > { %v9781_v48 = vadd.f32 %v9780_v27, %v8919_v52  ;;  %v9832_v22 = vadd.f32 %v9831_v32, %v9779_v21 }
 0x57c   : > { %v9782_v36 = vpop.f32.mrf.mxu1 }
 0x57d   : > { %v9783_v45 = vadd.f32 %v9782_v36, %v8915_v11  ;;  %v9834_v63 = vadd.f32 %v9833_v24, %v9781_v48 }
 0x57e   : > { %v9784_v33 = vpop.f32.mrf.mxu1 }
 0x57f   : > { %v9785_v43 = vadd.f32 %v9784_v33, %v8919_v52  ;;  %v9836_v34 = vadd.f32 %v9835_v30, %v9783_v45 }
 0x581   : > { %v9838_v46 = vadd.f32 %v9837_v13, %v9785_v43 }
 0x599   : > { %v9927_v9 = vpop.f32.mrf.mxu0 }
 0x59b   : > { %v9929_v4 = vpop.f32.mrf.mxu0 }
 0x59d   : > { %v9931_v61 = vpop.f32.mrf.mxu0 }
 0x59f   : > { %v9933_v6 = vpop.f32.mrf.mxu0 }
 0x5a1   : > { %v9937_v35 = vpop.f32.mrf.mxu0 }
 0x5a3   : > { %v9939_v44 = vpop.f32.mrf.mxu0 }
 0x5a5   : > { %v9941_v20 = vpop.f32.mrf.mxu0 }
 0x5a7   : > { %v9943_v30 = vpop.f32.mrf.mxu0 }
 0x5ab   : > { %v9874_v60 = vpop.f32.mrf.mxu1 }
 0x5ac   : > { %v9875_v29 = vadd.f32 %v9874_v60, %v9822_v50 }
 0x5ad   : > { %v9876_v26 = vpop.f32.mrf.mxu1 }
 0x5ae   : > { %v9877_v10 = vadd.f32 %v9876_v26, %v9824_v17  ;;  %v9928_v8 = vadd.f32 %v9927_v9, %v9875_v29 }
 0x5af   : > { %v9878_v0 = vpop.f32.mrf.mxu1 }
 0x5b0   : > { %v9879_v31 = vadd.f32 %v9878_v0, %v9826_v18  ;;  %v9930_v37 = vadd.f32 %v9929_v4, %v9877_v10 }
 0x5b1   : > { %v9880_v47 = vpop.f32.mrf.mxu1 }
 0x5b2   : > { %v9881_v3 = vadd.f32 %v9880_v47, %v9828_v41  ;;  %v9932_v2 = vadd.f32 %v9931_v61, %v9879_v31 }
 0x5b3   : > { %v9884_v53 = vpop.f32.mrf.mxu1 }
 0x5b4   : > { %v9885_v42 = vadd.f32 %v9884_v53, %v9832_v22  ;;  %v9934_v40 = vadd.f32 %v9933_v6, %v9881_v3 }
 0x5b5   : > { %v9886_v58 = vpop.f32.mrf.mxu1 }
 0x5b6   : > { %v9887_v25 = vadd.f32 %v9886_v58, %v9834_v63  ;;  %v9938_v32 = vadd.f32 %v9937_v35, %v9885_v42 }
 0x5b7   : > { %v9888_v23 = vpop.f32.mrf.mxu1 }
 0x5b8   : > { %v9889_v27 = vadd.f32 %v9888_v23, %v9836_v34  ;;  %v9940_v55 = vadd.f32 %v9939_v44, %v9887_v25 }
 0x5b9   : > { %v9890_v15 = vpop.f32.mrf.mxu1 }
 0x5ba   : > { %v9891_v33 = vadd.f32 %v9890_v15, %v9838_v46  ;;  %v9942_v53 = vadd.f32 %v9941_v20, %v9889_v27 }
 0x5bc   : > { %v9944_v11 = vadd.f32 %v9943_v30, %v9891_v33  ;;  %v12360_v33 = vld [vmem:[%s15025_s9] sm:$0xff]  }
 0x5cb   : > { %v9980_v1 = vpop.f32.mrf.mxu1 }
 0x5cc   : > { %v9981_v62 = vadd.f32 %v9980_v1, %v9928_v8 }
 0x5cd   : > { %v9982_v5 = vpop.f32.mrf.mxu1 }
 0x5ce   : > { %v9983_v28 = vadd.f32 %v9982_v5, %v9930_v37  ;;  %v9999_v38 = vmax.f32 %v9981_v62, 0.0 }
 0x5cf   : > { %v9984_v39 = vpop.f32.mrf.mxu1 }
 0x5d0   : > { %v9985_v16 = vadd.f32 %v9984_v39, %v9932_v2  ;;  %v10000_v26 = vmax.f32 %v9983_v28, 0.0 }
 0x5d1   : > { %v9986_v14 = vpop.f32.mrf.mxu1 }
 0x5d2   : > { %v10001_v36 = vmax.f32 %v9985_v16, 0.0  ;;  %v9987_v49 = vadd.f32 %v9986_v14, %v9934_v40 }
 0x5d3   : > { %v9990_v60 = vpop.f32.mrf.mxu1 }
 0x5d4   : > { %v10007_v0 = vmax.f32 %v9999_v38, %v10001_v36  ;;  %v10002_v47 = vmax.f32 %v9987_v49, 0.0  ;;  %v9991_v24 = vadd.f32 %v9990_v60, %v9938_v32  ;;  %v12358_v36 = vld [vmem:[%s15025_s9 + $0x10] sm:$0xff]   ;;  %v12359_v49 = vld [vmem:[%s15025_s9 + $0x8] sm:$0xff]   ;;  %v11160_v60 = vld [vmem:[%s15024_s8] ss:$0 sm:$0xff] }
 0x5d5   : > { %v9992_v59 = vpop.f32.mrf.mxu1  ;;  %11817 = vmatpush3.bf16.msra.mxu0 %v12358_v36 }
 0x5d6   : > { %v10008_v9 = vrot.slane %v10007_v0, 4  ;;  %v10014_v57 = vmax.f32 %v10000_v26, %v10002_v47  ;;  %v9993_v58 = vadd.f32 %v9992_v59, %v9940_v55  ;;  %v10003_v61 = vmax.f32 %v9991_v24, 0.0  ;;  %11818 = vmatprep.subr.bf16.mxu0 %v12430_v56 }
 0x5d7   : > { %v9994_v13 = vpop.f32.mrf.mxu1 }
 0x5d8   : > { %v10009_v4 = vmax.f32 %v10007_v0, %v10008_v9  ;;  %v10015_v52 = vrot.slane %v10014_v57, 4  ;;  %v9995_v51 = vadd.f32 %v9994_v13, %v9942_v53  ;;  %v10004_v29 = vmax.f32 %v9993_v58, 0.0 }
 0x5d9   : > { %v9996_v12 = vpop.f32.mrf.mxu1  ;;  %11819 = vmatpush3.bf16.msra.mxu0 %v12359_v49 }
 0x5da   : > { %v10010_v19 = vrot.slane %v10009_v4, 2  ;;  %v10016_v23 = vmax.f32 %v10014_v57, %v10015_v52  ;;  %v10005_v54 = vmax.f32 %v9995_v51, 0.0  ;;  %v9997_v50 = vadd.f32 %v9996_v12, %v9944_v11  ;;  %11820 = vmatprep.subr.bf16.mxu0 %v12430_v56  ;;  %v11177_v56 = vld [vmem:[%s15026_s10] ss:$0 sm:$0xff] }
 0x5db   : > { %v12432_v57 = vmov 1966171168  }
 0x5dc   : > { %v10017_v6 = vrot.slane %v10016_v23, 2  ;;  %v10021_v17 = vmax.f32 %v10003_v61, %v10005_v54  ;;  %v10006_v18 = vmax.f32 %v9997_v50, 0.0  ;;  %v10011_v21 = vmax.f32 %v10009_v4, %v10010_v19 }
 0x5dd   : > { %11821 = vmatpush3.bf16.msra.mxu0 %v12360_v33  ;;  %v10344_v55 = vunpack.c.l.s4 %v12432_v57 }
 0x5de   : > { %v10018_v15 = vmax.f32 %v10016_v23, %v10017_v6  ;;  %v10022_v10 = vrot.slane %v10021_v17, 4  ;;  %v10028_v31 = vmax.f32 %v10004_v29, %v10006_v18  ;;  %v10012_v48 = vrot.slane %v10011_v21, 1 }
 0x5df   : > { %v10345_v53 = vunpack.c.0.s8 %v10344_v55 }
 0x5e0   : > { %v10023_v41 = vmax.f32 %v10021_v17, %v10022_v10  ;;  %v10029_v35 = vrot.slane %v10028_v31, 4  ;;  %v10019_v1 = vrot.slane %v10018_v15, 1  ;;  %v10013_v22 = vmax.f32 %v10011_v21, %v10012_v48 }
 0x5e1   : > { %v10348_v13 = vsub.s32 %v10345_v53, %v12677_v7 }
 0x5e2   : > { %v10024_v45 = vrot.slane %v10023_v41, 2  ;;  %v10030_v3 = vmax.f32 %v10028_v31, %v10029_v35  ;;  %v10020_v5 = vmax.f32 %v10018_v15, %v10019_v1  ;;  %v10035_v42 = vpack.c.bf16 %v10013_v22, %v10013_v22 }
 0x5e4   : > { %v10025_v8 = vmax.f32 %v10023_v41, %v10024_v45  ;;  %v10031_v43 = vrot.slane %v10030_v3, 2  ;;  %v10036_v34 = vpack.c.bf16 %v10020_v5, %v10020_v5  ;;  %v10082_v40 = vunpack.c.l.b16 %v10035_v42 }
 0x5e6   : > { %v10026_v44 = vrot.slane %v10025_v8, 1  ;;  %v10032_v62 = vmax.f32 %v10030_v3, %v10031_v43  ;;  %v10083_v25 = vunpack.c.l.b16 %v10036_v34 }
 0x5e8   : > { %v10027_v37 = vmax.f32 %v10025_v8, %v10026_v44  ;;  %v10033_v2 = vrot.slane %v10032_v62, 1 }
 0x5ea   : > { %v10037_v63 = vpack.c.bf16 %v10027_v37, %v10027_v37  ;;  %v10034_v39 = vmax.f32 %v10032_v62, %v10033_v2 }
 0x5ec   : > { %v10084_v28 = vunpack.c.l.b16 %v10037_v63  ;;  %v10038_v16 = vpack.c.bf16 %v10034_v39, %v10034_v39 }
 0x5ee   : > { %v10085_v46 = vunpack.c.l.b16 %v10038_v16  ;;  %v10087_v14 = vsel %vm10086_vm9, %v10084_v28, %v10082_v40 }
 0x5ef   : > { %v10089_v38 = vpack.c.b16 %v10087_v14, %v10087_v14 }
 0x5f0   : > { %v10088_v20 = vsel %vm10086_vm9, %v10085_v46, %v10083_v25 }
 0x5f1   : > { %v10090_v27 = vpack.c.b16 %v10088_v20, %v10088_v20 }
 0x5f3   : > { %10221 = vmatprep.mubr.bf16.mxu1 %v10090_v27 }
 0x5f4   : > { %10222 = vmatmul.mubr.bf16.vlgmr.msra.gmra.mxu1 %v10089_v38 }
 0x6b4   : > { %v11691_v32 = vpop.f32.mrf.mxu1 }
 0x6b6   : > { %v11692_v26 = vpop.f32.mrf.mxu1 }
 0x6b7   : > { %v11693_v0 = vadd.f32 %v11692_v26, %v11691_v32 }
 0x6b8   : > { %v11694_v47 = vpop.f32.mrf.mxu1 }
 0x6b9   : > { %v10224_v24 = vadd.f32 %v11693_v0, %v11160_v60 }
 0x6ba   : > { %v11695_v59 = vpop.f32.mrf.mxu1 }
 0x6bb   : > { %v10229_v30 = vmax.f32 %v10224_v24, 0.0 }
 0x6bd   : > { %v10230_v9 = vpack.c.bf16 %v10229_v30, %v10229_v30 }
 0x6bf   : > { %11823 = vmatmul.mubr.bf16.vlgmr.msra.gmra.mxu0 %v10230_v9 }
 0x77f   : > { %v10336_v11 = vpop.f32.mrf.mxu0 }
 0x780   : > { %v10337_v4 = vadd.f32 %v11177_v56, %v10336_v11 }
 0x781   : > { %v11824_v52 = vpop.f32.mrf.mxu0 }
 0x782   : > { %v10349_v58 = vrot.slane %v10337_v4, %v10348_v13 }
 0x783   : > { %v10339_v51 = vpop.f32.mrf.mxu0 }
 0x784   : > { %v10350_v61 = vcombine.high %v10349_v58, %v10349_v58  ;;  %v10357_v12 = vrot.slane %v10349_v58, %v10348_v13 }
 0x785   : > { %v11825_v19 = vpop.f32.mrf.mxu0 }
 0x786   : > { %v10364_v7 = vrot.slane %v10350_v61, %v10348_v13  ;;  %10368 = vst.msk [vmem:[%s382_s29] sm:$0x1] %vm10367_vm11, %v10357_v12 }
 0x788   : > { %10369 = vst.msk [vmem:[%s382_s29 + $0x1] sm:$0x1] %vm10367_vm11, %v10364_v7 }
 0x789   : > { %12378 = shalt.err (!%p12375_p3)
}
 0x78a   : > { %s12379_s15 = scalar_lea.hbm %s14972_s14, 32  ;;  %s12383_s13 = scalar_lea.hbm %s15027_s11, 64 }
 0x78b   : > { %p12380_p4 = scmp.ne.s32.totalorder %s14972_s14, %s12379_s15  ;;  %p12384_p9 = scmp.lt.s32.totalorder %s14972_s14, %s15027_s11 }
 0x78c   : > { %p12385_p10 = scmp.lt.s32.totalorder %s12383_s13, %s12379_s15 }
 0x78d   : > { %p12381_p7 = pnand %p12380_p4, %p12534_p5 }
 0x78e   : > { %p12386_p11 = por %p12385_p10, %p12384_p9 }
 0x78f   : > { %p12382_p8 = pneg %p12381_p7 }
 0x791   : > { %p12387_p12 = pnand %p12386_p11, %p12382_p8 }
 0x793   : > { %12390 = shalt.err (!%p12387_p12)
}
 0x794   : > { %s12434_s16 = smov 16   ;;  %s12435_s24 = smov 1  }
 0x795   : > { %11826 = dma.vmem_to_hbm [thread:$0]  (%p12534_p5), %s14974_s30, 32, %s14972_s14, %s14976_s21, %s12434_s16, %s12434_s16, %s12435_s24  }
 0x796 PF: > { %p11832_p13 = scmp.ge.s32.totalorder %s12425_s20, 2  ;;  %s10399_s25 = sand.u32 1, %s12413_s17  }
 0x797   : > { %s10400_s0 = scalar_lea.sflag [#allocation7], %s10399_s25 }
 0x798   : > { %p11829_p0 = pnand %p11832_p13, %p12538_p6 }
 0x79a   : > { %p11830_p1 = pneg %p11829_p0 }
 0x79c   : > { %12408 = dma.done.wait (%p11830_p1), %s10400_s0, 32  }
 0x79d   : > { %12410 = vsyncadd (%p11830_p1), %s10400_s0, 4294967264  ;;  %p21_p2 = scmp.ge.s32.totalorder %s12521_s23, 4   ;;  %s15052_s17 = smov %s12417_s18 }
 0x79e   : > { %s15053_s18 = smov %s12421_s19  ;;  %s15054_s19 = smov %s12532_s26 }
 0x79f   : > { %s15055_s20 = smov %s12521_s23  ;;  %23 = sbr.rel (!%p21_p2) target bundleno = 5 (0x5), region = 105 }
 0x7a4   :  { %10405 = vsyncpa [#allocation7], 1 }
 0x7a5   :  { %10407 = vsyncpa [#allocation7 + $0x1], 1 }

</bundles_post_ra>
